<compile_context>
chip_gen: v7x
topology: tpu7x:2x2x1
jax: 0.10.0
libtpu: 0.0.40
codegen_flags: <defaults>
</compile_context>

<pallas_src>
from functools import partial

import numpy as np
import jax
import jax.numpy as jnp
from jax.experimental import pallas as pl
from jax.experimental.pallas import tpu as pltpu


NEG_SLOPE = 0.2  # LeakyReLU negative slope (WGAN-typical); verify against module config.


# ----------------------------------------------------------------------------
# The single fused kernel: whole discriminator forward.
# ----------------------------------------------------------------------------
def _discriminator_kernel(
    x_ref,                       # (B*T, Fa+Fd) f32, rows = [audio | dir] features
    wfe1_ref, bfe1_ref,          # fused (block-diag) feature-extractor fc1
    wfe2_ref, bfe2_ref,          # fused (block-diag) feature-extractor fc2
    sel1_ref, wc1_ref, bc1_ref,  # conv1 k3 s1
    sel2_ref, wc2_ref, bc2_ref,  # conv2 k4 s2
    sel3_ref, wc3_ref, bc3_ref,  # conv3 k3 s1
    sel4_ref, bc4_ref,           # conv4 k4 s2 (weight streamed manually)
    sel5_ref, bc5_ref,           # conv5 k3 s1 (weight streamed manually)
    sel6_ref, bo1f_ref,          # conv6(k3 s1, no act) folded with out_fc1; folded bias
    wo2_ref, bo2_ref,            # out_net Linear(256, 64)
    wo3_ref, bo3_ref,            # out_net Linear(64, 1)
    wc4_hbm, wc5_hbm, wc6f_hbm,  # big weights, left in HBM (pl.ANY)
    o_ref,                       # (B, 1) f32
    wc4_v, wc5_v, wc6f_v, dma_sems,  # VMEM scratch + DMA semaphores
    *, neg_slope,
):
    cdt = wc1_ref.dtype  # bf16 compute dtype for MXU inputs

    # Start streaming the big weights HBM->VMEM now; they arrive while the
    # feature extractors and the small-weight conv layers compute.
    cp4 = pltpu.make_async_copy(wc4_hbm, wc4_v, dma_sems.at[0]); cp4.start()
    cp5 = pltpu.make_async_copy(wc5_hbm, wc5_v, dma_sems.at[1]); cp5.start()
    cp6 = pltpu.make_async_copy(wc6f_hbm, wc6f_v, dma_sems.at[2]); cp6.start()

    def leaky(y):
        return jnp.where(y > 0, y, neg_slope * y)

    def dense(x, w, b, act):
        y = jnp.dot(x.astype(cdt), w, preferred_element_type=jnp.float32) + b
        return leaky(y) if act else y

    def conv(x, sel_ref, w_ref, b, act):
        # x: (B*t_in, Cin) f32.  sel_ref[k]: (B*t_out, B*t_in) exact one-hot
        # selector implementing tap gather + stride + batch blocking as a matmul
        # (bit-exact copy of bf16 rows).  w_ref: (K, Cin, Cout).
        x_c = x.astype(cdt)
        k_size = sel_ref.shape[0]
        acc = None
        for k in range(k_size):
            tap = jnp.dot(sel_ref[k], x_c, preferred_element_type=jnp.float32).astype(cdt)
            y = jnp.dot(tap, w_ref[k], preferred_element_type=jnp.float32)
            acc = y if acc is None else acc + y
        acc = acc + b
        return leaky(acc) if act else acc

    # ---- fused audio + pose feature extractors (block-diagonal weights) ----
    h = dense(x_ref[...], wfe1_ref[...], bfe1_ref[...], act=True)   # (B*T, 64)
    h = dense(h, wfe2_ref[...], bfe2_ref[...], act=False)           # (B*T, 128) == cat([audio, pose])

    # ---- conv stack, both batch elements fused into every matmul ----
    h = conv(h, sel1_ref, wc1_ref, bc1_ref[...], act=True)          # (B*32, 128)
    h = conv(h, sel2_ref, wc2_ref, bc2_ref[...], act=True)          # (B*15, 256)
    h = conv(h, sel3_ref, wc3_ref, bc3_ref[...], act=True)          # (B*13, 256)

    cp4.wait()
    h = conv(h, sel4_ref, wc4_v, bc4_ref[...], act=True)            # (B*5, 512)
    cp5.wait()
    h = conv(h, sel5_ref, wc5_v, bc5_ref[...], act=True)            # (B*3, 512)
    cp6.wait()
    # conv6 (no activation) folded with out_net Linear(1024,256); the out_net
    # activation follows the folded layer -- exact linear-algebra identity.
    h = conv(h, sel6_ref, wc6f_v, bo1f_ref[...], act=True)          # (B, 256)

    # ---- rest of out_net ----
    h = dense(h, wo2_ref[...], bo2_ref[...], act=True)              # (B, 64)
    h = dense(h, wo3_ref[...], bo3_ref[...], act=False)             # (B, 1)
    o_ref[...] = h.astype(o_ref.dtype)


# ----------------------------------------------------------------------------
# Deterministic parameter init (PyTorch-default-style uniform bounds).
# ----------------------------------------------------------------------------
def _init_linear(key, fan_in, fan_out):
    kw, kb = jax.random.split(key)
    bound = 1.0 / (float(fan_in) ** 0.5)
    w = jax.random.uniform(kw, (fan_in, fan_out), jnp.float32, -bound, bound)
    b = jax.random.uniform(kb, (fan_out,), jnp.float32, -bound, bound)
    return w, b


def _init_conv(key, cin, cout, k):
    kw, kb = jax.random.split(key)
    bound = 1.0 / (float(cin * k) ** 0.5)
    w = jax.random.uniform(kw, (cout, cin, k), jnp.float32, -bound, bound)  # torch layout
    b = jax.random.uniform(kb, (cout,), jnp.float32, -bound, bound)
    return w, b


def init_params(key, audio_feature_size, dir_size, hidden_size):
    H = hidden_size
    keys = jax.random.split(key, 13)
    p = {}
    p["audio_fc1"] = _init_linear(keys[0], audio_feature_size, H // 4)
    p["audio_fc2"] = _init_linear(keys[1], H // 4, H // 2)
    p["pose_fc1"] = _init_linear(keys[2], dir_size, H // 4)
    p["pose_fc2"] = _init_linear(keys[3], H // 4, H // 2)
    p["conv1"] = _init_conv(keys[4], H, H, 3)
    p["conv2"] = _init_conv(keys[5], H, 2 * H, 4)
    p["conv3"] = _init_conv(keys[6], 2 * H, 2 * H, 3)
    p["conv4"] = _init_conv(keys[7], 2 * H, 4 * H, 4)
    p["conv5"] = _init_conv(keys[8], 4 * H, 4 * H, 3)
    p["conv6"] = _init_conv(keys[9], 4 * H, 8 * H, 3)
    p["out_fc1"] = _init_linear(keys[10], 1024, 256)
    p["out_fc2"] = _init_linear(keys[11], 256, 64)
    p["out_fc3"] = _init_linear(keys[12], 64, 1)
    return p


# ----------------------------------------------------------------------------
# Host-side packing: block-diag feature extractors, (K,Cin,Cout) conv weights,
# batched one-hot tap selectors, conv6+out_fc1 fold, bf16 casts.
# ----------------------------------------------------------------------------
def _block_diag(a, b):
    out = jnp.zeros((a.shape[0] + b.shape[0], a.shape[1] + b.shape[1]), jnp.float32)
    out = out.at[: a.shape[0], : a.shape[1]].set(a)
    out = out.at[a.shape[0]:, a.shape[1]:].set(b)
    return out


def prepare_params(params, n_poses, batch, compute_dtype=jnp.bfloat16):
    def w(x):
        return jnp.asarray(x, compute_dtype)

    def bias(x):
        return jnp.asarray(x, jnp.float32).reshape(1, -1)

    def conv_w(wc):  # (Cout, Cin, K) -> (K, Cin, Cout)
        return w(jnp.transpose(wc, (2, 1, 0)))

    # Conv-stack temporal sizes (must end at 1 for the Linear(1024, .) head).
    t0 = n_poses
    t1 = t0 - 2                  # conv1 k3 s1
    t2 = (t1 - 4) // 2 + 1       # conv2 k4 s2
    t3 = t2 - 2                  # conv3 k3 s1
    t4 = (t3 - 4) // 2 + 1       # conv4 k4 s2
    t5 = t4 - 2                  # conv5 k3 s1
    t6 = t5 - 2                  # conv6 k3 s1
    assert t6 == 1, "module's Linear(1024,256) head requires n_poses=34 (T_final==1)"

    def sel(t_in, t_out, k_size, stride):
        # One-hot (K, B*t_out, B*t_in): output row b*t_out+t takes input row
        # b*t_in + stride*t + k.  Exact 0/1 values -> MXU selection is bit-exact.
        s = np.zeros((k_size, batch * t_out, batch * t_in), np.float32)
        for k in range(k_size):
            for b in range(batch):
                for t in range(t_out):
                    s[k, b * t_out + t, b * t_in + stride * t + k] = 1.0
        return jnp.asarray(s, compute_dtype)

    # Fused feature extractors (audio columns first => matches cat([x_audio, x_pose], -1)).
    wa1, ba1 = params["audio_fc1"]
    wp1, bp1 = params["pose_fc1"]
    wa2, ba2 = params["audio_fc2"]
    wp2, bp2 = params["pose_fc2"]
    wfe1 = w(_block_diag(wa1, wp1))
    bfe1 = bias(jnp.concatenate([ba1, bp1]))
    wfe2 = w(_block_diag(wa2, wp2))
    bfe2 = bias(jnp.concatenate([ba2, bp2]))

    # Fold conv6 (linear, no activation) with out_net Linear(1024, 256).
    w6, b6 = params["conv6"]          # (8H, 4H, 3), (8H,)
    w1, b1 = params["out_fc1"]        # (1024, 256), (256,)
    w6_kio = jnp.transpose(w6, (2, 1, 0)).astype(jnp.float32)        # (3, 4H, 8H)
    w6f = jnp.einsum("kio,oj->kij", w6_kio, w1.astype(jnp.float32))  # (3, 4H, 256)
    b6f = b6.astype(jnp.float32) @ w1.astype(jnp.float32) + b1       # (256,)

    vmem_ops = (
        wfe1, bfe1, wfe2, bfe2,
        sel(t0, t1, 3, 1), conv_w(params["conv1"][0]), bias(params["conv1"][1]),
        sel(t1, t2, 4, 2), conv_w(params["conv2"][0]), bias(params["conv2"][1]),
        sel(t2, t3, 3, 1), conv_w(params["conv3"][0]), bias(params["conv3"][1]),
        sel(t3, t4, 4, 2), bias(params["conv4"][1]),
        sel(t4, t5, 3, 1), bias(params["conv5"][1]),
        sel(t5, t6, 3, 1), bias(b6f),
        w(params["out_fc2"][0]), bias(params["out_fc2"][1]),
        w(params["out_fc3"][0]), bias(params["out_fc3"][1]),
    )
    # Large weights: left in HBM, streamed manually inside the kernel.
    hbm_ops = (conv_w(params["conv4"][0]), conv_w(params["conv5"][0]), w(w6f))
    return vmem_ops, hbm_ops


# ----------------------------------------------------------------------------
# Forward pass: one pallas_call for the whole network.
# ----------------------------------------------------------------------------
def conv_discriminator_forward(prepared, in_dir, in_audio):
    vmem_ops, hbm_ops = prepared
    B, T, Fa = in_audio.shape
    _, _, Fd = in_dir.shape
    # Fused feature-extractor input: cols = [audio | dir], matching block-diag weights.
    x = jnp.concatenate([in_audio, in_dir], axis=-1).reshape(B * T, Fa + Fd)
    x = x.astype(jnp.float32)

    assert vmem_ops[4].shape[-1] == B * T, "selection matrices were built for a different (batch, n_poses)"

    ops = (x,) + tuple(vmem_ops) + tuple(hbm_ops)
    n_vmem = 1 + len(vmem_ops)
    vmem = pltpu.MemorySpace.VMEM
    in_specs = ([pl.BlockSpec(memory_space=vmem)] * n_vmem
                + [pl.BlockSpec(memory_space=pl.ANY)] * len(hbm_ops))

    wc4, wc5, wc6f = hbm_ops
    out = pl.pallas_call(
        partial(_discriminator_kernel, neg_slope=NEG_SLOPE),
        out_shape=jax.ShapeDtypeStruct((B, 1), jnp.float32),
        in_specs=in_specs,
        out_specs=pl.BlockSpec(memory_space=vmem),
        scratch_shapes=[
            pltpu.VMEM(wc4.shape, wc4.dtype),
            pltpu.VMEM(wc5.shape, wc5.dtype),
            pltpu.VMEM(wc6f.shape, wc6f.dtype),
            pltpu.SemaphoreType.DMA((3,)),
        ],
        compiler_params=pltpu.CompilerParams(vmem_limit_bytes=32 * 1024 * 1024),
    )(*ops)
    return out  # (B, 1)


if __name__ == "__main__":
    B = 2
    N_POSES = 34           # required so the conv stack collapses T to 1
    HIDDEN = 128           # required so 8*HIDDEN*1 == 1024 (Linear(1024, 256))
    AUDIO_FEAT = 16
    DIR_SIZE = 12

    key = jax.random.PRNGKey(0)
    k_param, k_dir, k_audio = jax.random.split(key, 3)

    params = init_params(k_param, AUDIO_FEAT, DIR_SIZE, HIDDEN)
    prepared = prepare_params(params, N_POSES, B)

    in_dir = jax.random.normal(k_dir, (B, N_POSES, DIR_SIZE), jnp.float32)
    in_audio = jax.random.normal(k_audio, (B, N_POSES, AUDIO_FEAT), jnp.float32)

    fwd = jax.jit(conv_discriminator_forward)
    out = fwd(prepared, in_dir, in_audio)
    out = jax.block_until_ready(out)

    assert out.shape == (B, 1) and out.dtype == jnp.float32
    assert bool(jnp.all(jnp.isfinite(out)))
    print("KERNEL_OK")
</pallas_src>

<mosaic_0001>
module attributes {stable_mosaic.version = 11 : i64} {
  func.func @_discriminator_kernel(%arg0: memref<68x28xf32, #tpu.memory_space<vmem>>, %arg1: memref<28x64xbf16, #tpu.memory_space<vmem>>, %arg2: memref<1x64xf32, #tpu.memory_space<vmem>>, %arg3: memref<64x128xbf16, #tpu.memory_space<vmem>>, %arg4: memref<1x128xf32, #tpu.memory_space<vmem>>, %arg5: memref<3x64x68xbf16, #tpu.memory_space<vmem>>, %arg6: memref<3x128x128xbf16, #tpu.memory_space<vmem>>, %arg7: memref<1x128xf32, #tpu.memory_space<vmem>>, %arg8: memref<4x30x64xbf16, #tpu.memory_space<vmem>>, %arg9: memref<4x128x256xbf16, #tpu.memory_space<vmem>>, %arg10: memref<1x256xf32, #tpu.memory_space<vmem>>, %arg11: memref<3x26x30xbf16, #tpu.memory_space<vmem>>, %arg12: memref<3x256x256xbf16, #tpu.memory_space<vmem>>, %arg13: memref<1x256xf32, #tpu.memory_space<vmem>>, %arg14: memref<4x10x26xbf16, #tpu.memory_space<vmem>>, %arg15: memref<1x512xf32, #tpu.memory_space<vmem>>, %arg16: memref<3x6x10xbf16, #tpu.memory_space<vmem>>, %arg17: memref<1x512xf32, #tpu.memory_space<vmem>>, %arg18: memref<3x2x6xbf16, #tpu.memory_space<vmem>>, %arg19: memref<1x256xf32, #tpu.memory_space<vmem>>, %arg20: memref<256x64xbf16, #tpu.memory_space<vmem>>, %arg21: memref<1x64xf32, #tpu.memory_space<vmem>>, %arg22: memref<64x1xbf16, #tpu.memory_space<vmem>>, %arg23: memref<1x1xf32, #tpu.memory_space<vmem>>, %arg24: memref<4x256x512xbf16, #tpu.memory_space<any>>, %arg25: memref<3x512x512xbf16, #tpu.memory_space<any>>, %arg26: memref<3x512x256xbf16, #tpu.memory_space<any>>, %arg27: memref<2x1xf32, #tpu.memory_space<vmem>>, %arg28: memref<4x256x512xbf16, #tpu.memory_space<vmem>>, %arg29: memref<3x512x512xbf16, #tpu.memory_space<vmem>>, %arg30: memref<3x512x256xbf16, #tpu.memory_space<vmem>>, %arg31: memref<3x!tpu.dma_semaphore, #tpu.memory_space<semaphore_mem>>) attributes {dimension_semantics = [], scalar_prefetch = 0 : i64, scratch_operands = 4 : i64, tpu.core_type = #tpu.core_type<tc>} {
    %c0_i32 = arith.constant 0 : i32
    %0 = tpu.memref_slice %arg31[%c0_i32] : memref<3x!tpu.dma_semaphore, #tpu.memory_space<semaphore_mem>> -> memref<1x!tpu.dma_semaphore, #tpu.memory_space<semaphore_mem>>
    %1 = tpu.memref_squeeze %0 : memref<1x!tpu.dma_semaphore, #tpu.memory_space<semaphore_mem>> -> memref<!tpu.dma_semaphore, #tpu.memory_space<semaphore_mem>>
    tpu.enqueue_dma source(%arg24 : memref<4x256x512xbf16, #tpu.memory_space<any>>) target(%arg28 : memref<4x256x512xbf16, #tpu.memory_space<vmem>>) target_semaphore(%1 : memref<!tpu.dma_semaphore, #tpu.memory_space<semaphore_mem>>)
    %c1_i32 = arith.constant 1 : i32
    %2 = tpu.memref_slice %arg31[%c1_i32] : memref<3x!tpu.dma_semaphore, #tpu.memory_space<semaphore_mem>> -> memref<1x!tpu.dma_semaphore, #tpu.memory_space<semaphore_mem>>
    %3 = tpu.memref_squeeze %2 : memref<1x!tpu.dma_semaphore, #tpu.memory_space<semaphore_mem>> -> memref<!tpu.dma_semaphore, #tpu.memory_space<semaphore_mem>>
    tpu.enqueue_dma source(%arg25 : memref<3x512x512xbf16, #tpu.memory_space<any>>) target(%arg29 : memref<3x512x512xbf16, #tpu.memory_space<vmem>>) target_semaphore(%3 : memref<!tpu.dma_semaphore, #tpu.memory_space<semaphore_mem>>)
    %c2_i32 = arith.constant 2 : i32
    %4 = tpu.memref_slice %arg31[%c2_i32] : memref<3x!tpu.dma_semaphore, #tpu.memory_space<semaphore_mem>> -> memref<1x!tpu.dma_semaphore, #tpu.memory_space<semaphore_mem>>
    %5 = tpu.memref_squeeze %4 : memref<1x!tpu.dma_semaphore, #tpu.memory_space<semaphore_mem>> -> memref<!tpu.dma_semaphore, #tpu.memory_space<semaphore_mem>>
    tpu.enqueue_dma source(%arg26 : memref<3x512x256xbf16, #tpu.memory_space<any>>) target(%arg30 : memref<3x512x256xbf16, #tpu.memory_space<vmem>>) target_semaphore(%5 : memref<!tpu.dma_semaphore, #tpu.memory_space<semaphore_mem>>)
    %c0 = arith.constant 0 : index
    %c0_0 = arith.constant 0 : index
    %6 = vector.load %arg0[%c0, %c0_0] : memref<68x28xf32, #tpu.memory_space<vmem>>, vector<68x28xf32>
    %c0_1 = arith.constant 0 : index
    %c0_2 = arith.constant 0 : index
    %7 = vector.load %arg1[%c0_1, %c0_2] : memref<28x64xbf16, #tpu.memory_space<vmem>>, vector<28x64xbf16>
    %c0_3 = arith.constant 0 : index
    %c0_4 = arith.constant 0 : index
    %8 = vector.load %arg2[%c0_3, %c0_4] : memref<1x64xf32, #tpu.memory_space<vmem>>, vector<1x64xf32>
    %9 = arith.truncf %6 : vector<68x28xf32> to vector<68x28xbf16>
    %cst = arith.constant dense<0.000000e+00> : vector<68x64xf32>
    %10 = tpu.matmul %9, %7, %cst {dimension_numbers = #tpu.dot_dimension_numbers<[1], [0], [0], [1], [0, 0, 1, 1], [], []>} : vector<68x28xbf16>, vector<28x64xbf16>, vector<68x64xf32> -> vector<68x64xf32>
    %11 = vector.broadcast %8 : vector<1x64xf32> to vector<68x64xf32>
    %12 = arith.addf %10, %11 : vector<68x64xf32>
    %cst_5 = arith.constant 0.000000e+00 : f32
    %13 = vector.broadcast %cst_5 : f32 to vector<68x64xf32>
    %14 = arith.cmpf ogt, %12, %13 : vector<68x64xf32>
    %cst_6 = arith.constant 2.000000e-01 : f32
    %15 = vector.broadcast %cst_6 : f32 to vector<68x64xf32>
    %16 = arith.mulf %15, %12 : vector<68x64xf32>
    %17 = arith.select %14, %12, %16 : vector<68x64xi1>, vector<68x64xf32>
    %c0_7 = arith.constant 0 : index
    %c0_8 = arith.constant 0 : index
    %18 = vector.load %arg3[%c0_7, %c0_8] : memref<64x128xbf16, #tpu.memory_space<vmem>>, vector<64x128xbf16>
    %c0_9 = arith.constant 0 : index
    %c0_10 = arith.constant 0 : index
    %19 = vector.load %arg4[%c0_9, %c0_10] : memref<1x128xf32, #tpu.memory_space<vmem>>, vector<1x128xf32>
    %20 = arith.truncf %17 : vector<68x64xf32> to vector<68x64xbf16>
    %cst_11 = arith.constant dense<0.000000e+00> : vector<68x128xf32>
    %21 = tpu.matmul %20, %18, %cst_11 {dimension_numbers = #tpu.dot_dimension_numbers<[1], [0], [0], [1], [0, 0, 1, 1], [], []>} : vector<68x64xbf16>, vector<64x128xbf16>, vector<68x128xf32> -> vector<68x128xf32>
    %22 = vector.broadcast %19 : vector<1x128xf32> to vector<68x128xf32>
    %23 = arith.addf %21, %22 : vector<68x128xf32>
    %c0_12 = arith.constant 0 : index
    %c0_13 = arith.constant 0 : index
    %24 = vector.load %arg7[%c0_12, %c0_13] : memref<1x128xf32, #tpu.memory_space<vmem>>, vector<1x128xf32>
    %25 = arith.truncf %23 : vector<68x128xf32> to vector<68x128xbf16>
    %c0_14 = arith.constant 0 : index
    %c0_15 = arith.constant 0 : index
    %c0_16 = arith.constant 0 : index
    %26 = vector.load %arg5[%c0_14, %c0_15, %c0_16] : memref<3x64x68xbf16, #tpu.memory_space<vmem>>, vector<1x64x68xbf16>
    %27 = vector.shape_cast %26 : vector<1x64x68xbf16> to vector<64x68xbf16>
    %cst_17 = arith.constant dense<0.000000e+00> : vector<64x128xf32>
    %28 = tpu.matmul %27, %25, %cst_17 {dimension_numbers = #tpu.dot_dimension_numbers<[1], [0], [0], [1], [0, 0, 1, 1], [], []>} : vector<64x68xbf16>, vector<68x128xbf16>, vector<64x128xf32> -> vector<64x128xf32>
    %29 = arith.truncf %28 : vector<64x128xf32> to vector<64x128xbf16>
    %c0_18 = arith.constant 0 : index
    %c0_19 = arith.constant 0 : index
    %c0_20 = arith.constant 0 : index
    %30 = vector.load %arg6[%c0_18, %c0_19, %c0_20] : memref<3x128x128xbf16, #tpu.memory_space<vmem>>, vector<1x128x128xbf16>
    %31 = vector.shape_cast %30 : vector<1x128x128xbf16> to vector<128x128xbf16>
    %cst_21 = arith.constant dense<0.000000e+00> : vector<64x128xf32>
    %32 = tpu.matmul %29, %31, %cst_21 {dimension_numbers = #tpu.dot_dimension_numbers<[1], [0], [0], [1], [0, 0, 1, 1], [], []>} : vector<64x128xbf16>, vector<128x128xbf16>, vector<64x128xf32> -> vector<64x128xf32>
    %c1 = arith.constant 1 : index
    %c0_22 = arith.constant 0 : index
    %c0_23 = arith.constant 0 : index
    %33 = vector.load %arg5[%c1, %c0_22, %c0_23] : memref<3x64x68xbf16, #tpu.memory_space<vmem>>, vector<1x64x68xbf16>
    %34 = vector.shape_cast %33 : vector<1x64x68xbf16> to vector<64x68xbf16>
    %cst_24 = arith.constant dense<0.000000e+00> : vector<64x128xf32>
    %35 = tpu.matmul %34, %25, %cst_24 {dimension_numbers = #tpu.dot_dimension_numbers<[1], [0], [0], [1], [0, 0, 1, 1], [], []>} : vector<64x68xbf16>, vector<68x128xbf16>, vector<64x128xf32> -> vector<64x128xf32>
    %36 = arith.truncf %35 : vector<64x128xf32> to vector<64x128xbf16>
    %c1_25 = arith.constant 1 : index
    %c0_26 = arith.constant 0 : index
    %c0_27 = arith.constant 0 : index
    %37 = vector.load %arg6[%c1_25, %c0_26, %c0_27] : memref<3x128x128xbf16, #tpu.memory_space<vmem>>, vector<1x128x128xbf16>
    %38 = vector.shape_cast %37 : vector<1x128x128xbf16> to vector<128x128xbf16>
    %cst_28 = arith.constant dense<0.000000e+00> : vector<64x128xf32>
    %39 = tpu.matmul %36, %38, %cst_28 {dimension_numbers = #tpu.dot_dimension_numbers<[1], [0], [0], [1], [0, 0, 1, 1], [], []>} : vector<64x128xbf16>, vector<128x128xbf16>, vector<64x128xf32> -> vector<64x128xf32>
    %40 = arith.addf %32, %39 : vector<64x128xf32>
    %c2 = arith.constant 2 : index
    %c0_29 = arith.constant 0 : index
    %c0_30 = arith.constant 0 : index
    %41 = vector.load %arg5[%c2, %c0_29, %c0_30] : memref<3x64x68xbf16, #tpu.memory_space<vmem>>, vector<1x64x68xbf16>
    %42 = vector.shape_cast %41 : vector<1x64x68xbf16> to vector<64x68xbf16>
    %cst_31 = arith.constant dense<0.000000e+00> : vector<64x128xf32>
    %43 = tpu.matmul %42, %25, %cst_31 {dimension_numbers = #tpu.dot_dimension_numbers<[1], [0], [0], [1], [0, 0, 1, 1], [], []>} : vector<64x68xbf16>, vector<68x128xbf16>, vector<64x128xf32> -> vector<64x128xf32>
    %44 = arith.truncf %43 : vector<64x128xf32> to vector<64x128xbf16>
    %c2_32 = arith.constant 2 : index
    %c0_33 = arith.constant 0 : index
    %c0_34 = arith.constant 0 : index
    %45 = vector.load %arg6[%c2_32, %c0_33, %c0_34] : memref<3x128x128xbf16, #tpu.memory_space<vmem>>, vector<1x128x128xbf16>
    %46 = vector.shape_cast %45 : vector<1x128x128xbf16> to vector<128x128xbf16>
    %cst_35 = arith.constant dense<0.000000e+00> : vector<64x128xf32>
    %47 = tpu.matmul %44, %46, %cst_35 {dimension_numbers = #tpu.dot_dimension_numbers<[1], [0], [0], [1], [0, 0, 1, 1], [], []>} : vector<64x128xbf16>, vector<128x128xbf16>, vector<64x128xf32> -> vector<64x128xf32>
    %48 = arith.addf %40, %47 : vector<64x128xf32>
    %49 = vector.broadcast %24 : vector<1x128xf32> to vector<64x128xf32>
    %50 = arith.addf %48, %49 : vector<64x128xf32>
    %cst_36 = arith.constant 0.000000e+00 : f32
    %51 = vector.broadcast %cst_36 : f32 to vector<64x128xf32>
    %52 = arith.cmpf ogt, %50, %51 : vector<64x128xf32>
    %cst_37 = arith.constant 2.000000e-01 : f32
    %53 = vector.broadcast %cst_37 : f32 to vector<64x128xf32>
    %54 = arith.mulf %53, %50 : vector<64x128xf32>
    %55 = arith.select %52, %50, %54 : vector<64x128xi1>, vector<64x128xf32>
    %c0_38 = arith.constant 0 : index
    %c0_39 = arith.constant 0 : index
    %56 = vector.load %arg10[%c0_38, %c0_39] : memref<1x256xf32, #tpu.memory_space<vmem>>, vector<1x256xf32>
    %57 = arith.truncf %55 : vector<64x128xf32> to vector<64x128xbf16>
    %c0_40 = arith.constant 0 : index
    %c0_41 = arith.constant 0 : index
    %c0_42 = arith.constant 0 : index
    %58 = vector.load %arg8[%c0_40, %c0_41, %c0_42] : memref<4x30x64xbf16, #tpu.memory_space<vmem>>, vector<1x30x64xbf16>
    %59 = vector.shape_cast %58 : vector<1x30x64xbf16> to vector<30x64xbf16>
    %cst_43 = arith.constant dense<0.000000e+00> : vector<30x128xf32>
    %60 = tpu.matmul %59, %57, %cst_43 {dimension_numbers = #tpu.dot_dimension_numbers<[1], [0], [0], [1], [0, 0, 1, 1], [], []>} : vector<30x64xbf16>, vector<64x128xbf16>, vector<30x128xf32> -> vector<30x128xf32>
    %61 = arith.truncf %60 : vector<30x128xf32> to vector<30x128xbf16>
    %c0_44 = arith.constant 0 : index
    %c0_45 = arith.constant 0 : index
    %c0_46 = arith.constant 0 : index
    %62 = vector.load %arg9[%c0_44, %c0_45, %c0_46] : memref<4x128x256xbf16, #tpu.memory_space<vmem>>, vector<1x128x256xbf16>
    %63 = vector.shape_cast %62 : vector<1x128x256xbf16> to vector<128x256xbf16>
    %cst_47 = arith.constant dense<0.000000e+00> : vector<30x256xf32>
    %64 = tpu.matmul %61, %63, %cst_47 {dimension_numbers = #tpu.dot_dimension_numbers<[1], [0], [0], [1], [0, 0, 1, 1], [], []>} : vector<30x128xbf16>, vector<128x256xbf16>, vector<30x256xf32> -> vector<30x256xf32>
    %c1_48 = arith.constant 1 : index
    %c0_49 = arith.constant 0 : index
    %c0_50 = arith.constant 0 : index
    %65 = vector.load %arg8[%c1_48, %c0_49, %c0_50] : memref<4x30x64xbf16, #tpu.memory_space<vmem>>, vector<1x30x64xbf16>
    %66 = vector.shape_cast %65 : vector<1x30x64xbf16> to vector<30x64xbf16>
    %cst_51 = arith.constant dense<0.000000e+00> : vector<30x128xf32>
    %67 = tpu.matmul %66, %57, %cst_51 {dimension_numbers = #tpu.dot_dimension_numbers<[1], [0], [0], [1], [0, 0, 1, 1], [], []>} : vector<30x64xbf16>, vector<64x128xbf16>, vector<30x128xf32> -> vector<30x128xf32>
    %68 = arith.truncf %67 : vector<30x128xf32> to vector<30x128xbf16>
    %c1_52 = arith.constant 1 : index
    %c0_53 = arith.constant 0 : index
    %c0_54 = arith.constant 0 : index
    %69 = vector.load %arg9[%c1_52, %c0_53, %c0_54] : memref<4x128x256xbf16, #tpu.memory_space<vmem>>, vector<1x128x256xbf16>
    %70 = vector.shape_cast %69 : vector<1x128x256xbf16> to vector<128x256xbf16>
    %cst_55 = arith.constant dense<0.000000e+00> : vector<30x256xf32>
    %71 = tpu.matmul %68, %70, %cst_55 {dimension_numbers = #tpu.dot_dimension_numbers<[1], [0], [0], [1], [0, 0, 1, 1], [], []>} : vector<30x128xbf16>, vector<128x256xbf16>, vector<30x256xf32> -> vector<30x256xf32>
    %72 = arith.addf %64, %71 : vector<30x256xf32>
    %c2_56 = arith.constant 2 : index
    %c0_57 = arith.constant 0 : index
    %c0_58 = arith.constant 0 : index
    %73 = vector.load %arg8[%c2_56, %c0_57, %c0_58] : memref<4x30x64xbf16, #tpu.memory_space<vmem>>, vector<1x30x64xbf16>
    %74 = vector.shape_cast %73 : vector<1x30x64xbf16> to vector<30x64xbf16>
    %cst_59 = arith.constant dense<0.000000e+00> : vector<30x128xf32>
    %75 = tpu.matmul %74, %57, %cst_59 {dimension_numbers = #tpu.dot_dimension_numbers<[1], [0], [0], [1], [0, 0, 1, 1], [], []>} : vector<30x64xbf16>, vector<64x128xbf16>, vector<30x128xf32> -> vector<30x128xf32>
    %76 = arith.truncf %75 : vector<30x128xf32> to vector<30x128xbf16>
    %c2_60 = arith.constant 2 : index
    %c0_61 = arith.constant 0 : index
    %c0_62 = arith.constant 0 : index
    %77 = vector.load %arg9[%c2_60, %c0_61, %c0_62] : memref<4x128x256xbf16, #tpu.memory_space<vmem>>, vector<1x128x256xbf16>
    %78 = vector.shape_cast %77 : vector<1x128x256xbf16> to vector<128x256xbf16>
    %cst_63 = arith.constant dense<0.000000e+00> : vector<30x256xf32>
    %79 = tpu.matmul %76, %78, %cst_63 {dimension_numbers = #tpu.dot_dimension_numbers<[1], [0], [0], [1], [0, 0, 1, 1], [], []>} : vector<30x128xbf16>, vector<128x256xbf16>, vector<30x256xf32> -> vector<30x256xf32>
    %80 = arith.addf %72, %79 : vector<30x256xf32>
    %c3 = arith.constant 3 : index
    %c0_64 = arith.constant 0 : index
    %c0_65 = arith.constant 0 : index
    %81 = vector.load %arg8[%c3, %c0_64, %c0_65] : memref<4x30x64xbf16, #tpu.memory_space<vmem>>, vector<1x30x64xbf16>
    %82 = vector.shape_cast %81 : vector<1x30x64xbf16> to vector<30x64xbf16>
    %cst_66 = arith.constant dense<0.000000e+00> : vector<30x128xf32>
    %83 = tpu.matmul %82, %57, %cst_66 {dimension_numbers = #tpu.dot_dimension_numbers<[1], [0], [0], [1], [0, 0, 1, 1], [], []>} : vector<30x64xbf16>, vector<64x128xbf16>, vector<30x128xf32> -> vector<30x128xf32>
    %84 = arith.truncf %83 : vector<30x128xf32> to vector<30x128xbf16>
    %c3_67 = arith.constant 3 : index
    %c0_68 = arith.constant 0 : index
    %c0_69 = arith.constant 0 : index
    %85 = vector.load %arg9[%c3_67, %c0_68, %c0_69] : memref<4x128x256xbf16, #tpu.memory_space<vmem>>, vector<1x128x256xbf16>
    %86 = vector.shape_cast %85 : vector<1x128x256xbf16> to vector<128x256xbf16>
    %cst_70 = arith.constant dense<0.000000e+00> : vector<30x256xf32>
    %87 = tpu.matmul %84, %86, %cst_70 {dimension_numbers = #tpu.dot_dimension_numbers<[1], [0], [0], [1], [0, 0, 1, 1], [], []>} : vector<30x128xbf16>, vector<128x256xbf16>, vector<30x256xf32> -> vector<30x256xf32>
    %88 = arith.addf %80, %87 : vector<30x256xf32>
    %89 = vector.broadcast %56 : vector<1x256xf32> to vector<30x256xf32>
    %90 = arith.addf %88, %89 : vector<30x256xf32>
    %cst_71 = arith.constant 0.000000e+00 : f32
    %91 = vector.broadcast %cst_71 : f32 to vector<30x256xf32>
    %92 = arith.cmpf ogt, %90, %91 : vector<30x256xf32>
    %cst_72 = arith.constant 2.000000e-01 : f32
    %93 = vector.broadcast %cst_72 : f32 to vector<30x256xf32>
    %94 = arith.mulf %93, %90 : vector<30x256xf32>
    %95 = arith.select %92, %90, %94 : vector<30x256xi1>, vector<30x256xf32>
    %c0_73 = arith.constant 0 : index
    %c0_74 = arith.constant 0 : index
    %96 = vector.load %arg13[%c0_73, %c0_74] : memref<1x256xf32, #tpu.memory_space<vmem>>, vector<1x256xf32>
    %97 = arith.truncf %95 : vector<30x256xf32> to vector<30x256xbf16>
    %c0_75 = arith.constant 0 : index
    %c0_76 = arith.constant 0 : index
    %c0_77 = arith.constant 0 : index
    %98 = vector.load %arg11[%c0_75, %c0_76, %c0_77] : memref<3x26x30xbf16, #tpu.memory_space<vmem>>, vector<1x26x30xbf16>
    %99 = vector.shape_cast %98 : vector<1x26x30xbf16> to vector<26x30xbf16>
    %cst_78 = arith.constant dense<0.000000e+00> : vector<26x256xf32>
    %100 = tpu.matmul %99, %97, %cst_78 {dimension_numbers = #tpu.dot_dimension_numbers<[1], [0], [0], [1], [0, 0, 1, 1], [], []>} : vector<26x30xbf16>, vector<30x256xbf16>, vector<26x256xf32> -> vector<26x256xf32>
    %101 = arith.truncf %100 : vector<26x256xf32> to vector<26x256xbf16>
    %c0_79 = arith.constant 0 : index
    %c0_80 = arith.constant 0 : index
    %c0_81 = arith.constant 0 : index
    %102 = vector.load %arg12[%c0_79, %c0_80, %c0_81] : memref<3x256x256xbf16, #tpu.memory_space<vmem>>, vector<1x256x256xbf16>
    %103 = vector.shape_cast %102 : vector<1x256x256xbf16> to vector<256x256xbf16>
    %cst_82 = arith.constant dense<0.000000e+00> : vector<26x256xf32>
    %104 = tpu.matmul %101, %103, %cst_82 {dimension_numbers = #tpu.dot_dimension_numbers<[1], [0], [0], [1], [0, 0, 1, 1], [], []>} : vector<26x256xbf16>, vector<256x256xbf16>, vector<26x256xf32> -> vector<26x256xf32>
    %c1_83 = arith.constant 1 : index
    %c0_84 = arith.constant 0 : index
    %c0_85 = arith.constant 0 : index
    %105 = vector.load %arg11[%c1_83, %c0_84, %c0_85] : memref<3x26x30xbf16, #tpu.memory_space<vmem>>, vector<1x26x30xbf16>
    %106 = vector.shape_cast %105 : vector<1x26x30xbf16> to vector<26x30xbf16>
    %cst_86 = arith.constant dense<0.000000e+00> : vector<26x256xf32>
    %107 = tpu.matmul %106, %97, %cst_86 {dimension_numbers = #tpu.dot_dimension_numbers<[1], [0], [0], [1], [0, 0, 1, 1], [], []>} : vector<26x30xbf16>, vector<30x256xbf16>, vector<26x256xf32> -> vector<26x256xf32>
    %108 = arith.truncf %107 : vector<26x256xf32> to vector<26x256xbf16>
    %c1_87 = arith.constant 1 : index
    %c0_88 = arith.constant 0 : index
    %c0_89 = arith.constant 0 : index
    %109 = vector.load %arg12[%c1_87, %c0_88, %c0_89] : memref<3x256x256xbf16, #tpu.memory_space<vmem>>, vector<1x256x256xbf16>
    %110 = vector.shape_cast %109 : vector<1x256x256xbf16> to vector<256x256xbf16>
    %cst_90 = arith.constant dense<0.000000e+00> : vector<26x256xf32>
    %111 = tpu.matmul %108, %110, %cst_90 {dimension_numbers = #tpu.dot_dimension_numbers<[1], [0], [0], [1], [0, 0, 1, 1], [], []>} : vector<26x256xbf16>, vector<256x256xbf16>, vector<26x256xf32> -> vector<26x256xf32>
    %112 = arith.addf %104, %111 : vector<26x256xf32>
    %c2_91 = arith.constant 2 : index
    %c0_92 = arith.constant 0 : index
    %c0_93 = arith.constant 0 : index
    %113 = vector.load %arg11[%c2_91, %c0_92, %c0_93] : memref<3x26x30xbf16, #tpu.memory_space<vmem>>, vector<1x26x30xbf16>
    %114 = vector.shape_cast %113 : vector<1x26x30xbf16> to vector<26x30xbf16>
    %cst_94 = arith.constant dense<0.000000e+00> : vector<26x256xf32>
    %115 = tpu.matmul %114, %97, %cst_94 {dimension_numbers = #tpu.dot_dimension_numbers<[1], [0], [0], [1], [0, 0, 1, 1], [], []>} : vector<26x30xbf16>, vector<30x256xbf16>, vector<26x256xf32> -> vector<26x256xf32>
    %116 = arith.truncf %115 : vector<26x256xf32> to vector<26x256xbf16>
    %c2_95 = arith.constant 2 : index
    %c0_96 = arith.constant 0 : index
    %c0_97 = arith.constant 0 : index
    %117 = vector.load %arg12[%c2_95, %c0_96, %c0_97] : memref<3x256x256xbf16, #tpu.memory_space<vmem>>, vector<1x256x256xbf16>
    %118 = vector.shape_cast %117 : vector<1x256x256xbf16> to vector<256x256xbf16>
    %cst_98 = arith.constant dense<0.000000e+00> : vector<26x256xf32>
    %119 = tpu.matmul %116, %118, %cst_98 {dimension_numbers = #tpu.dot_dimension_numbers<[1], [0], [0], [1], [0, 0, 1, 1], [], []>} : vector<26x256xbf16>, vector<256x256xbf16>, vector<26x256xf32> -> vector<26x256xf32>
    %120 = arith.addf %112, %119 : vector<26x256xf32>
    %121 = vector.broadcast %96 : vector<1x256xf32> to vector<26x256xf32>
    %122 = arith.addf %120, %121 : vector<26x256xf32>
    %cst_99 = arith.constant 0.000000e+00 : f32
    %123 = vector.broadcast %cst_99 : f32 to vector<26x256xf32>
    %124 = arith.cmpf ogt, %122, %123 : vector<26x256xf32>
    %cst_100 = arith.constant 2.000000e-01 : f32
    %125 = vector.broadcast %cst_100 : f32 to vector<26x256xf32>
    %126 = arith.mulf %125, %122 : vector<26x256xf32>
    %127 = arith.select %124, %122, %126 : vector<26x256xi1>, vector<26x256xf32>
    %c0_i32_101 = arith.constant 0 : i32
    %128 = tpu.memref_slice %arg31[%c0_i32_101] : memref<3x!tpu.dma_semaphore, #tpu.memory_space<semaphore_mem>> -> memref<1x!tpu.dma_semaphore, #tpu.memory_space<semaphore_mem>>
    %129 = tpu.memref_squeeze %128 : memref<1x!tpu.dma_semaphore, #tpu.memory_space<semaphore_mem>> -> memref<!tpu.dma_semaphore, #tpu.memory_space<semaphore_mem>>
    tpu.wait_dma2 semaphore(%129 : memref<!tpu.dma_semaphore, #tpu.memory_space<semaphore_mem>>) src(%arg24 : memref<4x256x512xbf16, #tpu.memory_space<any>>) dst(%arg28 : memref<4x256x512xbf16, #tpu.memory_space<vmem>>)
    %c0_102 = arith.constant 0 : index
    %c0_103 = arith.constant 0 : index
    %130 = vector.load %arg15[%c0_102, %c0_103] : memref<1x512xf32, #tpu.memory_space<vmem>>, vector<1x512xf32>
    %131 = arith.truncf %127 : vector<26x256xf32> to vector<26x256xbf16>
    %c0_104 = arith.constant 0 : index
    %c0_105 = arith.constant 0 : index
    %c0_106 = arith.constant 0 : index
    %132 = vector.load %arg14[%c0_104, %c0_105, %c0_106] : memref<4x10x26xbf16, #tpu.memory_space<vmem>>, vector<1x10x26xbf16>
    %133 = vector.shape_cast %132 : vector<1x10x26xbf16> to vector<10x26xbf16>
    %cst_107 = arith.constant dense<0.000000e+00> : vector<10x256xf32>
    %134 = tpu.matmul %133, %131, %cst_107 {dimension_numbers = #tpu.dot_dimension_numbers<[1], [0], [0], [1], [0, 0, 1, 1], [], []>} : vector<10x26xbf16>, vector<26x256xbf16>, vector<10x256xf32> -> vector<10x256xf32>
    %135 = arith.truncf %134 : vector<10x256xf32> to vector<10x256xbf16>
    %c0_108 = arith.constant 0 : index
    %c0_109 = arith.constant 0 : index
    %c0_110 = arith.constant 0 : index
    %136 = vector.load %arg28[%c0_108, %c0_109, %c0_110] : memref<4x256x512xbf16, #tpu.memory_space<vmem>>, vector<1x256x512xbf16>
    %137 = vector.shape_cast %136 : vector<1x256x512xbf16> to vector<256x512xbf16>
    %cst_111 = arith.constant dense<0.000000e+00> : vector<10x512xf32>
    %138 = tpu.matmul %135, %137, %cst_111 {dimension_numbers = #tpu.dot_dimension_numbers<[1], [0], [0], [1], [0, 0, 1, 1], [], []>} : vector<10x256xbf16>, vector<256x512xbf16>, vector<10x512xf32> -> vector<10x512xf32>
    %c1_112 = arith.constant 1 : index
    %c0_113 = arith.constant 0 : index
    %c0_114 = arith.constant 0 : index
    %139 = vector.load %arg14[%c1_112, %c0_113, %c0_114] : memref<4x10x26xbf16, #tpu.memory_space<vmem>>, vector<1x10x26xbf16>
    %140 = vector.shape_cast %139 : vector<1x10x26xbf16> to vector<10x26xbf16>
    %cst_115 = arith.constant dense<0.000000e+00> : vector<10x256xf32>
    %141 = tpu.matmul %140, %131, %cst_115 {dimension_numbers = #tpu.dot_dimension_numbers<[1], [0], [0], [1], [0, 0, 1, 1], [], []>} : vector<10x26xbf16>, vector<26x256xbf16>, vector<10x256xf32> -> vector<10x256xf32>
    %142 = arith.truncf %141 : vector<10x256xf32> to vector<10x256xbf16>
    %c1_116 = arith.constant 1 : index
    %c0_117 = arith.constant 0 : index
    %c0_118 = arith.constant 0 : index
    %143 = vector.load %arg28[%c1_116, %c0_117, %c0_118] : memref<4x256x512xbf16, #tpu.memory_space<vmem>>, vector<1x256x512xbf16>
    %144 = vector.shape_cast %143 : vector<1x256x512xbf16> to vector<256x512xbf16>
    %cst_119 = arith.constant dense<0.000000e+00> : vector<10x512xf32>
    %145 = tpu.matmul %142, %144, %cst_119 {dimension_numbers = #tpu.dot_dimension_numbers<[1], [0], [0], [1], [0, 0, 1, 1], [], []>} : vector<10x256xbf16>, vector<256x512xbf16>, vector<10x512xf32> -> vector<10x512xf32>
    %146 = arith.addf %138, %145 : vector<10x512xf32>
    %c2_120 = arith.constant 2 : index
    %c0_121 = arith.constant 0 : index
    %c0_122 = arith.constant 0 : index
    %147 = vector.load %arg14[%c2_120, %c0_121, %c0_122] : memref<4x10x26xbf16, #tpu.memory_space<vmem>>, vector<1x10x26xbf16>
    %148 = vector.shape_cast %147 : vector<1x10x26xbf16> to vector<10x26xbf16>
    %cst_123 = arith.constant dense<0.000000e+00> : vector<10x256xf32>
    %149 = tpu.matmul %148, %131, %cst_123 {dimension_numbers = #tpu.dot_dimension_numbers<[1], [0], [0], [1], [0, 0, 1, 1], [], []>} : vector<10x26xbf16>, vector<26x256xbf16>, vector<10x256xf32> -> vector<10x256xf32>
    %150 = arith.truncf %149 : vector<10x256xf32> to vector<10x256xbf16>
    %c2_124 = arith.constant 2 : index
    %c0_125 = arith.constant 0 : index
    %c0_126 = arith.constant 0 : index
    %151 = vector.load %arg28[%c2_124, %c0_125, %c0_126] : memref<4x256x512xbf16, #tpu.memory_space<vmem>>, vector<1x256x512xbf16>
    %152 = vector.shape_cast %151 : vector<1x256x512xbf16> to vector<256x512xbf16>
    %cst_127 = arith.constant dense<0.000000e+00> : vector<10x512xf32>
    %153 = tpu.matmul %150, %152, %cst_127 {dimension_numbers = #tpu.dot_dimension_numbers<[1], [0], [0], [1], [0, 0, 1, 1], [], []>} : vector<10x256xbf16>, vector<256x512xbf16>, vector<10x512xf32> -> vector<10x512xf32>
    %154 = arith.addf %146, %153 : vector<10x512xf32>
    %c3_128 = arith.constant 3 : index
    %c0_129 = arith.constant 0 : index
    %c0_130 = arith.constant 0 : index
    %155 = vector.load %arg14[%c3_128, %c0_129, %c0_130] : memref<4x10x26xbf16, #tpu.memory_space<vmem>>, vector<1x10x26xbf16>
    %156 = vector.shape_cast %155 : vector<1x10x26xbf16> to vector<10x26xbf16>
    %cst_131 = arith.constant dense<0.000000e+00> : vector<10x256xf32>
    %157 = tpu.matmul %156, %131, %cst_131 {dimension_numbers = #tpu.dot_dimension_numbers<[1], [0], [0], [1], [0, 0, 1, 1], [], []>} : vector<10x26xbf16>, vector<26x256xbf16>, vector<10x256xf32> -> vector<10x256xf32>
    %158 = arith.truncf %157 : vector<10x256xf32> to vector<10x256xbf16>
    %c3_132 = arith.constant 3 : index
    %c0_133 = arith.constant 0 : index
    %c0_134 = arith.constant 0 : index
    %159 = vector.load %arg28[%c3_132, %c0_133, %c0_134] : memref<4x256x512xbf16, #tpu.memory_space<vmem>>, vector<1x256x512xbf16>
    %160 = vector.shape_cast %159 : vector<1x256x512xbf16> to vector<256x512xbf16>
    %cst_135 = arith.constant dense<0.000000e+00> : vector<10x512xf32>
    %161 = tpu.matmul %158, %160, %cst_135 {dimension_numbers = #tpu.dot_dimension_numbers<[1], [0], [0], [1], [0, 0, 1, 1], [], []>} : vector<10x256xbf16>, vector<256x512xbf16>, vector<10x512xf32> -> vector<10x512xf32>
    %162 = arith.addf %154, %161 : vector<10x512xf32>
    %163 = vector.broadcast %130 : vector<1x512xf32> to vector<10x512xf32>
    %164 = arith.addf %162, %163 : vector<10x512xf32>
    %cst_136 = arith.constant 0.000000e+00 : f32
    %165 = vector.broadcast %cst_136 : f32 to vector<10x512xf32>
    %166 = arith.cmpf ogt, %164, %165 : vector<10x512xf32>
    %cst_137 = arith.constant 2.000000e-01 : f32
    %167 = vector.broadcast %cst_137 : f32 to vector<10x512xf32>
    %168 = arith.mulf %167, %164 : vector<10x512xf32>
    %169 = arith.select %166, %164, %168 : vector<10x512xi1>, vector<10x512xf32>
    %c1_i32_138 = arith.constant 1 : i32
    %170 = tpu.memref_slice %arg31[%c1_i32_138] : memref<3x!tpu.dma_semaphore, #tpu.memory_space<semaphore_mem>> -> memref<1x!tpu.dma_semaphore, #tpu.memory_space<semaphore_mem>>
    %171 = tpu.memref_squeeze %170 : memref<1x!tpu.dma_semaphore, #tpu.memory_space<semaphore_mem>> -> memref<!tpu.dma_semaphore, #tpu.memory_space<semaphore_mem>>
    tpu.wait_dma2 semaphore(%171 : memref<!tpu.dma_semaphore, #tpu.memory_space<semaphore_mem>>) src(%arg25 : memref<3x512x512xbf16, #tpu.memory_space<any>>) dst(%arg29 : memref<3x512x512xbf16, #tpu.memory_space<vmem>>)
    %c0_139 = arith.constant 0 : index
    %c0_140 = arith.constant 0 : index
    %172 = vector.load %arg17[%c0_139, %c0_140] : memref<1x512xf32, #tpu.memory_space<vmem>>, vector<1x512xf32>
    %173 = arith.truncf %169 : vector<10x512xf32> to vector<10x512xbf16>
    %c0_141 = arith.constant 0 : index
    %c0_142 = arith.constant 0 : index
    %c0_143 = arith.constant 0 : index
    %174 = vector.load %arg16[%c0_141, %c0_142, %c0_143] : memref<3x6x10xbf16, #tpu.memory_space<vmem>>, vector<1x6x10xbf16>
    %175 = vector.shape_cast %174 : vector<1x6x10xbf16> to vector<6x10xbf16>
    %cst_144 = arith.constant dense<0.000000e+00> : vector<6x512xf32>
    %176 = tpu.matmul %175, %173, %cst_144 {dimension_numbers = #tpu.dot_dimension_numbers<[1], [0], [0], [1], [0, 0, 1, 1], [], []>} : vector<6x10xbf16>, vector<10x512xbf16>, vector<6x512xf32> -> vector<6x512xf32>
    %177 = arith.truncf %176 : vector<6x512xf32> to vector<6x512xbf16>
    %c0_145 = arith.constant 0 : index
    %c0_146 = arith.constant 0 : index
    %c0_147 = arith.constant 0 : index
    %178 = vector.load %arg29[%c0_145, %c0_146, %c0_147] : memref<3x512x512xbf16, #tpu.memory_space<vmem>>, vector<1x512x512xbf16>
    %179 = vector.shape_cast %178 : vector<1x512x512xbf16> to vector<512x512xbf16>
    %cst_148 = arith.constant dense<0.000000e+00> : vector<6x512xf32>
    %180 = tpu.matmul %177, %179, %cst_148 {dimension_numbers = #tpu.dot_dimension_numbers<[1], [0], [0], [1], [0, 0, 1, 1], [], []>} : vector<6x512xbf16>, vector<512x512xbf16>, vector<6x512xf32> -> vector<6x512xf32>
    %c1_149 = arith.constant 1 : index
    %c0_150 = arith.constant 0 : index
    %c0_151 = arith.constant 0 : index
    %181 = vector.load %arg16[%c1_149, %c0_150, %c0_151] : memref<3x6x10xbf16, #tpu.memory_space<vmem>>, vector<1x6x10xbf16>
    %182 = vector.shape_cast %181 : vector<1x6x10xbf16> to vector<6x10xbf16>
    %cst_152 = arith.constant dense<0.000000e+00> : vector<6x512xf32>
    %183 = tpu.matmul %182, %173, %cst_152 {dimension_numbers = #tpu.dot_dimension_numbers<[1], [0], [0], [1], [0, 0, 1, 1], [], []>} : vector<6x10xbf16>, vector<10x512xbf16>, vector<6x512xf32> -> vector<6x512xf32>
    %184 = arith.truncf %183 : vector<6x512xf32> to vector<6x512xbf16>
    %c1_153 = arith.constant 1 : index
    %c0_154 = arith.constant 0 : index
    %c0_155 = arith.constant 0 : index
    %185 = vector.load %arg29[%c1_153, %c0_154, %c0_155] : memref<3x512x512xbf16, #tpu.memory_space<vmem>>, vector<1x512x512xbf16>
    %186 = vector.shape_cast %185 : vector<1x512x512xbf16> to vector<512x512xbf16>
    %cst_156 = arith.constant dense<0.000000e+00> : vector<6x512xf32>
    %187 = tpu.matmul %184, %186, %cst_156 {dimension_numbers = #tpu.dot_dimension_numbers<[1], [0], [0], [1], [0, 0, 1, 1], [], []>} : vector<6x512xbf16>, vector<512x512xbf16>, vector<6x512xf32> -> vector<6x512xf32>
    %188 = arith.addf %180, %187 : vector<6x512xf32>
    %c2_157 = arith.constant 2 : index
    %c0_158 = arith.constant 0 : index
    %c0_159 = arith.constant 0 : index
    %189 = vector.load %arg16[%c2_157, %c0_158, %c0_159] : memref<3x6x10xbf16, #tpu.memory_space<vmem>>, vector<1x6x10xbf16>
    %190 = vector.shape_cast %189 : vector<1x6x10xbf16> to vector<6x10xbf16>
    %cst_160 = arith.constant dense<0.000000e+00> : vector<6x512xf32>
    %191 = tpu.matmul %190, %173, %cst_160 {dimension_numbers = #tpu.dot_dimension_numbers<[1], [0], [0], [1], [0, 0, 1, 1], [], []>} : vector<6x10xbf16>, vector<10x512xbf16>, vector<6x512xf32> -> vector<6x512xf32>
    %192 = arith.truncf %191 : vector<6x512xf32> to vector<6x512xbf16>
    %c2_161 = arith.constant 2 : index
    %c0_162 = arith.constant 0 : index
    %c0_163 = arith.constant 0 : index
    %193 = vector.load %arg29[%c2_161, %c0_162, %c0_163] : memref<3x512x512xbf16, #tpu.memory_space<vmem>>, vector<1x512x512xbf16>
    %194 = vector.shape_cast %193 : vector<1x512x512xbf16> to vector<512x512xbf16>
    %cst_164 = arith.constant dense<0.000000e+00> : vector<6x512xf32>
    %195 = tpu.matmul %192, %194, %cst_164 {dimension_numbers = #tpu.dot_dimension_numbers<[1], [0], [0], [1], [0, 0, 1, 1], [], []>} : vector<6x512xbf16>, vector<512x512xbf16>, vector<6x512xf32> -> vector<6x512xf32>
    %196 = arith.addf %188, %195 : vector<6x512xf32>
    %197 = vector.broadcast %172 : vector<1x512xf32> to vector<6x512xf32>
    %198 = arith.addf %196, %197 : vector<6x512xf32>
    %cst_165 = arith.constant 0.000000e+00 : f32
    %199 = vector.broadcast %cst_165 : f32 to vector<6x512xf32>
    %200 = arith.cmpf ogt, %198, %199 : vector<6x512xf32>
    %cst_166 = arith.constant 2.000000e-01 : f32
    %201 = vector.broadcast %cst_166 : f32 to vector<6x512xf32>
    %202 = arith.mulf %201, %198 : vector<6x512xf32>
    %203 = arith.select %200, %198, %202 : vector<6x512xi1>, vector<6x512xf32>
    %c2_i32_167 = arith.constant 2 : i32
    %204 = tpu.memref_slice %arg31[%c2_i32_167] : memref<3x!tpu.dma_semaphore, #tpu.memory_space<semaphore_mem>> -> memref<1x!tpu.dma_semaphore, #tpu.memory_space<semaphore_mem>>
    %205 = tpu.memref_squeeze %204 : memref<1x!tpu.dma_semaphore, #tpu.memory_space<semaphore_mem>> -> memref<!tpu.dma_semaphore, #tpu.memory_space<semaphore_mem>>
    tpu.wait_dma2 semaphore(%205 : memref<!tpu.dma_semaphore, #tpu.memory_space<semaphore_mem>>) src(%arg26 : memref<3x512x256xbf16, #tpu.memory_space<any>>) dst(%arg30 : memref<3x512x256xbf16, #tpu.memory_space<vmem>>)
    %c0_168 = arith.constant 0 : index
    %c0_169 = arith.constant 0 : index
    %206 = vector.load %arg19[%c0_168, %c0_169] : memref<1x256xf32, #tpu.memory_space<vmem>>, vector<1x256xf32>
    %207 = arith.truncf %203 : vector<6x512xf32> to vector<6x512xbf16>
    %c0_170 = arith.constant 0 : index
    %c0_171 = arith.constant 0 : index
    %c0_172 = arith.constant 0 : index
    %208 = vector.load %arg18[%c0_170, %c0_171, %c0_172] : memref<3x2x6xbf16, #tpu.memory_space<vmem>>, vector<1x2x6xbf16>
    %209 = vector.shape_cast %208 : vector<1x2x6xbf16> to vector<2x6xbf16>
    %cst_173 = arith.constant dense<0.000000e+00> : vector<2x512xf32>
    %210 = tpu.matmul %209, %207, %cst_173 {dimension_numbers = #tpu.dot_dimension_numbers<[1], [0], [0], [1], [0, 0, 1, 1], [], []>} : vector<2x6xbf16>, vector<6x512xbf16>, vector<2x512xf32> -> vector<2x512xf32>
    %211 = arith.truncf %210 : vector<2x512xf32> to vector<2x512xbf16>
    %c0_174 = arith.constant 0 : index
    %c0_175 = arith.constant 0 : index
    %c0_176 = arith.constant 0 : index
    %212 = vector.load %arg30[%c0_174, %c0_175, %c0_176] : memref<3x512x256xbf16, #tpu.memory_space<vmem>>, vector<1x512x256xbf16>
    %213 = vector.shape_cast %212 : vector<1x512x256xbf16> to vector<512x256xbf16>
    %cst_177 = arith.constant dense<0.000000e+00> : vector<2x256xf32>
    %214 = tpu.matmul %211, %213, %cst_177 {dimension_numbers = #tpu.dot_dimension_numbers<[1], [0], [0], [1], [0, 0, 1, 1], [], []>} : vector<2x512xbf16>, vector<512x256xbf16>, vector<2x256xf32> -> vector<2x256xf32>
    %c1_178 = arith.constant 1 : index
    %c0_179 = arith.constant 0 : index
    %c0_180 = arith.constant 0 : index
    %215 = vector.load %arg18[%c1_178, %c0_179, %c0_180] : memref<3x2x6xbf16, #tpu.memory_space<vmem>>, vector<1x2x6xbf16>
    %216 = vector.shape_cast %215 : vector<1x2x6xbf16> to vector<2x6xbf16>
    %cst_181 = arith.constant dense<0.000000e+00> : vector<2x512xf32>
    %217 = tpu.matmul %216, %207, %cst_181 {dimension_numbers = #tpu.dot_dimension_numbers<[1], [0], [0], [1], [0, 0, 1, 1], [], []>} : vector<2x6xbf16>, vector<6x512xbf16>, vector<2x512xf32> -> vector<2x512xf32>
    %218 = arith.truncf %217 : vector<2x512xf32> to vector<2x512xbf16>
    %c1_182 = arith.constant 1 : index
    %c0_183 = arith.constant 0 : index
    %c0_184 = arith.constant 0 : index
    %219 = vector.load %arg30[%c1_182, %c0_183, %c0_184] : memref<3x512x256xbf16, #tpu.memory_space<vmem>>, vector<1x512x256xbf16>
    %220 = vector.shape_cast %219 : vector<1x512x256xbf16> to vector<512x256xbf16>
    %cst_185 = arith.constant dense<0.000000e+00> : vector<2x256xf32>
    %221 = tpu.matmul %218, %220, %cst_185 {dimension_numbers = #tpu.dot_dimension_numbers<[1], [0], [0], [1], [0, 0, 1, 1], [], []>} : vector<2x512xbf16>, vector<512x256xbf16>, vector<2x256xf32> -> vector<2x256xf32>
    %222 = arith.addf %214, %221 : vector<2x256xf32>
    %c2_186 = arith.constant 2 : index
    %c0_187 = arith.constant 0 : index
    %c0_188 = arith.constant 0 : index
    %223 = vector.load %arg18[%c2_186, %c0_187, %c0_188] : memref<3x2x6xbf16, #tpu.memory_space<vmem>>, vector<1x2x6xbf16>
    %224 = vector.shape_cast %223 : vector<1x2x6xbf16> to vector<2x6xbf16>
    %cst_189 = arith.constant dense<0.000000e+00> : vector<2x512xf32>
    %225 = tpu.matmul %224, %207, %cst_189 {dimension_numbers = #tpu.dot_dimension_numbers<[1], [0], [0], [1], [0, 0, 1, 1], [], []>} : vector<2x6xbf16>, vector<6x512xbf16>, vector<2x512xf32> -> vector<2x512xf32>
    %226 = arith.truncf %225 : vector<2x512xf32> to vector<2x512xbf16>
    %c2_190 = arith.constant 2 : index
    %c0_191 = arith.constant 0 : index
    %c0_192 = arith.constant 0 : index
    %227 = vector.load %arg30[%c2_190, %c0_191, %c0_192] : memref<3x512x256xbf16, #tpu.memory_space<vmem>>, vector<1x512x256xbf16>
    %228 = vector.shape_cast %227 : vector<1x512x256xbf16> to vector<512x256xbf16>
    %cst_193 = arith.constant dense<0.000000e+00> : vector<2x256xf32>
    %229 = tpu.matmul %226, %228, %cst_193 {dimension_numbers = #tpu.dot_dimension_numbers<[1], [0], [0], [1], [0, 0, 1, 1], [], []>} : vector<2x512xbf16>, vector<512x256xbf16>, vector<2x256xf32> -> vector<2x256xf32>
    %230 = arith.addf %222, %229 : vector<2x256xf32>
    %231 = vector.broadcast %206 : vector<1x256xf32> to vector<2x256xf32>
    %232 = arith.addf %230, %231 : vector<2x256xf32>
    %cst_194 = arith.constant 0.000000e+00 : f32
    %233 = vector.broadcast %cst_194 : f32 to vector<2x256xf32>
    %234 = arith.cmpf ogt, %232, %233 : vector<2x256xf32>
    %cst_195 = arith.constant 2.000000e-01 : f32
    %235 = vector.broadcast %cst_195 : f32 to vector<2x256xf32>
    %236 = arith.mulf %235, %232 : vector<2x256xf32>
    %237 = arith.select %234, %232, %236 : vector<2x256xi1>, vector<2x256xf32>
    %c0_196 = arith.constant 0 : index
    %c0_197 = arith.constant 0 : index
    %238 = vector.load %arg20[%c0_196, %c0_197] : memref<256x64xbf16, #tpu.memory_space<vmem>>, vector<256x64xbf16>
    %c0_198 = arith.constant 0 : index
    %c0_199 = arith.constant 0 : index
    %239 = vector.load %arg21[%c0_198, %c0_199] : memref<1x64xf32, #tpu.memory_space<vmem>>, vector<1x64xf32>
    %240 = arith.truncf %237 : vector<2x256xf32> to vector<2x256xbf16>
    %cst_200 = arith.constant dense<0.000000e+00> : vector<2x64xf32>
    %241 = tpu.matmul %240, %238, %cst_200 {dimension_numbers = #tpu.dot_dimension_numbers<[1], [0], [0], [1], [0, 0, 1, 1], [], []>} : vector<2x256xbf16>, vector<256x64xbf16>, vector<2x64xf32> -> vector<2x64xf32>
    %242 = vector.broadcast %239 : vector<1x64xf32> to vector<2x64xf32>
    %243 = arith.addf %241, %242 : vector<2x64xf32>
    %cst_201 = arith.constant 0.000000e+00 : f32
    %244 = vector.broadcast %cst_201 : f32 to vector<2x64xf32>
    %245 = arith.cmpf ogt, %243, %244 : vector<2x64xf32>
    %cst_202 = arith.constant 2.000000e-01 : f32
    %246 = vector.broadcast %cst_202 : f32 to vector<2x64xf32>
    %247 = arith.mulf %246, %243 : vector<2x64xf32>
    %248 = arith.select %245, %243, %247 : vector<2x64xi1>, vector<2x64xf32>
    %c0_203 = arith.constant 0 : index
    %c0_204 = arith.constant 0 : index
    %249 = vector.load %arg22[%c0_203, %c0_204] : memref<64x1xbf16, #tpu.memory_space<vmem>>, vector<64x1xbf16>
    %c0_205 = arith.constant 0 : index
    %c0_206 = arith.constant 0 : index
    %250 = vector.load %arg23[%c0_205, %c0_206] : memref<1x1xf32, #tpu.memory_space<vmem>>, vector<1x1xf32>
    %251 = arith.truncf %248 : vector<2x64xf32> to vector<2x64xbf16>
    %cst_207 = arith.constant dense<0.000000e+00> : vector<2x1xf32>
    %252 = tpu.matmul %251, %249, %cst_207 {dimension_numbers = #tpu.dot_dimension_numbers<[1], [0], [0], [1], [0, 0, 1, 1], [], []>} : vector<2x64xbf16>, vector<64x1xbf16>, vector<2x1xf32> -> vector<2x1xf32>
    %253 = vector.broadcast %250 : vector<1x1xf32> to vector<2x1xf32>
    %254 = arith.addf %252, %253 : vector<2x1xf32>
    %c0_208 = arith.constant 0 : index
    %c0_209 = arith.constant 0 : index
    %255 = vector.load %arg27[%c0_208, %c0_209] : memref<2x1xf32, #tpu.memory_space<vmem>>, vector<2x1xf32>
    tpu.vector_store %arg27[%c0_208, %c0_209], %254 {strides = array<i32>} : memref<2x1xf32, #tpu.memory_space<vmem>>, vector<2x1xf32>,
    return
  }
}

</mosaic_0001>

<bundles_post_ra>
// kernel: conv_discriminator_forward.1
= control target key start
LH: loop header
LB: loop body
LE: loop exit
PB: predicated region body
PF: predicated region fallthrough
CT: control target
= control target key end

     0   :  { %s9321_s0 = inlined_call_operand.vmem [shape: f32[68,28], index: 0, kind: input, shape index: {}]   ;;  %s9322_s1 = inlined_call_operand.hbm [shape: bf16[28,64], index: 1, kind: input, shape index: {}]   ;;  %s9323_s2 = inlined_call_operand.hbm [shape: f32[1,64], index: 2, kind: input, shape index: {}]   ;;  %s9324_s3 = inlined_call_operand.hbm [shape: bf16[64,128], index: 3, kind: input, shape index: {}]   ;;  %s9325_s4 = inlined_call_operand.hbm [shape: f32[1,128], index: 4, kind: input, shape index: {}]   ;;  %s9326_s5 = inlined_call_operand.hbm [shape: bf16[3,64,68], index: 5, kind: input, shape index: {}]   ;;  %s9327_s6 = inlined_call_operand.hbm [shape: bf16[3,128,128], index: 6, kind: input, shape index: {}]   ;;  %s9328_s7 = inlined_call_operand.hbm [shape: f32[1,128], index: 7, kind: input, shape index: {}]   ;;  %s9329_s8 = inlined_call_operand.vmem [shape: bf16[4,30,64], index: 8, kind: input, shape index: {}]   ;;  %s9330_s9 = inlined_call_operand.hbm [shape: bf16[4,128,256], index: 9, kind: input, shape index: {}]   ;;  %s9331_s10 = inlined_call_operand.hbm [shape: f32[1,256], index: 10, kind: input, shape index: {}]   ;;  %s9332_s11 = inlined_call_operand.hbm [shape: bf16[3,26,30], index: 11, kind: input, shape index: {}]   ;;  %s9333_s12 = inlined_call_operand.hbm [shape: bf16[3,256,256], index: 12, kind: input, shape index: {}]   ;;  %s9334_s13 = inlined_call_operand.hbm [shape: f32[1,256], index: 13, kind: input, shape index: {}]   ;;  %s9335_s14 = inlined_call_operand.vmem [shape: bf16[4,10,26], index: 14, kind: input, shape index: {}]   ;;  %s9336_s15 = inlined_call_operand.hbm [shape: f32[1,512], index: 15, kind: input, shape index: {}]   ;;  %s9337_s16 = inlined_call_operand.hbm [shape: bf16[3,6,10], index: 16, kind: input, shape index: {}]   ;;  %s9338_s17 = inlined_call_operand.hbm [shape: f32[1,512], index: 17, kind: input, shape index: {}]   ;;  %s9339_s18 = inlined_call_operand.hbm [shape: bf16[3,2,6], index: 18, kind: input, shape index: {}]   ;;  %s9340_s19 = inlined_call_operand.hbm [shape: f32[1,256], index: 19, kind: input, shape index: {}]   ;;  %s9341_s20 = inlined_call_operand.vmem [shape: bf16[256,64], index: 20, kind: input, shape index: {}]   ;;  %s9342_s21 = inlined_call_operand.hbm [shape: f32[1,64], index: 21, kind: input, shape index: {}]   ;;  %s9343_s22 = inlined_call_operand.vmem [shape: bf16[64,1], index: 22, kind: input, shape index: {}]   ;;  %s9344_s23 = inlined_call_operand.<no memory space> [shape: f32[1,1], index: 23, kind: input, shape index: {}]   ;;  %s9345_s24 = inlined_call_operand.hbm [shape: bf16[4,256,512], index: 24, kind: input, shape index: {}]   ;;  %s9346_s25 = inlined_call_operand.hbm [shape: bf16[3,512,512], index: 25, kind: input, shape index: {}]   ;;  %s9347_s26 = inlined_call_operand.hbm [shape: bf16[3,512,256], index: 26, kind: input, shape index: {}]   ;;  %s9348_s27 = inlined_call_operand.vmem [shape: f32[2,1], index: 27, kind: output, shape index: {}]  }
   0x1   :  { %9368 = sst [smem:[#allocation54_spill]] %s9321_s0  ;;  %v32_v0 = vstv %s9344_s23 }
   0x2   :  { %9369 = sst [smem:[#allocation55_spill]] %s9322_s1  ;;  %33 = vst [vmem:[#allocation6] sm:$0x1] %v32_v0 }
   0x3   :  { %9370 = sst [smem:[#allocation56_spill]] %s9323_s2 }
   0x4   :  { %9371 = sst [smem:[#allocation57_spill]] %s9324_s3 }
   0x5   :  { %9372 = sst [smem:[#allocation58_spill]] %s9325_s4 }
   0x6   :  { %9373 = sst [smem:[#allocation59_spill]] %s9326_s5 }
   0x7   :  { %9374 = sst [smem:[#allocation60_spill]] %s9327_s6 }
   0x8   :  { %9375 = sst [smem:[#allocation61_spill]] %s9328_s7 }
   0x9   :  { %9376 = sst [smem:[#allocation62_spill]] %s9329_s8 }
   0xa   :  { %9377 = sst [smem:[#allocation63_spill]] %s9330_s9 }
   0xb   :  { %9378 = sst [smem:[#allocation64_spill]] %s9331_s10 }
   0xc   :  { %9379 = sst [smem:[#allocation65_spill]] %s9332_s11 }
   0xd   :  { %9380 = sst [smem:[#allocation66_spill]] %s9343_s22 }
   0xe   :  { %9381 = sst [smem:[#allocation67_spill]] %s9348_s27 }
   0xf   :  { %34 = vsyncpa [#allocation8], 0 }
  0x10   :  { %35 = vsyncpa [#allocation10], 0 }
  0x11   :  { %36 = vsyncpa [#allocation13], 0 }
  0x12   :  { %37 = vsyncpa [#allocation16], 0 }
  0x13   :  { %38 = vsyncpa [#allocation19], 0 }
  0x14   :  { %39 = vsyncpa [#allocation22], 0 }
  0x15   :  { %40 = vsyncpa [#allocation25], 0 }
  0x16   :  { %41 = vsyncpa [#allocation28], 0 }
  0x17   :  { %42 = vsyncpa [#allocation31], 0 }
  0x18   :  { %43 = vsyncpa [#allocation34], 0  ;;  %s8221_s8 = smov [#allocation9]   ;;  %s8222_s9 = smov [#allocation12]  }
  0x19   :  { %s64_s30 = sshll.u32 %s8221_s8, 4  ;;  %s86_s5 = sshll.u32 %s8222_s9, 4  ;;  %s65_s30 = int_to_ptr.vmem [resolvable:$true] %s64_s30  ;;  %s87_s5 = int_to_ptr.vmem [resolvable:$true] %s86_s5 }
  0x1a   :  { %s9382_s23 = sld [smem:[#allocation56_spill]] }
  0x20   :  { %s7799_s10 = scalar_lea.hbm %s9382_s23, 16 }
  0x21   :  { %p7800_p0 = scmp.ne.s32.totalorder %s9382_s23, %s7799_s10  ;;  %p7803_p1 = scmp.lt.u32.totalorder %s7799_s10, %s9382_s23 }
  0x23   :  { %p7805_p2 = pnand %p7803_p1, %p7800_p0 }
  0x25   :  { %7808 = shalt.err (!%p7805_p2)
}
  0x26   :  { %s7809_s2 = scalar_lea.vmem %s65_s30, 16  ;;  %s7813_s3 = scalar_lea.vmem %s65_s30, 32 }
  0x27   :  { %p7810_p3 = scmp.ne.s32.totalorder %s65_s30, %s7809_s2  ;;  %p7814_p4 = scmp.lt.s32.totalorder %s65_s30, %s65_s30 }
  0x28   :  { %p7815_p5 = scmp.lt.s32.totalorder %s7813_s3, %s7809_s2 }
  0x2a   :  { %p7816_p6 = por %p7815_p5, %p7814_p4 }
  0x2c   :  { %p7817_p7 = pnand %p7816_p6, %p7810_p3 }
  0x2e   :  { %7820 = shalt.err (!%p7817_p7)
}
  0x2f   :  { %67 = dma.hbm_to_vmem [thread:$0]  %s9382_s23, 16, %s65_s30, [#allocation10]  }
  0x30   :  { %s9383_s28 = sld [smem:[#allocation58_spill]] }
  0x36   :  { %s7821_s0 = scalar_lea.hbm %s9383_s28, 16 }
  0x37   :  { %p7822_p8 = scmp.ne.s32.totalorder %s9383_s28, %s7821_s0  ;;  %p7825_p9 = scmp.lt.u32.totalorder %s7821_s0, %s9383_s28 }
  0x39   :  { %p7827_p10 = pnand %p7825_p9, %p7822_p8 }
  0x3b   :  { %7830 = shalt.err (!%p7827_p10)
}
  0x3c   :  { %s7831_s11 = scalar_lea.vmem %s87_s5, 16  ;;  %s7835_s2 = scalar_lea.vmem %s87_s5, 32 }
  0x3d   :  { %p7832_p11 = scmp.ne.s32.totalorder %s87_s5, %s7831_s11  ;;  %p7836_p12 = scmp.lt.s32.totalorder %s87_s5, %s87_s5 }
  0x3e   :  { %p7837_p13 = scmp.lt.s32.totalorder %s7835_s2, %s7831_s11 }
  0x40   :  { %p7838_p0 = por %p7837_p13, %p7836_p12 }
  0x42   :  { %p7839_p1 = pnand %p7838_p0, %p7832_p11 }
  0x44   :  { %7842 = shalt.err (!%p7839_p1)
}
  0x45   :  { %89 = dma.hbm_to_vmem [thread:$0]  %s9383_s28, 16, %s87_s5, [#allocation13]  }
  0x46   :  { %s8223_s3 = smov [#allocation15]   ;;  %s8224_s4 = smov [#allocation18]  }
  0x47   :  { %s107_s7 = sshll.u32 %s8223_s3, 4  ;;  %s131_s8 = sshll.u32 %s8224_s4, 4  ;;  %s108_s7 = int_to_ptr.vmem [resolvable:$true] %s107_s7  ;;  %s8427_s8 = int_to_ptr.vmem [resolvable:$true] %s131_s8 }
  0x48   :  { %s9384_s29 = sld [smem:[#allocation60_spill]] }
  0x4e   :  { %s7843_s10 = scalar_lea.hbm %s9384_s29, 3072 }
  0x4f   :  { %p7844_p2 = scmp.ne.s32.totalorder %s9384_s29, %s7843_s10  ;;  %p7847_p3 = scmp.lt.u32.totalorder %s7843_s10, %s9384_s29 }
  0x51   :  { %p7849_p4 = pnand %p7847_p3, %p7844_p2 }
  0x53   :  { %7852 = shalt.err (!%p7849_p4)
}
  0x54   :  { %s7853_s5 = scalar_lea.vmem %s108_s7, 3072  ;;  %p7858_p6 = scmp.lt.s32.totalorder %s108_s7, %s108_s7 }
  0x55   :  { %p7854_p5 = scmp.ne.s32.totalorder %s108_s7, %s7853_s5  ;;  %p7859_p7 = scmp.lt.s32.totalorder %s7853_s5, %s7853_s5 }
  0x57   :  { %p7860_p8 = por %p7859_p7, %p7858_p6 }
  0x59   :  { %p7861_p9 = pnand %p7860_p8, %p7854_p5 }
  0x5b   :  { %7864 = shalt.err (!%p7861_p9)
}
  0x5c   :  { %s9361_s28 = smov 64   ;;  %s9363_s30 = smov 4  }
  0x5d   :  { %113 = dma.hbm_to_vmem [thread:$0]  %s9384_s29, 3072, %s108_s7, [#allocation16], %s9361_s28, %s9361_s28, %s9363_s30  }
  0x5e   :  { %s9385_s0 = sld [smem:[#allocation63_spill]] }
  0x64   :  { %s7865_s10 = scalar_lea.hbm %s9385_s0, 8192 }
  0x65   :  { %p7866_p10 = scmp.ne.s32.totalorder %s9385_s0, %s7865_s10  ;;  %p7869_p11 = scmp.lt.u32.totalorder %s7865_s10, %s9385_s0 }
  0x67   :  { %p7871_p12 = pnand %p7869_p11, %p7866_p10 }
  0x69   :  { %7874 = shalt.err (!%p7871_p12)
}
  0x6a   :  { %s7875_s5 = scalar_lea.vmem %s8427_s8, 8192  ;;  %p7880_p0 = scmp.lt.s32.totalorder %s8427_s8, %s8427_s8 }
  0x6b   :  { %p7876_p13 = scmp.ne.s32.totalorder %s8427_s8, %s7875_s5  ;;  %p7881_p1 = scmp.lt.s32.totalorder %s7875_s5, %s7875_s5 }
  0x6d   :  { %p7882_p2 = por %p7881_p1, %p7880_p0 }
  0x6f   :  { %p7883_p3 = pnand %p7882_p2, %p7876_p13 }
  0x71   :  { %7886 = shalt.err (!%p7883_p3)
}
  0x72   :  { %s9366_s7 = smov 128   ;;  %s8228_s29 = smov 8  }
  0x73   :  { %137 = dma.hbm_to_vmem [thread:$0]  %s9385_s0, 8192, %s8427_s8, [#allocation19], %s9366_s7, %s9366_s7, %s8228_s29  }
  0x74   :  { %s8229_s4 = smov [#allocation21]   ;;  %s8230_s10 = smov [#allocation24]  }
  0x75   :  { %s153_s9 = sshll.u32 %s8229_s4, 4  ;;  %s178_s1 = sshll.u32 %s8230_s10, 4  ;;  %s154_s9 = int_to_ptr.vmem [resolvable:$true] %s153_s9  ;;  %s179_s1 = int_to_ptr.vmem [resolvable:$true] %s178_s1 }
  0x76   :  { %s9386_s2 = sld [smem:[#allocation65_spill]] }
  0x7c   :  { %s7887_s5 = scalar_lea.hbm %s9386_s2, 768 }
  0x7d   :  { %p7888_p4 = scmp.ne.s32.totalorder %s9386_s2, %s7887_s5  ;;  %p7891_p5 = scmp.lt.u32.totalorder %s7887_s5, %s9386_s2 }
  0x7f   :  { %p7893_p6 = pnand %p7891_p5, %p7888_p4 }
  0x81   :  { %7896 = shalt.err (!%p7893_p6)
}
  0x82   :  { %s7897_s8 = scalar_lea.vmem %s154_s9, 768  ;;  %p7902_p8 = scmp.lt.s32.totalorder %s154_s9, %s154_s9 }
  0x83   :  { %p7898_p7 = scmp.ne.s32.totalorder %s154_s9, %s7897_s8  ;;  %p7903_p9 = scmp.lt.s32.totalorder %s7897_s8, %s7897_s8 }
  0x85   :  { %p7904_p10 = por %p7903_p9, %p7902_p8 }
  0x87   :  { %p7905_p11 = pnand %p7904_p10, %p7898_p7 }
  0x89   :  { %7908 = shalt.err (!%p7905_p11)
}
  0x8a   :  { %s9387_s0 = smov 4   ;;  %s9388_s23 = smov 64  }
  0x8b   :  { %159 = dma.hbm_to_vmem [thread:$0]  %s9386_s2, 768, %s154_s9, [#allocation22], %s9388_s23, %s9388_s23, %s9387_s0  }
  0x8c   :  { %s7909_s22 = scalar_lea.hbm %s9334_s13, 32 }
  0x8d   :  { %p7910_p12 = scmp.ne.s32.totalorder %s9334_s13, %s7909_s22  ;;  %p7913_p13 = scmp.lt.u32.totalorder %s7909_s22, %s9334_s13 }
  0x8f   :  { %p7915_p0 = pnand %p7913_p13, %p7910_p12 }
  0x91   :  { %7918 = shalt.err (!%p7915_p0)
}
  0x92   :  { %s7919_s5 = scalar_lea.vmem %s179_s1, 32  ;;  %p7924_p2 = scmp.lt.s32.totalorder %s179_s1, %s179_s1 }
  0x93   :  { %p7920_p1 = scmp.ne.s32.totalorder %s179_s1, %s7919_s5  ;;  %p7925_p3 = scmp.lt.s32.totalorder %s7919_s5, %s7919_s5 }
  0x95   :  { %p7926_p4 = por %p7925_p3, %p7924_p2 }
  0x97   :  { %p7927_p5 = pnand %p7926_p4, %p7920_p1 }
  0x99   :  { %7930 = shalt.err (!%p7927_p5)
}
  0x9a   :  { %181 = dma.hbm_to_vmem [thread:$0]  %s9334_s13, 32, %s179_s1, [#allocation25]  }
  0x9b   :  { %s8231_s8 = smov [#allocation27]   ;;  %s8232_s4 = smov [#allocation30]  }
  0x9c   :  { %s199_s3 = sshll.u32 %s8231_s8, 4  ;;  %s221_s28 = sshll.u32 %s8232_s4, 4  ;;  %s200_s3 = int_to_ptr.vmem [resolvable:$true] %s199_s3  ;;  %s8491_s28 = int_to_ptr.vmem [resolvable:$true] %s221_s28 }
  0x9d   :  { %s7931_s27 = scalar_lea.hbm %s9337_s16, 192 }
  0x9e   :  { %p7932_p6 = scmp.ne.s32.totalorder %s9337_s16, %s7931_s27  ;;  %p7935_p7 = scmp.lt.u32.totalorder %s7931_s27, %s9337_s16 }
  0xa0   :  { %p7937_p8 = pnand %p7935_p7, %p7932_p6 }
  0xa2   :  { %7940 = shalt.err (!%p7937_p8)
}
  0xa3   :  { %s7941_s13 = scalar_lea.vmem %s200_s3, 192  ;;  %p7946_p10 = scmp.lt.s32.totalorder %s200_s3, %s200_s3 }
  0xa4   :  { %p7942_p9 = scmp.ne.s32.totalorder %s200_s3, %s7941_s13  ;;  %p7947_p11 = scmp.lt.s32.totalorder %s7941_s13, %s7941_s13 }
  0xa6   :  { %p7948_p12 = por %p7947_p11, %p7946_p10 }
  0xa8   :  { %p7949_p13 = pnand %p7948_p12, %p7942_p9 }
  0xaa   :  { %7952 = shalt.err (!%p7949_p13)
}
  0xab   :  { %205 = dma.hbm_to_vmem [thread:$0]  %s9337_s16, 192, %s200_s3, [#allocation28], %s9388_s23, %s9388_s23, %s9387_s0  }
  0xac   :  { %s7953_s4 = scalar_lea.hbm %s9339_s18, 48 }
  0xad   :  { %p7954_p0 = scmp.ne.s32.totalorder %s9339_s18, %s7953_s4  ;;  %p7957_p1 = scmp.lt.u32.totalorder %s7953_s4, %s9339_s18 }
  0xaf   :  { %p7959_p2 = pnand %p7957_p1, %p7954_p0 }
  0xb1   :  { %7962 = shalt.err (!%p7959_p2)
}
  0xb2   :  { %s7963_s6 = scalar_lea.vmem %s8491_s28, 48  ;;  %s7967_s16 = scalar_lea.vmem %s8491_s28, 64 }
  0xb3   :  { %p7964_p3 = scmp.ne.s32.totalorder %s8491_s28, %s7963_s6  ;;  %p7968_p4 = scmp.lt.s32.totalorder %s8491_s28, %s8491_s28 }
  0xb4   :  { %p7969_p5 = scmp.lt.s32.totalorder %s7967_s16, %s7963_s6 }
  0xb6   :  { %p7970_p6 = por %p7969_p5, %p7968_p4 }
  0xb8   :  { %p7971_p7 = pnand %p7970_p6, %p7964_p3 }
  0xba   :  { %7974 = shalt.err (!%p7971_p7)
}
  0xbb   :  { %s8233_s3 = smov 16   ;;  %s8234_s11 = smov 1  }
  0xbc   :  { %227 = dma.hbm_to_vmem [thread:$0]  %s9339_s18, 48, %s8491_s28, [#allocation31], %s8233_s3, %s8233_s3, %s8234_s11  }
  0xbd   :  { %s8235_s1 = smov [#allocation7]   ;;  %s8236_s2 = smov [#allocation11]  }
  0xbe   :  { %s51_s9 = sshll.u32 %s8235_s1, 4  ;;  %s73_s8 = sshll.u32 %s8236_s2, 4  ;;  %s52_s9 = int_to_ptr.vmem [resolvable:$true] %s51_s9  ;;  %s8526_s8 = int_to_ptr.vmem [resolvable:$true] %s73_s8 }
  0xbf   :  { %s9389_s22 = sld [smem:[#allocation55_spill]] }
  0xc5   :  { %s7975_s27 = scalar_lea.hbm %s9389_s22, 256 }
  0xc6   :  { %p7976_p8 = scmp.ne.s32.totalorder %s9389_s22, %s7975_s27  ;;  %p7979_p9 = scmp.lt.u32.totalorder %s7975_s27, %s9389_s22 }
  0xc8   :  { %p7981_p10 = pnand %p7979_p9, %p7976_p8 }
  0xca   :  { %7984 = shalt.err (!%p7981_p10)
}
  0xcb   :  { %s7985_s18 = scalar_lea.vmem %s52_s9, 256  ;;  %p7990_p12 = scmp.lt.s32.totalorder %s52_s9, %s52_s9 }
  0xcc   :  { %p7986_p11 = scmp.ne.s32.totalorder %s52_s9, %s7985_s18  ;;  %p7991_p13 = scmp.lt.s32.totalorder %s7985_s18, %s7985_s18 }
  0xce   :  { %p7992_p0 = por %p7991_p13, %p7990_p12 }
  0xd0   :  { %p7993_p1 = pnand %p7992_p0, %p7986_p11 }
  0xd2   :  { %7996 = shalt.err (!%p7993_p1)
}
  0xd3   :  { %57 = dma.hbm_to_vmem [thread:$0]  %s9389_s22, 256, %s52_s9, [#allocation8], %s9388_s23, %s9388_s23, %s9387_s0  }
  0xd4   :  { %s9390_s7 = sld [smem:[#allocation57_spill]] }
  0xda   :  { %s7997_s13 = scalar_lea.hbm %s9390_s7, 512 }
  0xdb   :  { %p7998_p2 = scmp.ne.s32.totalorder %s9390_s7, %s7997_s13  ;;  %p8001_p3 = scmp.lt.u32.totalorder %s7997_s13, %s9390_s7 }
  0xdd   :  { %p8003_p4 = pnand %p8001_p3, %p7998_p2 }
  0xdf   :  { %8006 = shalt.err (!%p8003_p4)
}
  0xe0   :  { %s8007_s27 = scalar_lea.vmem %s8526_s8, 512  ;;  %p8012_p6 = scmp.lt.s32.totalorder %s8526_s8, %s8526_s8 }
  0xe1   :  { %p8008_p5 = scmp.ne.s32.totalorder %s8526_s8, %s8007_s27  ;;  %p8013_p7 = scmp.lt.s32.totalorder %s8007_s27, %s8007_s27 }
  0xe3   :  { %p8014_p8 = por %p8013_p7, %p8012_p6 }
  0xe5   :  { %p8015_p9 = pnand %p8014_p8, %p8008_p5 }
  0xe7   :  { %8018 = shalt.err (!%p8015_p9)
}
  0xe8   :  { %79 = dma.hbm_to_vmem [thread:$0]  %s9390_s7, 512, %s8526_s8, [#allocation10], %s9388_s23, %s9388_s23, %s9387_s0  }
  0xe9   :  { %s8237_s10 = smov [#allocation14]   ;;  %s8238_s16 = smov [#allocation17]  }
  0xea   :  { %s95_s6 = sshll.u32 %s8237_s10, 4  ;;  %s120_s18 = sshll.u32 %s8238_s16, 4  ;;  %s96_s6 = int_to_ptr.vmem [resolvable:$true] %s95_s6  ;;  %s121_s18 = int_to_ptr.vmem [resolvable:$true] %s120_s18 }
  0xeb   :  { %s9391_s11 = sld [smem:[#allocation59_spill]] }
  0xf1   :  { %s8019_s5 = scalar_lea.hbm %s9391_s11, 1536 }
  0xf2   :  { %p8020_p10 = scmp.ne.s32.totalorder %s9391_s11, %s8019_s5  ;;  %p8023_p11 = scmp.lt.u32.totalorder %s8019_s5, %s9391_s11 }
  0xf4   :  { %p8025_p12 = pnand %p8023_p11, %p8020_p10 }
  0xf6   :  { %8028 = shalt.err (!%p8025_p12)
}
  0xf7   :  { %s8029_s8 = scalar_lea.vmem %s96_s6, 1536  ;;  %p8034_p0 = scmp.lt.s32.totalorder %s96_s6, %s96_s6 }
  0xf8   :  { %p8030_p13 = scmp.ne.s32.totalorder %s96_s6, %s8029_s8  ;;  %p8035_p1 = scmp.lt.s32.totalorder %s8029_s8, %s8029_s8 }
  0xfa   :  { %p8036_p2 = por %p8035_p1, %p8034_p0 }
  0xfc   :  { %p8037_p3 = pnand %p8036_p2, %p8030_p13 }
  0xfe   :  { %8040 = shalt.err (!%p8037_p3)
}
  0xff   :  { %101 = dma.hbm_to_vmem [thread:$0]  %s9391_s11, 1536, %s96_s6, [#allocation13], %s9388_s23, %s9388_s23, %s9387_s0  }
 0x100   :  { %s9392_s22 = sld [smem:[#allocation61_spill]] }
 0x106   :  { %s8041_s10 = scalar_lea.hbm %s9392_s22, 16 }
 0x107   :  { %p8042_p4 = scmp.ne.s32.totalorder %s9392_s22, %s8041_s10  ;;  %p8045_p5 = scmp.lt.u32.totalorder %s8041_s10, %s9392_s22 }
 0x109   :  { %p8047_p6 = pnand %p8045_p5, %p8042_p4 }
 0x10b   :  { %8050 = shalt.err (!%p8047_p6)
}
 0x10c   :  { %s8051_s13 = scalar_lea.vmem %s121_s18, 16  ;;  %s8055_s1 = scalar_lea.vmem %s121_s18, 32 }
 0x10d   :  { %p8052_p7 = scmp.ne.s32.totalorder %s121_s18, %s8051_s13  ;;  %p8056_p8 = scmp.lt.s32.totalorder %s121_s18, %s121_s18 }
 0x10e   :  { %p8057_p9 = scmp.lt.s32.totalorder %s8055_s1, %s8051_s13 }
 0x110   :  { %p8058_p10 = por %p8057_p9, %p8056_p8 }
 0x112   :  { %p8059_p11 = pnand %p8058_p10, %p8052_p7 }
 0x114   :  { %8062 = shalt.err (!%p8059_p11)
}
 0x115   :  { %123 = dma.hbm_to_vmem [thread:$0]  %s9392_s22, 16, %s121_s18, [#allocation16]  }
 0x116   :  { %s8239_s2 = smov [#allocation20]   ;;  %s8240_s8 = smov [#allocation23]  }
 0x117   :  { %s144_s4 = sshll.u32 %s8239_s2, 4  ;;  %s165_s7 = sshll.u32 %s8240_s8, 4  ;;  %s145_s4 = int_to_ptr.vmem [resolvable:$true] %s144_s4  ;;  %s8590_s7 = int_to_ptr.vmem [resolvable:$true] %s165_s7 }
 0x118   :  { %s9393_s9 = sld [smem:[#allocation64_spill]] }
 0x11e   :  { %s8063_s10 = scalar_lea.hbm %s9393_s9, 32 }
 0x11f   :  { %p8064_p12 = scmp.ne.s32.totalorder %s9393_s9, %s8063_s10  ;;  %p8067_p13 = scmp.lt.u32.totalorder %s8063_s10, %s9393_s9 }
 0x121   :  { %p8069_p0 = pnand %p8067_p13, %p8064_p12 }
 0x123   :  { %8072 = shalt.err (!%p8069_p0)
}
 0x124   :  { %s8073_s18 = scalar_lea.vmem %s145_s4, 32  ;;  %p8078_p2 = scmp.lt.s32.totalorder %s145_s4, %s145_s4 }
 0x125   :  { %p8074_p1 = scmp.ne.s32.totalorder %s145_s4, %s8073_s18  ;;  %p8079_p3 = scmp.lt.s32.totalorder %s8073_s18, %s8073_s18 }
 0x127   :  { %p8080_p4 = por %p8079_p3, %p8078_p2 }
 0x129   :  { %p8081_p5 = pnand %p8080_p4, %p8074_p1 }
 0x12b   :  { %8084 = shalt.err (!%p8081_p5)
}
 0x12c   :  { %147 = dma.hbm_to_vmem [thread:$0]  %s9393_s9, 32, %s145_s4, [#allocation19]  }
 0x12d   :  { %s8085_s11 = scalar_lea.hbm %s9333_s12, 12288 }
 0x12e   :  { %p8086_p6 = scmp.ne.s32.totalorder %s9333_s12, %s8085_s11  ;;  %p8089_p7 = scmp.lt.u32.totalorder %s8085_s11, %s9333_s12 }
 0x130   :  { %p8091_p8 = pnand %p8089_p7, %p8086_p6 }
 0x132   :  { %8094 = shalt.err (!%p8091_p8)
}
 0x133   :  { %s8095_s10 = scalar_lea.vmem %s8590_s7, 12288  ;;  %p8100_p10 = scmp.lt.s32.totalorder %s8590_s7, %s8590_s7 }
 0x134   :  { %p8096_p9 = scmp.ne.s32.totalorder %s8590_s7, %s8095_s10  ;;  %p8101_p11 = scmp.lt.s32.totalorder %s8095_s10, %s8095_s10 }
 0x136   :  { %p8102_p12 = por %p8101_p11, %p8100_p10 }
 0x138   :  { %p8103_p13 = pnand %p8102_p12, %p8096_p9 }
 0x13a   :  { %8106 = shalt.err (!%p8103_p13)
}
 0x13b   :  { %s9394_s4 = smov 128   ;;  %s8241_s28 = smov [#allocation26]  }
 0x13c   :  { %171 = dma.hbm_to_vmem [thread:$0]  %s9333_s12, 12288, %s8590_s7, [#allocation22], %s9394_s4, %s9394_s4, %s8228_s29  }
 0x13d   :  { %s190_s3 = sshll.u32 %s8241_s28, 4  ;;  %s8242_s5 = smov [#allocation29]   ;;  %s191_s3 = int_to_ptr.vmem [resolvable:$true] %s190_s3 }
 0x13e   :  { %s212_s18 = sshll.u32 %s8242_s5, 4  ;;  %s8107_s1 = scalar_lea.hbm %s9336_s15, 64  ;;  %s213_s18 = int_to_ptr.vmem [resolvable:$true] %s212_s18 }
 0x13f   :  { %p8108_p0 = scmp.ne.s32.totalorder %s9336_s15, %s8107_s1  ;;  %p8111_p1 = scmp.lt.u32.totalorder %s8107_s1, %s9336_s15 }
 0x141   :  { %p8113_p2 = pnand %p8111_p1, %p8108_p0 }
 0x143   :  { %8116 = shalt.err (!%p8113_p2)
}
 0x144   :  { %s8117_s12 = scalar_lea.vmem %s191_s3, 64  ;;  %p8122_p4 = scmp.lt.s32.totalorder %s191_s3, %s191_s3 }
 0x145   :  { %p8118_p3 = scmp.ne.s32.totalorder %s191_s3, %s8117_s12  ;;  %p8123_p5 = scmp.lt.s32.totalorder %s8117_s12, %s8117_s12 }
 0x147   :  { %p8124_p6 = por %p8123_p5, %p8122_p4 }
 0x149   :  { %p8125_p7 = pnand %p8124_p6, %p8118_p3 }
 0x14b   :  { %8128 = shalt.err (!%p8125_p7)
}
 0x14c   :  { %193 = dma.hbm_to_vmem [thread:$0]  %s9336_s15, 64, %s191_s3, [#allocation25]  }
 0x14d   :  { %s8129_s10 = scalar_lea.hbm %s9338_s17, 64 }
 0x14e   :  { %p8130_p8 = scmp.ne.s32.totalorder %s9338_s17, %s8129_s10  ;;  %p8133_p9 = scmp.lt.u32.totalorder %s8129_s10, %s9338_s17 }
 0x150   :  { %p8135_p10 = pnand %p8133_p9, %p8130_p8 }
 0x152   :  { %8138 = shalt.err (!%p8135_p10)
}
 0x153   :  { %s8139_s22 = scalar_lea.vmem %s213_s18, 64  ;;  %p8144_p12 = scmp.lt.s32.totalorder %s213_s18, %s213_s18 }
 0x154   :  { %p8140_p11 = scmp.ne.s32.totalorder %s213_s18, %s8139_s22  ;;  %p8145_p13 = scmp.lt.s32.totalorder %s8139_s22, %s8139_s22 }
 0x156   :  { %p8146_p0 = por %p8145_p13, %p8144_p12 }
 0x158   :  { %p8147_p1 = pnand %p8146_p0, %p8140_p11 }
 0x15a   :  { %8150 = shalt.err (!%p8147_p1)
}
 0x15b   :  { %215 = dma.hbm_to_vmem [thread:$0]  %s9338_s17, 64, %s213_s18, [#allocation28]  }
 0x15c   :  { %s8243_s13 = smov [#allocation32]   ;;  %s8244_s6 = smov [#allocation33]  }
 0x15d   :  { %s234_s1 = sshll.u32 %s8243_s13, 4  ;;  %s246_s11 = sshll.u32 %s8244_s6, 4  ;;  %s235_s1 = int_to_ptr.vmem [resolvable:$true] %s234_s1  ;;  %s247_s11 = int_to_ptr.vmem [resolvable:$true] %s246_s11 }
 0x15e   :  { %s8151_s12 = scalar_lea.hbm %s9340_s19, 32 }
 0x15f   :  { %p8152_p2 = scmp.ne.s32.totalorder %s9340_s19, %s8151_s12  ;;  %p8155_p3 = scmp.lt.u32.totalorder %s8151_s12, %s9340_s19 }
 0x161   :  { %p8157_p4 = pnand %p8155_p3, %p8152_p2 }
 0x163   :  { %8160 = shalt.err (!%p8157_p4)
}
 0x164   :  { %s8161_s17 = scalar_lea.vmem %s235_s1, 32  ;;  %p8166_p6 = scmp.lt.s32.totalorder %s235_s1, %s235_s1 }
 0x165   :  { %p8162_p5 = scmp.ne.s32.totalorder %s235_s1, %s8161_s17  ;;  %p8167_p7 = scmp.lt.s32.totalorder %s8161_s17, %s8161_s17 }
 0x167   :  { %p8168_p8 = por %p8167_p7, %p8166_p6 }
 0x169   :  { %p8169_p9 = pnand %p8168_p8, %p8162_p5 }
 0x16b   :  { %8172 = shalt.err (!%p8169_p9)
}
 0x16c   :  { %237 = dma.hbm_to_vmem [thread:$0]  %s9340_s19, 32, %s235_s1, [#allocation31]  }
 0x16d   :  { %s8173_s28 = scalar_lea.hbm %s9342_s21, 16 }
 0x16e   :  { %p8174_p10 = scmp.ne.s32.totalorder %s9342_s21, %s8173_s28  ;;  %p8177_p11 = scmp.lt.u32.totalorder %s8173_s28, %s9342_s21 }
 0x170   :  { %p8179_p12 = pnand %p8177_p11, %p8174_p10 }
 0x172   :  { %8182 = shalt.err (!%p8179_p12)
}
 0x173   :  { %s8183_s13 = scalar_lea.vmem %s247_s11, 16  ;;  %s8187_s6 = scalar_lea.vmem %s247_s11, 32 }
 0x174   :  { %p8184_p13 = scmp.ne.s32.totalorder %s247_s11, %s8183_s13  ;;  %p8188_p0 = scmp.lt.s32.totalorder %s247_s11, %s247_s11 }
 0x175   :  { %p8189_p1 = scmp.lt.s32.totalorder %s8187_s6, %s8183_s13 }
 0x177   :  { %p8190_p2 = por %p8189_p1, %p8188_p0 }
 0x179   :  { %p8191_p3 = pnand %p8190_p2, %p8184_p13 }
 0x17b   :  { %8194 = shalt.err (!%p8191_p3)
}
 0x17c   :  { %249 = dma.hbm_to_vmem [thread:$0]  %s9342_s21, 16, %s247_s11, [#allocation34]  }
 0x17d   :  { %8195 = dma.done.wait [#allocation8], 256  }
 0x17e   :  { %8196 = vsyncadd [#allocation8], 4294967040 }
 0x17f   :  { %8197 = dma.done.wait [#allocation10], 528  }
 0x180   :  { %8198 = vsyncadd [#allocation10], 4294966768 }
 0x181   :  { %8199 = dma.done.wait [#allocation13], 1552  }
 0x182   :  { %8200 = vsyncadd [#allocation13], 4294965744 }
 0x183   :  { %8201 = dma.done.wait [#allocation16], 3088  }
 0x184   :  { %8202 = vsyncadd [#allocation16], 4294964208 }
 0x185   :  { %8203 = dma.done.wait [#allocation19], 8224  }
 0x186   :  { %8204 = vsyncadd [#allocation19], 4294959072 }
 0x187   :  { %8205 = dma.done.wait [#allocation22], 13056  }
 0x188   :  { %8206 = vsyncadd [#allocation22], 4294954240 }
 0x189   :  { %8207 = dma.done.wait [#allocation25], 96  }
 0x18a   :  { %8208 = vsyncadd [#allocation25], 4294967200 }
 0x18b   :  { %8209 = dma.done.wait [#allocation28], 256  }
 0x18c   :  { %8210 = vsyncadd [#allocation28], 4294967040 }
 0x18d   :  { %8211 = dma.done.wait [#allocation31], 80  }
 0x18e   :  { %8212 = vsyncadd [#allocation31], 4294967216 }
 0x18f   :  { %8213 = dma.done.wait [#allocation34], 16  }
 0x190   :  { %8214 = vsyncadd [#allocation34], 4294967280  ;;  %s313_s21 = sld [smem:[#allocation0]]   ;;  %329 = sst [smem:[#allocation36 + $0x2]] %s9387_s0  ;;  %v8245_v1 = vmov 0.0   ;;  %vm8247_vm0 = vmmov 0  }
 0x191   :  { %7115 = vmatprep.subr.bf16.mxu0 %v8245_v1  ;;  %7353 = vmatprep.subr.bf16.mxu1 %v8245_v1  ;;  %331 = sst [smem:[#allocation36 + $0x3]] %s9388_s23  ;;  %s8246_s11 = smov [#allocation2]   ;;  %vm466_vm1 = vcmask 1045504   ;;  %vm450_vm2 = vcmask 228352   ;;  %vm613_vm7 = vcmask 523264   ;;  %vm735_vm13 = vcmask 556032  }
 0x192   :  { %s321_s2 = sshll.u32 %s8246_s11, 4  ;;  %7119 = vmatprep.mubr.msk.bf16.mxu0 %vm8247_vm0, %v8245_v1  ;;  %7131 = vmatprep.mubr.msk.bf16.mxu1 %vm8247_vm0, %v8245_v1  ;;  %333 = sst [smem:[#allocation36 + $0x4]] %s9394_s4  ;;  %vm748_vm14 = vcmask 1041408   ;;  %s322_s2 = int_to_ptr.vmem [resolvable:$true] %s321_s2 }
 0x193   :  { %339 = sst [smem:[#allocation36 + $0x7]] %s9388_s23  ;;  %s8248_s8 = smov 512  }
 0x194   :  { %341 = sst [smem:[#allocation36 + $0x8]] %s9387_s0  ;;  %s8249_s7 = smov 2  }
 0x195   :  { %325 = sst [smem:[#allocation36]] %s8248_s8  ;;  %s8250_s30 = smov 256  }
 0x196   :  { %s6641_s12 = sshll.u32 %s313_s21, 26  ;;  %327 = sst [smem:[#allocation36 + $0x1]] %s8248_s8 }
 0x197   :  { %s8683_s29 = sadd.s32 134217728, %s6641_s12  ;;  %335 = sst [smem:[#allocation36 + $0x5]] %s8249_s7 }
 0x198   :  { %337 = sst [smem:[#allocation36 + $0x6]] %s8250_s30  ;;  %s8251_s27 = smov [#allocation5]  }
 0x199   :  { %s8252_s17 = smov [#allocation35]   ;;  %s8253_s9 = smov [#allocation3]  }
 0x19a   :  { %343 = dma.general %s9345_s24, 32768, %s322_s2, %s8251_s27, %s8252_s17, [#allocation36], %s8683_s29, 0  }
 0x19b   :  { %360 = sst [smem:[#allocation38]] %s8248_s8  ;;  %s356_s16 = sshll.u32 %s8253_s9, 4  ;;  %s357_s16 = int_to_ptr.vmem [resolvable:$true] %s356_s16 }
 0x19c   :  { %362 = sst [smem:[#allocation38 + $0x1]] %s8248_s8  ;;  %s8254_s28 = smov [#allocation5 + $0x1]  }
 0x19d   :  { %364 = sst [smem:[#allocation38 + $0x2]] %s9387_s0  ;;  %s8255_s24 = smov [#allocation37]  }
 0x19e   :  { %366 = sst [smem:[#allocation38 + $0x3]] %s9388_s23  ;;  %s8256_s15 = smov [#allocation4]  }
 0x19f   :  { %368 = sst [smem:[#allocation38 + $0x4]] %s9394_s4  ;;  %s391_s3 = sshll.u32 %s8256_s15, 4  ;;  %s392_s3 = int_to_ptr.vmem [resolvable:$true] %s391_s3 }
 0x1a0   :  { %370 = sst [smem:[#allocation38 + $0x5]] %s8249_s7  ;;  %s8258_s13 = smov [#allocation39]  }
 0x1a1   :  { %372 = sst [smem:[#allocation38 + $0x6]] %s8250_s30 }
 0x1a2   :  { %374 = sst [smem:[#allocation38 + $0x7]] %s9388_s23 }
 0x1a3   :  { %376 = sst [smem:[#allocation38 + $0x8]] %s9387_s0 }
 0x1a4   :  { %378 = dma.general %s9346_s25, 49152, %s357_s16, %s8254_s28, %s8255_s24, [#allocation38], %s8683_s29, 0  }
 0x1a5   :  { %395 = sst [smem:[#allocation40]] %s8250_s30  ;;  %s8257_s25 = smov [#allocation5 + $0x2]  }
 0x1a6   :  { %397 = sst [smem:[#allocation40 + $0x1]] %s8250_s30 }
 0x1a7   :  { %399 = sst [smem:[#allocation40 + $0x2]] %s8249_s7 }
 0x1a8   :  { %401 = sst [smem:[#allocation40 + $0x3]] %s9388_s23 }
 0x1a9   :  { %403 = sst [smem:[#allocation40 + $0x4]] %s9394_s4 }
 0x1aa   :  { %405 = sst [smem:[#allocation40 + $0x5]] %s8249_s7 }
 0x1ab   :  { %407 = sst [smem:[#allocation40 + $0x6]] %s9394_s4 }
 0x1ac   :  { %409 = sst [smem:[#allocation40 + $0x7]] %s9388_s23 }
 0x1ad   :  { %411 = sst [smem:[#allocation40 + $0x8]] %s9387_s0 }
 0x1ae   :  { %413 = dma.general %s9347_s26, 24576, %s392_s3, %s8257_s25, %s8258_s13, [#allocation40], %s8683_s29, 0  }
 0x1af   :  { %v7479_v2 = vld [vmem:[#allocation7] sm:$0xff]   ;;  %v7480_v3 = vld [vmem:[#allocation7 + $0x8] sm:$0x3f]   ;;  %s9395_s11 = sld [smem:[#allocation54_spill]]  ;;  %v7481_v11 = vld [vmem:[#allocation11] sm:$0xff]  }
 0x1b0   :  { %7116 = vmatpush3.bf16.msra.mxu0 %v7479_v2  ;;  %7355 = vmatpush3.bf16.msra.mxu1 %v7479_v2  ;;  %v468_v6 = vsel %vm466_vm1, %v7480_v3, 0  ;;  %v7482_v15 = vld [vmem:[#allocation11 + $0x8] sm:$0xff]   ;;  %v7483_v21 = vld [vmem:[#allocation11 + $0x10] sm:$0xff]   ;;  %v7484_v22 = vld [vmem:[#allocation11 + $0x18] sm:$0xff]   ;;  %s9396_s5 = sld [smem:[#allocation62_spill]] }
 0x1b1   :  { %7117 = vmatprep.subr.bf16.mxu0 %v8245_v1  ;;  %7354 = vmatprep.subr.bf16.mxu1 %v8245_v1  ;;  %v8757_v23 = vld [vmem:[#allocation9] ss:$0 sm:$0xff] }
 0x1b4   :  { %7118 = vmatpush3.bf16.msra.mxu0 %v468_v6  ;;  %7356 = vmatpush3.bf16.msra.mxu1 %v468_v6 }
 0x1b5   :  { %v414_v4 = vld [vmem:[%s9395_s11] sm:$0xff]  ;;  %v415_v5 = vld [vmem:[%s9395_s11 + $0x8] sm:$0xff]  ;;  %v420_v7 = vld [vmem:[%s9395_s11 + $0x30] sm:$0xff]  ;;  %7139 = vmatprep.subr.bf16.mxu1 %v8245_v1 }
 0x1b6   :  { %v421_v8 = vld [vmem:[%s9395_s11 + $0x38] sm:$0xff]  ;;  %v428_v9 = vpack.c.bf16 %v415_v5, %v414_v4  ;;  %v416_v12 = vld [vmem:[%s9395_s11 + $0x10] sm:$0xff]  ;;  %v422_v14 = vld [vmem:[%s9395_s11 + $0x40] sm:$0xf] }
 0x1b7   :  { %v431_v10 = vpack.c.bf16 %v421_v8, %v420_v7  ;;  %v417_v13 = vld [vmem:[%s9395_s11 + $0x18] sm:$0xff]  ;;  %v432_v17 = vpack.c.bf16 %v422_v14, %v422_v14  ;;  %v418_v18 = vld [vmem:[%s9395_s11 + $0x20] sm:$0xff]  ;;  %v419_v19 = vld [vmem:[%s9395_s11 + $0x28] sm:$0xff] }
 0x1b8   :  { %7120 = vmatmul.mubr.msk.bf16.vlgmr.msra.gmra.mrb[0].mxu0 %vm450_vm2, %v428_v9  ;;  %v429_v16 = vpack.c.bf16 %v417_v13, %v416_v12  ;;  %v430_v20 = vpack.c.bf16 %v419_v19, %v418_v18  ;;  %v7485_v13 = vld [vmem:[#allocation14 + $0x20] sm:$0xff]  }
 0x1b9   :  { %7132 = vmatmul.mubr.msk.bf16.vlgmr.msra.gmra.mrb[0].mxu1 %vm450_vm2, %v431_v10  ;;  %7123 = vmatprep.mubr.msk.bf16.mxu0 %vm8247_vm0, %v8245_v1  ;;  %v7489_v14 = vld [vmem:[#allocation14] sm:$0xff]  }
 0x1ba   :  { %7135 = vmatprep.mubr.msk.bf16.mxu1 %vm8247_vm0, %v8245_v1  ;;  %7140 = vmatpush3.bf16.msra.mxu1 %v7481_v11 }
 0x1bb   :  { %7141 = vmatprep.subr.bf16.mxu1 %v8245_v1 }
 0x1be   :  { %7142 = vmatpush3.bf16.msra.mxu1 %v7482_v15  ;;  %v6655_v15 = vld [vmem:[#allocation12] ss:$0 sm:$0xff] }
 0x1bf   :  { %7143 = vmatprep.subr.bf16.mxu1 %v8245_v1 }
 0x1c0   :  { %7124 = vmatmul.mubr.msk.bf16.gmra.mrb[4].mxu0 %vm450_vm2, %v429_v16 }
 0x1c1   :  { %7136 = vmatmul.mubr.msk.bf16.gmra.mrb[4].mxu1 %vm450_vm2, %v432_v17  ;;  %7127 = vmatprep.mubr.msk.bf16.mxu0 %vm8247_vm0, %v8245_v1 }
 0x1c2   :  { %7147 = vmatprep.mubr.msk.bf16.mxu1 %vm8247_vm0, %v8245_v1  ;;  %7144 = vmatpush3.bf16.msra.mxu1 %v7483_v21 }
 0x1c3   :  { %7145 = vmatprep.subr.bf16.mxu1 %v8245_v1 }
 0x1c6   :  { %7146 = vmatpush3.bf16.msra.mxu1 %v7484_v22 }
 0x1c8   :  { %7128 = vmatmul.mubr.msk.bf16.gmra.mrb[8].mxu0 %vm450_vm2, %v430_v20 }
 0x1c9   :  { %7177 = vmatprep.mubr.msk.bf16.mxu0 %vm735_vm13, %v7489_v14 }
 0x28b   :  { %v504_v24 = vpop.f32.mrb[0].mxu0 }
 0x28c   :  { %v528_v25 = vpop.f32.mrb[0].mxu1  ;;  %v505_v26 = vadd.f32 %v8757_v23, %v504_v24  ;;  %v7121_v27 = vpop.f32.mrb[1].mxu0 }
 0x28d   :  { %v529_v28 = vadd.f32 %v8757_v23, %v528_v25  ;;  %v7133_v29 = vpop.f32.mrb[1].mxu1  ;;  %v507_v30 = vpop.f32.mrb[2].mxu0 }
 0x28e   :  { %v531_v31 = vpop.f32.mrb[2].mxu1  ;;  %v551_v32 = vmul.f32 0.2, %v505_v26  ;;  %v508_v33 = vadd.f32 %v8757_v23, %v507_v30  ;;  %v7122_v34 = vpop.f32.mrb[3].mxu0  ;;  %vm542_vm4 = vcmp.gt.f32.partialorder %v505_v26, 0.0 }
 0x28f   :  { %vm548_vm3 = vcmp.gt.f32.partialorder %v529_v28, 0.0  ;;  %v7134_v35 = vpop.f32.mrb[3].mxu1  ;;  %v557_v36 = vmul.f32 0.2, %v529_v28  ;;  %v532_v37 = vadd.f32 %v8757_v23, %v531_v31 }
 0x290   :  { %vm543_vm5 = vcmp.gt.f32.partialorder %v508_v33, 0.0  ;;  %v552_v38 = vmul.f32 0.2, %v508_v33  ;;  %v560_v41 = vsel %vm542_vm4, %v505_v26, %v551_v32 }
 0x291   :  { %v566_v39 = vsel %vm548_vm3, %v529_v28, %v557_v36  ;;  %vm549_vm6 = vcmp.gt.f32.partialorder %v532_v37, 0.0  ;;  %v558_v40 = vmul.f32 0.2, %v532_v37 }
 0x292   :  { %v561_v42 = vsel %vm543_vm5, %v508_v33, %v552_v38 }
 0x293   :  { %v578_v43 = vpack.c.bf16 %v561_v42, %v560_v41  ;;  %v512_v44 = vpop.f32.mrb[4].mxu0  ;;  %v567_v45 = vsel %vm549_vm6, %v532_v37, %v558_v40 }
 0x294   :  { %v536_v46 = vpop.f32.mrb[4].mxu1  ;;  %v513_v47 = vadd.f32 %v8757_v23, %v512_v44  ;;  %v7125_v48 = vpop.f32.mrb[5].mxu0  ;;  %v581_v49 = vpack.c.bf16 %v567_v45, %v566_v39 }
 0x295   :  { %v7137_v50 = vpop.f32.mrb[5].mxu1  ;;  %v515_v51 = vpop.f32.mrb[6].mxu0  ;;  %7148 = vmatmul.mubr.msk.bf16.vlgmr.msra.gmra.mrb[8].mxu1 %vm613_vm7, %v578_v43  ;;  %v537_v9 = vadd.f32 %v8757_v23, %v536_v46 }
 0x296   :  { %v539_v52 = vpop.f32.mrb[6].mxu1  ;;  %v553_v53 = vmul.f32 0.2, %v513_v47  ;;  %v516_v54 = vadd.f32 %v8757_v23, %v515_v51  ;;  %v7126_v55 = vpop.f32.mrb[7].mxu0  ;;  %7151 = vmatprep.mubr.msk.bf16.mxu1 %vm8247_vm0, %v8245_v1  ;;  %vm544_vm8 = vcmp.gt.f32.partialorder %v513_v47, 0.0  ;;  %v7497_v50 = vld [vmem:[#allocation15 + $0x40] sm:$0xff]  }
 0x297   :  { %v7138_v56 = vpop.f32.mrb[7].mxu1  ;;  %v559_v10 = vmul.f32 0.2, %v537_v9  ;;  %vm550_vm12 = vcmp.gt.f32.partialorder %v537_v9, 0.0  ;;  %v7486_v52 = vld [vmem:[#allocation14 + $0x28] sm:$0xff]   ;;  %v7491_v55 = vld [vmem:[#allocation14 + $0x10] sm:$0xff]  }
 0x298   :  { %vm545_vm9 = vcmp.gt.f32.partialorder %v516_v54, 0.0  ;;  %v554_v57 = vmul.f32 0.2, %v516_v54  ;;  %v562_v58 = vsel %vm544_vm8, %v513_v47, %v553_v53  ;;  %v7490_v53 = vld [vmem:[#allocation14 + $0x8] sm:$0xff]  }
 0x299   :  { %v568_v11 = vsel %vm550_vm12, %v537_v9, %v559_v10  ;;  %v7498_v56 = vld [vmem:[#allocation15 + $0x48] sm:$0xff]  }
 0x29a   :  { %v563_v59 = vsel %vm545_vm9, %v516_v54, %v554_v57  ;;  %v582_v12 = vpack.c.bf16 %v568_v11, %v568_v11  ;;  %v7487_v54 = vld [vmem:[#allocation14 + $0x30] sm:$0xff]   ;;  %v7488_v57 = vld [vmem:[#allocation14 + $0x38] sm:$0xff]  }
 0x29b   :  { %v579_v60 = vpack.c.bf16 %v563_v59, %v562_v58  ;;  %v520_v61 = vpop.f32.mrb[8].mxu0  ;;  %v7492_v58 = vld [vmem:[#allocation14 + $0x18] sm:$0xff]   ;;  %v7493_v59 = vld [vmem:[#allocation14 + $0x40] sm:$0xff]  }
 0x29c   :  { %v521_v62 = vadd.f32 %v8757_v23, %v520_v61  ;;  %v7129_v63 = vpop.f32.mrb[9].mxu0  ;;  %v7500_v61 = vld [vmem:[#allocation15 + $0x58] sm:$0xff]  }
 0x29d   :  { %v523_v0 = vpop.f32.mrb[10].mxu0  ;;  %7152 = vmatmul.mubr.msk.bf16.gmra.mrb[12].mxu1 %vm613_vm7, %v579_v60  ;;  %v7499_v60 = vld [vmem:[#allocation15 + $0x50] sm:$0xff]   ;;  %v7494_v63 = vld [vmem:[#allocation14 + $0x48] sm:$0xff]  }
 0x29e   :  { %v555_v2 = vmul.f32 0.2, %v521_v62  ;;  %v524_v3 = vadd.f32 %v8757_v23, %v523_v0  ;;  %v7130_v4 = vpop.f32.mrb[11].mxu0  ;;  %7155 = vmatprep.mubr.msk.bf16.mxu1 %vm8247_vm0, %v8245_v1  ;;  %vm546_vm10 = vcmp.gt.f32.partialorder %v521_v62, 0.0  ;;  %v7502_v0 = vld [vmem:[#allocation15 + $0x68] sm:$0xff]  }
 0x29f   :  { %v7496_v4 = vld [vmem:[#allocation14 + $0x58] sm:$0xff]  }
 0x2a0   :  { %vm547_vm11 = vcmp.gt.f32.partialorder %v524_v3, 0.0  ;;  %v556_v5 = vmul.f32 0.2, %v524_v3  ;;  %v564_v6 = vsel %vm546_vm10, %v521_v62, %v555_v2  ;;  %v7501_v62 = vld [vmem:[#allocation15 + $0x60] sm:$0xff]   ;;  %v7495_v2 = vld [vmem:[#allocation14 + $0x50] sm:$0xff]  }
 0x2a2   :  { %v565_v7 = vsel %vm547_vm11, %v524_v3, %v556_v5  ;;  %v7503_v3 = vld [vmem:[#allocation15 + $0x70] sm:$0xff]   ;;  %v7504_v5 = vld [vmem:[#allocation15 + $0x78] sm:$0xff]  }
 0x2a3   :  { %v580_v8 = vpack.c.bf16 %v565_v7, %v564_v6  ;;  %v7505_v6 = vld [vmem:[#allocation15] sm:$0xff]  }
 0x2a5   :  { %7156 = vmatmul.mubr.msk.bf16.gmra.mrb[16].mxu1 %vm613_vm7, %v580_v8 }
 0x2a6   :  { %7159 = vmatprep.mubr.msk.bf16.mxu1 %vm8247_vm0, %v8245_v1 }
 0x2ad   :  { %7160 = vmatmul.mubr.msk.bf16.gmra.mrb[20].mxu1 %vm613_vm7, %v581_v49 }
 0x2ae   :  { %7163 = vmatprep.mubr.msk.bf16.mxu1 %vm8247_vm0, %v8245_v1 }
 0x2b5   :  { %7164 = vmatmul.mubr.msk.bf16.gmra.mrb[24].mxu1 %vm613_vm7, %v582_v12 }
 0x2b6   :  { %7195 = vmatprep.mubr.msk.bf16.mxu1 %vm735_vm13, %v7485_v13 }
 0x368   :  { %v663_v16 = vpop.f32.mrb[8].mxu1 }
 0x369   :  { %v7149_v17 = vpop.f32.mrb[9].mxu1  ;;  %v664_v19 = vadd.f32 %v6655_v15, %v663_v16 }
 0x36a   :  { %v666_v18 = vpop.f32.mrb[10].mxu1 }
 0x36b   :  { %v667_v20 = vadd.f32 %v6655_v15, %v666_v18  ;;  %v7150_v21 = vpop.f32.mrb[11].mxu1 }
 0x36d   :  { %v702_v22 = vpack.c.bf16 %v667_v20, %v664_v19  ;;  %v7506_v19 = vld [vmem:[#allocation15 + $0x8] sm:$0xff]  }
 0x36f   :  { %7167 = vmatprep.subr.bf16.mxu0 %v702_v22  ;;  %7185 = vmatprep.subr.bf16.mxu1 %v702_v22 }
 0x370   :  { %v671_v23 = vpop.f32.mrb[12].mxu1  ;;  %7168 = vmatpush3.bf16.msra.mxu0 %v702_v22  ;;  %7186 = vmatpush3.bf16.msra.mxu1 %v702_v22 }
 0x371   :  { %v7153_v24 = vpop.f32.mrb[13].mxu1  ;;  %v672_v26 = vadd.f32 %v6655_v15, %v671_v23 }
 0x372   :  { %v674_v25 = vpop.f32.mrb[14].mxu1 }
 0x373   :  { %v675_v27 = vadd.f32 %v6655_v15, %v674_v25  ;;  %v7154_v28 = vpop.f32.mrb[15].mxu1 }
 0x375   :  { %v703_v29 = vpack.c.bf16 %v675_v27, %v672_v26 }
 0x377   :  { %7169 = vmatprep.subr.bf16.mxu0 %v703_v29  ;;  %7187 = vmatprep.subr.bf16.mxu1 %v703_v29 }
 0x378   :  { %v679_v30 = vpop.f32.mrb[16].mxu1  ;;  %7170 = vmatpush3.bf16.msra.mxu0 %v703_v29  ;;  %7188 = vmatpush3.bf16.msra.mxu1 %v703_v29 }
 0x379   :  { %v7157_v31 = vpop.f32.mrb[17].mxu1  ;;  %v680_v33 = vadd.f32 %v6655_v15, %v679_v30 }
 0x37a   :  { %v682_v32 = vpop.f32.mrb[18].mxu1 }
 0x37b   :  { %v683_v34 = vadd.f32 %v6655_v15, %v682_v32  ;;  %v7158_v35 = vpop.f32.mrb[19].mxu1 }
 0x37d   :  { %v704_v36 = vpack.c.bf16 %v683_v34, %v680_v33  ;;  %v7508_v33 = vld [vmem:[#allocation15 + $0x18] sm:$0xff]   ;;  %v7509_v34 = vld [vmem:[#allocation15 + $0x20] sm:$0xff]  }
 0x37f   :  { %7171 = vmatprep.subr.bf16.mxu0 %v704_v36  ;;  %7189 = vmatprep.subr.bf16.mxu1 %v704_v36 }
 0x380   :  { %v687_v37 = vpop.f32.mrb[20].mxu1  ;;  %7172 = vmatpush3.bf16.msra.mxu0 %v704_v36  ;;  %7190 = vmatpush3.bf16.msra.mxu1 %v704_v36 }
 0x381   :  { %v7161_v38 = vpop.f32.mrb[21].mxu1  ;;  %v688_v40 = vadd.f32 %v6655_v15, %v687_v37 }
 0x382   :  { %v690_v39 = vpop.f32.mrb[22].mxu1 }
 0x383   :  { %v691_v41 = vadd.f32 %v6655_v15, %v690_v39  ;;  %v7162_v42 = vpop.f32.mrb[23].mxu1 }
 0x384   :  { %v7511_v42 = vld [vmem:[#allocation15 + $0x30] sm:$0xff]  }
 0x385   :  { %v705_v43 = vpack.c.bf16 %v691_v41, %v688_v40 }
 0x387   :  { %7173 = vmatprep.subr.bf16.mxu0 %v705_v43  ;;  %7191 = vmatprep.subr.bf16.mxu1 %v705_v43 }
 0x388   :  { %v695_v44 = vpop.f32.mrb[24].mxu1  ;;  %7174 = vmatpush3.bf16.msra.mxu0 %v705_v43  ;;  %7192 = vmatpush3.bf16.msra.mxu1 %v705_v43 }
 0x389   :  { %v696_v45 = vadd.f32 %v6655_v15, %v695_v44  ;;  %v7165_v46 = vpop.f32.mrb[25].mxu1  ;;  %v7512_v44 = vld [vmem:[#allocation15 + $0x38] sm:$0xff]  }
 0x38a   :  { %v698_v47 = vpop.f32.mrb[26].mxu1 }
 0x38b   :  { %v706_v48 = vpack.c.bf16 %v696_v45, %v696_v45  ;;  %v7166_v49 = vpop.f32.mrb[27].mxu1 }
 0x38d   :  { %7437 = vmatprep.subr.msk.bf16.mxu0 %vm748_vm14, %v706_v48  ;;  %7438 = vmatprep.subr.msk.bf16.mxu1 %vm748_vm14, %v706_v48  ;;  %v750_v51 = vsel %vm748_vm14, %v706_v48, 0 }
 0x38e   :  { %7176 = vmatpush3.bf16.msra.mxu0 %v750_v51  ;;  %7194 = vmatpush3.bf16.msra.mxu1 %v750_v51 }
 0x38f   :  { %7251 = vmatprep.subr.bf16.mxu1 %v702_v22  ;;  %7203 = vmatprep.subr.bf16.mxu0 %v7497_v50 }
 0x391   :  { %7196 = vmatmul.mubr.msk.bf16.vlgmr.msra.gmra.mrb[28].mxu1 %vm735_vm13, %v7486_v52  ;;  %7178 = vmatmul.mubr.msk.bf16.vlgmr.msra.gmra.mrb[12].mxu0 %vm735_vm13, %v7490_v53  ;;  %v7515_v52 = vld [vmem:[#allocation15 + $0x90] sm:$0xff]   ;;  %v7516_v53 = vld [vmem:[#allocation15 + $0x98] sm:$0xff]  }
 0x392   :  { %7252 = vmatpush3.bf16.msra.mxu1 %v702_v22  ;;  %7199 = vmatprep.mubr.msk.bf16.mxu1 %vm735_vm13, %v7487_v54  ;;  %v7507_v22 = vld [vmem:[#allocation15 + $0x10] sm:$0xff]   ;;  %v7517_v54 = vld [vmem:[#allocation15 + $0xa0] sm:$0xff]  }
 0x393   :  { %7253 = vmatprep.subr.bf16.mxu1 %v703_v29  ;;  %7181 = vmatprep.mubr.msk.bf16.mxu0 %vm735_vm13, %v7491_v55  ;;  %v7518_v55 = vld [vmem:[#allocation15 + $0xa8] sm:$0xff]  }
 0x394   :  { %7204 = vmatpush3.bf16.msra.mxu0 %v7497_v50  ;;  %v7513_v50 = vld [vmem:[#allocation15 + $0x80] sm:$0xff]  }
 0x395   :  { %7205 = vmatprep.subr.bf16.mxu0 %v7498_v56 }
 0x396   :  { %7254 = vmatpush3.bf16.msra.mxu1 %v703_v29 }
 0x397   :  { %7255 = vmatprep.subr.bf16.mxu1 %v704_v36 }
 0x398   :  { %7206 = vmatpush3.bf16.msra.mxu0 %v7498_v56  ;;  %v7519_v56 = vld [vmem:[#allocation15 + $0xb0] sm:$0xff]  }
 0x399   :  { %7200 = vmatmul.mubr.msk.bf16.gmra.mrb[32].mxu1 %vm735_vm13, %v7488_v57  ;;  %7182 = vmatmul.mubr.msk.bf16.gmra.mrb[16].mxu0 %vm735_vm13, %v7492_v58  ;;  %v7520_v57 = vld [vmem:[#allocation15 + $0xb8] sm:$0xff]   ;;  %v7521_v58 = vld [vmem:[%s9396_s5] sm:$0xff]  }
 0x39a   :  { %7256 = vmatpush3.bf16.msra.mxu1 %v704_v36  ;;  %7261 = vmatprep.mubr.msk.bf16.mxu1 %vm735_vm13, %v7493_v59  ;;  %v7510_v36 = vld [vmem:[#allocation15 + $0x28] sm:$0xff]  }
 0x39b   :  { %7257 = vmatprep.subr.bf16.mxu1 %v705_v43  ;;  %7207 = vmatprep.subr.bf16.mxu0 %v7499_v60  ;;  %v7522_v59 = vld [vmem:[%s9396_s5 + $0x20] sm:$0xff]  }
 0x39c   :  { %7208 = vmatpush3.bf16.msra.mxu0 %v7499_v60  ;;  %v6713_v60 = vld [vmem:[#allocation17] ss:$0 sm:$0xff] }
 0x39d   :  { %7209 = vmatprep.subr.bf16.mxu0 %v7500_v61 }
 0x39e   :  { %7258 = vmatpush3.bf16.msra.mxu1 %v705_v43 }
 0x39f   :  { %7439 = vmatprep.subr.msk.bf16.mxu1 %vm748_vm14, %v706_v48 }
 0x3a0   :  { %7210 = vmatpush3.bf16.msra.mxu0 %v7500_v61 }
 0x3a1   :  { %7211 = vmatprep.subr.bf16.mxu0 %v7501_v62 }
 0x3a2   :  { %7260 = vmatpush3.bf16.msra.mxu1 %v750_v51  ;;  %v7514_v51 = vld [vmem:[#allocation15 + $0x88] sm:$0xff]  }
 0x3a4   :  { %7212 = vmatpush3.bf16.msra.mxu0 %v7501_v62 }
 0x3a5   :  { %7262 = vmatmul.mubr.msk.bf16.vlgmr.msra.gmra.mrb[36].mxu1 %vm735_vm13, %v7494_v63  ;;  %7213 = vmatprep.subr.bf16.mxu0 %v7502_v0 }
 0x3a6   :  { %7265 = vmatprep.mubr.msk.bf16.mxu1 %vm735_vm13, %v7495_v2 }
 0x3a8   :  { %7214 = vmatpush3.bf16.msra.mxu0 %v7502_v0 }
 0x3a9   :  { %7215 = vmatprep.subr.bf16.mxu0 %v7503_v3 }
 0x3ac   :  { %7216 = vmatpush3.bf16.msra.mxu0 %v7503_v3 }
 0x3ad   :  { %7266 = vmatmul.mubr.msk.bf16.gmra.mrb[40].mxu1 %vm735_vm13, %v7496_v4  ;;  %7217 = vmatprep.subr.bf16.mxu0 %v7504_v5 }
 0x3ae   :  { %7301 = vmatprep.mubr.msk.bf16.mxu1 %vm613_vm7, %v7521_v58 }
 0x3b0   :  { %7218 = vmatpush3.bf16.msra.mxu0 %v7504_v5 }
 0x3b1   :  { %7227 = vmatprep.subr.bf16.mxu0 %v7505_v6 }
 0x464   :  { %v7197_v7 = vpop.f32.mrb[28].mxu1  ;;  %v8797_v8 = vpop.f32.mrb[12].mxu0 }
 0x465   :  { %v912_v9 = vpop.f32.mrb[29].mxu1  ;;  %v786_v10 = vpop.f32.mrb[13].mxu0 }
 0x466   :  { %v7198_v11 = vpop.f32.mrb[30].mxu1  ;;  %v7180_v12 = vpop.f32.mrb[14].mxu0 }
 0x467   :  { %v944_v13 = vpack.c.bf16 %v7198_v11, %v7197_v7  ;;  %v915_v14 = vpop.f32.mrb[31].mxu1  ;;  %v818_v15 = vpack.c.bf16 %v7180_v12, %v8797_v8  ;;  %v789_v16 = vpop.f32.mrb[15].mxu0 }
 0x468   :  { %v943_v17 = vpack.c.bf16 %v915_v14, %v912_v9  ;;  %v817_v18 = vpack.c.bf16 %v789_v16, %v786_v10 }
 0x46a   :  { %7219 = vmatprep.mubr.bf16.mxu0 %v943_v17 }
 0x46b   :  { %7220 = vmatmul.mubr.bf16.vlgmr.msra.gmra.mrb[20].mxu0 %v944_v13 }
 0x46c   :  { %7228 = vmatpush3.bf16.msra.mxu0 %v7505_v6  ;;  %v7201_v20 = vpop.f32.mrb[32].mxu1  ;;  %v7183_v21 = vpop.f32.mrb[16].mxu0 }
 0x46d   :  { %7229 = vmatprep.subr.bf16.mxu0 %v7506_v19  ;;  %v928_v23 = vpop.f32.mrb[33].mxu1  ;;  %v802_v24 = vpop.f32.mrb[17].mxu0 }
 0x46e   :  { %v7202_v25 = vpop.f32.mrb[34].mxu1  ;;  %v7184_v26 = vpop.f32.mrb[18].mxu0 }
 0x46f   :  { %v946_v27 = vpack.c.bf16 %v7202_v25, %v7201_v20  ;;  %v931_v28 = vpop.f32.mrb[35].mxu1  ;;  %v820_v29 = vpack.c.bf16 %v7184_v26, %v7183_v21  ;;  %v805_v30 = vpop.f32.mrb[19].mxu0 }
 0x470   :  { %7230 = vmatpush3.bf16.msra.mxu0 %v7506_v19  ;;  %v945_v31 = vpack.c.bf16 %v931_v28, %v928_v23  ;;  %v819_v32 = vpack.c.bf16 %v805_v30, %v802_v24 }
 0x471   :  { %7231 = vmatprep.subr.bf16.mxu0 %v7507_v22 }
 0x472   :  { %7223 = vmatprep.mubr.bf16.mxu0 %v945_v31 }
 0x473   :  { %7224 = vmatmul.mubr.bf16.gmra.mrb[24].mxu0 %v946_v27 }
 0x474   :  { %7232 = vmatpush3.bf16.msra.mxu0 %v7507_v22  ;;  %7243 = vmatprep.mubr.bf16.mxu0 %v817_v18 }
 0x475   :  { %7233 = vmatprep.subr.bf16.mxu0 %v7508_v33 }
 0x478   :  { %7234 = vmatpush3.bf16.msra.mxu0 %v7508_v33  ;;  %v7263_v35 = vpop.f32.mrb[36].mxu1 }
 0x479   :  { %7235 = vmatprep.subr.bf16.mxu0 %v7509_v34  ;;  %v1265_v37 = vpop.f32.mrb[37].mxu1 }
 0x47a   :  { %v7264_v38 = vpop.f32.mrb[38].mxu1 }
 0x47b   :  { %v1297_v39 = vpack.c.bf16 %v7264_v38, %v7263_v35  ;;  %v1268_v40 = vpop.f32.mrb[39].mxu1  ;;  %v7524_v35 = vld [vmem:[%s9396_s5 + $0x28] sm:$0x7f]   ;;  %v7531_v38 = vld [vmem:[#allocation18 + $0x84] ss:$8 sps:$4 sm:$0xff]  }
 0x47c   :  { %7236 = vmatpush3.bf16.msra.mxu0 %v7509_v34  ;;  %v1296_v41 = vpack.c.bf16 %v1268_v40, %v1265_v37  ;;  %v7523_v34 = vld [vmem:[%s9396_s5 + $0x8] sm:$0x7f]   ;;  %v7527_v37 = vld [vmem:[%s9396_s5 + $0x30] sm:$0xff]   ;;  %v7528_v40 = vld [vmem:[%s9396_s5 + $0x38] sm:$0x7f]  }
 0x47d   :  { %7237 = vmatprep.subr.bf16.mxu0 %v7510_v36 }
 0x480   :  { %7238 = vmatpush3.bf16.msra.mxu0 %v7510_v36  ;;  %v7267_v43 = vpop.f32.mrb[40].mxu1  ;;  %v7525_v36 = vld [vmem:[%s9396_s5 + $0x10] sm:$0xff]  }
 0x481   :  { %7239 = vmatprep.subr.bf16.mxu0 %v7511_v42  ;;  %v1281_v45 = vpop.f32.mrb[41].mxu1 }
 0x482   :  { %v7268_v46 = vpop.f32.mrb[42].mxu1 }
 0x483   :  { %v1299_v47 = vpack.c.bf16 %v7268_v46, %v7267_v43  ;;  %v1284_v48 = vpop.f32.mrb[43].mxu1  ;;  %v7532_v43 = vld [vmem:[#allocation18 + $0x90] ss:$8 sps:$4 sm:$0xff]   ;;  %v7540_v46 = vld [vmem:[#allocation18 + $0xb4] ss:$8 sps:$4 sm:$0xff]  }
 0x484   :  { %7240 = vmatpush3.bf16.msra.mxu0 %v7511_v42  ;;  %v1298_v49 = vpack.c.bf16 %v1284_v48, %v1281_v45  ;;  %v7534_v42 = vld [vmem:[#allocation18 + $0x94] ss:$8 sps:$4 sm:$0xff]   ;;  %v7535_v45 = vld [vmem:[#allocation18 + $0xa0] ss:$8 sps:$4 sm:$0xff]  }
 0x485   :  { %7241 = vmatprep.subr.bf16.mxu0 %v7512_v44  ;;  %v7541_v48 = vld [vmem:[#allocation18 + $0xc0] ss:$8 sps:$4 sm:$0xff]  }
 0x488   :  { %7242 = vmatpush3.bf16.msra.mxu0 %v7512_v44  ;;  %v7537_v44 = vld [vmem:[#allocation18 + $0xa4] ss:$8 sps:$4 sm:$0xff]  }
 0x489   :  { %7269 = vmatprep.subr.bf16.mxu0 %v7513_v50 }
 0x48b   :  { %7244 = vmatmul.mubr.bf16.vlgmr.msra.gmra.mrb[20].mxu0 %v818_v15 }
 0x48c   :  { %7270 = vmatpush3.bf16.msra.mxu0 %v7513_v50  ;;  %7247 = vmatprep.mubr.bf16.mxu0 %v819_v32  ;;  %v7544_v50 = vld [vmem:[#allocation18 + $0xd0] ss:$8 sps:$4 sm:$0xff]  }
 0x48d   :  { %7271 = vmatprep.subr.bf16.mxu0 %v7514_v51 }
 0x490   :  { %7272 = vmatpush3.bf16.msra.mxu0 %v7514_v51  ;;  %v7546_v51 = vld [vmem:[#allocation18 + $0xd4] ss:$8 sps:$4 sm:$0xff]  }
 0x491   :  { %7273 = vmatprep.subr.bf16.mxu0 %v7515_v52 }
 0x493   :  { %7248 = vmatmul.mubr.bf16.gmra.mrb[24].mxu0 %v820_v29 }
 0x494   :  { %7274 = vmatpush3.bf16.msra.mxu0 %v7515_v52  ;;  %7285 = vmatprep.mubr.bf16.mxu0 %v1296_v41  ;;  %v7529_v41 = vld [vmem:[#allocation18 + $0x80] ss:$8 sps:$4 sm:$0xff]   ;;  %v7549_v52 = vld [vmem:[#allocation18 + $0xe4] ss:$8 sps:$4 sm:$0xff]  }
 0x495   :  { %7275 = vmatprep.subr.bf16.mxu0 %v7516_v53 }
 0x498   :  { %7276 = vmatpush3.bf16.msra.mxu0 %v7516_v53  ;;  %v7547_v53 = vld [vmem:[#allocation18 + $0xe0] ss:$8 sps:$4 sm:$0xff]  }
 0x499   :  { %7277 = vmatprep.subr.bf16.mxu0 %v7517_v54 }
 0x49c   :  { %7278 = vmatpush3.bf16.msra.mxu0 %v7517_v54  ;;  %v7552_v54 = vld [vmem:[#allocation18 + $0xf4] ss:$8 sps:$4 sm:$0xff]  }
 0x49d   :  { %7279 = vmatprep.subr.bf16.mxu0 %v7518_v55 }
 0x4a0   :  { %7280 = vmatpush3.bf16.msra.mxu0 %v7518_v55  ;;  %v7550_v55 = vld [vmem:[#allocation18 + $0xf0] ss:$8 sps:$4 sm:$0xff]  }
 0x4a1   :  { %7281 = vmatprep.subr.bf16.mxu0 %v7519_v56 }
 0x4a4   :  { %7282 = vmatpush3.bf16.msra.mxu0 %v7519_v56  ;;  %v7555_v56 = vld [vmem:[#allocation18 + $0x4] ss:$8 sps:$4 sm:$0xff]  }
 0x4a5   :  { %7283 = vmatprep.subr.bf16.mxu0 %v7520_v57 }
 0x4a8   :  { %7284 = vmatpush3.bf16.msra.mxu0 %v7520_v57  ;;  %v8259_v57 = vmov 0  }
 0x4ab   :  { %7286 = vmatmul.mubr.bf16.vlgmr.msra.gmra.mrb[20].mxu0 %v1297_v39  ;;  %v7526_v39 = vld [vmem:[%s9396_s5 + $0x18] sm:$0x7f]  }
 0x4ac   :  { %7289 = vmatprep.mubr.bf16.mxu0 %v1298_v49  ;;  %v7543_v49 = vld [vmem:[#allocation18 + $0xc4] ss:$8 sps:$4 sm:$0xff]  }
 0x4b3   :  { %7290 = vmatmul.mubr.bf16.gmra.mrb[24].mxu0 %v1299_v47  ;;  %v7538_v47 = vld [vmem:[#allocation18 + $0xb0] ss:$8 sps:$4 sm:$0xff]  }
 0x4b4   :  { %7325 = vmatprep.mubr.msk.bf16.mxu0 %vm613_vm7, %v7522_v59 }
 0x57e   :  { %v7287_v61 = vpop.f32.mrb[20].mxu0 }
 0x57f   :  { %v1446_v62 = vadd.f32 %v7287_v61, %v6713_v60  ;;  %v1399_v63 = vpop.f32.mrb[21].mxu0 }
 0x580   :  { %v1444_v0 = vadd.f32 %v6713_v60, %v1399_v63  ;;  %v7288_v2 = vpop.f32.mrb[22].mxu0 }
 0x581   :  { %v1462_v3 = vmul.f32 0.2, %v1446_v62  ;;  %v1447_v4 = vadd.f32 %v7288_v2, %v6713_v60  ;;  %v1402_v5 = vpop.f32.mrb[23].mxu0  ;;  %vm1454_vm15 = vcmp.gt.f32.partialorder %v1446_v62, 0.0 }
 0x582   :  { %v1460_v6 = vmul.f32 0.2, %v1444_v0  ;;  %v1445_v7 = vadd.f32 %v6713_v60, %v1402_v5  ;;  %vm1452_vm1 = vcmp.gt.f32.partialorder %v1444_v0, 0.0 }
 0x583   :  { %vm1455_vm2 = vcmp.gt.f32.partialorder %v1447_v4, 0.0  ;;  %v1463_v8 = vmul.f32 0.2, %v1447_v4  ;;  %v1470_v10 = vsel %vm1454_vm15, %v1446_v62, %v1462_v3 }
 0x584   :  { %vm1453_vm3 = vcmp.gt.f32.partialorder %v1445_v7, 0.0  ;;  %v1461_v9 = vmul.f32 0.2, %v1445_v7  ;;  %v1468_v12 = vsel %vm1452_vm1, %v1444_v0, %v1460_v6 }
 0x585   :  { %v1471_v11 = vsel %vm1455_vm2, %v1447_v4, %v1463_v8  ;;  %vm2452_vm2 = vcmask 1046528  }
 0x586   :  { %v1478_v13 = vpack.c.bf16 %v1471_v11, %v1470_v10  ;;  %v1469_v14 = vsel %vm1453_vm3, %v1445_v7, %v1461_v9  ;;  %v7291_v15 = vpop.f32.mrb[24].mxu0  ;;  %vm2445_vm3 = vcmask 244736  }
 0x587   :  { %v1477_v16 = vpack.c.bf16 %v1469_v14, %v1468_v12  ;;  %v1450_v17 = vadd.f32 %v7291_v15, %v6713_v60  ;;  %v1415_v18 = vpop.f32.mrb[25].mxu0  ;;  %v7553_v15 = vld [vmem:[#allocation18] ss:$8 sps:$4 sm:$0xff]  }
 0x588   :  { %v1448_v19 = vadd.f32 %v6713_v60, %v1415_v18  ;;  %v7292_v20 = vpop.f32.mrb[26].mxu0 }
 0x589   :  { %v1466_v21 = vmul.f32 0.2, %v1450_v17  ;;  %v1451_v22 = vadd.f32 %v7292_v20, %v6713_v60  ;;  %v1418_v23 = vpop.f32.mrb[27].mxu0  ;;  %7293 = vmatprep.subr.bf16.mxu1 %v1477_v16  ;;  %7317 = vmatprep.subr.bf16.mxu0 %v1477_v16  ;;  %vm1458_vm4 = vcmp.gt.f32.partialorder %v1450_v17, 0.0 }
 0x58a   :  { %v1464_v24 = vmul.f32 0.2, %v1448_v19  ;;  %v1449_v25 = vadd.f32 %v6713_v60, %v1418_v23  ;;  %7294 = vmatpush3.bf16.msra.mxu1 %v1477_v16  ;;  %7318 = vmatpush3.bf16.msra.mxu0 %v1477_v16  ;;  %vm1456_vm5 = vcmp.gt.f32.partialorder %v1448_v19, 0.0  ;;  %v7559_v23 = vld [vmem:[#allocation18 + $0x20] ss:$8 sps:$4 sm:$0xff]  }
 0x58b   :  { %vm1459_vm6 = vcmp.gt.f32.partialorder %v1451_v22, 0.0  ;;  %v1467_v26 = vmul.f32 0.2, %v1451_v22  ;;  %7295 = vmatprep.subr.bf16.mxu1 %v1478_v13  ;;  %7319 = vmatprep.subr.bf16.mxu0 %v1478_v13  ;;  %v1474_v28 = vsel %vm1458_vm4, %v1450_v17, %v1466_v21  ;;  %v7556_v21 = vld [vmem:[#allocation18 + $0x10] ss:$8 sps:$4 sm:$0xff]  }
 0x58c   :  { %vm1457_vm8 = vcmp.gt.f32.partialorder %v1449_v25, 0.0  ;;  %v1465_v27 = vmul.f32 0.2, %v1449_v25  ;;  %v1472_v30 = vsel %vm1456_vm5, %v1448_v19, %v1464_v24  ;;  %v7558_v19 = vld [vmem:[#allocation18 + $0x14] ss:$8 sps:$4 sm:$0xff]  }
 0x58d   :  { %v1475_v29 = vsel %vm1459_vm6, %v1451_v22, %v1467_v26  ;;  %v7561_v22 = vld [vmem:[#allocation18 + $0x24] ss:$8 sps:$4 sm:$0xff]   ;;  %v7564_v24 = vld [vmem:[#allocation18 + $0x34] ss:$8 sps:$4 sm:$0xff]  }
 0x58e   :  { %v1480_v31 = vpack.c.bf16 %v1475_v29, %v1474_v28  ;;  %v1473_v32 = vsel %vm1457_vm8, %v1449_v25, %v1465_v27  ;;  %7296 = vmatpush3.bf16.msra.mxu1 %v1478_v13  ;;  %7320 = vmatpush3.bf16.msra.mxu0 %v1478_v13  ;;  %v7562_v25 = vld [vmem:[#allocation18 + $0x30] ss:$8 sps:$4 sm:$0xff]   ;;  %v7567_v26 = vld [vmem:[#allocation18 + $0x44] ss:$8 sps:$4 sm:$0xff]   ;;  %v7565_v27 = vld [vmem:[#allocation18 + $0x40] ss:$8 sps:$4 sm:$0xff]  }
 0x58f   :  { %v1479_v33 = vpack.c.bf16 %v1473_v32, %v1472_v30  ;;  %v7570_v28 = vld [vmem:[#allocation18 + $0x54] ss:$8 sps:$4 sm:$0xff]   ;;  %v7568_v29 = vld [vmem:[#allocation18 + $0x50] ss:$8 sps:$4 sm:$0xff]   ;;  %v7573_v30 = vld [vmem:[#allocation18 + $0x64] ss:$8 sps:$4 sm:$0xff]  }
 0x590   :  { %v7576_v32 = vld [vmem:[#allocation18 + $0x74] ss:$8 sps:$4 sm:$0xff]  }
 0x591   :  { %7297 = vmatprep.subr.bf16.mxu1 %v1479_v33  ;;  %7321 = vmatprep.subr.bf16.mxu0 %v1479_v33 }
 0x592   :  { %7298 = vmatpush3.bf16.msra.mxu1 %v1479_v33  ;;  %7322 = vmatpush3.bf16.msra.mxu0 %v1479_v33 }
 0x593   :  { %7299 = vmatprep.subr.bf16.mxu1 %v1480_v31  ;;  %7323 = vmatprep.subr.bf16.mxu0 %v1480_v31 }
 0x596   :  { %7300 = vmatpush3.bf16.msra.mxu1 %v1480_v31  ;;  %7324 = vmatpush3.bf16.msra.mxu0 %v1480_v31 }
 0x597   :  { %7305 = vmatprep.subr.bf16.mxu1 %v1477_v16  ;;  %7329 = vmatprep.subr.bf16.mxu0 %v1477_v16 }
 0x599   :  { %7302 = vmatmul.mubr.msk.bf16.vlgmr.msra.gmra.mrb[44].mxu1 %vm613_vm7, %v7523_v34  ;;  %7326 = vmatmul.mubr.msk.bf16.vlgmr.msra.gmra.mrb[28].mxu0 %vm613_vm7, %v7524_v35  ;;  %v7579_v34 = vld [vmem:[#allocation18 + $0x104] ss:$8 sps:$4 sm:$0xff]   ;;  %v7577_v35 = vld [vmem:[#allocation18 + $0x100] ss:$8 sps:$4 sm:$0xff]  }
 0x59a   :  { %7306 = vmatpush3.bf16.msra.mxu1 %v1477_v16  ;;  %7330 = vmatpush3.bf16.msra.mxu0 %v1477_v16 }
 0x59b   :  { %7307 = vmatprep.subr.bf16.mxu1 %v1478_v13  ;;  %7331 = vmatprep.subr.bf16.mxu0 %v1478_v13 }
 0x59c   :  { %7313 = vmatprep.mubr.msk.bf16.mxu1 %vm613_vm7, %v7525_v36  ;;  %7337 = vmatprep.mubr.msk.bf16.mxu0 %vm613_vm7, %v7527_v37  ;;  %v7582_v36 = vld [vmem:[#allocation18 + $0x114] ss:$8 sps:$4 sm:$0xff]   ;;  %v7580_v37 = vld [vmem:[#allocation18 + $0x110] ss:$8 sps:$4 sm:$0xff]  }
 0x59e   :  { %7308 = vmatpush3.bf16.msra.mxu1 %v1478_v13  ;;  %7332 = vmatpush3.bf16.msra.mxu0 %v1478_v13 }
 0x59f   :  { %7309 = vmatprep.subr.bf16.mxu1 %v1479_v33  ;;  %7333 = vmatprep.subr.bf16.mxu0 %v1479_v33 }
 0x5a2   :  { %7310 = vmatpush3.bf16.msra.mxu1 %v1479_v33  ;;  %7334 = vmatpush3.bf16.msra.mxu0 %v1479_v33  ;;  %v7574_v33 = vld [vmem:[#allocation18 + $0x70] ss:$8 sps:$4 sm:$0xff]  }
 0x5a3   :  { %7311 = vmatprep.subr.bf16.mxu1 %v1480_v31  ;;  %7335 = vmatprep.subr.bf16.mxu0 %v1480_v31 }
 0x5a6   :  { %7312 = vmatpush3.bf16.msra.mxu1 %v1480_v31  ;;  %7336 = vmatpush3.bf16.msra.mxu0 %v1480_v31  ;;  %v7571_v31 = vld [vmem:[#allocation18 + $0x60] ss:$8 sps:$4 sm:$0xff]  }
 0x5a7   :  { %1737 = vmatprep.subr.bf16.mxu1 %v7531_v38  ;;  %v7585_v38 = vld [vmem:[#allocation18 + $0x124] ss:$8 sps:$4 sm:$0xff]  }
 0x5a9   :  { %7314 = vmatmul.mubr.msk.bf16.vlgmr.msra.gmra.mrb[48].mxu1 %vm613_vm7, %v7526_v39  ;;  %7338 = vmatmul.mubr.msk.bf16.vlgmr.msra.gmra.mrb[32].mxu0 %vm613_vm7, %v7528_v40  ;;  %v7583_v39 = vld [vmem:[#allocation18 + $0x120] ss:$8 sps:$4 sm:$0xff]   ;;  %v7588_v40 = vld [vmem:[#allocation18 + $0x134] ss:$8 sps:$4 sm:$0xff]  }
 0x5aa   :  { %1738 = vmatpush1.bf16.msra.mxu1 %v7529_v41  ;;  %1769 = vmatprep.mubr.bf16.mxu1 %v8259_v57  ;;  %v7586_v41 = vld [vmem:[#allocation18 + $0x130] ss:$8 sps:$4 sm:$0xff]  }
 0x5ab   :  { %1739 = vmatprep.subr.bf16.mxu1 %v7534_v42  ;;  %2491 = vmatprep.mubr.bf16.mxu0 %v8259_v57  ;;  %v7591_v42 = vld [vmem:[#allocation18 + $0x144] ss:$8 sps:$4 sm:$0xff]  }
 0x5ae   :  { %1740 = vmatpush1.bf16.msra.mxu1 %v7532_v43  ;;  %v7589_v43 = vld [vmem:[#allocation18 + $0x140] ss:$8 sps:$4 sm:$0xff]  }
 0x5af   :  { %1741 = vmatprep.subr.bf16.mxu1 %v7537_v44  ;;  %v7594_v44 = vld [vmem:[#allocation18 + $0x154] ss:$8 sps:$4 sm:$0xff]  }
 0x5b2   :  { %1742 = vmatpush1.bf16.msra.mxu1 %v7535_v45  ;;  %v7592_v45 = vld [vmem:[#allocation18 + $0x150] ss:$8 sps:$4 sm:$0xff]  }
 0x5b3   :  { %1743 = vmatprep.subr.bf16.mxu1 %v7540_v46  ;;  %v7597_v46 = vld [vmem:[#allocation18 + $0x164] ss:$8 sps:$4 sm:$0xff]  }
 0x5b6   :  { %1744 = vmatpush1.bf16.msra.mxu1 %v7538_v47  ;;  %v7595_v47 = vld [vmem:[#allocation18 + $0x160] ss:$8 sps:$4 sm:$0xff]  }
 0x5b7   :  { %1745 = vmatprep.subr.bf16.mxu1 %v7543_v49  ;;  %v7598_v49 = vld [vmem:[#allocation18 + $0x170] ss:$8 sps:$4 sm:$0xff]  }
 0x5ba   :  { %1746 = vmatpush1.bf16.msra.mxu1 %v7541_v48  ;;  %v7600_v48 = vld [vmem:[#allocation18 + $0x174] ss:$8 sps:$4 sm:$0xff]  }
 0x5bb   :  { %1747 = vmatprep.subr.bf16.mxu1 %v7546_v51  ;;  %v7601_v51 = vld [vmem:[#allocation18 + $0x180] ss:$8 sps:$4 sm:$0xff]  }
 0x5be   :  { %1748 = vmatpush1.bf16.msra.mxu1 %v7544_v50  ;;  %v7603_v50 = vld [vmem:[#allocation18 + $0x184] ss:$8 sps:$4 sm:$0xff]  }
 0x5bf   :  { %1749 = vmatprep.subr.bf16.mxu1 %v7549_v52  ;;  %v7606_v52 = vld [vmem:[#allocation18 + $0x194] ss:$8 sps:$4 sm:$0xff]  }
 0x5c2   :  { %1750 = vmatpush1.bf16.msra.mxu1 %v7547_v53  ;;  %v7604_v53 = vld [vmem:[#allocation18 + $0x190] ss:$8 sps:$4 sm:$0xff]  }
 0x5c3   :  { %1751 = vmatprep.subr.bf16.mxu1 %v7552_v54  ;;  %v7609_v54 = vld [vmem:[#allocation18 + $0x1a4] ss:$8 sps:$4 sm:$0xff]  }
 0x5c6   :  { %1752 = vmatpush1.bf16.msra.mxu1 %v7550_v55  ;;  %v7607_v55 = vld [vmem:[#allocation18 + $0x1a0] ss:$8 sps:$4 sm:$0xff]  }
 0x5c7   :  { %1870 = vmatprep.subr.bf16.mxu1 %v7555_v56  ;;  %v7612_v56 = vld [vmem:[#allocation18 + $0x1b4] ss:$8 sps:$4 sm:$0xff]  }
 0x66c   :  { %v8834_v58 = vpop.f32.mrb[44].mxu1  ;;  %v8836_v59 = vpop.f32.mrb[28].mxu0 }
 0x66d   :  { %v1535_v60 = vpop.f32.mrb[45].mxu1  ;;  %v8838_v61 = vpop.f32.mrb[29].mxu0 }
 0x66e   :  { %v8840_v62 = vpop.f32.mrb[46].mxu1  ;;  %v8842_v63 = vpop.f32.mrb[30].mxu0 }
 0x66f   :  { %v1551_v0 = vpack.c.bf16 %v8840_v62, %v8834_v58  ;;  %v1538_v2 = vpop.f32.mrb[47].mxu1  ;;  %v1994_v3 = vpack.c.bf16 %v8842_v63, %v8836_v59  ;;  %v8848_v4 = vpop.f32.mrb[31].mxu0  ;;  %v7610_v58 = vld [vmem:[#allocation18 + $0x1b0] ss:$8 sps:$4 sm:$0xff]   ;;  %v7618_v62 = vld [vmem:[#allocation18 + $0x1d4] ss:$8 sps:$4 sm:$0xff]   ;;  %v2384_v63 = vlaneseq }
 0x670   :  { %v1550_v5 = vpack.c.bf16 %v1538_v2, %v1535_v60  ;;  %v1993_v6 = vpack.c.bf16 %v8848_v4, %v8838_v61  ;;  %v7615_v60 = vld [vmem:[#allocation18 + $0x1c4] ss:$8 sps:$4 sm:$0xff]   ;;  %v7613_v61 = vld [vmem:[#allocation18 + $0x1c0] ss:$8 sps:$4 sm:$0xff]   ;;  %v7622_v59 = vld [vmem:[#allocation18 + $0x1f0] ss:$8 sps:$4 sm:$0xff]  }
 0x671   :  { %v7621_v2 = vld [vmem:[#allocation18 + $0x1e4] ss:$8 sps:$4 sm:$0xff]   ;;  %v7619_v4 = vld [vmem:[#allocation18 + $0x1e0] ss:$8 sps:$4 sm:$0xff]  }
 0x67c   :  { %v7315_v7 = vpop.f32.mrb[48].mxu1  ;;  %v8852_v8 = vpop.f32.mrb[32].mxu0 }
 0x67d   :  { %v1623_v9 = vpop.f32.mrb[49].mxu1  ;;  %v8854_v10 = vpop.f32.mrb[33].mxu0 }
 0x67e   :  { %v7316_v11 = vpop.f32.mrb[50].mxu1  ;;  %v8856_v12 = vpop.f32.mrb[34].mxu0 }
 0x67f   :  { %v1639_v13 = vpack.c.bf16 %v7316_v11, %v7315_v7  ;;  %v1626_v14 = vpop.f32.mrb[51].mxu1  ;;  %v2224_v16 = vpack.c.bf16 %v8856_v12, %v8852_v8  ;;  %v8860_v17 = vpop.f32.mrb[35].mxu0  ;;  %v1476_v7 = vld [vmem:[#allocation20] sm:$0x3] }
 0x680   :  { %v1638_v18 = vpack.c.bf16 %v1626_v14, %v1623_v9  ;;  %v2223_v20 = vpack.c.bf16 %v8860_v17, %v8854_v10 }
 0x682   :  { %1770 = vmatmul.mubr.bf16.vlgmr.msra.gmra.mrb[52].mxu1 %v1638_v18 }
 0x683   :  { %1871 = vmatpush1.bf16.msra.mxu1 %v7553_v15  ;;  %1779 = vmatprep.mubr.bf16.mxu1 %v8259_v57 }
 0x684   :  { %1872 = vmatprep.subr.bf16.mxu1 %v7558_v19 }
 0x687   :  { %1873 = vmatpush1.bf16.msra.mxu1 %v7556_v21 }
 0x688   :  { %1874 = vmatprep.subr.bf16.mxu1 %v7561_v22 }
 0x68a   :  { %1780 = vmatmul.mubr.bf16.gmra.mrb[56].mxu1 %v1639_v13 }
 0x68b   :  { %1875 = vmatpush1.bf16.msra.mxu1 %v7559_v23  ;;  %1902 = vmatprep.mubr.bf16.mxu1 %v8259_v57 }
 0x68c   :  { %1876 = vmatprep.subr.bf16.mxu1 %v7564_v24 }
 0x68f   :  { %1877 = vmatpush1.bf16.msra.mxu1 %v7562_v25 }
 0x690   :  { %1878 = vmatprep.subr.bf16.mxu1 %v7567_v26 }
 0x693   :  { %1879 = vmatpush1.bf16.msra.mxu1 %v7565_v27 }
 0x694   :  { %1880 = vmatprep.subr.bf16.mxu1 %v7570_v28 }
 0x697   :  { %1881 = vmatpush1.bf16.msra.mxu1 %v7568_v29 }
 0x698   :  { %1882 = vmatprep.subr.bf16.mxu1 %v7573_v30 }
 0x69b   :  { %1883 = vmatpush1.bf16.msra.mxu1 %v7571_v31 }
 0x69c   :  { %1884 = vmatprep.subr.bf16.mxu1 %v7576_v32 }
 0x69f   :  { %1885 = vmatpush1.bf16.msra.mxu1 %v7574_v33 }
 0x6a0   :  { %2092 = vmatprep.subr.bf16.mxu1 %v7579_v34 }
 0x6a2   :  { %1903 = vmatmul.mubr.bf16.vlgmr.msra.gmra.mrb[52].mxu1 %v1550_v5  ;;  %v7624_v5 = vld [vmem:[#allocation18 + $0x1f4] ss:$8 sps:$4 sm:$0xff]  }
 0x6a3   :  { %2093 = vmatpush1.bf16.msra.mxu1 %v7577_v35  ;;  %1912 = vmatprep.mubr.bf16.mxu1 %v8259_v57 }
 0x6a4   :  { %2094 = vmatprep.subr.bf16.mxu1 %v7582_v36 }
 0x6a7   :  { %2095 = vmatpush1.bf16.msra.mxu1 %v7580_v37 }
 0x6a8   :  { %2096 = vmatprep.subr.bf16.mxu1 %v7585_v38 }
 0x6aa   :  { %1913 = vmatmul.mubr.bf16.gmra.mrb[56].mxu1 %v1551_v0  ;;  %v7616_v0 = vld [vmem:[#allocation18 + $0x1d0] ss:$8 sps:$4 sm:$0xff]  }
 0x6ab   :  { %2097 = vmatpush1.bf16.msra.mxu1 %v7583_v39  ;;  %2124 = vmatprep.mubr.bf16.mxu1 %v8259_v57 }
 0x6ac   :  { %2098 = vmatprep.subr.bf16.mxu1 %v7588_v40 }
 0x6af   :  { %2099 = vmatpush1.bf16.msra.mxu1 %v7586_v41 }
 0x6b0   :  { %2100 = vmatprep.subr.bf16.mxu1 %v7591_v42 }
 0x6b3   :  { %2101 = vmatpush1.bf16.msra.mxu1 %v7589_v43 }
 0x6b4   :  { %2102 = vmatprep.subr.bf16.mxu1 %v7594_v44 }
 0x6b7   :  { %2103 = vmatpush1.bf16.msra.mxu1 %v7592_v45 }
 0x6b8   :  { %2104 = vmatprep.subr.bf16.mxu1 %v7597_v46 }
 0x6bb   :  { %2105 = vmatpush1.bf16.msra.mxu1 %v7595_v47 }
 0x6bc   :  { %2106 = vmatprep.subr.bf16.mxu1 %v7600_v48  ;;  %v7625_v48 = vld [vmem:[#allocation21] sm:$0xff]  }
 0x6bf   :  { %2107 = vmatpush1.bf16.msra.mxu1 %v7598_v49  ;;  %v7629_v49 = vld [vmem:[#allocation21 + $0x20] sm:$0xff]  }
 0x6c0   :  { %2322 = vmatprep.subr.bf16.mxu1 %v7603_v50  ;;  %v7633_v50 = vld [vmem:[#allocation23 + $0x104] ss:$8 sps:$4 sm:$0xff]  }
 0x6c2   :  { %2125 = vmatmul.mubr.bf16.vlgmr.msra.gmra.mrb[52].mxu1 %v1993_v6 }
 0x6c3   :  { %2323 = vmatpush1.bf16.msra.mxu1 %v7601_v51  ;;  %2134 = vmatprep.mubr.bf16.mxu1 %v8259_v57  ;;  %v7626_v51 = vld [vmem:[#allocation21 + $0x8] sm:$0x1f]  }
 0x6c4   :  { %2324 = vmatprep.subr.bf16.mxu1 %v7606_v52  ;;  %v7630_v52 = vld [vmem:[#allocation21 + $0x28] sm:$0x1f]  }
 0x6c7   :  { %2325 = vmatpush1.bf16.msra.mxu1 %v7604_v53  ;;  %v7627_v53 = vld [vmem:[#allocation21 + $0x10] sm:$0xff]  }
 0x6c8   :  { %2326 = vmatprep.subr.bf16.mxu1 %v7609_v54  ;;  %v7631_v54 = vld [vmem:[#allocation23 + $0x100] ss:$8 sps:$4 sm:$0xff]  }
 0x6ca   :  { %2135 = vmatmul.mubr.bf16.gmra.mrb[56].mxu1 %v1994_v3  ;;  %v8887_v3 = vshrl.u32 %v2384_v63, 7  ;;  %v7651_v63 = vld [vmem:[#allocation23 + $0x164] ss:$8 sps:$4 sm:$0xff]  }
 0x6cb   :  { %2327 = vmatpush1.bf16.msra.mxu1 %v7607_v55  ;;  %2354 = vmatprep.mubr.bf16.mxu1 %v8259_v57  ;;  %v7636_v55 = vld [vmem:[#allocation23 + $0x114] ss:$8 sps:$4 sm:$0xff]  }
 0x6cc   :  { %2328 = vmatprep.subr.bf16.mxu1 %v7612_v56  ;;  %v8890_v6 = vsub.s32 0, %v8887_v3  ;;  %v8893_v9 = vsub.s32 1, %v8887_v3  ;;  %v7634_v56 = vld [vmem:[#allocation23 + $0x110] ss:$8 sps:$4 sm:$0xff]  }
 0x6ce   :  { %v2387_v10 = vrot.slane %v1476_v7, %v8890_v6  ;;  %v2391_v11 = vrot.slane %v1476_v7, %v8893_v9  ;;  %v7649_v7 = vld [vmem:[#allocation23 + $0x160] ss:$8 sps:$4 sm:$0xff]  }
 0x6cf   :  { %2329 = vmatpush1.bf16.msra.mxu1 %v7610_v58  ;;  %v7639_v58 = vld [vmem:[#allocation23 + $0x124] ss:$8 sps:$4 sm:$0xff]  }
 0x6d0   :  { %2330 = vmatprep.subr.bf16.mxu1 %v7615_v60  ;;  %v7628_v60 = vld [vmem:[#allocation21 + $0x18] sm:$0x1f]  }
 0x6d3   :  { %2331 = vmatpush1.bf16.msra.mxu1 %v7613_v61  ;;  %v7637_v61 = vld [vmem:[#allocation23 + $0x120] ss:$8 sps:$4 sm:$0xff]  }
 0x6d4   :  { %2332 = vmatprep.subr.bf16.mxu1 %v7618_v62  ;;  %v7642_v62 = vld [vmem:[#allocation23 + $0x134] ss:$8 sps:$4 sm:$0xff]  }
 0x6d7   :  { %2333 = vmatpush1.bf16.msra.mxu1 %v7616_v0  ;;  %v7640_v0 = vld [vmem:[#allocation23 + $0x130] ss:$8 sps:$4 sm:$0xff]  }
 0x6d8   :  { %2334 = vmatprep.subr.bf16.mxu1 %v7621_v2  ;;  %v7645_v2 = vld [vmem:[#allocation23 + $0x144] ss:$8 sps:$4 sm:$0xff]  }
 0x6db   :  { %2335 = vmatpush1.bf16.msra.mxu1 %v7619_v4  ;;  %v7643_v4 = vld [vmem:[#allocation23 + $0x140] ss:$8 sps:$4 sm:$0xff]  }
 0x6dc   :  { %2336 = vmatprep.subr.bf16.mxu1 %v7624_v5  ;;  %v7648_v5 = vld [vmem:[#allocation23 + $0x154] ss:$8 sps:$4 sm:$0xff]  }
 0x6df   :  { %2337 = vmatpush1.bf16.msra.mxu1 %v7622_v59  ;;  %v7646_v59 = vld [vmem:[#allocation23 + $0x150] ss:$8 sps:$4 sm:$0xff]  }
 0x6e2   :  { %2355 = vmatmul.mubr.bf16.vlgmr.msra.gmra.mrb[52].mxu1 %v2223_v20 }
 0x6e3   :  { %2364 = vmatprep.mubr.bf16.mxu1 %v8259_v57 }
 0x6ea   :  { %2365 = vmatmul.mubr.bf16.gmra.mrb[56].mxu1 %v2224_v16 }
 0x6eb   :  { %3138 = vmatprep.mubr.bf16.mxu1 %v8259_v57 }
 0x7b5   :  { %v2356_v13 = vpop.f32.mrb[52].mxu1 }
 0x7b6   :  { %v2394_v14 = vadd.f32 %v2387_v10, %v2356_v13  ;;  %v2358_v8 = vpop.f32.mrb[53].mxu1  ;;  %v7657_v13 = vld [vmem:[#allocation23 + $0x184] ss:$8 sps:$4 sm:$0xff]  }
 0x7b7   :  { %v2395_v12 = vadd.f32 %v2391_v11, %v2358_v8  ;;  %v2360_v15 = vpop.f32.mrb[54].mxu1  ;;  %v7660_v8 = vld [vmem:[#allocation23 + $0x194] ss:$8 sps:$4 sm:$0xff]  }
 0x7b8   :  { %v2410_v16 = vmul.f32 0.2, %v2394_v14  ;;  %v2396_v17 = vadd.f32 %v2387_v10, %v2360_v15  ;;  %v2362_v18 = vpop.f32.mrb[55].mxu1  ;;  %vm2402_vm9 = vcmp.gt.f32.partialorder %v2394_v14, 0.0  ;;  %v7663_v15 = vld [vmem:[#allocation23 + $0x1a4] ss:$8 sps:$4 sm:$0xff]  }
 0x7b9   :  { %v2411_v19 = vmul.f32 0.2, %v2395_v12  ;;  %v2397_v20 = vadd.f32 %v2391_v11, %v2362_v18  ;;  %vm2403_vm10 = vcmp.gt.f32.partialorder %v2395_v12, 0.0  ;;  %v7664_v18 = vld [vmem:[#allocation23 + $0x1b0] ss:$8 sps:$4 sm:$0xff]  }
 0x7ba   :  { %vm2404_vm11 = vcmp.gt.f32.partialorder %v2396_v17, 0.0  ;;  %v2412_v21 = vmul.f32 0.2, %v2396_v17  ;;  %v2418_v23 = vsel %vm2402_vm9, %v2394_v14, %v2410_v16  ;;  %v7655_v14 = vld [vmem:[#allocation23 + $0x180] ss:$8 sps:$4 sm:$0xff]  }
 0x7bb   :  { %vm2405_vm12 = vcmp.gt.f32.partialorder %v2397_v20, 0.0  ;;  %v2413_v22 = vmul.f32 0.2, %v2397_v20  ;;  %v2419_v27 = vsel %vm2403_vm10, %v2395_v12, %v2411_v19  ;;  %v7658_v12 = vld [vmem:[#allocation23 + $0x190] ss:$8 sps:$4 sm:$0xff]  }
 0x7bc   :  { %v2420_v24 = vsel %vm2404_vm11, %v2396_v17, %v2412_v21  ;;  %v7661_v16 = vld [vmem:[#allocation23 + $0x1a0] ss:$8 sps:$4 sm:$0xff]   ;;  %v7666_v17 = vld [vmem:[#allocation23 + $0x1b4] ss:$8 sps:$4 sm:$0xff]  }
 0x7bd   :  { %v2427_v25 = vpack.c.bf16 %v2420_v24, %v2418_v23  ;;  %v2366_v26 = vpop.f32.mrb[56].mxu1  ;;  %v2421_v28 = vsel %vm2405_vm12, %v2397_v20, %v2413_v22  ;;  %v7667_v19 = vld [vmem:[#allocation23 + $0x1c0] ss:$8 sps:$4 sm:$0xff]   ;;  %v7669_v20 = vld [vmem:[#allocation23 + $0x1c4] ss:$8 sps:$4 sm:$0xff]  }
 0x7be   :  { %v2398_v29 = vadd.f32 %v2387_v10, %v2366_v26  ;;  %v2368_v30 = vpop.f32.mrb[57].mxu1  ;;  %v2428_v31 = vpack.c.bf16 %v2421_v28, %v2419_v27  ;;  %v7672_v21 = vld [vmem:[#allocation23 + $0x1d4] ss:$8 sps:$4 sm:$0xff]   ;;  %v7670_v22 = vld [vmem:[#allocation23 + $0x1d0] ss:$8 sps:$4 sm:$0xff]  }
 0x7bf   :  { %v2399_v32 = vadd.f32 %v2391_v11, %v2368_v30  ;;  %v2370_v33 = vpop.f32.mrb[58].mxu1  ;;  %v7673_v23 = vld [vmem:[#allocation23 + $0x1e0] ss:$8 sps:$4 sm:$0xff]   ;;  %v7675_v24 = vld [vmem:[#allocation23 + $0x1e4] ss:$8 sps:$4 sm:$0xff]  }
 0x7c0   :  { %v2414_v34 = vmul.f32 0.2, %v2398_v29  ;;  %v2400_v35 = vadd.f32 %v2387_v10, %v2370_v33  ;;  %v2372_v36 = vpop.f32.mrb[59].mxu1  ;;  %2459 = vmatprep.subr.bf16.mxu0 %v2428_v31  ;;  %3106 = vmatprep.subr.bf16.mxu1 %v2428_v31  ;;  %vm2406_vm13 = vcmp.gt.f32.partialorder %v2398_v29, 0.0  ;;  %v7654_v10 = vld [vmem:[#allocation23 + $0x174] ss:$8 sps:$4 sm:$0xff]  }
 0x7c1   :  { %v2415_v37 = vmul.f32 0.2, %v2399_v32  ;;  %v2401_v38 = vadd.f32 %v2391_v11, %v2372_v36  ;;  %2460 = vmatpush1.bf16.msra.mxu0 %v2427_v25  ;;  %3107 = vmatpush1.bf16.msra.mxu1 %v2427_v25  ;;  %vm2407_vm14 = vcmp.gt.f32.partialorder %v2399_v32, 0.0  ;;  %v7652_v11 = vld [vmem:[#allocation23 + $0x170] ss:$8 sps:$4 sm:$0xff]  }
 0x7c2   :  { %vm2408_vm15 = vcmp.gt.f32.partialorder %v2400_v35, 0.0  ;;  %v2416_v39 = vmul.f32 0.2, %v2400_v35  ;;  %v2422_v41 = vsel %vm2406_vm13, %v2398_v29, %v2414_v34  ;;  %v7676_v26 = vld [vmem:[#allocation23 + $0x1f0] ss:$8 sps:$4 sm:$0xff]  }
 0x7c3   :  { %vm2409_vm1 = vcmp.gt.f32.partialorder %v2401_v38, 0.0  ;;  %v2417_v40 = vmul.f32 0.2, %v2401_v38  ;;  %v2423_v43 = vsel %vm2407_vm14, %v2399_v32, %v2415_v37  ;;  %v7681_v27 = vld [vmem:[#allocation23 + $0x4] ss:$8 sps:$4 sm:$0xff]  }
 0x7c4   :  { %v2424_v42 = vsel %vm2408_vm15, %v2400_v35, %v2416_v39 }
 0x7c5   :  { %v2425_v44 = vsel %vm2409_vm1, %v2401_v38, %v2417_v40  ;;  %v2429_v45 = vpack.c.bf16 %v2424_v42, %v2422_v41 }
 0x7c6   :  { %v2430_v46 = vpack.c.bf16 %v2425_v44, %v2423_v43 }
 0x7c7   :  { %v2454_v47 = vsel %vm2452_vm2, %v2429_v45, 0 }
 0x7c8   :  { %6808 = vmatprep.subr.msk.bf16.mxu0 %vm2452_vm2, %v2430_v46  ;;  %6882 = vmatprep.subr.msk.bf16.mxu1 %vm2452_vm2, %v2430_v46 }
 0x7c9   :  { %2462 = vmatpush1.bf16.msra.mxu0 %v2454_v47  ;;  %3109 = vmatpush1.bf16.msra.mxu1 %v2454_v47 }
 0x7ca   :  { %2569 = vmatprep.subr.bf16.mxu0 %v2428_v31 }
 0x7cc   :  { %6809 = vmatmul.mubr.msk.bf16.vlgmr.msra.gmra.mrb[36].mxu0 %vm2445_vm3, %v7625_v48  ;;  %6883 = vmatmul.mubr.msk.bf16.vlgmr.msra.gmra.mrb[60].mxu1 %vm2445_vm3, %v7629_v49 }
 0x7cd   :  { %2570 = vmatpush1.bf16.msra.mxu0 %v2427_v25  ;;  %2501 = vmatprep.mubr.bf16.mxu0 %v8259_v57  ;;  %v7678_v25 = vld [vmem:[#allocation23 + $0x1f4] ss:$8 sps:$4 sm:$0xff]  }
 0x7ce   :  { %6813 = vmatprep.subr.msk.bf16.mxu0 %vm2452_vm2, %v2430_v46  ;;  %3148 = vmatprep.mubr.bf16.mxu1 %v8259_v57 }
 0x7d1   :  { %2572 = vmatpush1.bf16.msra.mxu0 %v2454_v47 }
 0x7d2   :  { %2819 = vmatprep.subr.bf16.mxu0 %v7633_v50 }
 0x7d4   :  { %6810 = vmatmul.mubr.msk.bf16.gmra.mrb[40].mxu0 %vm2445_vm3, %v7626_v51  ;;  %6884 = vmatmul.mubr.msk.bf16.gmra.mrb[64].mxu1 %vm2445_vm3, %v7630_v52  ;;  %v7679_v52 = vld [vmem:[#allocation23] ss:$8 sps:$4 sm:$0xff]  }
 0x7d5   :  { %2601 = vmatprep.mubr.bf16.mxu0 %v8259_v57 }
 0x7dc   :  { %6814 = vmatmul.mubr.msk.bf16.vlgmr.msra.gmra.mrb[44].mxu0 %vm2445_vm3, %v7627_v53  ;;  %v7684_v53 = vld [vmem:[#allocation23 + $0x14] ss:$8 sps:$4 sm:$0xff]  }
 0x7dd   :  { %2611 = vmatprep.mubr.bf16.mxu0 %v8259_v57  ;;  %2820 = vmatpush1.bf16.msra.mxu0 %v7631_v54 }
 0x7de   :  { %2821 = vmatprep.subr.bf16.mxu0 %v7636_v55 }
 0x7e1   :  { %2822 = vmatpush1.bf16.msra.mxu0 %v7634_v56 }
 0x7e2   :  { %2823 = vmatprep.subr.bf16.mxu0 %v7639_v58 }
 0x7e4   :  { %6815 = vmatmul.mubr.msk.bf16.gmra.mrb[48].mxu0 %vm2445_vm3, %v7628_v60  ;;  %v7682_v60 = vld [vmem:[#allocation23 + $0x10] ss:$8 sps:$4 sm:$0xff]  }
 0x7e5   :  { %2824 = vmatpush1.bf16.msra.mxu0 %v7637_v61 }
 0x7e6   :  { %2825 = vmatprep.subr.bf16.mxu0 %v7642_v62 }
 0x7e9   :  { %2826 = vmatpush1.bf16.msra.mxu0 %v7640_v0 }
 0x7ea   :  { %2827 = vmatprep.subr.bf16.mxu0 %v7645_v2  ;;  %v7687_v2 = vld [vmem:[#allocation23 + $0x24] ss:$8 sps:$4 sm:$0xff]  }
 0x7ed   :  { %2828 = vmatpush1.bf16.msra.mxu0 %v7643_v4 }
 0x7ee   :  { %2829 = vmatprep.subr.bf16.mxu0 %v7648_v5 }
 0x7f1   :  { %2830 = vmatpush1.bf16.msra.mxu0 %v7646_v59 }
 0x7f2   :  { %2831 = vmatprep.subr.bf16.mxu0 %v7651_v63 }
 0x7f5   :  { %2832 = vmatpush1.bf16.msra.mxu0 %v7649_v7 }
 0x7f6   :  { %2833 = vmatprep.subr.bf16.mxu0 %v7654_v10  ;;  %v7685_v10 = vld [vmem:[#allocation23 + $0x20] ss:$8 sps:$4 sm:$0xff]  }
 0x7f9   :  { %2834 = vmatpush1.bf16.msra.mxu0 %v7652_v11  ;;  %v7690_v11 = vld [vmem:[#allocation23 + $0x34] ss:$8 sps:$4 sm:$0xff]  }
 0x7fa   :  { %2835 = vmatprep.subr.bf16.mxu0 %v7657_v13  ;;  %v7688_v13 = vld [vmem:[#allocation23 + $0x30] ss:$8 sps:$4 sm:$0xff]  }
 0x7fd   :  { %2836 = vmatpush1.bf16.msra.mxu0 %v7655_v14  ;;  %v7693_v14 = vld [vmem:[#allocation23 + $0x44] ss:$8 sps:$4 sm:$0xff]  }
 0x7fe   :  { %2837 = vmatprep.subr.bf16.mxu0 %v7660_v8  ;;  %v7691_v8 = vld [vmem:[#allocation23 + $0x40] ss:$8 sps:$4 sm:$0xff]  }
 0x801   :  { %2838 = vmatpush1.bf16.msra.mxu0 %v7658_v12  ;;  %v7696_v12 = vld [vmem:[#allocation23 + $0x54] ss:$8 sps:$4 sm:$0xff]  }
 0x802   :  { %2839 = vmatprep.subr.bf16.mxu0 %v7663_v15  ;;  %v7694_v15 = vld [vmem:[#allocation23 + $0x50] ss:$8 sps:$4 sm:$0xff]  }
 0x805   :  { %2840 = vmatpush1.bf16.msra.mxu0 %v7661_v16  ;;  %v7699_v16 = vld [vmem:[#allocation23 + $0x64] ss:$8 sps:$4 sm:$0xff]  }
 0x806   :  { %2841 = vmatprep.subr.bf16.mxu0 %v7666_v17  ;;  %v7697_v17 = vld [vmem:[#allocation23 + $0x60] ss:$8 sps:$4 sm:$0xff]  }
 0x809   :  { %2842 = vmatpush1.bf16.msra.mxu0 %v7664_v18  ;;  %v7702_v18 = vld [vmem:[#allocation23 + $0x74] ss:$8 sps:$4 sm:$0xff]  }
 0x80a   :  { %2843 = vmatprep.subr.bf16.mxu0 %v7669_v20  ;;  %v7705_v20 = vld [vmem:[#allocation23 + $0x84] ss:$8 sps:$4 sm:$0xff]  }
 0x80d   :  { %2844 = vmatpush1.bf16.msra.mxu0 %v7667_v19  ;;  %v7700_v19 = vld [vmem:[#allocation23 + $0x70] ss:$8 sps:$4 sm:$0xff]  }
 0x80e   :  { %2845 = vmatprep.subr.bf16.mxu0 %v7672_v21  ;;  %v7703_v21 = vld [vmem:[#allocation23 + $0x80] ss:$8 sps:$4 sm:$0xff]  }
 0x811   :  { %2846 = vmatpush1.bf16.msra.mxu0 %v7670_v22  ;;  %v7708_v22 = vld [vmem:[#allocation23 + $0x94] ss:$8 sps:$4 sm:$0xff]  }
 0x812   :  { %2847 = vmatprep.subr.bf16.mxu0 %v7675_v24  ;;  %v7711_v24 = vld [vmem:[#allocation23 + $0xa4] ss:$8 sps:$4 sm:$0xff]  }
 0x815   :  { %2848 = vmatpush1.bf16.msra.mxu0 %v7673_v23  ;;  %v7706_v23 = vld [vmem:[#allocation23 + $0x90] ss:$8 sps:$4 sm:$0xff]  }
 0x816   :  { %2849 = vmatprep.subr.bf16.mxu0 %v7678_v25  ;;  %v7709_v25 = vld [vmem:[#allocation23 + $0xa0] ss:$8 sps:$4 sm:$0xff]  }
 0x819   :  { %2850 = vmatpush1.bf16.msra.mxu0 %v7676_v26  ;;  %v7714_v26 = vld [vmem:[#allocation23 + $0xb4] ss:$8 sps:$4 sm:$0xff]  }
 0x81a   :  { %3032 = vmatprep.subr.bf16.mxu0 %v7681_v27  ;;  %v7712_v27 = vld [vmem:[#allocation23 + $0xb0] ss:$8 sps:$4 sm:$0xff]  }
 0x89f   :  { %v8911_v28 = vpop.f32.mrb[36].mxu0  ;;  %v8929_v40 = vpop.f32.mrb[60].mxu1 }
 0x8a0   :  { %v2495_v29 = vpop.f32.mrb[37].mxu0  ;;  %v8931_v41 = vpop.f32.mrb[61].mxu1 }
 0x8a1   :  { %v8913_v30 = vpop.f32.mrb[38].mxu0  ;;  %v8933_v42 = vpop.f32.mrb[62].mxu1 }
 0x8a2   :  { %v2512_v31 = vpack.c.bf16 %v8913_v30, %v8911_v28  ;;  %v2499_v32 = vpop.f32.mrb[39].mxu0  ;;  %v3159_v44 = vpack.c.bf16 %v8933_v42, %v8929_v40  ;;  %v8937_v45 = vpop.f32.mrb[63].mxu1  ;;  %v7741_v28 = vld [vmem:[#allocation23 + $0x244] ss:$8 sps:$4 sm:$0xff]   ;;  %v7739_v30 = vld [vmem:[#allocation23 + $0x240] ss:$8 sps:$4 sm:$0xff]  }
 0x8a3   :  { %v2513_v33 = vpack.c.bf16 %v2499_v32, %v2495_v29  ;;  %v3160_v47 = vpack.c.bf16 %v8937_v45, %v8931_v41  ;;  %v7717_v29 = vld [vmem:[#allocation23 + $0xc4] ss:$8 sps:$4 sm:$0xff]   ;;  %v7715_v32 = vld [vmem:[#allocation23 + $0xc0] ss:$8 sps:$4 sm:$0xff]   ;;  %v7756_v45 = vld [vmem:[#allocation23 + $0x294] ss:$8 sps:$4 sm:$0xff]  }
 0x8a4   :  { %v7751_v41 = vld [vmem:[#allocation23 + $0x280] ss:$8 sps:$4 sm:$0xff]  }
 0x8a7   :  { %v8917_v34 = vpop.f32.mrb[40].mxu0  ;;  %v8941_v54 = vpop.f32.mrb[64].mxu1 }
 0x8a8   :  { %v8919_v35 = vpop.f32.mrb[41].mxu0  ;;  %v8943_v55 = vpop.f32.mrb[65].mxu1 }
 0x8a9   :  { %v8921_v36 = vpop.f32.mrb[42].mxu0  ;;  %v8945_v56 = vpop.f32.mrb[66].mxu1 }
 0x8aa   :  { %v2514_v37 = vpack.c.bf16 %v8921_v36, %v8917_v34  ;;  %v8925_v38 = vpop.f32.mrb[43].mxu0  ;;  %v3161_v61 = vpack.c.bf16 %v8945_v56, %v8941_v54  ;;  %v8949_v62 = vpop.f32.mrb[67].mxu1  ;;  %v7750_v34 = vld [vmem:[#allocation23 + $0x274] ss:$8 sps:$4 sm:$0xff]   ;;  %v7748_v36 = vld [vmem:[#allocation23 + $0x270] ss:$8 sps:$4 sm:$0xff]  }
 0x8ab   :  { %v2515_v39 = vpack.c.bf16 %v8925_v38, %v8919_v35  ;;  %v3162_v4 = vpack.c.bf16 %v8949_v62, %v8943_v55  ;;  %v7742_v35 = vld [vmem:[#allocation23 + $0x250] ss:$8 sps:$4 sm:$0xff]   ;;  %v7747_v38 = vld [vmem:[#allocation23 + $0x264] ss:$8 sps:$4 sm:$0xff]  }
 0x8af   :  { %v2603_v43 = vpop.f32.mrb[44].mxu0 }
 0x8b0   :  { %v2605_v46 = vpop.f32.mrb[45].mxu0 }
 0x8b1   :  { %v2607_v48 = vpop.f32.mrb[46].mxu0 }
 0x8b2   :  { %v2622_v49 = vpack.c.bf16 %v2607_v48, %v2603_v43  ;;  %v2609_v50 = vpop.f32.mrb[47].mxu0  ;;  %v7718_v43 = vld [vmem:[#allocation23 + $0xd0] ss:$8 sps:$4 sm:$0xff]   ;;  %v7721_v48 = vld [vmem:[#allocation23 + $0xe0] ss:$8 sps:$4 sm:$0xff]  }
 0x8b3   :  { %v2623_v51 = vpack.c.bf16 %v2609_v50, %v2605_v46  ;;  %v7723_v46 = vld [vmem:[#allocation23 + $0xe4] ss:$8 sps:$4 sm:$0xff]   ;;  %v7724_v50 = vld [vmem:[#allocation23 + $0xf0] ss:$8 sps:$4 sm:$0xff]  }
 0x8b5   :  { %2851 = vmatprep.mubr.bf16.mxu0 %v2623_v51  ;;  %v7729_v51 = vld [vmem:[#allocation23 + $0x204] ss:$8 sps:$4 sm:$0xff]  }
 0x8b6   :  { %2852 = vmatmul.mubr.bf16.vlgmr.msra.gmra.mrb[52].mxu0 %v2622_v49  ;;  %v7726_v49 = vld [vmem:[#allocation23 + $0xf4] ss:$8 sps:$4 sm:$0xff]  }
 0x8b7   :  { %3033 = vmatpush1.bf16.msra.mxu0 %v7679_v52  ;;  %v2613_v58 = vpop.f32.mrb[48].mxu0  ;;  %v7727_v52 = vld [vmem:[#allocation23 + $0x200] ss:$8 sps:$4 sm:$0xff]  }
 0x8b8   :  { %v2615_v0 = vpop.f32.mrb[49].mxu0  ;;  %3034 = vmatprep.subr.bf16.mxu0 %v7684_v53  ;;  %v7732_v53 = vld [vmem:[#allocation23 + $0x214] ss:$8 sps:$4 sm:$0xff]  }
 0x8b9   :  { %v2617_v5 = vpop.f32.mrb[50].mxu0 }
 0x8ba   :  { %v2624_v59 = vpack.c.bf16 %v2617_v5, %v2613_v58  ;;  %v2619_v63 = vpop.f32.mrb[51].mxu0  ;;  %v7730_v58 = vld [vmem:[#allocation23 + $0x210] ss:$8 sps:$4 sm:$0xff]  }
 0x8bb   :  { %v2625_v7 = vpack.c.bf16 %v2619_v63, %v2615_v0  ;;  %3035 = vmatpush1.bf16.msra.mxu0 %v7682_v60  ;;  %v7735_v60 = vld [vmem:[#allocation23 + $0x224] ss:$8 sps:$4 sm:$0xff]   ;;  %v7733_v0 = vld [vmem:[#allocation23 + $0x220] ss:$8 sps:$4 sm:$0xff]   ;;  %v7736_v5 = vld [vmem:[#allocation23 + $0x230] ss:$8 sps:$4 sm:$0xff]  }
 0x8bc   :  { %3036 = vmatprep.subr.bf16.mxu0 %v7687_v2  ;;  %v7738_v2 = vld [vmem:[#allocation23 + $0x234] ss:$8 sps:$4 sm:$0xff]   ;;  %v7757_v63 = vld [vmem:[#allocation23 + $0x2a0] ss:$8 sps:$4 sm:$0xff]  }
 0x8bd   :  { %2861 = vmatprep.mubr.bf16.mxu0 %v2625_v7  ;;  %v7762_v7 = vld [vmem:[#allocation23 + $0x2b4] ss:$8 sps:$4 sm:$0xff]  }
 0x8be   :  { %2862 = vmatmul.mubr.bf16.gmra.mrb[56].mxu0 %v2624_v59  ;;  %v7759_v59 = vld [vmem:[#allocation23 + $0x2a4] ss:$8 sps:$4 sm:$0xff]  }
 0x8bf   :  { %3037 = vmatpush1.bf16.msra.mxu0 %v7685_v10  ;;  %3064 = vmatprep.mubr.bf16.mxu0 %v2513_v33  ;;  %v7720_v33 = vld [vmem:[#allocation23 + $0xd4] ss:$8 sps:$4 sm:$0xff]   ;;  %v7760_v10 = vld [vmem:[#allocation23 + $0x2b0] ss:$8 sps:$4 sm:$0xff]  }
 0x8c0   :  { %3038 = vmatprep.subr.bf16.mxu0 %v7690_v11  ;;  %v7765_v11 = vld [vmem:[#allocation23 + $0x2c4] ss:$8 sps:$4 sm:$0xff]  }
 0x8c3   :  { %3039 = vmatpush1.bf16.msra.mxu0 %v7688_v13  ;;  %v7763_v13 = vld [vmem:[#allocation23 + $0x2c0] ss:$8 sps:$4 sm:$0xff]  }
 0x8c4   :  { %3040 = vmatprep.subr.bf16.mxu0 %v7693_v14  ;;  %v7768_v14 = vld [vmem:[#allocation23 + $0x2d4] ss:$8 sps:$4 sm:$0xff]  }
 0x8c7   :  { %3041 = vmatpush1.bf16.msra.mxu0 %v7691_v8  ;;  %v7766_v8 = vld [vmem:[#allocation23 + $0x2d0] ss:$8 sps:$4 sm:$0xff]  }
 0x8c8   :  { %3042 = vmatprep.subr.bf16.mxu0 %v7696_v12  ;;  %v7771_v12 = vld [vmem:[#allocation23 + $0x2e4] ss:$8 sps:$4 sm:$0xff]  }
 0x8cb   :  { %3043 = vmatpush1.bf16.msra.mxu0 %v7694_v15  ;;  %v7769_v15 = vld [vmem:[#allocation23 + $0x2e0] ss:$8 sps:$4 sm:$0xff]  }
 0x8cc   :  { %3044 = vmatprep.subr.bf16.mxu0 %v7699_v16  ;;  %v7774_v16 = vld [vmem:[#allocation23 + $0x2f4] ss:$8 sps:$4 sm:$0xff]  }
 0x8cf   :  { %3045 = vmatpush1.bf16.msra.mxu0 %v7697_v17  ;;  %v7772_v17 = vld [vmem:[#allocation23 + $0x2f0] ss:$8 sps:$4 sm:$0xff]  }
 0x8d0   :  { %3046 = vmatprep.subr.bf16.mxu0 %v7702_v18  ;;  %v2426_v18 = vld [vmem:[#allocation24] sm:$0x3] }
 0x8d3   :  { %3047 = vmatpush1.bf16.msra.mxu0 %v7700_v19  ;;  %v3421_v19 = vrot.slane %v2426_v18, %v8890_v6 }
 0x8d4   :  { %3048 = vmatprep.subr.bf16.mxu0 %v7705_v20  ;;  %v3425_v20 = vrot.slane %v2426_v18, %v8893_v9 }
 0x8d7   :  { %3049 = vmatpush1.bf16.msra.mxu0 %v7703_v21 }
 0x8d8   :  { %3050 = vmatprep.subr.bf16.mxu0 %v7708_v22 }
 0x8db   :  { %3051 = vmatpush1.bf16.msra.mxu0 %v7706_v23 }
 0x8dc   :  { %3052 = vmatprep.subr.bf16.mxu0 %v7711_v24 }
 0x8df   :  { %3053 = vmatpush1.bf16.msra.mxu0 %v7709_v25 }
 0x8e0   :  { %3054 = vmatprep.subr.bf16.mxu0 %v7714_v26 }
 0x8e3   :  { %3055 = vmatpush1.bf16.msra.mxu0 %v7712_v27 }
 0x8e4   :  { %3056 = vmatprep.subr.bf16.mxu0 %v7717_v29 }
 0x8e7   :  { %3057 = vmatpush1.bf16.msra.mxu0 %v7715_v32 }
 0x8e8   :  { %3058 = vmatprep.subr.bf16.mxu0 %v7720_v33 }
 0x8eb   :  { %3059 = vmatpush1.bf16.msra.mxu0 %v7718_v43 }
 0x8ec   :  { %3060 = vmatprep.subr.bf16.mxu0 %v7723_v46 }
 0x8ef   :  { %3061 = vmatpush1.bf16.msra.mxu0 %v7721_v48 }
 0x8f0   :  { %3062 = vmatprep.subr.bf16.mxu0 %v7726_v49 }
 0x8f3   :  { %3063 = vmatpush1.bf16.msra.mxu0 %v7724_v50 }
 0x8f4   :  { %3356 = vmatprep.subr.bf16.mxu0 %v7729_v51 }
 0x8f6   :  { %3065 = vmatmul.mubr.bf16.vlgmr.msra.gmra.mrb[52].mxu0 %v2512_v31  ;;  %v7744_v31 = vld [vmem:[#allocation23 + $0x254] ss:$8 sps:$4 sm:$0xff]  }
 0x8f7   :  { %3074 = vmatprep.mubr.bf16.mxu0 %v2515_v39  ;;  %3357 = vmatpush1.bf16.msra.mxu0 %v7727_v52  ;;  %v7745_v39 = vld [vmem:[#allocation23 + $0x260] ss:$8 sps:$4 sm:$0xff]  }
 0x8f8   :  { %3358 = vmatprep.subr.bf16.mxu0 %v7732_v53 }
 0x8fb   :  { %3359 = vmatpush1.bf16.msra.mxu0 %v7730_v58 }
 0x8fc   :  { %3360 = vmatprep.subr.bf16.mxu0 %v7735_v60 }
 0x8fe   :  { %3075 = vmatmul.mubr.bf16.gmra.mrb[56].mxu0 %v2514_v37  ;;  %v7753_v37 = vld [vmem:[#allocation23 + $0x284] ss:$8 sps:$4 sm:$0xff]  }
 0x8ff   :  { %3361 = vmatpush1.bf16.msra.mxu0 %v7733_v0  ;;  %3388 = vmatprep.mubr.bf16.mxu0 %v3160_v47  ;;  %v7754_v47 = vld [vmem:[#allocation23 + $0x290] ss:$8 sps:$4 sm:$0xff]  }
 0x900   :  { %3362 = vmatprep.subr.bf16.mxu0 %v7738_v2 }
 0x903   :  { %3363 = vmatpush1.bf16.msra.mxu0 %v7736_v5 }
 0x904   :  { %3364 = vmatprep.subr.bf16.mxu0 %v7741_v28 }
 0x907   :  { %3365 = vmatpush1.bf16.msra.mxu0 %v7739_v30 }
 0x908   :  { %3366 = vmatprep.subr.bf16.mxu0 %v7744_v31 }
 0x90b   :  { %3367 = vmatpush1.bf16.msra.mxu0 %v7742_v35 }
 0x90c   :  { %3368 = vmatprep.subr.bf16.mxu0 %v7747_v38 }
 0x90f   :  { %3369 = vmatpush1.bf16.msra.mxu0 %v7745_v39 }
 0x910   :  { %3370 = vmatprep.subr.bf16.mxu0 %v7750_v34 }
 0x913   :  { %3371 = vmatpush1.bf16.msra.mxu0 %v7748_v36 }
 0x914   :  { %3372 = vmatprep.subr.bf16.mxu0 %v7753_v37 }
 0x917   :  { %3373 = vmatpush1.bf16.msra.mxu0 %v7751_v41 }
 0x918   :  { %3374 = vmatprep.subr.bf16.mxu0 %v7756_v45 }
 0x91b   :  { %3375 = vmatpush1.bf16.msra.mxu0 %v7754_v47 }
 0x91c   :  { %3376 = vmatprep.subr.bf16.mxu0 %v7759_v59 }
 0x91f   :  { %3377 = vmatpush1.bf16.msra.mxu0 %v7757_v63 }
 0x920   :  { %3378 = vmatprep.subr.bf16.mxu0 %v7762_v7 }
 0x923   :  { %3379 = vmatpush1.bf16.msra.mxu0 %v7760_v10 }
 0x924   :  { %3380 = vmatprep.subr.bf16.mxu0 %v7765_v11 }
 0x927   :  { %3381 = vmatpush1.bf16.msra.mxu0 %v7763_v13 }
 0x928   :  { %3382 = vmatprep.subr.bf16.mxu0 %v7768_v14 }
 0x92b   :  { %3383 = vmatpush1.bf16.msra.mxu0 %v7766_v8 }
 0x92c   :  { %3384 = vmatprep.subr.bf16.mxu0 %v7771_v12 }
 0x92f   :  { %3385 = vmatpush1.bf16.msra.mxu0 %v7769_v15 }
 0x930   :  { %3386 = vmatprep.subr.bf16.mxu0 %v7774_v16 }
 0x933   :  { %3387 = vmatpush1.bf16.msra.mxu0 %v7772_v17 }
 0x936   :  { %3389 = vmatmul.mubr.bf16.vlgmr.msra.gmra.mrb[52].mxu0 %v3159_v44 }
 0x937   :  { %3398 = vmatprep.mubr.bf16.mxu0 %v3162_v4 }
 0x93e   :  { %3399 = vmatmul.mubr.bf16.gmra.mrb[56].mxu0 %v3161_v61 }
 0xa09   :  { %v3390_v21 = vpop.f32.mrb[52].mxu0 }
 0xa0a   :  { %v3428_v22 = vadd.f32 %v3421_v19, %v3390_v21  ;;  %v3392_v23 = vpop.f32.mrb[53].mxu0 }
 0xa0b   :  { %v3429_v24 = vadd.f32 %v3425_v20, %v3392_v23  ;;  %v3394_v25 = vpop.f32.mrb[54].mxu0 }
 0xa0c   :  { %vm3436_vm4 = vcmp.gt.f32.partialorder %v3428_v22, 0.0  ;;  %v3444_v40 = vmul.f32 0.2, %v3428_v22  ;;  %v3430_v42 = vadd.f32 %v3421_v19, %v3394_v25  ;;  %v3396_v44 = vpop.f32.mrb[55].mxu0 }
 0xa0d   :  { %vm3437_vm5 = vcmp.gt.f32.partialorder %v3429_v24, 0.0  ;;  %v3445_v55 = vmul.f32 0.2, %v3429_v24  ;;  %v3431_v62 = vadd.f32 %v3425_v20, %v3396_v44 }
 0xa0e   :  { %v3452_v4 = vsel %vm3436_vm4, %v3428_v22, %v3444_v40  ;;  %vm3438_vm6 = vcmp.gt.f32.partialorder %v3430_v42, 0.0  ;;  %v3446_v54 = vmul.f32 0.2, %v3430_v42 }
 0xa0f   :  { %v3453_v56 = vsel %vm3437_vm5, %v3429_v24, %v3445_v55  ;;  %vm3439_vm8 = vcmp.gt.f32.partialorder %v3431_v62, 0.0  ;;  %v3447_v61 = vmul.f32 0.2, %v3431_v62 }
 0xa10   :  { %v3454_v26 = vsel %vm3438_vm6, %v3430_v42, %v3446_v54 }
 0xa11   :  { %v3455_v27 = vsel %vm3439_vm8, %v3431_v62, %v3447_v61  ;;  %v3400_v29 = vpop.f32.mrb[56].mxu0 }
 0xa12   :  { %v3432_v32 = vadd.f32 %v3421_v19, %v3400_v29  ;;  %v3402_v33 = vpop.f32.mrb[57].mxu0 }
 0xa13   :  { %v3433_v43 = vadd.f32 %v3425_v20, %v3402_v33  ;;  %v3404_v46 = vpop.f32.mrb[58].mxu0 }
 0xa14   :  { %vm3440_vm9 = vcmp.gt.f32.partialorder %v3432_v32, 0.0  ;;  %v3448_v48 = vmul.f32 0.2, %v3432_v32  ;;  %v3434_v49 = vadd.f32 %v3421_v19, %v3404_v46  ;;  %v3406_v50 = vpop.f32.mrb[59].mxu0 }
 0xa15   :  { %vm3441_vm10 = vcmp.gt.f32.partialorder %v3433_v43, 0.0  ;;  %v3449_v51 = vmul.f32 0.2, %v3433_v43  ;;  %v3435_v52 = vadd.f32 %v3425_v20, %v3406_v50 }
 0xa16   :  { %v3456_v53 = vsel %vm3440_vm9, %v3432_v32, %v3448_v48  ;;  %vm3442_vm11 = vcmp.gt.f32.partialorder %v3434_v49, 0.0  ;;  %v3450_v58 = vmul.f32 0.2, %v3434_v49 }
 0xa17   :  { %v3457_v60 = vsel %vm3441_vm10, %v3433_v43, %v3449_v51  ;;  %vm3443_vm12 = vcmp.gt.f32.partialorder %v3435_v52, 0.0  ;;  %v3451_v0 = vmul.f32 0.2, %v3435_v52 }
 0xa18   :  { %v3458_v2 = vsel %vm3442_vm11, %v3434_v49, %v3450_v58 }
 0xa19   :  { %v3459_v5 = vsel %vm3443_vm12, %v3435_v52, %v3451_v0 }
 0xa1a   :  { %8215 = dma.done.wait [#allocation5], 32768 }
 0xa1b   :  { %8216 = vsyncadd [#allocation5], 4294934528  ;;  %v3467_v28 = vpack.c.bf16 %v3455_v27, %v3453_v56  ;;  %v8976_v30 = vpack.c.bf16 %v3454_v26, %v3452_v4  ;;  %v8978_v31 = vpack.c.bf16 %v3459_v5, %v3457_v60  ;;  %3640 = vmatprep.mubr.bf16.mxu1 %v8259_v57  ;;  %3520 = vmatprep.mubr.bf16.mxu0 %v8259_v57  ;;  %vm3481_vm13 = vcmask 1044480   ;;  %v7775_v39 = vld [vmem:[%s9335_s14 + $0x8] sm:$0x1f]   ;;  %v3654_v37 = vld [vmem:[#allocation2 + $0x200] sm:$0xff] }
 0xa1c   :  { %v3468_v35 = vpack.c.bf16 %v3458_v2, %v3456_v53  ;;  %vm3477_vm14 = vcmask 211968   ;;  %v7776_v34 = vld [vmem:[%s9335_s14] sm:$0x1f]   ;;  %v3655_v36 = vld [vmem:[#allocation2 + $0x208] sm:$0xff]  ;;  %v3657_v56 = vld [vmem:[#allocation2 + $0x218] sm:$0xff] }
 0xa1d   :  { %3608 = vmatprep.subr.bf16.mxu1 %v3467_v28  ;;  %3488 = vmatprep.subr.bf16.mxu0 %v3467_v28  ;;  %v3659_v41 = vld [vmem:[#allocation2 + $0x228] sm:$0xff]  ;;  %v3658_v45 = vld [vmem:[#allocation2 + $0x220] sm:$0xff]  ;;  %v7777_v61 = vld [vmem:[%s9335_s14 + $0x10] sm:$0x1f]  }
 0xa1e   :  { %3609 = vmatpush1.bf16.msra.mxu1 %v8976_v30  ;;  %3489 = vmatpush1.bf16.msra.mxu0 %v8976_v30  ;;  %v8987_v38 = vsel %vm3481_vm13, %v3468_v35, 0  ;;  %v3663_v47 = vld [vmem:[#allocation2 + $0x248] sm:$0xff]  ;;  %v3662_v59 = vld [vmem:[#allocation2 + $0x240] sm:$0xff]  ;;  %v3656_v53 = vld [vmem:[#allocation2 + $0x210] sm:$0xff] }
 0xa1f   :  { %6923 = vmatprep.subr.msk.bf16.mxu1 %vm3481_vm13, %v8978_v31  ;;  %6918 = vmatprep.subr.msk.bf16.mxu0 %vm3481_vm13, %v8978_v31  ;;  %v3667_v63 = vld [vmem:[#allocation2 + $0x268] sm:$0xff]  ;;  %v3666_v7 = vld [vmem:[#allocation2 + $0x260] sm:$0xff]  ;;  %v3661_v58 = vld [vmem:[#allocation2 + $0x238] sm:$0xff] }
 0xa20   :  { %v3671_v10 = vld [vmem:[#allocation2 + $0x288] sm:$0xff]  ;;  %v3670_v11 = vld [vmem:[#allocation2 + $0x280] sm:$0xff]  ;;  %v3660_v60 = vld [vmem:[#allocation2 + $0x230] sm:$0xff] }
 0xa21   :  { %v3675_v13 = vld [vmem:[#allocation2 + $0x2a8] sm:$0xff]  ;;  %v3674_v14 = vld [vmem:[#allocation2 + $0x2a0] sm:$0xff]  ;;  %v3665_v0 = vld [vmem:[#allocation2 + $0x258] sm:$0xff] }
 0xa22   :  { %3611 = vmatpush1.bf16.msra.mxu1 %v8987_v38  ;;  %3491 = vmatpush1.bf16.msra.mxu0 %v8987_v38  ;;  %v3679_v8 = vld [vmem:[#allocation2 + $0x2c8] sm:$0xff]  ;;  %v3678_v12 = vld [vmem:[#allocation2 + $0x2c0] sm:$0xff]  ;;  %v3664_v2 = vld [vmem:[#allocation2 + $0x250] sm:$0xff] }
 0xa23   :  { %3901 = vmatprep.subr.bf16.mxu0 %v3467_v28  ;;  %3718 = vmatprep.subr.bf16.mxu1 %v3655_v36  ;;  %v3683_v15 = vld [vmem:[#allocation2 + $0x2e8] sm:$0xff]  ;;  %v3682_v16 = vld [vmem:[#allocation2 + $0x2e0] sm:$0xff]  ;;  %v3669_v5 = vld [vmem:[#allocation2 + $0x278] sm:$0xff] }
 0xa24   :  { %v3687_v17 = vld [vmem:[#allocation2 + $0x308] sm:$0xff]  ;;  %v3686_v18 = vld [vmem:[#allocation2 + $0x300] sm:$0xff]  ;;  %v3677_v35 = vld [vmem:[#allocation2 + $0x2b8] sm:$0xff] }
 0xa25   :  { %6924 = vmatmul.mubr.msk.bf16.vlgmr.msra.gmra.mrb[68].mxu1 %vm3477_vm14, %v7775_v39  ;;  %6919 = vmatmul.mubr.msk.bf16.vlgmr.msra.gmra.mrb[60].mxu0 %vm3477_vm14, %v7776_v34  ;;  %v3691_v19 = vld [vmem:[#allocation2 + $0x328] sm:$0xff]  ;;  %v3690_v20 = vld [vmem:[#allocation2 + $0x320] sm:$0xff]  ;;  %v3681_v39 = vld [vmem:[#allocation2 + $0x2d8] sm:$0xff] }
 0xa26   :  { %3902 = vmatpush1.bf16.msra.mxu0 %v8976_v30  ;;  %3719 = vmatpush1.bf16.msra.mxu1 %v3654_v37  ;;  %v3695_v21 = vld [vmem:[#allocation2 + $0x348] sm:$0xff]  ;;  %v3694_v22 = vld [vmem:[#allocation2 + $0x340] sm:$0xff]  ;;  %v3680_v34 = vld [vmem:[#allocation2 + $0x2d0] sm:$0xff] }
 0xa27   :  { %6928 = vmatprep.subr.msk.bf16.mxu0 %vm3481_vm13, %v8978_v31  ;;  %3720 = vmatprep.subr.bf16.mxu1 %v3659_v41  ;;  %v3699_v23 = vld [vmem:[#allocation2 + $0x368] sm:$0xff]  ;;  %v3698_v24 = vld [vmem:[#allocation2 + $0x360] sm:$0xff]  ;;  %v3685_v36 = vld [vmem:[#allocation2 + $0x2f8] sm:$0xff] }
 0xa28   :  { %3933 = vmatprep.mubr.bf16.mxu0 %v8259_v57  ;;  %v3703_v25 = vld [vmem:[#allocation2 + $0x388] sm:$0xff]  ;;  %v3702_v40 = vld [vmem:[#allocation2 + $0x380] sm:$0xff]  ;;  %v3684_v37 = vld [vmem:[#allocation2 + $0x2f0] sm:$0xff] }
 0xa29   :  { %v3707_v42 = vld [vmem:[#allocation2 + $0x3a8] sm:$0xff]  ;;  %v3706_v44 = vld [vmem:[#allocation2 + $0x3a0] sm:$0xff]  ;;  %v3689_v41 = vld [vmem:[#allocation2 + $0x318] sm:$0xff] }
 0xa2a   :  { %3904 = vmatpush1.bf16.msra.mxu0 %v8987_v38  ;;  %3721 = vmatpush1.bf16.msra.mxu1 %v3658_v45  ;;  %v3711_v55 = vld [vmem:[#allocation2 + $0x3c8] sm:$0xff]  ;;  %v3710_v62 = vld [vmem:[#allocation2 + $0x3c0] sm:$0xff]  ;;  %v3688_v45 = vld [vmem:[#allocation2 + $0x310] sm:$0xff] }
 0xa2b   :  { %4116 = vmatprep.subr.bf16.mxu0 %v3467_v28  ;;  %3722 = vmatprep.subr.bf16.mxu1 %v3663_v47  ;;  %v3715_v4 = vld [vmem:[#allocation2 + $0x3e8] sm:$0xff]  ;;  %v3714_v54 = vld [vmem:[#allocation2 + $0x3e0] sm:$0xff]  ;;  %v3668_v28 = vld [vmem:[#allocation2 + $0x270] sm:$0xff] }
 0xa2c   :  { %v3693_v47 = vld [vmem:[#allocation2 + $0x338] sm:$0xff] }
 0xa2d   :  { %6929 = vmatmul.mubr.msk.bf16.vlgmr.msra.gmra.mrb[64].mxu0 %vm3477_vm14, %v7777_v61  ;;  %v3562_v61 = vld [vmem:[#allocation2 + $0xe8] sm:$0xff] }
 0xa2e   :  { %3723 = vmatpush1.bf16.msra.mxu1 %v3662_v59  ;;  %4117 = vmatpush1.bf16.msra.mxu0 %v8976_v30  ;;  %v3673_v30 = vld [vmem:[#allocation2 + $0x298] sm:$0xff]  ;;  %v3692_v59 = vld [vmem:[#allocation2 + $0x330] sm:$0xff] }
 0xa2f   :  { %3724 = vmatprep.subr.bf16.mxu1 %v3667_v63  ;;  %4148 = vmatprep.mubr.bf16.mxu0 %v8259_v57  ;;  %v7778_v63 = vld [vmem:[%s9335_s14 + $0x18] sm:$0x1f]  }
 0xa30   :  { %6933 = vmatprep.subr.msk.bf16.mxu0 %vm3481_vm13, %v8978_v31  ;;  %v3672_v31 = vld [vmem:[#allocation2 + $0x290] sm:$0xff] }
 0xa32   :  { %3725 = vmatpush1.bf16.msra.mxu1 %v3666_v7  ;;  %4119 = vmatpush1.bf16.msra.mxu0 %v8987_v38  ;;  %v3676_v38 = vld [vmem:[#allocation2 + $0x2b0] sm:$0xff]  ;;  %v3697_v7 = vld [vmem:[#allocation2 + $0x358] sm:$0xff] }
 0xa33   :  { %3726 = vmatprep.subr.bf16.mxu1 %v3671_v10  ;;  %v3696_v10 = vld [vmem:[#allocation2 + $0x350] sm:$0xff] }
 0xa35   :  { %6934 = vmatmul.mubr.msk.bf16.vlgmr.msra.gmra.mrb[68].mxu0 %vm3477_vm14, %v7778_v63  ;;  %v3548_v63 = vld [vmem:[#allocation2 + $0x78] sm:$0xff] }
 0xa36   :  { %3727 = vmatpush1.bf16.msra.mxu1 %v3670_v11  ;;  %v3701_v11 = vld [vmem:[#allocation2 + $0x378] sm:$0xff] }
 0xa37   :  { %3728 = vmatprep.subr.bf16.mxu1 %v3675_v13  ;;  %v3700_v13 = vld [vmem:[#allocation2 + $0x370] sm:$0xff] }
 0xa3a   :  { %3729 = vmatpush1.bf16.msra.mxu1 %v3674_v14  ;;  %v3705_v14 = vld [vmem:[#allocation2 + $0x398] sm:$0xff] }
 0xa3b   :  { %3730 = vmatprep.subr.bf16.mxu1 %v3679_v8  ;;  %v3704_v8 = vld [vmem:[#allocation2 + $0x390] sm:$0xff] }
 0xa3e   :  { %3731 = vmatpush1.bf16.msra.mxu1 %v3678_v12  ;;  %v3709_v12 = vld [vmem:[#allocation2 + $0x3b8] sm:$0xff] }
 0xa3f   :  { %3732 = vmatprep.subr.bf16.mxu1 %v3683_v15  ;;  %v3708_v15 = vld [vmem:[#allocation2 + $0x3b0] sm:$0xff] }
 0xa42   :  { %3733 = vmatpush1.bf16.msra.mxu1 %v3682_v16  ;;  %v3713_v16 = vld [vmem:[#allocation2 + $0x3d8] sm:$0xff] }
 0xa43   :  { %3734 = vmatprep.subr.bf16.mxu1 %v3687_v17  ;;  %v3712_v17 = vld [vmem:[#allocation2 + $0x3d0] sm:$0xff] }
 0xa46   :  { %3735 = vmatpush1.bf16.msra.mxu1 %v3686_v18  ;;  %v3717_v18 = vld [vmem:[#allocation2 + $0x3f8] sm:$0xff] }
 0xa47   :  { %3736 = vmatprep.subr.bf16.mxu1 %v3691_v19  ;;  %v3716_v19 = vld [vmem:[#allocation2 + $0x3f0] sm:$0xff] }
 0xa4a   :  { %3737 = vmatpush1.bf16.msra.mxu1 %v3690_v20  ;;  %v3534_v20 = vld [vmem:[#allocation2 + $0x8] sm:$0xff] }
 0xa4b   :  { %3738 = vmatprep.subr.bf16.mxu1 %v3695_v21  ;;  %v3533_v21 = vld [vmem:[#allocation2] sm:$0xff] }
 0xa4e   :  { %3739 = vmatpush1.bf16.msra.mxu1 %v3694_v22  ;;  %v3538_v22 = vld [vmem:[#allocation2 + $0x28] sm:$0xff] }
 0xa4f   :  { %3740 = vmatprep.subr.bf16.mxu1 %v3699_v23  ;;  %v3537_v23 = vld [vmem:[#allocation2 + $0x20] sm:$0xff] }
 0xa52   :  { %3741 = vmatpush1.bf16.msra.mxu1 %v3698_v24  ;;  %v3542_v24 = vld [vmem:[#allocation2 + $0x48] sm:$0xff] }
 0xa53   :  { %3742 = vmatprep.subr.bf16.mxu1 %v3703_v25  ;;  %v3541_v25 = vld [vmem:[#allocation2 + $0x40] sm:$0xff] }
 0xa56   :  { %3743 = vmatpush1.bf16.msra.mxu1 %v3702_v40  ;;  %v3546_v40 = vld [vmem:[#allocation2 + $0x68] sm:$0xff] }
 0xa57   :  { %3744 = vmatprep.subr.bf16.mxu1 %v3707_v42  ;;  %v3545_v42 = vld [vmem:[#allocation2 + $0x60] sm:$0xff] }
 0xa5a   :  { %3745 = vmatpush1.bf16.msra.mxu1 %v3706_v44  ;;  %v3550_v44 = vld [vmem:[#allocation2 + $0x88] sm:$0xff] }
 0xa5b   :  { %3746 = vmatprep.subr.bf16.mxu1 %v3711_v55  ;;  %v3549_v55 = vld [vmem:[#allocation2 + $0x80] sm:$0xff] }
 0xa5e   :  { %3747 = vmatpush1.bf16.msra.mxu1 %v3710_v62  ;;  %v3554_v62 = vld [vmem:[#allocation2 + $0xa8] sm:$0xff] }
 0xa5f   :  { %3748 = vmatprep.subr.bf16.mxu1 %v3715_v4  ;;  %v3553_v4 = vld [vmem:[#allocation2 + $0xa0] sm:$0xff] }
 0xa62   :  { %3749 = vmatpush1.bf16.msra.mxu1 %v3714_v54  ;;  %v3558_v54 = vld [vmem:[#allocation2 + $0xc8] sm:$0xff] }
 0xa63   :  { %3761 = vmatprep.subr.bf16.mxu1 %v3657_v56  ;;  %v3557_v56 = vld [vmem:[#allocation2 + $0xc0] sm:$0xff] }
 0xaf8   :  { %v3642_v26 = vpop.f32.mrb[68].mxu1  ;;  %v3522_v27 = vpop.f32.mrb[60].mxu0 }
 0xaf9   :  { %v3644_v29 = vpop.f32.mrb[69].mxu1  ;;  %v3524_v32 = vpop.f32.mrb[61].mxu0 }
 0xafa   :  { %v3646_v33 = vpop.f32.mrb[70].mxu1  ;;  %v3526_v43 = vpop.f32.mrb[62].mxu0 }
 0xafb   :  { %v9015_v46 = vpack.c.bf16 %v3646_v33, %v3642_v26  ;;  %v3648_v48 = vpop.f32.mrb[71].mxu1  ;;  %v9017_v49 = vpack.c.bf16 %v3526_v43, %v3522_v27  ;;  %v3528_v50 = vpop.f32.mrb[63].mxu0  ;;  %v3561_v26 = vld [vmem:[#allocation2 + $0xe0] sm:$0xff]  ;;  %v3566_v27 = vld [vmem:[#allocation2 + $0x108] sm:$0xff] }
 0xafc   :  { %v3652_v51 = vpack.c.bf16 %v3648_v48, %v3644_v29  ;;  %v9019_v52 = vpack.c.bf16 %v3528_v50, %v3524_v32  ;;  %v3565_v29 = vld [vmem:[#allocation2 + $0x100] sm:$0xff]  ;;  %v3570_v32 = vld [vmem:[#allocation2 + $0x128] sm:$0xff] }
 0xafd   :  { %v3569_v33 = vld [vmem:[#allocation2 + $0x120] sm:$0xff]  ;;  %v3574_v43 = vld [vmem:[#allocation2 + $0x148] sm:$0xff] }
 0xafe   :  { %3750 = vmatprep.mubr.bf16.mxu1 %v3652_v51  ;;  %v3578_v48 = vld [vmem:[#allocation2 + $0x168] sm:$0xff]  ;;  %v3577_v50 = vld [vmem:[#allocation2 + $0x160] sm:$0xff] }
 0xaff   :  { %3751 = vmatmul.mubr.bf16.vlgmr.msra.gmra.mrb[72].mxu1 %v9015_v46 }
 0xb00   :  { %3762 = vmatpush1.bf16.msra.mxu1 %v3656_v53  ;;  %3793 = vmatprep.mubr.bf16.mxu1 %v3652_v51  ;;  %v3582_v51 = vld [vmem:[#allocation2 + $0x188] sm:$0xff]  ;;  %v3581_v53 = vld [vmem:[#allocation2 + $0x180] sm:$0xff] }
 0xb01   :  { %3763 = vmatprep.subr.bf16.mxu1 %v3661_v58  ;;  %v3586_v58 = vld [vmem:[#allocation2 + $0x1a8] sm:$0xff] }
 0xb04   :  { %3764 = vmatpush1.bf16.msra.mxu1 %v3660_v60  ;;  %v3585_v60 = vld [vmem:[#allocation2 + $0x1a0] sm:$0xff] }
 0xb05   :  { %3765 = vmatprep.subr.bf16.mxu1 %v3665_v0  ;;  %v3590_v0 = vld [vmem:[#allocation2 + $0x1c8] sm:$0xff] }
 0xb08   :  { %3766 = vmatpush1.bf16.msra.mxu1 %v3664_v2  ;;  %v3589_v2 = vld [vmem:[#allocation2 + $0x1c0] sm:$0xff] }
 0xb09   :  { %3767 = vmatprep.subr.bf16.mxu1 %v3669_v5  ;;  %v3594_v5 = vld [vmem:[#allocation2 + $0x1e8] sm:$0xff] }
 0xb0c   :  { %3768 = vmatpush1.bf16.msra.mxu1 %v3668_v28  ;;  %v3935_v28 = vpop.f32.mrb[64].mxu0 }
 0xb0d   :  { %3769 = vmatprep.subr.bf16.mxu1 %v3673_v30  ;;  %v3937_v30 = vpop.f32.mrb[65].mxu0 }
 0xb10   :  { %3770 = vmatpush1.bf16.msra.mxu1 %v3672_v31  ;;  %v3939_v31 = vpop.f32.mrb[66].mxu0 }
 0xb11   :  { %3771 = vmatprep.subr.bf16.mxu1 %v3677_v35  ;;  %v3593_v35 = vld [vmem:[#allocation2 + $0x1e0] sm:$0xff] }
 0xb14   :  { %3772 = vmatpush1.bf16.msra.mxu1 %v3676_v38  ;;  %v9028_v38 = vpack.c.bf16 %v3939_v31, %v3935_v28  ;;  %v3988_v28 = vld [vmem:[#allocation2 + $0x548] sm:$0xff] }
 0xb15   :  { %3773 = vmatprep.subr.bf16.mxu1 %v3681_v39  ;;  %v3941_v39 = vpop.f32.mrb[67].mxu0  ;;  %v3992_v31 = vld [vmem:[#allocation2 + $0x568] sm:$0xff] }
 0xb18   :  { %3774 = vmatpush1.bf16.msra.mxu1 %v3680_v34  ;;  %v3536_v34 = vld [vmem:[#allocation2 + $0x18] sm:$0xff] }
 0xb19   :  { %3775 = vmatprep.subr.bf16.mxu1 %v3685_v36  ;;  %v9030_v36 = vpack.c.bf16 %v3941_v39, %v3937_v30  ;;  %v3987_v30 = vld [vmem:[#allocation2 + $0x540] sm:$0xff]  ;;  %v3996_v39 = vld [vmem:[#allocation2 + $0x588] sm:$0xff] }
 0xb1c   :  { %3776 = vmatpush1.bf16.msra.mxu1 %v3684_v37  ;;  %v3535_v37 = vld [vmem:[#allocation2 + $0x10] sm:$0xff] }
 0xb1d   :  { %3777 = vmatprep.subr.bf16.mxu1 %v3689_v41  ;;  %v3540_v41 = vld [vmem:[#allocation2 + $0x38] sm:$0xff] }
 0xb20   :  { %3778 = vmatpush1.bf16.msra.mxu1 %v3688_v45  ;;  %v3539_v45 = vld [vmem:[#allocation2 + $0x30] sm:$0xff] }
 0xb21   :  { %3779 = vmatprep.subr.bf16.mxu1 %v3693_v47  ;;  %v3544_v47 = vld [vmem:[#allocation2 + $0x58] sm:$0xff] }
 0xb24   :  { %3780 = vmatpush1.bf16.msra.mxu1 %v3692_v59  ;;  %v3543_v59 = vld [vmem:[#allocation2 + $0x50] sm:$0xff] }
 0xb25   :  { %3781 = vmatprep.subr.bf16.mxu1 %v3697_v7  ;;  %v3547_v7 = vld [vmem:[#allocation2 + $0x70] sm:$0xff] }
 0xb28   :  { %3782 = vmatpush1.bf16.msra.mxu1 %v3696_v10  ;;  %v3552_v10 = vld [vmem:[#allocation2 + $0x98] sm:$0xff] }
 0xb29   :  { %3783 = vmatprep.subr.bf16.mxu1 %v3701_v11  ;;  %v3551_v11 = vld [vmem:[#allocation2 + $0x90] sm:$0xff] }
 0xb2c   :  { %3784 = vmatpush1.bf16.msra.mxu1 %v3700_v13  ;;  %v3556_v13 = vld [vmem:[#allocation2 + $0xb8] sm:$0xff] }
 0xb2d   :  { %3785 = vmatprep.subr.bf16.mxu1 %v3705_v14  ;;  %v3555_v14 = vld [vmem:[#allocation2 + $0xb0] sm:$0xff] }
 0xb30   :  { %3786 = vmatpush1.bf16.msra.mxu1 %v3704_v8  ;;  %v3560_v8 = vld [vmem:[#allocation2 + $0xd8] sm:$0xff] }
 0xb31   :  { %3787 = vmatprep.subr.bf16.mxu1 %v3709_v12  ;;  %v3564_v12 = vld [vmem:[#allocation2 + $0xf8] sm:$0xff] }
 0xb34   :  { %3788 = vmatpush1.bf16.msra.mxu1 %v3708_v15  ;;  %v3563_v15 = vld [vmem:[#allocation2 + $0xf0] sm:$0xff] }
 0xb35   :  { %3789 = vmatprep.subr.bf16.mxu1 %v3713_v16  ;;  %v3568_v16 = vld [vmem:[#allocation2 + $0x118] sm:$0xff] }
 0xb38   :  { %3790 = vmatpush1.bf16.msra.mxu1 %v3712_v17  ;;  %v3567_v17 = vld [vmem:[#allocation2 + $0x110] sm:$0xff] }
 0xb39   :  { %3791 = vmatprep.subr.bf16.mxu1 %v3717_v18  ;;  %v3572_v18 = vld [vmem:[#allocation2 + $0x138] sm:$0xff] }
 0xb3c   :  { %3792 = vmatpush1.bf16.msra.mxu1 %v3716_v19  ;;  %v3571_v19 = vld [vmem:[#allocation2 + $0x130] sm:$0xff] }
 0xb3d   :  { %3804 = vmatprep.subr.bf16.mxu1 %v3534_v20  ;;  %v3576_v20 = vld [vmem:[#allocation2 + $0x158] sm:$0xff] }
 0xb3f   :  { %3794 = vmatmul.mubr.bf16.vlgmr.msra.gmra.mrb[76].mxu1 %v9015_v46  ;;  %v3573_v46 = vld [vmem:[#allocation2 + $0x140] sm:$0xff] }
 0xb40   :  { %3805 = vmatpush1.bf16.msra.mxu1 %v3533_v21  ;;  %3836 = vmatprep.mubr.bf16.mxu1 %v9019_v52  ;;  %v3575_v21 = vld [vmem:[#allocation2 + $0x150] sm:$0xff] }
 0xb41   :  { %3806 = vmatprep.subr.bf16.mxu1 %v3538_v22  ;;  %v3580_v22 = vld [vmem:[#allocation2 + $0x178] sm:$0xff] }
 0xb44   :  { %3807 = vmatpush1.bf16.msra.mxu1 %v3537_v23  ;;  %v3579_v23 = vld [vmem:[#allocation2 + $0x170] sm:$0xff] }
 0xb45   :  { %3808 = vmatprep.subr.bf16.mxu1 %v3542_v24  ;;  %v3584_v24 = vld [vmem:[#allocation2 + $0x198] sm:$0xff] }
 0xb48   :  { %3809 = vmatpush1.bf16.msra.mxu1 %v3541_v25  ;;  %v3583_v25 = vld [vmem:[#allocation2 + $0x190] sm:$0xff] }
 0xb49   :  { %3810 = vmatprep.subr.bf16.mxu1 %v3546_v40  ;;  %v3588_v40 = vld [vmem:[#allocation2 + $0x1b8] sm:$0xff] }
 0xb4c   :  { %3811 = vmatpush1.bf16.msra.mxu1 %v3545_v42  ;;  %v3587_v42 = vld [vmem:[#allocation2 + $0x1b0] sm:$0xff] }
 0xb4d   :  { %3812 = vmatprep.subr.bf16.mxu1 %v3550_v44  ;;  %v3592_v44 = vld [vmem:[#allocation2 + $0x1d8] sm:$0xff] }
 0xb50   :  { %3813 = vmatpush1.bf16.msra.mxu1 %v3549_v55  ;;  %v3591_v55 = vld [vmem:[#allocation2 + $0x1d0] sm:$0xff] }
 0xb51   :  { %3814 = vmatprep.subr.bf16.mxu1 %v3554_v62  ;;  %v3596_v62 = vld [vmem:[#allocation2 + $0x1f8] sm:$0xff] }
 0xb54   :  { %3815 = vmatpush1.bf16.msra.mxu1 %v3553_v4  ;;  %v3595_v4 = vld [vmem:[#allocation2 + $0x1f0] sm:$0xff] }
 0xb55   :  { %3816 = vmatprep.subr.bf16.mxu1 %v3558_v54  ;;  %v3948_v54 = vld [vmem:[#allocation2 + $0x408] sm:$0xff] }
 0xb58   :  { %3817 = vmatpush1.bf16.msra.mxu1 %v3557_v56  ;;  %v3947_v56 = vld [vmem:[#allocation2 + $0x400] sm:$0xff] }
 0xb59   :  { %3818 = vmatprep.subr.bf16.mxu1 %v3562_v61  ;;  %v3952_v61 = vld [vmem:[#allocation2 + $0x428] sm:$0xff] }
 0xb5c   :  { %3819 = vmatpush1.bf16.msra.mxu1 %v3561_v26  ;;  %v3951_v26 = vld [vmem:[#allocation2 + $0x420] sm:$0xff] }
 0xb5d   :  { %3820 = vmatprep.subr.bf16.mxu1 %v3566_v27  ;;  %v3956_v27 = vld [vmem:[#allocation2 + $0x448] sm:$0xff] }
 0xb60   :  { %3821 = vmatpush1.bf16.msra.mxu1 %v3565_v29  ;;  %v3955_v29 = vld [vmem:[#allocation2 + $0x440] sm:$0xff] }
 0xb61   :  { %3822 = vmatprep.subr.bf16.mxu1 %v3570_v32  ;;  %v3960_v32 = vld [vmem:[#allocation2 + $0x468] sm:$0xff] }
 0xb64   :  { %3823 = vmatpush1.bf16.msra.mxu1 %v3569_v33  ;;  %v3959_v33 = vld [vmem:[#allocation2 + $0x460] sm:$0xff] }
 0xb65   :  { %3824 = vmatprep.subr.bf16.mxu1 %v3574_v43  ;;  %v3964_v43 = vld [vmem:[#allocation2 + $0x488] sm:$0xff] }
 0xb68   :  { %3825 = vmatpush1.bf16.msra.mxu1 %v3573_v46  ;;  %v3963_v46 = vld [vmem:[#allocation2 + $0x480] sm:$0xff] }
 0xb69   :  { %3826 = vmatprep.subr.bf16.mxu1 %v3578_v48  ;;  %v3968_v48 = vld [vmem:[#allocation2 + $0x4a8] sm:$0xff] }
 0xb6c   :  { %3827 = vmatpush1.bf16.msra.mxu1 %v3577_v50  ;;  %v3972_v50 = vld [vmem:[#allocation2 + $0x4c8] sm:$0xff] }
 0xb6d   :  { %3828 = vmatprep.subr.bf16.mxu1 %v3582_v51  ;;  %v3971_v51 = vld [vmem:[#allocation2 + $0x4c0] sm:$0xff] }
 0xb70   :  { %3829 = vmatpush1.bf16.msra.mxu1 %v3581_v53  ;;  %v3976_v53 = vld [vmem:[#allocation2 + $0x4e8] sm:$0xff] }
 0xb71   :  { %3830 = vmatprep.subr.bf16.mxu1 %v3586_v58  ;;  %v3975_v58 = vld [vmem:[#allocation2 + $0x4e0] sm:$0xff] }
 0xb74   :  { %3831 = vmatpush1.bf16.msra.mxu1 %v3585_v60  ;;  %v3980_v60 = vld [vmem:[#allocation2 + $0x508] sm:$0xff] }
 0xb75   :  { %3832 = vmatprep.subr.bf16.mxu1 %v3590_v0  ;;  %v3979_v0 = vld [vmem:[#allocation2 + $0x500] sm:$0xff] }
 0xb78   :  { %3833 = vmatpush1.bf16.msra.mxu1 %v3589_v2  ;;  %v3984_v2 = vld [vmem:[#allocation2 + $0x528] sm:$0xff] }
 0xb79   :  { %3834 = vmatprep.subr.bf16.mxu1 %v3594_v5  ;;  %v3983_v5 = vld [vmem:[#allocation2 + $0x520] sm:$0xff] }
 0xb7c   :  { %3835 = vmatpush1.bf16.msra.mxu1 %v3593_v35  ;;  %v3991_v35 = vld [vmem:[#allocation2 + $0x560] sm:$0xff] }
 0xb7d   :  { %3847 = vmatprep.subr.bf16.mxu1 %v3536_v34  ;;  %v3995_v34 = vld [vmem:[#allocation2 + $0x580] sm:$0xff] }
 0xb7f   :  { %3837 = vmatmul.mubr.bf16.vlgmr.msra.gmra.mrb[72].mxu1 %v9017_v49 }
 0xb80   :  { %3848 = vmatpush1.bf16.msra.mxu1 %v3535_v37  ;;  %3879 = vmatprep.mubr.bf16.mxu1 %v9019_v52  ;;  %v3559_v52 = vld [vmem:[#allocation2 + $0xd0] sm:$0xff]  ;;  %v4000_v37 = vld [vmem:[#allocation2 + $0x5a8] sm:$0xff] }
 0xb81   :  { %3849 = vmatprep.subr.bf16.mxu1 %v3540_v41  ;;  %v3999_v41 = vld [vmem:[#allocation2 + $0x5a0] sm:$0xff] }
 0xb84   :  { %3850 = vmatpush1.bf16.msra.mxu1 %v3539_v45  ;;  %v4004_v45 = vld [vmem:[#allocation2 + $0x5c8] sm:$0xff] }
 0xb85   :  { %3851 = vmatprep.subr.bf16.mxu1 %v3544_v47  ;;  %v4003_v47 = vld [vmem:[#allocation2 + $0x5c0] sm:$0xff] }
 0xb88   :  { %3852 = vmatpush1.bf16.msra.mxu1 %v3543_v59  ;;  %v4008_v59 = vld [vmem:[#allocation2 + $0x5e8] sm:$0xff] }
 0xb89   :  { %3853 = vmatprep.subr.bf16.mxu1 %v3548_v63  ;;  %v4150_v63 = vpop.f32.mrb[68].mxu0 }
 0xb8c   :  { %3854 = vmatpush1.bf16.msra.mxu1 %v3547_v7  ;;  %v4152_v7 = vpop.f32.mrb[69].mxu0 }
 0xb8d   :  { %3855 = vmatprep.subr.bf16.mxu1 %v3552_v10  ;;  %v4154_v10 = vpop.f32.mrb[70].mxu0 }
 0xb90   :  { %3856 = vmatpush1.bf16.msra.mxu1 %v3551_v11  ;;  %v4007_v11 = vld [vmem:[#allocation2 + $0x5e0] sm:$0xff] }
 0xb91   :  { %3857 = vmatprep.subr.bf16.mxu1 %v3556_v13  ;;  %v9036_v13 = vpack.c.bf16 %v4154_v10, %v4150_v63  ;;  %v4203_v63 = vld [vmem:[#allocation2 + $0x748] sm:$0xff] }
 0xb92   :  { %v4207_v10 = vld [vmem:[#allocation2 + $0x768] sm:$0xff] }
 0xb94   :  { %3858 = vmatpush1.bf16.msra.mxu1 %v3555_v14  ;;  %v4156_v14 = vpop.f32.mrb[71].mxu0 }
 0xb95   :  { %3859 = vmatprep.subr.bf16.mxu1 %v3560_v8  ;;  %v3950_v8 = vld [vmem:[#allocation2 + $0x418] sm:$0xff] }
 0xb98   :  { %3860 = vmatpush1.bf16.msra.mxu1 %v3559_v52  ;;  %v9038_v52 = vpack.c.bf16 %v4156_v14, %v4152_v7  ;;  %v4202_v7 = vld [vmem:[#allocation2 + $0x740] sm:$0xff]  ;;  %v4211_v14 = vld [vmem:[#allocation2 + $0x788] sm:$0xff] }
 0xb99   :  { %3861 = vmatprep.subr.bf16.mxu1 %v3564_v12  ;;  %v3949_v12 = vld [vmem:[#allocation2 + $0x410] sm:$0xff] }
 0xb9c   :  { %3862 = vmatpush1.bf16.msra.mxu1 %v3563_v15  ;;  %v3954_v15 = vld [vmem:[#allocation2 + $0x438] sm:$0xff] }
 0xb9d   :  { %3863 = vmatprep.subr.bf16.mxu1 %v3568_v16  ;;  %v3953_v16 = vld [vmem:[#allocation2 + $0x430] sm:$0xff] }
 0xba0   :  { %3864 = vmatpush1.bf16.msra.mxu1 %v3567_v17  ;;  %v3958_v17 = vld [vmem:[#allocation2 + $0x458] sm:$0xff] }
 0xba1   :  { %3865 = vmatprep.subr.bf16.mxu1 %v3572_v18  ;;  %v3957_v18 = vld [vmem:[#allocation2 + $0x450] sm:$0xff] }
 0xba4   :  { %3866 = vmatpush1.bf16.msra.mxu1 %v3571_v19  ;;  %v3962_v19 = vld [vmem:[#allocation2 + $0x478] sm:$0xff] }
 0xba5   :  { %3867 = vmatprep.subr.bf16.mxu1 %v3576_v20  ;;  %v3961_v20 = vld [vmem:[#allocation2 + $0x470] sm:$0xff] }
 0xba8   :  { %3868 = vmatpush1.bf16.msra.mxu1 %v3575_v21  ;;  %v3966_v21 = vld [vmem:[#allocation2 + $0x498] sm:$0xff] }
 0xba9   :  { %3869 = vmatprep.subr.bf16.mxu1 %v3580_v22  ;;  %v3965_v22 = vld [vmem:[#allocation2 + $0x490] sm:$0xff] }
 0xbac   :  { %3870 = vmatpush1.bf16.msra.mxu1 %v3579_v23  ;;  %v3970_v23 = vld [vmem:[#allocation2 + $0x4b8] sm:$0xff] }
 0xbad   :  { %3871 = vmatprep.subr.bf16.mxu1 %v3584_v24  ;;  %v3969_v24 = vld [vmem:[#allocation2 + $0x4b0] sm:$0xff] }
 0xbb0   :  { %3872 = vmatpush1.bf16.msra.mxu1 %v3583_v25  ;;  %v3974_v25 = vld [vmem:[#allocation2 + $0x4d8] sm:$0xff] }
 0xbb1   :  { %3873 = vmatprep.subr.bf16.mxu1 %v3588_v40  ;;  %v3978_v40 = vld [vmem:[#allocation2 + $0x4f8] sm:$0xff] }
 0xbb4   :  { %3874 = vmatpush1.bf16.msra.mxu1 %v3587_v42  ;;  %v3977_v42 = vld [vmem:[#allocation2 + $0x4f0] sm:$0xff] }
 0xbb5   :  { %3875 = vmatprep.subr.bf16.mxu1 %v3592_v44  ;;  %v3982_v44 = vld [vmem:[#allocation2 + $0x518] sm:$0xff] }
 0xbb8   :  { %3876 = vmatpush1.bf16.msra.mxu1 %v3591_v55  ;;  %v3981_v55 = vld [vmem:[#allocation2 + $0x510] sm:$0xff] }
 0xbb9   :  { %3877 = vmatprep.subr.bf16.mxu1 %v3596_v62  ;;  %v3986_v62 = vld [vmem:[#allocation2 + $0x538] sm:$0xff] }
 0xbbc   :  { %3878 = vmatpush1.bf16.msra.mxu1 %v3595_v4  ;;  %v3985_v4 = vld [vmem:[#allocation2 + $0x530] sm:$0xff] }
 0xbbd   :  { %4011 = vmatprep.subr.bf16.mxu1 %v3948_v54  ;;  %v3990_v54 = vld [vmem:[#allocation2 + $0x558] sm:$0xff] }
 0xbbf   :  { %3880 = vmatmul.mubr.bf16.vlgmr.msra.gmra.mrb[76].mxu1 %v9017_v49  ;;  %v3967_v49 = vld [vmem:[#allocation2 + $0x4a0] sm:$0xff] }
 0xbc0   :  { %4012 = vmatpush1.bf16.msra.mxu1 %v3947_v56  ;;  %4043 = vmatprep.mubr.bf16.mxu1 %v9030_v36  ;;  %v3989_v56 = vld [vmem:[#allocation2 + $0x550] sm:$0xff] }
 0xbc1   :  { %4013 = vmatprep.subr.bf16.mxu1 %v3952_v61  ;;  %v3994_v61 = vld [vmem:[#allocation2 + $0x578] sm:$0xff] }
 0xbc4   :  { %4014 = vmatpush1.bf16.msra.mxu1 %v3951_v26  ;;  %v3993_v26 = vld [vmem:[#allocation2 + $0x570] sm:$0xff] }
 0xbc5   :  { %4015 = vmatprep.subr.bf16.mxu1 %v3956_v27  ;;  %v3998_v27 = vld [vmem:[#allocation2 + $0x598] sm:$0xff] }
 0xbc8   :  { %4016 = vmatpush1.bf16.msra.mxu1 %v3955_v29  ;;  %v3997_v29 = vld [vmem:[#allocation2 + $0x590] sm:$0xff] }
 0xbc9   :  { %4017 = vmatprep.subr.bf16.mxu1 %v3960_v32  ;;  %v4002_v32 = vld [vmem:[#allocation2 + $0x5b8] sm:$0xff] }
 0xbcc   :  { %4018 = vmatpush1.bf16.msra.mxu1 %v3959_v33  ;;  %v4001_v33 = vld [vmem:[#allocation2 + $0x5b0] sm:$0xff] }
 0xbcd   :  { %4019 = vmatprep.subr.bf16.mxu1 %v3964_v43  ;;  %v4006_v43 = vld [vmem:[#allocation2 + $0x5d8] sm:$0xff] }
 0xbd0   :  { %4020 = vmatpush1.bf16.msra.mxu1 %v3963_v46  ;;  %v4005_v46 = vld [vmem:[#allocation2 + $0x5d0] sm:$0xff] }
 0xbd1   :  { %4021 = vmatprep.subr.bf16.mxu1 %v3968_v48  ;;  %v4010_v48 = vld [vmem:[#allocation2 + $0x5f8] sm:$0xff] }
 0xbd4   :  { %4022 = vmatpush1.bf16.msra.mxu1 %v3967_v49  ;;  %v4009_v49 = vld [vmem:[#allocation2 + $0x5f0] sm:$0xff] }
 0xbd5   :  { %4023 = vmatprep.subr.bf16.mxu1 %v3972_v50  ;;  %v4163_v50 = vld [vmem:[#allocation2 + $0x608] sm:$0xff] }
 0xbd8   :  { %4024 = vmatpush1.bf16.msra.mxu1 %v3971_v51  ;;  %v4162_v51 = vld [vmem:[#allocation2 + $0x600] sm:$0xff] }
 0xbd9   :  { %4025 = vmatprep.subr.bf16.mxu1 %v3976_v53  ;;  %v4167_v53 = vld [vmem:[#allocation2 + $0x628] sm:$0xff] }
 0xbdc   :  { %4026 = vmatpush1.bf16.msra.mxu1 %v3975_v58  ;;  %v4166_v58 = vld [vmem:[#allocation2 + $0x620] sm:$0xff] }
 0xbdd   :  { %4027 = vmatprep.subr.bf16.mxu1 %v3980_v60  ;;  %v4171_v60 = vld [vmem:[#allocation2 + $0x648] sm:$0xff] }
 0xbe0   :  { %4028 = vmatpush1.bf16.msra.mxu1 %v3979_v0  ;;  %v4170_v0 = vld [vmem:[#allocation2 + $0x640] sm:$0xff] }
 0xbe1   :  { %4029 = vmatprep.subr.bf16.mxu1 %v3984_v2  ;;  %v4175_v2 = vld [vmem:[#allocation2 + $0x668] sm:$0xff] }
 0xbe4   :  { %4030 = vmatpush1.bf16.msra.mxu1 %v3983_v5  ;;  %v4174_v5 = vld [vmem:[#allocation2 + $0x660] sm:$0xff] }
 0xbe5   :  { %4031 = vmatprep.subr.bf16.mxu1 %v3988_v28  ;;  %v4179_v28 = vld [vmem:[#allocation2 + $0x688] sm:$0xff] }
 0xbe8   :  { %4032 = vmatpush1.bf16.msra.mxu1 %v3987_v30  ;;  %v4178_v30 = vld [vmem:[#allocation2 + $0x680] sm:$0xff] }
 0xbe9   :  { %4033 = vmatprep.subr.bf16.mxu1 %v3992_v31  ;;  %v4183_v31 = vld [vmem:[#allocation2 + $0x6a8] sm:$0xff] }
 0xbec   :  { %4034 = vmatpush1.bf16.msra.mxu1 %v3991_v35  ;;  %v4187_v35 = vld [vmem:[#allocation2 + $0x6c8] sm:$0xff] }
 0xbed   :  { %4035 = vmatprep.subr.bf16.mxu1 %v3996_v39  ;;  %v4186_v39 = vld [vmem:[#allocation2 + $0x6c0] sm:$0xff] }
 0xbf0   :  { %4036 = vmatpush1.bf16.msra.mxu1 %v3995_v34  ;;  %v4191_v34 = vld [vmem:[#allocation2 + $0x6e8] sm:$0xff] }
 0xbf1   :  { %4037 = vmatprep.subr.bf16.mxu1 %v4000_v37  ;;  %v4190_v37 = vld [vmem:[#allocation2 + $0x6e0] sm:$0xff] }
 0xbf4   :  { %4038 = vmatpush1.bf16.msra.mxu1 %v3999_v41  ;;  %v4195_v41 = vld [vmem:[#allocation2 + $0x708] sm:$0xff] }
 0xbf5   :  { %4039 = vmatprep.subr.bf16.mxu1 %v4004_v45  ;;  %v4194_v45 = vld [vmem:[#allocation2 + $0x700] sm:$0xff] }
 0xbf8   :  { %4040 = vmatpush1.bf16.msra.mxu1 %v4003_v47  ;;  %v4199_v47 = vld [vmem:[#allocation2 + $0x728] sm:$0xff] }
 0xbf9   :  { %4041 = vmatprep.subr.bf16.mxu1 %v4008_v59  ;;  %v4198_v59 = vld [vmem:[#allocation2 + $0x720] sm:$0xff] }
 0xbfc   :  { %4042 = vmatpush1.bf16.msra.mxu1 %v4007_v11  ;;  %v4206_v11 = vld [vmem:[#allocation2 + $0x760] sm:$0xff] }
 0xbfd   :  { %4054 = vmatprep.subr.bf16.mxu1 %v3950_v8  ;;  %v4210_v8 = vld [vmem:[#allocation2 + $0x780] sm:$0xff] }
 0xbff   :  { %4044 = vmatmul.mubr.bf16.vlgmr.msra.gmra.mrb[72].mxu1 %v9028_v38 }
 0xc00   :  { %4055 = vmatpush1.bf16.msra.mxu1 %v3949_v12  ;;  %4086 = vmatprep.mubr.bf16.mxu1 %v9030_v36  ;;  %v3973_v36 = vld [vmem:[#allocation2 + $0x4d0] sm:$0xff]  ;;  %v4215_v12 = vld [vmem:[#allocation2 + $0x7a8] sm:$0xff] }
 0xc01   :  { %4056 = vmatprep.subr.bf16.mxu1 %v3954_v15  ;;  %v4214_v15 = vld [vmem:[#allocation2 + $0x7a0] sm:$0xff] }
 0xc04   :  { %4057 = vmatpush1.bf16.msra.mxu1 %v3953_v16  ;;  %v4219_v16 = vld [vmem:[#allocation2 + $0x7c8] sm:$0xff] }
 0xc05   :  { %4058 = vmatprep.subr.bf16.mxu1 %v3958_v17  ;;  %v4218_v17 = vld [vmem:[#allocation2 + $0x7c0] sm:$0xff] }
 0xc08   :  { %4059 = vmatpush1.bf16.msra.mxu1 %v3957_v18  ;;  %v4223_v18 = vld [vmem:[#allocation2 + $0x7e8] sm:$0xff] }
 0xc09   :  { %4060 = vmatprep.subr.bf16.mxu1 %v3962_v19  ;;  %v4222_v19 = vld [vmem:[#allocation2 + $0x7e0] sm:$0xff] }
 0xc0c   :  { %4061 = vmatpush1.bf16.msra.mxu1 %v3961_v20  ;;  %v4165_v20 = vld [vmem:[#allocation2 + $0x618] sm:$0xff] }
 0xc0d   :  { %4062 = vmatprep.subr.bf16.mxu1 %v3966_v21  ;;  %v4164_v21 = vld [vmem:[#allocation2 + $0x610] sm:$0xff] }
 0xc10   :  { %4063 = vmatpush1.bf16.msra.mxu1 %v3965_v22  ;;  %v4169_v22 = vld [vmem:[#allocation2 + $0x638] sm:$0xff] }
 0xc11   :  { %4064 = vmatprep.subr.bf16.mxu1 %v3970_v23  ;;  %v4168_v23 = vld [vmem:[#allocation2 + $0x630] sm:$0xff] }
 0xc14   :  { %4065 = vmatpush1.bf16.msra.mxu1 %v3969_v24  ;;  %v4173_v24 = vld [vmem:[#allocation2 + $0x658] sm:$0xff] }
 0xc15   :  { %4066 = vmatprep.subr.bf16.mxu1 %v3974_v25  ;;  %v4172_v25 = vld [vmem:[#allocation2 + $0x650] sm:$0xff] }
 0xc18   :  { %4067 = vmatpush1.bf16.msra.mxu1 %v3973_v36  ;;  %v4177_v36 = vld [vmem:[#allocation2 + $0x678] sm:$0xff] }
 0xc19   :  { %4068 = vmatprep.subr.bf16.mxu1 %v3978_v40  ;;  %v4176_v40 = vld [vmem:[#allocation2 + $0x670] sm:$0xff] }
 0xc1c   :  { %4069 = vmatpush1.bf16.msra.mxu1 %v3977_v42  ;;  %v4181_v42 = vld [vmem:[#allocation2 + $0x698] sm:$0xff] }
 0xc1d   :  { %4070 = vmatprep.subr.bf16.mxu1 %v3982_v44  ;;  %v4180_v44 = vld [vmem:[#allocation2 + $0x690] sm:$0xff] }
 0xc20   :  { %4071 = vmatpush1.bf16.msra.mxu1 %v3981_v55  ;;  %v4185_v55 = vld [vmem:[#allocation2 + $0x6b8] sm:$0xff] }
 0xc21   :  { %4072 = vmatprep.subr.bf16.mxu1 %v3986_v62  ;;  %v4184_v62 = vld [vmem:[#allocation2 + $0x6b0] sm:$0xff] }
 0xc24   :  { %4073 = vmatpush1.bf16.msra.mxu1 %v3985_v4  ;;  %v4189_v4 = vld [vmem:[#allocation2 + $0x6d8] sm:$0xff] }
 0xc25   :  { %4074 = vmatprep.subr.bf16.mxu1 %v3990_v54  ;;  %v4193_v54 = vld [vmem:[#allocation2 + $0x6f8] sm:$0xff] }
 0xc28   :  { %4075 = vmatpush1.bf16.msra.mxu1 %v3989_v56  ;;  %v4192_v56 = vld [vmem:[#allocation2 + $0x6f0] sm:$0xff] }
 0xc29   :  { %4076 = vmatprep.subr.bf16.mxu1 %v3994_v61  ;;  %v4197_v61 = vld [vmem:[#allocation2 + $0x718] sm:$0xff] }
 0xc2c   :  { %4077 = vmatpush1.bf16.msra.mxu1 %v3993_v26  ;;  %v4196_v26 = vld [vmem:[#allocation2 + $0x710] sm:$0xff] }
 0xc2d   :  { %4078 = vmatprep.subr.bf16.mxu1 %v3998_v27  ;;  %v4201_v27 = vld [vmem:[#allocation2 + $0x738] sm:$0xff] }
 0xc30   :  { %4079 = vmatpush1.bf16.msra.mxu1 %v3997_v29  ;;  %v4200_v29 = vld [vmem:[#allocation2 + $0x730] sm:$0xff] }
 0xc31   :  { %4080 = vmatprep.subr.bf16.mxu1 %v4002_v32  ;;  %v4205_v32 = vld [vmem:[#allocation2 + $0x758] sm:$0xff] }
 0xc34   :  { %4081 = vmatpush1.bf16.msra.mxu1 %v4001_v33  ;;  %v4204_v33 = vld [vmem:[#allocation2 + $0x750] sm:$0xff] }
 0xc35   :  { %4082 = vmatprep.subr.bf16.mxu1 %v4006_v43  ;;  %v4209_v43 = vld [vmem:[#allocation2 + $0x778] sm:$0xff] }
 0xc38   :  { %4083 = vmatpush1.bf16.msra.mxu1 %v4005_v46  ;;  %v4208_v46 = vld [vmem:[#allocation2 + $0x770] sm:$0xff] }
 0xc39   :  { %4084 = vmatprep.subr.bf16.mxu1 %v4010_v48  ;;  %v4213_v48 = vld [vmem:[#allocation2 + $0x798] sm:$0xff] }
 0xc3c   :  { %4085 = vmatpush1.bf16.msra.mxu1 %v4009_v49  ;;  %v4212_v49 = vld [vmem:[#allocation2 + $0x790] sm:$0xff] }
 0xc3d   :  { %4226 = vmatprep.subr.bf16.mxu1 %v4163_v50  ;;  %v4217_v50 = vld [vmem:[#allocation2 + $0x7b8] sm:$0xff] }
 0xc3f   :  { %4087 = vmatmul.mubr.bf16.vlgmr.msra.gmra.mrb[76].mxu1 %v9028_v38  ;;  %v4182_v38 = vld [vmem:[#allocation2 + $0x6a0] sm:$0xff] }
 0xc40   :  { %4227 = vmatpush1.bf16.msra.mxu1 %v4162_v51  ;;  %4258 = vmatprep.mubr.bf16.mxu1 %v9038_v52  ;;  %v4216_v51 = vld [vmem:[#allocation2 + $0x7b0] sm:$0xff] }
 0xc41   :  { %4228 = vmatprep.subr.bf16.mxu1 %v4167_v53  ;;  %v4221_v53 = vld [vmem:[#allocation2 + $0x7d8] sm:$0xff] }
 0xc44   :  { %4229 = vmatpush1.bf16.msra.mxu1 %v4166_v58  ;;  %v4220_v58 = vld [vmem:[#allocation2 + $0x7d0] sm:$0xff] }
 0xc45   :  { %4230 = vmatprep.subr.bf16.mxu1 %v4171_v60  ;;  %v4225_v60 = vld [vmem:[#allocation2 + $0x7f8] sm:$0xff] }
 0xc48   :  { %4231 = vmatpush1.bf16.msra.mxu1 %v4170_v0  ;;  %v4224_v0 = vld [vmem:[#allocation2 + $0x7f0] sm:$0xff] }
 0xc49   :  { %4232 = vmatprep.subr.bf16.mxu1 %v4175_v2  ;;  %v3465_v2 = vld [vmem:[#allocation26] sm:$0xf] }
 0xc4c   :  { %4233 = vmatpush1.bf16.msra.mxu1 %v4174_v5  ;;  %v4324_v5 = vrot.slane %v3465_v2, %v8890_v6 }
 0xc4d   :  { %4234 = vmatprep.subr.bf16.mxu1 %v4179_v28  ;;  %v4328_v28 = vrot.slane %v3465_v2, %v8893_v9 }
 0xc50   :  { %4235 = vmatpush1.bf16.msra.mxu1 %v4178_v30 }
 0xc51   :  { %4236 = vmatprep.subr.bf16.mxu1 %v4183_v31 }
 0xc54   :  { %4237 = vmatpush1.bf16.msra.mxu1 %v4182_v38 }
 0xc55   :  { %4238 = vmatprep.subr.bf16.mxu1 %v4187_v35 }
 0xc58   :  { %4239 = vmatpush1.bf16.msra.mxu1 %v4186_v39 }
 0xc59   :  { %4240 = vmatprep.subr.bf16.mxu1 %v4191_v34 }
 0xc5c   :  { %4241 = vmatpush1.bf16.msra.mxu1 %v4190_v37 }
 0xc5d   :  { %4242 = vmatprep.subr.bf16.mxu1 %v4195_v41 }
 0xc60   :  { %4243 = vmatpush1.bf16.msra.mxu1 %v4194_v45 }
 0xc61   :  { %4244 = vmatprep.subr.bf16.mxu1 %v4199_v47 }
 0xc64   :  { %4245 = vmatpush1.bf16.msra.mxu1 %v4198_v59 }
 0xc65   :  { %4246 = vmatprep.subr.bf16.mxu1 %v4203_v63 }
 0xc68   :  { %4247 = vmatpush1.bf16.msra.mxu1 %v4202_v7 }
 0xc69   :  { %4248 = vmatprep.subr.bf16.mxu1 %v4207_v10 }
 0xc6c   :  { %4249 = vmatpush1.bf16.msra.mxu1 %v4206_v11 }
 0xc6d   :  { %4250 = vmatprep.subr.bf16.mxu1 %v4211_v14  ;;  %v4331_v14 = vsub.s32 2, %v8887_v3 }
 0xc70   :  { %4251 = vmatpush1.bf16.msra.mxu1 %v4210_v8  ;;  %v4335_v8 = vsub.s32 3, %v8887_v3 }
 0xc71   :  { %4252 = vmatprep.subr.bf16.mxu1 %v4215_v12  ;;  %v4332_v12 = vrot.slane %v3465_v2, %v4331_v14 }
 0xc74   :  { %4253 = vmatpush1.bf16.msra.mxu1 %v4214_v15  ;;  %v4336_v15 = vrot.slane %v3465_v2, %v4335_v8 }
 0xc75   :  { %4254 = vmatprep.subr.bf16.mxu1 %v4219_v16 }
 0xc78   :  { %4255 = vmatpush1.bf16.msra.mxu1 %v4218_v17 }
 0xc79   :  { %4256 = vmatprep.subr.bf16.mxu1 %v4223_v18 }
 0xc7c   :  { %4257 = vmatpush1.bf16.msra.mxu1 %v4222_v19 }
 0xc7d   :  { %4269 = vmatprep.subr.bf16.mxu1 %v4165_v20 }
 0xc7f   :  { %4259 = vmatmul.mubr.bf16.vlgmr.msra.gmra.mrb[72].mxu1 %v9036_v13 }
 0xc80   :  { %4270 = vmatpush1.bf16.msra.mxu1 %v4164_v21  ;;  %4301 = vmatprep.mubr.bf16.mxu1 %v9038_v52  ;;  %v4188_v52 = vld [vmem:[#allocation2 + $0x6d0] sm:$0xff] }
 0xc81   :  { %4271 = vmatprep.subr.bf16.mxu1 %v4169_v22 }
 0xc84   :  { %4272 = vmatpush1.bf16.msra.mxu1 %v4168_v23 }
 0xc85   :  { %4273 = vmatprep.subr.bf16.mxu1 %v4173_v24 }
 0xc88   :  { %4274 = vmatpush1.bf16.msra.mxu1 %v4172_v25 }
 0xc89   :  { %4275 = vmatprep.subr.bf16.mxu1 %v4177_v36 }
 0xc8c   :  { %4276 = vmatpush1.bf16.msra.mxu1 %v4176_v40 }
 0xc8d   :  { %4277 = vmatprep.subr.bf16.mxu1 %v4181_v42 }
 0xc90   :  { %4278 = vmatpush1.bf16.msra.mxu1 %v4180_v44 }
 0xc91   :  { %4279 = vmatprep.subr.bf16.mxu1 %v4185_v55 }
 0xc94   :  { %4280 = vmatpush1.bf16.msra.mxu1 %v4184_v62 }
 0xc95   :  { %4281 = vmatprep.subr.bf16.mxu1 %v4189_v4 }
 0xc98   :  { %4282 = vmatpush1.bf16.msra.mxu1 %v4188_v52 }
 0xc99   :  { %4283 = vmatprep.subr.bf16.mxu1 %v4193_v54 }
 0xc9c   :  { %4284 = vmatpush1.bf16.msra.mxu1 %v4192_v56 }
 0xc9d   :  { %4285 = vmatprep.subr.bf16.mxu1 %v4197_v61 }
 0xca0   :  { %4286 = vmatpush1.bf16.msra.mxu1 %v4196_v26 }
 0xca1   :  { %4287 = vmatprep.subr.bf16.mxu1 %v4201_v27 }
 0xca4   :  { %4288 = vmatpush1.bf16.msra.mxu1 %v4200_v29 }
 0xca5   :  { %4289 = vmatprep.subr.bf16.mxu1 %v4205_v32 }
 0xca8   :  { %4290 = vmatpush1.bf16.msra.mxu1 %v4204_v33 }
 0xca9   :  { %4291 = vmatprep.subr.bf16.mxu1 %v4209_v43 }
 0xcac   :  { %4292 = vmatpush1.bf16.msra.mxu1 %v4208_v46 }
 0xcad   :  { %4293 = vmatprep.subr.bf16.mxu1 %v4213_v48 }
 0xcb0   :  { %4294 = vmatpush1.bf16.msra.mxu1 %v4212_v49 }
 0xcb1   :  { %4295 = vmatprep.subr.bf16.mxu1 %v4217_v50 }
 0xcb4   :  { %4296 = vmatpush1.bf16.msra.mxu1 %v4216_v51 }
 0xcb5   :  { %4297 = vmatprep.subr.bf16.mxu1 %v4221_v53 }
 0xcb8   :  { %4298 = vmatpush1.bf16.msra.mxu1 %v4220_v58 }
 0xcb9   :  { %4299 = vmatprep.subr.bf16.mxu1 %v4225_v60 }
 0xcbc   :  { %4300 = vmatpush1.bf16.msra.mxu1 %v4224_v0 }
 0xcbf   :  { %4302 = vmatmul.mubr.bf16.vlgmr.msra.gmra.mrb[76].mxu1 %v9036_v13 }
 0xd52   :  { %v4260_v30 = vpop.f32.mrb[72].mxu1 }
 0xd53   :  { %v4341_v31 = vadd.f32 %v4324_v5, %v4260_v30  ;;  %v4262_v38 = vpop.f32.mrb[73].mxu1 }
 0xd54   :  { %v4342_v35 = vadd.f32 %v4328_v28, %v4262_v38  ;;  %v4264_v39 = vpop.f32.mrb[74].mxu1 }
 0xd55   :  { %vm4349_vm15 = vcmp.gt.f32.partialorder %v4341_v31, 0.0  ;;  %v4357_v34 = vmul.f32 0.2, %v4341_v31  ;;  %v4345_v37 = vadd.f32 %v4324_v5, %v4264_v39  ;;  %v4266_v41 = vpop.f32.mrb[75].mxu1 }
 0xd56   :  { %vm4350_vm1 = vcmp.gt.f32.partialorder %v4342_v35, 0.0  ;;  %v4358_v45 = vmul.f32 0.2, %v4342_v35  ;;  %v4346_v47 = vadd.f32 %v4328_v28, %v4266_v41 }
 0xd57   :  { %v4365_v59 = vsel %vm4349_vm15, %v4341_v31, %v4357_v34  ;;  %vm4353_vm2 = vcmp.gt.f32.partialorder %v4345_v37, 0.0  ;;  %v4361_v13 = vmul.f32 0.2, %v4345_v37 }
 0xd58   :  { %v4366_v63 = vsel %vm4350_vm1, %v4342_v35, %v4358_v45  ;;  %vm4354_vm3 = vcmp.gt.f32.partialorder %v4346_v47, 0.0  ;;  %v4362_v7 = vmul.f32 0.2, %v4346_v47 }
 0xd59   :  { %v4369_v10 = vsel %vm4353_vm2, %v4345_v37, %v4361_v13 }
 0xd5a   :  { %v4370_v11 = vsel %vm4354_vm3, %v4346_v47, %v4362_v7 }
 0xd92   :  { %v4303_v16 = vpop.f32.mrb[76].mxu1 }
 0xd93   :  { %v4343_v17 = vadd.f32 %v4332_v12, %v4303_v16  ;;  %v4305_v18 = vpop.f32.mrb[77].mxu1 }
 0xd94   :  { %v4344_v19 = vadd.f32 %v4336_v15, %v4305_v18  ;;  %v4307_v20 = vpop.f32.mrb[78].mxu1 }
 0xd95   :  { %vm4351_vm4 = vcmp.gt.f32.partialorder %v4343_v17, 0.0  ;;  %v4359_v21 = vmul.f32 0.2, %v4343_v17  ;;  %v4347_v22 = vadd.f32 %v4332_v12, %v4307_v20  ;;  %v4309_v23 = vpop.f32.mrb[79].mxu1 }
 0xd96   :  { %vm4352_vm5 = vcmp.gt.f32.partialorder %v4344_v19, 0.0  ;;  %v4360_v24 = vmul.f32 0.2, %v4344_v19  ;;  %v4348_v25 = vadd.f32 %v4336_v15, %v4309_v23 }
 0xd97   :  { %v4367_v36 = vsel %vm4351_vm4, %v4343_v17, %v4359_v21  ;;  %vm4355_vm6 = vcmp.gt.f32.partialorder %v4347_v22, 0.0  ;;  %v4363_v40 = vmul.f32 0.2, %v4347_v22 }
 0xd98   :  { %v4368_v42 = vsel %vm4352_vm5, %v4344_v19, %v4360_v24  ;;  %vm4356_vm8 = vcmp.gt.f32.partialorder %v4348_v25, 0.0  ;;  %v4364_v44 = vmul.f32 0.2, %v4348_v25 }
 0xd99   :  { %v4371_v55 = vsel %vm4355_vm6, %v4347_v22, %v4363_v40 }
 0xd9a   :  { %v4372_v62 = vsel %vm4356_vm8, %v4348_v25, %v4364_v44 }
 0xd9b   :  { %8217 = dma.done.wait [#allocation5 + $0x1], 49152 }
 0xd9c   :  { %8218 = vsyncadd [#allocation5 + $0x1], 4294918144  ;;  %v9055_v4 = vpack.c.bf16 %v4370_v11, %v4366_v63  ;;  %v4379_v52 = vpack.c.bf16 %v4369_v10, %v4365_v59  ;;  %4432 = vmatprep.mubr.bf16.mxu0 %v8259_v57  ;;  %v9058_v54 = vpack.c.bf16 %v4372_v62, %v4368_v42  ;;  %v4381_v61 = vpack.c.bf16 %v4371_v55, %v4367_v36  ;;  %v4383_v27 = vld [vmem:[#allocation27] sm:$0x7]  ;;  %v4489_v29 = vld [vmem:[#allocation3 + $0x18] sm:$0xff] }
 0xd9d   :  { %vm4384_vm9 = vcmask 80896   ;;  %5080 = vmatprep.subr.bf16.mxu1 %v4489_v29  ;;  %v4488_v32 = vld [vmem:[#allocation3 + $0x10] sm:$0xff]  ;;  %v4493_v33 = vld [vmem:[#allocation3 + $0x38] sm:$0xff]  ;;  %v4707_v58 = vld [vmem:[#allocation3 + $0x408] sm:$0xff] }
 0xd9e   :  { %6935 = vmatprep.subr.msk.bf16.mxu0 %vm3481_vm13, %v9055_v4  ;;  %v9063_v56 = vsel %vm3481_vm13, %v4379_v52, 0  ;;  %v9069_v26 = vsel %vm3481_vm13, %v4381_v61, 0  ;;  %5081 = vmatpush1.bf16.msra.mxu1 %v4488_v32  ;;  %v4492_v43 = vld [vmem:[#allocation3 + $0x30] sm:$0xff]  ;;  %v4497_v46 = vld [vmem:[#allocation3 + $0x58] sm:$0xff]  ;;  %v4706_v28 = vld [vmem:[#allocation3 + $0x400] sm:$0xff] }
 0xd9f   :  { %4401 = vmatpush1.bf16.msra.mxu0 %v9063_v56  ;;  %5082 = vmatprep.subr.bf16.mxu1 %v4493_v33  ;;  %v4496_v48 = vld [vmem:[#allocation3 + $0x50] sm:$0xff]  ;;  %v4501_v49 = vld [vmem:[#allocation3 + $0x78] sm:$0xff]  ;;  %v4711_v30 = vld [vmem:[#allocation3 + $0x428] sm:$0xff] }
 0xda0   :  { %6937 = vmatprep.subr.msk.bf16.mxu0 %vm3481_vm13, %v9058_v54  ;;  %v4500_v50 = vld [vmem:[#allocation3 + $0x70] sm:$0xff]  ;;  %v4505_v51 = vld [vmem:[#allocation3 + $0x98] sm:$0xff]  ;;  %v4710_v35 = vld [vmem:[#allocation3 + $0x420] sm:$0xff] }
 0xda1   :  { %v4615_v53 = vld [vmem:[#allocation27 + $0x4] sm:$0x7]  ;;  %v4509_v0 = vld [vmem:[#allocation3 + $0xb8] sm:$0xff]  ;;  %v4715_v39 = vld [vmem:[#allocation3 + $0x448] sm:$0xff] }
 0xda2   :  { %6936 = vmatmul.mubr.msk.bf16.vlgmr.msra.gmra.mrb[72].mxu0 %vm4384_vm9, %v4383_v27  ;;  %5083 = vmatpush1.bf16.msra.mxu1 %v4492_v43  ;;  %v4504_v60 = vld [vmem:[#allocation3 + $0x90] sm:$0xff]  ;;  %v4513_v5 = vld [vmem:[#allocation3 + $0xd8] sm:$0xff]  ;;  %v4714_v41 = vld [vmem:[#allocation3 + $0x440] sm:$0xff] }
 0xda3   :  { %4442 = vmatpush1.bf16.msra.mxu0 %v9069_v26  ;;  %4473 = vmatprep.mubr.bf16.mxu0 %v8259_v57  ;;  %v4508_v2 = vld [vmem:[#allocation3 + $0xb0] sm:$0xff]  ;;  %v4517_v38 = vld [vmem:[#allocation3 + $0xf8] sm:$0xff]  ;;  %v4719_v45 = vld [vmem:[#allocation3 + $0x468] sm:$0xff] }
 0xda4   :  { %6939 = vmatprep.subr.msk.bf16.mxu0 %vm3481_vm13, %v9055_v4  ;;  %5084 = vmatprep.subr.bf16.mxu1 %v4497_v46  ;;  %v4512_v31 = vld [vmem:[#allocation3 + $0xd0] sm:$0xff]  ;;  %v4521_v37 = vld [vmem:[#allocation3 + $0x118] sm:$0xff]  ;;  %v4718_v13 = vld [vmem:[#allocation3 + $0x460] sm:$0xff] }
 0xda5   :  { %v4516_v34 = vld [vmem:[#allocation3 + $0xf0] sm:$0xff]  ;;  %v4525_v59 = vld [vmem:[#allocation3 + $0x138] sm:$0xff]  ;;  %v4723_v63 = vld [vmem:[#allocation3 + $0x488] sm:$0xff] }
 0xda6   :  { %5085 = vmatpush1.bf16.msra.mxu1 %v4496_v48  ;;  %v4520_v47 = vld [vmem:[#allocation3 + $0x110] sm:$0xff]  ;;  %v4529_v10 = vld [vmem:[#allocation3 + $0x158] sm:$0xff]  ;;  %v4722_v11 = vld [vmem:[#allocation3 + $0x480] sm:$0xff] }
 0xda7   :  { %5086 = vmatprep.subr.bf16.mxu1 %v4501_v49  ;;  %v4524_v7 = vld [vmem:[#allocation3 + $0x130] sm:$0xff]  ;;  %v4727_v12 = vld [vmem:[#allocation3 + $0x4a8] sm:$0xff]  ;;  %v4533_v16 = vld [vmem:[#allocation3 + $0x178] sm:$0xff] }
 0xda8   :  { %v4528_v15 = vld [vmem:[#allocation3 + $0x150] sm:$0xff]  ;;  %v4726_v17 = vld [vmem:[#allocation3 + $0x4a0] sm:$0xff]  ;;  %v4731_v18 = vld [vmem:[#allocation3 + $0x4c8] sm:$0xff] }
 0xda9   :  { %v4532_v19 = vld [vmem:[#allocation3 + $0x170] sm:$0xff]  ;;  %v4537_v20 = vld [vmem:[#allocation3 + $0x198] sm:$0xff]  ;;  %v4730_v21 = vld [vmem:[#allocation3 + $0x4c0] sm:$0xff] }
 0xdaa   :  { %6938 = vmatmul.mubr.msk.bf16.vlgmr.msra.gmra.mrb[76].mxu0 %vm4384_vm9, %v4383_v27  ;;  %5087 = vmatpush1.bf16.msra.mxu1 %v4500_v50  ;;  %v4735_v22 = vld [vmem:[#allocation3 + $0x4e8] sm:$0xff]  ;;  %v4536_v23 = vld [vmem:[#allocation3 + $0x190] sm:$0xff]  ;;  %v4541_v24 = vld [vmem:[#allocation3 + $0x1b8] sm:$0xff] }
 0xdab   :  { %4620 = vmatpush1.bf16.msra.mxu0 %v9063_v56  ;;  %4651 = vmatprep.mubr.bf16.mxu0 %v8259_v57  ;;  %v4734_v25 = vld [vmem:[#allocation3 + $0x4e0] sm:$0xff]  ;;  %v4739_v36 = vld [vmem:[#allocation3 + $0x508] sm:$0xff]  ;;  %v4540_v40 = vld [vmem:[#allocation3 + $0x1b0] sm:$0xff] }
 0xdac   :  { %6941 = vmatprep.subr.msk.bf16.mxu0 %vm3481_vm13, %v9058_v54  ;;  %5088 = vmatprep.subr.bf16.mxu1 %v4505_v51  ;;  %v4545_v42 = vld [vmem:[#allocation3 + $0x1d8] sm:$0xff]  ;;  %v4738_v44 = vld [vmem:[#allocation3 + $0x500] sm:$0xff]  ;;  %v4743_v55 = vld [vmem:[#allocation3 + $0x528] sm:$0xff] }
 0xdad   :  { %v4544_v62 = vld [vmem:[#allocation3 + $0x1d0] sm:$0xff]  ;;  %v4742_v52 = vld [vmem:[#allocation3 + $0x520] sm:$0xff]  ;;  %v4747_v61 = vld [vmem:[#allocation3 + $0x548] sm:$0xff] }
 0xdae   :  { %5089 = vmatpush1.bf16.msra.mxu1 %v4504_v60  ;;  %v4746_v27 = vld [vmem:[#allocation3 + $0x540] sm:$0xff]  ;;  %v4751_v29 = vld [vmem:[#allocation3 + $0x568] sm:$0xff]  ;;  %v4549_v33 = vld [vmem:[#allocation3 + $0x1f8] sm:$0xff] }
 0xdaf   :  { %5090 = vmatprep.subr.bf16.mxu1 %v4509_v0  ;;  %v4750_v32 = vld [vmem:[#allocation3 + $0x560] sm:$0xff]  ;;  %v4548_v43 = vld [vmem:[#allocation3 + $0x1f0] sm:$0xff]  ;;  %v4755_v46 = vld [vmem:[#allocation3 + $0x588] sm:$0xff] }
 0xdb0   :  { %v4754_v48 = vld [vmem:[#allocation3 + $0x580] sm:$0xff]  ;;  %v4759_v49 = vld [vmem:[#allocation3 + $0x5a8] sm:$0xff] }
 0xdb1   :  { %v4758_v50 = vld [vmem:[#allocation3 + $0x5a0] sm:$0xff]  ;;  %v4763_v51 = vld [vmem:[#allocation3 + $0x5c8] sm:$0xff] }
 0xdb2   :  { %6940 = vmatmul.mubr.msk.bf16.vlgmr.msra.gmra.mrb[80].mxu0 %vm4384_vm9, %v4615_v53  ;;  %5091 = vmatpush1.bf16.msra.mxu1 %v4508_v2  ;;  %v4766_v60 = vld [vmem:[#allocation3 + $0x5e0] sm:$0xff]  ;;  %v4771_v0 = vld [vmem:[#allocation3 + $0x608] sm:$0xff] }
 0xdb3   :  { %4661 = vmatpush1.bf16.msra.mxu0 %v9069_v26  ;;  %4692 = vmatprep.mubr.bf16.mxu0 %v8259_v57 }
 0xdb4   :  { %4834 = vmatprep.subr.bf16.mxu0 %v4707_v58  ;;  %5092 = vmatprep.subr.bf16.mxu1 %v4513_v5  ;;  %v4767_v58 = vld [vmem:[#allocation3 + $0x5e8] sm:$0xff] }
 0xdb6   :  { %5093 = vmatpush1.bf16.msra.mxu1 %v4512_v31 }
 0xdb7   :  { %5094 = vmatprep.subr.bf16.mxu1 %v4517_v38 }
 0xdba   :  { %6942 = vmatmul.mubr.msk.bf16.vlgmr.msra.gmra.mrb[84].mxu0 %vm4384_vm9, %v4615_v53  ;;  %5095 = vmatpush1.bf16.msra.mxu1 %v4516_v34  ;;  %v4762_v53 = vld [vmem:[#allocation3 + $0x5c0] sm:$0xff] }
 0xdbb   :  { %4835 = vmatpush1.bf16.msra.mxu0 %v4706_v28  ;;  %5096 = vmatprep.subr.bf16.mxu1 %v4521_v37 }
 0xdbc   :  { %4836 = vmatprep.subr.bf16.mxu0 %v4711_v30 }
 0xdbe   :  { %5097 = vmatpush1.bf16.msra.mxu1 %v4520_v47 }
 0xdbf   :  { %4837 = vmatpush1.bf16.msra.mxu0 %v4710_v35  ;;  %5098 = vmatprep.subr.bf16.mxu1 %v4525_v59 }
 0xdc0   :  { %4838 = vmatprep.subr.bf16.mxu0 %v4715_v39 }
 0xdc2   :  { %5099 = vmatpush1.bf16.msra.mxu1 %v4524_v7  ;;  %v4779_v7 = vld [vmem:[#allocation3 + $0x648] sm:$0xff] }
 0xdc3   :  { %4839 = vmatpush1.bf16.msra.mxu0 %v4714_v41  ;;  %5100 = vmatprep.subr.bf16.mxu1 %v4529_v10 }
 0xdc4   :  { %4840 = vmatprep.subr.bf16.mxu0 %v4719_v45 }
 0xdc6   :  { %5101 = vmatpush1.bf16.msra.mxu1 %v4528_v15 }
 0xdc7   :  { %4841 = vmatpush1.bf16.msra.mxu0 %v4718_v13  ;;  %5102 = vmatprep.subr.bf16.mxu1 %v4533_v16  ;;  %v4778_v16 = vld [vmem:[#allocation3 + $0x640] sm:$0xff] }
 0xdc8   :  { %4842 = vmatprep.subr.bf16.mxu0 %v4723_v63  ;;  %v4775_v63 = vld [vmem:[#allocation3 + $0x628] sm:$0xff] }
 0xdca   :  { %5103 = vmatpush1.bf16.msra.mxu1 %v4532_v19  ;;  %v4782_v19 = vld [vmem:[#allocation3 + $0x660] sm:$0xff] }
 0xdcb   :  { %4843 = vmatpush1.bf16.msra.mxu0 %v4722_v11  ;;  %5104 = vmatprep.subr.bf16.mxu1 %v4537_v20  ;;  %v4787_v20 = vld [vmem:[#allocation3 + $0x688] sm:$0xff] }
 0xdcc   :  { %4844 = vmatprep.subr.bf16.mxu0 %v4727_v12 }
 0xdce   :  { %5105 = vmatpush1.bf16.msra.mxu1 %v4536_v23  ;;  %v4790_v23 = vld [vmem:[#allocation3 + $0x6a0] sm:$0xff] }
 0xdcf   :  { %4845 = vmatpush1.bf16.msra.mxu0 %v4726_v17  ;;  %5106 = vmatprep.subr.bf16.mxu1 %v4541_v24  ;;  %v4795_v24 = vld [vmem:[#allocation3 + $0x6c8] sm:$0xff] }
 0xdd0   :  { %4846 = vmatprep.subr.bf16.mxu0 %v4731_v18  ;;  %v4783_v18 = vld [vmem:[#allocation3 + $0x668] sm:$0xff] }
 0xdd2   :  { %5107 = vmatpush1.bf16.msra.mxu1 %v4540_v40  ;;  %v4798_v40 = vld [vmem:[#allocation3 + $0x6e0] sm:$0xff] }
 0xdd3   :  { %4847 = vmatpush1.bf16.msra.mxu0 %v4730_v21  ;;  %5108 = vmatprep.subr.bf16.mxu1 %v4545_v42  ;;  %v4786_v21 = vld [vmem:[#allocation3 + $0x680] sm:$0xff]  ;;  %v4803_v42 = vld [vmem:[#allocation3 + $0x708] sm:$0xff] }
 0xdd4   :  { %4848 = vmatprep.subr.bf16.mxu0 %v4735_v22  ;;  %v4791_v22 = vld [vmem:[#allocation3 + $0x6a8] sm:$0xff] }
 0xdd6   :  { %5109 = vmatpush1.bf16.msra.mxu1 %v4544_v62  ;;  %v4807_v62 = vld [vmem:[#allocation3 + $0x728] sm:$0xff] }
 0xdd7   :  { %4849 = vmatpush1.bf16.msra.mxu0 %v4734_v25  ;;  %5110 = vmatprep.subr.bf16.mxu1 %v4549_v33  ;;  %v4794_v25 = vld [vmem:[#allocation3 + $0x6c0] sm:$0xff]  ;;  %v4819_v33 = vld [vmem:[#allocation3 + $0x788] sm:$0xff] }
 0xdd8   :  { %4850 = vmatprep.subr.bf16.mxu0 %v4739_v36  ;;  %v4799_v36 = vld [vmem:[#allocation3 + $0x6e8] sm:$0xff] }
 0xdda   :  { %5111 = vmatpush1.bf16.msra.mxu1 %v4548_v43  ;;  %v4823_v43 = vld [vmem:[#allocation3 + $0x7a8] sm:$0xff] }
 0xddb   :  { %4851 = vmatpush1.bf16.msra.mxu0 %v4738_v44  ;;  %6943 = vmatprep.subr.msk.bf16.mxu1 %vm3481_vm13, %v9055_v4  ;;  %v5163_v44 = vld [vmem:[#allocation27 + $0x8] sm:$0x7] }
 0xddc   :  { %4852 = vmatprep.subr.bf16.mxu0 %v4743_v55  ;;  %v4802_v55 = vld [vmem:[#allocation3 + $0x700] sm:$0xff] }
 0xddf   :  { %4853 = vmatpush1.bf16.msra.mxu0 %v4742_v52  ;;  %v4806_v52 = vld [vmem:[#allocation3 + $0x720] sm:$0xff] }
 0xde0   :  { %4854 = vmatprep.subr.bf16.mxu0 %v4747_v61  ;;  %v4811_v61 = vld [vmem:[#allocation3 + $0x748] sm:$0xff] }
 0xde3   :  { %4855 = vmatpush1.bf16.msra.mxu0 %v4746_v27  ;;  %v4810_v27 = vld [vmem:[#allocation3 + $0x740] sm:$0xff] }
 0xde4   :  { %4856 = vmatprep.subr.bf16.mxu0 %v4751_v29  ;;  %v4815_v29 = vld [vmem:[#allocation3 + $0x768] sm:$0xff] }
 0xde7   :  { %4857 = vmatpush1.bf16.msra.mxu0 %v4750_v32  ;;  %v4814_v32 = vld [vmem:[#allocation3 + $0x760] sm:$0xff] }
 0xde8   :  { %4858 = vmatprep.subr.bf16.mxu0 %v4755_v46  ;;  %v4822_v46 = vld [vmem:[#allocation3 + $0x7a0] sm:$0xff] }
 0xdeb   :  { %4859 = vmatpush1.bf16.msra.mxu0 %v4754_v48  ;;  %v4827_v48 = vld [vmem:[#allocation3 + $0x7c8] sm:$0xff] }
 0xdec   :  { %4860 = vmatprep.subr.bf16.mxu0 %v4759_v49  ;;  %v4826_v49 = vld [vmem:[#allocation3 + $0x7c0] sm:$0xff] }
 0xdef   :  { %4861 = vmatpush1.bf16.msra.mxu0 %v4758_v50  ;;  %v4831_v50 = vld [vmem:[#allocation3 + $0x7e8] sm:$0xff] }
 0xdf0   :  { %4862 = vmatprep.subr.bf16.mxu0 %v4763_v51  ;;  %v4830_v51 = vld [vmem:[#allocation3 + $0x7e0] sm:$0xff] }
 0xdf3   :  { %4863 = vmatpush1.bf16.msra.mxu0 %v4762_v53  ;;  %v4709_v53 = vld [vmem:[#allocation3 + $0x418] sm:$0xff] }
 0xdf4   :  { %4864 = vmatprep.subr.bf16.mxu0 %v4767_v58 }
 0xdf7   :  { %4865 = vmatpush1.bf16.msra.mxu0 %v4766_v60  ;;  %v4708_v60 = vld [vmem:[#allocation3 + $0x410] sm:$0xff] }
 0xdf8   :  { %4875 = vmatprep.subr.bf16.mxu0 %v4771_v0  ;;  %v4713_v0 = vld [vmem:[#allocation3 + $0x438] sm:$0xff] }
 0xe75   :  { %v4434_v2 = vpop.f32.mrb[72].mxu0 }
 0xe76   :  { %v4436_v5 = vpop.f32.mrb[73].mxu0  ;;  %v9089_v30 = vpack.c.bf16 %v4434_v2, %v4434_v2  ;;  %v4712_v2 = vld [vmem:[#allocation3 + $0x430] sm:$0xff] }
 0xe77   :  { %v9087_v4 = vpack.c.bf16 %v4436_v5, %v4436_v5  ;;  %v4438_v28 = vpop.f32.mrb[74].mxu0  ;;  %v4717_v5 = vld [vmem:[#allocation3 + $0x458] sm:$0xff] }
 0xe78   :  { %v4439_v31 = vpop.f32.mrb[75].mxu0  ;;  %v4716_v28 = vld [vmem:[#allocation3 + $0x450] sm:$0xff] }
 0xe79   :  { %5112 = vmatprep.mubr.bf16.mxu1 %v9087_v4  ;;  %v4721_v31 = vld [vmem:[#allocation3 + $0x478] sm:$0xff] }
 0xe7a   :  { %5113 = vmatmul.mubr.bf16.vlgmr.msra.gmra.mrb[80].mxu1 %v9089_v30 }
 0xe7b   :  { %5168 = vmatpush1.bf16.msra.mxu1 %v9063_v56  ;;  %5199 = vmatprep.mubr.bf16.mxu1 %v8259_v57  ;;  %v4770_v56 = vld [vmem:[#allocation3 + $0x600] sm:$0xff] }
 0xe7c   :  { %6945 = vmatprep.subr.msk.bf16.mxu1 %vm3481_vm13, %v9058_v54  ;;  %v4774_v54 = vld [vmem:[#allocation3 + $0x620] sm:$0xff] }
 0xe7d   :  { %v9097_v38 = vpop.f32.mrb[76].mxu0 }
 0xe7e   :  { %v9099_v35 = vpop.f32.mrb[77].mxu0 }
 0xe7f   :  { %v4479_v39 = vpop.f32.mrb[78].mxu0 }
 0xe80   :  { %v4480_v34 = vpop.f32.mrb[79].mxu0  ;;  %v4720_v39 = vld [vmem:[#allocation3 + $0x470] sm:$0xff] }
 0xe81   :  { %v4725_v34 = vld [vmem:[#allocation3 + $0x498] sm:$0xff] }
 0xe82   :  { %6944 = vmatmul.mubr.msk.bf16.vlgmr.msra.gmra.mrb[84].mxu1 %vm4384_vm9, %v5163_v44 }
 0xe83   :  { %5209 = vmatpush1.bf16.msra.mxu1 %v9069_v26  ;;  %5240 = vmatprep.mubr.bf16.mxu1 %v8259_v57  ;;  %v4818_v26 = vld [vmem:[#allocation3 + $0x780] sm:$0xff] }
 0xe85   :  { %v4653_v37 = vpop.f32.mrb[80].mxu0 }
 0xe86   :  { %v4655_v41 = vpop.f32.mrb[81].mxu0  ;;  %v9103_v59 = vpack.c.bf16 %v4653_v37, %v4653_v37  ;;  %v4724_v37 = vld [vmem:[#allocation3 + $0x490] sm:$0xff] }
 0xe87   :  { %v9101_v45 = vpack.c.bf16 %v4655_v41, %v4655_v41  ;;  %v4657_v47 = vpop.f32.mrb[82].mxu0  ;;  %v4729_v41 = vld [vmem:[#allocation3 + $0x4b8] sm:$0xff] }
 0xe88   :  { %v4658_v13 = vpop.f32.mrb[83].mxu0  ;;  %v4728_v47 = vld [vmem:[#allocation3 + $0x4b0] sm:$0xff] }
 0xe89   :  { %4866 = vmatprep.mubr.bf16.mxu0 %v9101_v45  ;;  %v4733_v13 = vld [vmem:[#allocation3 + $0x4d8] sm:$0xff] }
 0xe8a   :  { %4867 = vmatmul.mubr.bf16.vlgmr.msra.gmra.mrb[88].mxu0 %v9103_v59  ;;  %6946 = vmatmul.mubr.msk.bf16.vlgmr.msra.gmra.mrb[88].mxu1 %vm4384_vm9, %v5163_v44  ;;  %v4777_v44 = vld [vmem:[#allocation3 + $0x638] sm:$0xff] }
 0xe8b   :  { %4876 = vmatpush1.bf16.msra.mxu0 %v4770_v56  ;;  %v4737_v56 = vld [vmem:[#allocation3 + $0x4f8] sm:$0xff] }
 0xe8c   :  { %4877 = vmatprep.subr.bf16.mxu0 %v4775_v63  ;;  %v4736_v63 = vld [vmem:[#allocation3 + $0x4f0] sm:$0xff] }
 0xe8d   :  { %v9107_v10 = vpop.f32.mrb[84].mxu0 }
 0xe8e   :  { %v4696_v11 = vpop.f32.mrb[85].mxu0  ;;  %v9118_v58 = vpack.c.bf16 %v9107_v10, %v9107_v10  ;;  %v4745_v10 = vld [vmem:[#allocation3 + $0x538] sm:$0xff] }
 0xe8f   :  { %4878 = vmatpush1.bf16.msra.mxu0 %v4774_v54  ;;  %v9109_v12 = vpack.c.bf16 %v4696_v11, %v4696_v11  ;;  %v4698_v15 = vpop.f32.mrb[86].mxu0  ;;  %v4741_v54 = vld [vmem:[#allocation3 + $0x518] sm:$0xff]  ;;  %v4744_v11 = vld [vmem:[#allocation3 + $0x530] sm:$0xff] }
 0xe90   :  { %4879 = vmatprep.subr.bf16.mxu0 %v4779_v7  ;;  %v4699_v17 = vpop.f32.mrb[87].mxu0  ;;  %v4740_v7 = vld [vmem:[#allocation3 + $0x510] sm:$0xff]  ;;  %v4749_v15 = vld [vmem:[#allocation3 + $0x558] sm:$0xff] }
 0xe91   :  { %4907 = vmatprep.mubr.bf16.mxu0 %v9109_v12  ;;  %v4753_v17 = vld [vmem:[#allocation3 + $0x578] sm:$0xff] }
 0xe93   :  { %4880 = vmatpush1.bf16.msra.mxu0 %v4778_v16  ;;  %v4748_v16 = vld [vmem:[#allocation3 + $0x550] sm:$0xff] }
 0xe94   :  { %4881 = vmatprep.subr.bf16.mxu0 %v4783_v18  ;;  %v4752_v18 = vld [vmem:[#allocation3 + $0x570] sm:$0xff] }
 0xe97   :  { %4882 = vmatpush1.bf16.msra.mxu0 %v4782_v19  ;;  %v4757_v19 = vld [vmem:[#allocation3 + $0x598] sm:$0xff] }
 0xe98   :  { %4883 = vmatprep.subr.bf16.mxu0 %v4787_v20  ;;  %v4756_v20 = vld [vmem:[#allocation3 + $0x590] sm:$0xff] }
 0xe9b   :  { %4884 = vmatpush1.bf16.msra.mxu0 %v4786_v21  ;;  %v4761_v21 = vld [vmem:[#allocation3 + $0x5b8] sm:$0xff] }
 0xe9c   :  { %4885 = vmatprep.subr.bf16.mxu0 %v4791_v22  ;;  %v4760_v22 = vld [vmem:[#allocation3 + $0x5b0] sm:$0xff] }
 0xe9f   :  { %4886 = vmatpush1.bf16.msra.mxu0 %v4790_v23  ;;  %v4765_v23 = vld [vmem:[#allocation3 + $0x5d8] sm:$0xff] }
 0xea0   :  { %4887 = vmatprep.subr.bf16.mxu0 %v4795_v24  ;;  %v4764_v24 = vld [vmem:[#allocation3 + $0x5d0] sm:$0xff] }
 0xea3   :  { %4888 = vmatpush1.bf16.msra.mxu0 %v4794_v25  ;;  %v4769_v25 = vld [vmem:[#allocation3 + $0x5f8] sm:$0xff] }
 0xea4   :  { %4889 = vmatprep.subr.bf16.mxu0 %v4799_v36  ;;  %v4768_v36 = vld [vmem:[#allocation3 + $0x5f0] sm:$0xff] }
 0xea7   :  { %4890 = vmatpush1.bf16.msra.mxu0 %v4798_v40  ;;  %v4773_v40 = vld [vmem:[#allocation3 + $0x618] sm:$0xff] }
 0xea8   :  { %4891 = vmatprep.subr.bf16.mxu0 %v4803_v42  ;;  %v4772_v42 = vld [vmem:[#allocation3 + $0x610] sm:$0xff] }
 0xeab   :  { %4892 = vmatpush1.bf16.msra.mxu0 %v4802_v55  ;;  %v4776_v55 = vld [vmem:[#allocation3 + $0x630] sm:$0xff] }
 0xeac   :  { %4893 = vmatprep.subr.bf16.mxu0 %v4807_v62  ;;  %v4781_v62 = vld [vmem:[#allocation3 + $0x658] sm:$0xff] }
 0xeaf   :  { %4894 = vmatpush1.bf16.msra.mxu0 %v4806_v52  ;;  %v4780_v52 = vld [vmem:[#allocation3 + $0x650] sm:$0xff] }
 0xeb0   :  { %4895 = vmatprep.subr.bf16.mxu0 %v4811_v61  ;;  %v4785_v61 = vld [vmem:[#allocation3 + $0x678] sm:$0xff] }
 0xeb3   :  { %4896 = vmatpush1.bf16.msra.mxu0 %v4810_v27  ;;  %v4784_v27 = vld [vmem:[#allocation3 + $0x670] sm:$0xff] }
 0xeb4   :  { %4897 = vmatprep.subr.bf16.mxu0 %v4815_v29  ;;  %v4789_v29 = vld [vmem:[#allocation3 + $0x698] sm:$0xff] }
 0xeb7   :  { %4898 = vmatpush1.bf16.msra.mxu0 %v4814_v32  ;;  %v4788_v32 = vld [vmem:[#allocation3 + $0x690] sm:$0xff] }
 0xeb8   :  { %4899 = vmatprep.subr.bf16.mxu0 %v4819_v33  ;;  %v4793_v33 = vld [vmem:[#allocation3 + $0x6b8] sm:$0xff] }
 0xebb   :  { %4900 = vmatpush1.bf16.msra.mxu0 %v4818_v26  ;;  %v4797_v26 = vld [vmem:[#allocation3 + $0x6d8] sm:$0xff] }
 0xebc   :  { %4901 = vmatprep.subr.bf16.mxu0 %v4823_v43  ;;  %v4801_v43 = vld [vmem:[#allocation3 + $0x6f8] sm:$0xff] }
 0xebf   :  { %4902 = vmatpush1.bf16.msra.mxu0 %v4822_v46  ;;  %v4800_v46 = vld [vmem:[#allocation3 + $0x6f0] sm:$0xff] }
 0xec0   :  { %4903 = vmatprep.subr.bf16.mxu0 %v4827_v48  ;;  %v4805_v48 = vld [vmem:[#allocation3 + $0x718] sm:$0xff] }
 0xec3   :  { %4904 = vmatpush1.bf16.msra.mxu0 %v4826_v49  ;;  %v4804_v49 = vld [vmem:[#allocation3 + $0x710] sm:$0xff] }
 0xec4   :  { %4905 = vmatprep.subr.bf16.mxu0 %v4831_v50  ;;  %v4809_v50 = vld [vmem:[#allocation3 + $0x738] sm:$0xff] }
 0xec7   :  { %4906 = vmatpush1.bf16.msra.mxu0 %v4830_v51  ;;  %v4808_v51 = vld [vmem:[#allocation3 + $0x730] sm:$0xff] }
 0xec8   :  { %4916 = vmatprep.subr.bf16.mxu0 %v4709_v53  ;;  %v4813_v53 = vld [vmem:[#allocation3 + $0x758] sm:$0xff] }
 0xeca   :  { %4908 = vmatmul.mubr.bf16.vlgmr.msra.gmra.mrb[92].mxu0 %v9118_v58 }
 0xecb   :  { %4917 = vmatpush1.bf16.msra.mxu0 %v4708_v60  ;;  %4948 = vmatprep.mubr.bf16.mxu0 %v9101_v45  ;;  %v4732_v45 = vld [vmem:[#allocation3 + $0x4d0] sm:$0xff] }
 0xecc   :  { %4918 = vmatprep.subr.bf16.mxu0 %v4713_v0  ;;  %v4812_v60 = vld [vmem:[#allocation3 + $0x750] sm:$0xff]  ;;  %v4817_v0 = vld [vmem:[#allocation3 + $0x778] sm:$0xff] }
 0xecf   :  { %4919 = vmatpush1.bf16.msra.mxu0 %v4712_v2  ;;  %v4816_v2 = vld [vmem:[#allocation3 + $0x770] sm:$0xff] }
 0xed0   :  { %4920 = vmatprep.subr.bf16.mxu0 %v4717_v5  ;;  %v4821_v5 = vld [vmem:[#allocation3 + $0x798] sm:$0xff] }
 0xed3   :  { %4921 = vmatpush1.bf16.msra.mxu0 %v4716_v28  ;;  %v4820_v28 = vld [vmem:[#allocation3 + $0x790] sm:$0xff] }
 0xed4   :  { %4922 = vmatprep.subr.bf16.mxu0 %v4721_v31  ;;  %v4825_v31 = vld [vmem:[#allocation3 + $0x7b8] sm:$0xff] }
 0xed7   :  { %4923 = vmatpush1.bf16.msra.mxu0 %v4720_v39  ;;  %v4824_v39 = vld [vmem:[#allocation3 + $0x7b0] sm:$0xff] }
 0xed8   :  { %4924 = vmatprep.subr.bf16.mxu0 %v4725_v34  ;;  %v5255_v34 = vld [vmem:[#allocation3 + $0x808] sm:$0xff] }
 0xed9   :  { %5382 = vmatprep.subr.bf16.mxu1 %v5255_v34  ;;  %v5298_v34 = vld [vmem:[#allocation3 + $0x960] sm:$0xff] }
 0xedb   :  { %4925 = vmatpush1.bf16.msra.mxu0 %v4724_v37  ;;  %v4829_v37 = vld [vmem:[#allocation3 + $0x7d8] sm:$0xff] }
 0xedc   :  { %4926 = vmatprep.subr.bf16.mxu0 %v4729_v41  ;;  %v5254_v41 = vld [vmem:[#allocation3 + $0x800] sm:$0xff] }
 0xedd   :  { %5383 = vmatpush1.bf16.msra.mxu1 %v5254_v41  ;;  %v5303_v41 = vld [vmem:[#allocation3 + $0x988] sm:$0xff] }
 0xedf   :  { %4927 = vmatpush1.bf16.msra.mxu0 %v4728_v47  ;;  %v4828_v47 = vld [vmem:[#allocation3 + $0x7d0] sm:$0xff] }
 0xee0   :  { %4928 = vmatprep.subr.bf16.mxu0 %v4733_v13  ;;  %v5259_v13 = vld [vmem:[#allocation3 + $0x828] sm:$0xff] }
 0xee1   :  { %5384 = vmatprep.subr.bf16.mxu1 %v5259_v13  ;;  %v5302_v13 = vld [vmem:[#allocation3 + $0x980] sm:$0xff] }
 0xee3   :  { %4929 = vmatpush1.bf16.msra.mxu0 %v4732_v45  ;;  %v4833_v45 = vld [vmem:[#allocation3 + $0x7f8] sm:$0xff] }
 0xee4   :  { %4930 = vmatprep.subr.bf16.mxu0 %v4737_v56  ;;  %v5258_v56 = vld [vmem:[#allocation3 + $0x820] sm:$0xff] }
 0xee5   :  { %5385 = vmatpush1.bf16.msra.mxu1 %v5258_v56  ;;  %v5307_v56 = vld [vmem:[#allocation3 + $0x9a8] sm:$0xff] }
 0xee7   :  { %4931 = vmatpush1.bf16.msra.mxu0 %v4736_v63  ;;  %v4832_v63 = vld [vmem:[#allocation3 + $0x7f0] sm:$0xff] }
 0xee8   :  { %4932 = vmatprep.subr.bf16.mxu0 %v4741_v54  ;;  %v5263_v54 = vld [vmem:[#allocation3 + $0x848] sm:$0xff] }
 0xee9   :  { %5386 = vmatprep.subr.bf16.mxu1 %v5263_v54  ;;  %v5306_v54 = vld [vmem:[#allocation3 + $0x9a0] sm:$0xff] }
 0xeeb   :  { %4933 = vmatpush1.bf16.msra.mxu0 %v4740_v7  ;;  %v4487_v7 = vld [vmem:[#allocation3 + $0x8] sm:$0xff] }
 0xeec   :  { %4934 = vmatprep.subr.bf16.mxu0 %v4745_v10  ;;  %v5262_v10 = vld [vmem:[#allocation3 + $0x840] sm:$0xff] }
 0xeed   :  { %5387 = vmatpush1.bf16.msra.mxu1 %v5262_v10  ;;  %v5311_v10 = vld [vmem:[#allocation3 + $0x9c8] sm:$0xff] }
 0xeef   :  { %4935 = vmatpush1.bf16.msra.mxu0 %v4744_v11  ;;  %v4486_v11 = vld [vmem:[#allocation3] sm:$0xff] }
 0xef0   :  { %4936 = vmatprep.subr.bf16.mxu0 %v4749_v15  ;;  %v4491_v15 = vld [vmem:[#allocation3 + $0x28] sm:$0xff] }
 0xef3   :  { %4937 = vmatpush1.bf16.msra.mxu0 %v4748_v16  ;;  %v5267_v16 = vld [vmem:[#allocation3 + $0x868] sm:$0xff] }
 0xef4   :  { %4938 = vmatprep.subr.bf16.mxu0 %v4753_v17  ;;  %5388 = vmatprep.subr.bf16.mxu1 %v5267_v16  ;;  %v5266_v17 = vld [vmem:[#allocation3 + $0x860] sm:$0xff] }
 0xef5   :  { %5389 = vmatpush1.bf16.msra.mxu1 %v5266_v17  ;;  %v4534_v16 = vld [vmem:[#allocation3 + $0x180] sm:$0xff]  ;;  %v5315_v17 = vld [vmem:[#allocation3 + $0x9e8] sm:$0xff] }
 0xef7   :  { %4939 = vmatpush1.bf16.msra.mxu0 %v4752_v18  ;;  %v4490_v18 = vld [vmem:[#allocation3 + $0x20] sm:$0xff] }
 0xef8   :  { %4940 = vmatprep.subr.bf16.mxu0 %v4757_v19  ;;  %v5271_v19 = vld [vmem:[#allocation3 + $0x888] sm:$0xff] }
 0xef9   :  { %5390 = vmatprep.subr.bf16.mxu1 %v5271_v19 }
 0xefb   :  { %4941 = vmatpush1.bf16.msra.mxu0 %v4756_v20 }
 0xefc   :  { %4942 = vmatprep.subr.bf16.mxu0 %v4761_v21  ;;  %v4495_v21 = vld [vmem:[#allocation3 + $0x48] sm:$0xff] }
 0xeff   :  { %4943 = vmatpush1.bf16.msra.mxu0 %v4760_v22 }
 0xf00   :  { %4944 = vmatprep.subr.bf16.mxu0 %v4765_v23  ;;  %v5270_v23 = vld [vmem:[#allocation3 + $0x880] sm:$0xff] }
 0xf01   :  { %5391 = vmatpush1.bf16.msra.mxu1 %v5270_v23 }
 0xf03   :  { %4945 = vmatpush1.bf16.msra.mxu0 %v4764_v24 }
 0xf04   :  { %4946 = vmatprep.subr.bf16.mxu0 %v4769_v25 }
 0xf07   :  { %4947 = vmatpush1.bf16.msra.mxu0 %v4768_v36  ;;  %v5275_v36 = vld [vmem:[#allocation3 + $0x8a8] sm:$0xff] }
 0xf08   :  { %4957 = vmatprep.subr.bf16.mxu0 %v4773_v40  ;;  %v4499_v40 = vld [vmem:[#allocation3 + $0x68] sm:$0xff]  ;;  %5392 = vmatprep.subr.bf16.mxu1 %v5275_v36  ;;  %v5257_v36 = vld [vmem:[#allocation3 + $0x818] sm:$0xff] }
 0xf0a   :  { %4949 = vmatmul.mubr.bf16.vlgmr.msra.gmra.mrb[96].mxu0 %v9103_v59  ;;  %v4792_v59 = vld [vmem:[#allocation3 + $0x6b0] sm:$0xff] }
 0xf0b   :  { %4958 = vmatpush1.bf16.msra.mxu0 %v4772_v42  ;;  %4989 = vmatprep.mubr.bf16.mxu0 %v9109_v12  ;;  %v4796_v12 = vld [vmem:[#allocation3 + $0x6d0] sm:$0xff]  ;;  %v4498_v42 = vld [vmem:[#allocation3 + $0x60] sm:$0xff] }
 0xf0c   :  { %4959 = vmatprep.subr.bf16.mxu0 %v4777_v44  ;;  %v5279_v44 = vld [vmem:[#allocation3 + $0x8c8] sm:$0xff] }
 0xf0f   :  { %4960 = vmatpush1.bf16.msra.mxu0 %v4776_v55  ;;  %v4503_v55 = vld [vmem:[#allocation3 + $0x88] sm:$0xff] }
 0xf10   :  { %4961 = vmatprep.subr.bf16.mxu0 %v4781_v62  ;;  %v5278_v62 = vld [vmem:[#allocation3 + $0x8c0] sm:$0xff] }
 0xf13   :  { %4962 = vmatpush1.bf16.msra.mxu0 %v4780_v52  ;;  %v4502_v52 = vld [vmem:[#allocation3 + $0x80] sm:$0xff] }
 0xf14   :  { %4963 = vmatprep.subr.bf16.mxu0 %v4785_v61  ;;  %v5283_v61 = vld [vmem:[#allocation3 + $0x8e8] sm:$0xff] }
 0xf17   :  { %4964 = vmatpush1.bf16.msra.mxu0 %v4784_v27  ;;  %v4507_v27 = vld [vmem:[#allocation3 + $0xa8] sm:$0xff] }
 0xf18   :  { %4965 = vmatprep.subr.bf16.mxu0 %v4789_v29  ;;  %v5282_v29 = vld [vmem:[#allocation3 + $0x8e0] sm:$0xff] }
 0xf1b   :  { %4966 = vmatpush1.bf16.msra.mxu0 %v4788_v32  ;;  %v4506_v32 = vld [vmem:[#allocation3 + $0xa0] sm:$0xff] }
 0xf1c   :  { %4967 = vmatprep.subr.bf16.mxu0 %v4793_v33 }
 0xf1f   :  { %4968 = vmatpush1.bf16.msra.mxu0 %v4792_v59  ;;  %v4511_v59 = vld [vmem:[#allocation3 + $0xc8] sm:$0xff] }
 0xf20   :  { %4969 = vmatprep.subr.bf16.mxu0 %v4797_v26  ;;  %v5287_v26 = vld [vmem:[#allocation3 + $0x908] sm:$0xff] }
 0xf23   :  { %4970 = vmatpush1.bf16.msra.mxu0 %v4796_v12 }
 0xf24   :  { %4971 = vmatprep.subr.bf16.mxu0 %v4801_v43  ;;  %v5286_v43 = vld [vmem:[#allocation3 + $0x900] sm:$0xff] }
 0xf27   :  { %4972 = vmatpush1.bf16.msra.mxu0 %v4800_v46 }
 0xf28   :  { %4973 = vmatprep.subr.bf16.mxu0 %v4805_v48 }
 0xf2b   :  { %4974 = vmatpush1.bf16.msra.mxu0 %v4804_v49  ;;  %v4510_v49 = vld [vmem:[#allocation3 + $0xc0] sm:$0xff] }
 0xf2c   :  { %4975 = vmatprep.subr.bf16.mxu0 %v4809_v50  ;;  %v5291_v50 = vld [vmem:[#allocation3 + $0x928] sm:$0xff] }
 0xf2f   :  { %4976 = vmatpush1.bf16.msra.mxu0 %v4808_v51  ;;  %v4515_v51 = vld [vmem:[#allocation3 + $0xe8] sm:$0xff] }
 0xf30   :  { %4977 = vmatprep.subr.bf16.mxu0 %v4813_v53  ;;  %v5290_v53 = vld [vmem:[#allocation3 + $0x920] sm:$0xff] }
 0xf33   :  { %4978 = vmatpush1.bf16.msra.mxu0 %v4812_v60  ;;  %v4514_v60 = vld [vmem:[#allocation3 + $0xe0] sm:$0xff] }
 0xf34   :  { %4979 = vmatprep.subr.bf16.mxu0 %v4817_v0  ;;  %v5295_v0 = vld [vmem:[#allocation3 + $0x948] sm:$0xff] }
 0xf37   :  { %4980 = vmatpush1.bf16.msra.mxu0 %v4816_v2  ;;  %v4519_v2 = vld [vmem:[#allocation3 + $0x108] sm:$0xff] }
 0xf38   :  { %4981 = vmatprep.subr.bf16.mxu0 %v4821_v5  ;;  %v5294_v5 = vld [vmem:[#allocation3 + $0x940] sm:$0xff] }
 0xf3b   :  { %4982 = vmatpush1.bf16.msra.mxu0 %v4820_v28  ;;  %v4518_v28 = vld [vmem:[#allocation3 + $0x100] sm:$0xff] }
 0xf3c   :  { %4983 = vmatprep.subr.bf16.mxu0 %v4825_v31  ;;  %v5299_v31 = vld [vmem:[#allocation3 + $0x968] sm:$0xff] }
 0xf3f   :  { %4984 = vmatpush1.bf16.msra.mxu0 %v4824_v39  ;;  %v4523_v39 = vld [vmem:[#allocation3 + $0x128] sm:$0xff] }
 0xf40   :  { %4985 = vmatprep.subr.bf16.mxu0 %v4829_v37  ;;  %v4522_v37 = vld [vmem:[#allocation3 + $0x120] sm:$0xff] }
 0xf43   :  { %4986 = vmatpush1.bf16.msra.mxu0 %v4828_v47  ;;  %v4527_v47 = vld [vmem:[#allocation3 + $0x148] sm:$0xff] }
 0xf44   :  { %4987 = vmatprep.subr.bf16.mxu0 %v4833_v45  ;;  %v4526_v45 = vld [vmem:[#allocation3 + $0x140] sm:$0xff] }
 0xf47   :  { %4988 = vmatpush1.bf16.msra.mxu0 %v4832_v63  ;;  %v4531_v63 = vld [vmem:[#allocation3 + $0x168] sm:$0xff] }
 0xf48   :  { %4998 = vmatprep.subr.bf16.mxu0 %v4487_v7  ;;  %v4530_v7 = vld [vmem:[#allocation3 + $0x160] sm:$0xff] }
 0xf4a   :  { %4990 = vmatmul.mubr.bf16.vlgmr.msra.gmra.mrb[100].mxu0 %v9118_v58  ;;  %v4494_v58 = vld [vmem:[#allocation3 + $0x40] sm:$0xff] }
 0xf4b   :  { %4999 = vmatpush1.bf16.msra.mxu0 %v4486_v11  ;;  %5030 = vmatprep.mubr.bf16.mxu0 %v9087_v4  ;;  %v5274_v4 = vld [vmem:[#allocation3 + $0x8a0] sm:$0xff]  ;;  %v4535_v11 = vld [vmem:[#allocation3 + $0x188] sm:$0xff] }
 0xf4c   :  { %5000 = vmatprep.subr.bf16.mxu0 %v4491_v15  ;;  %5393 = vmatpush1.bf16.msra.mxu1 %v5274_v4  ;;  %v5310_v15 = vld [vmem:[#allocation3 + $0x9c0] sm:$0xff]  ;;  %v4543_v4 = vld [vmem:[#allocation3 + $0x1c8] sm:$0xff] }
 0xf4d   :  { %v9126_v20 = vpop.f32.mrb[80].mxu1  ;;  %5394 = vmatprep.subr.bf16.mxu1 %v5279_v44  ;;  %v5256_v44 = vld [vmem:[#allocation3 + $0x810] sm:$0xff] }
 0xf4e   :  { %v9128_v22 = vpop.f32.mrb[81].mxu1 }
 0xf4f   :  { %5001 = vmatpush1.bf16.msra.mxu0 %v4490_v18  ;;  %v5118_v24 = vpop.f32.mrb[82].mxu1  ;;  %v4539_v18 = vld [vmem:[#allocation3 + $0x1a8] sm:$0xff] }
 0xf50   :  { %v5119_v25 = vpop.f32.mrb[83].mxu1  ;;  %5002 = vmatprep.subr.bf16.mxu0 %v4495_v21  ;;  %5395 = vmatpush1.bf16.msra.mxu1 %v5278_v62  ;;  %v5314_v21 = vld [vmem:[#allocation3 + $0x9e0] sm:$0xff]  ;;  %v5261_v62 = vld [vmem:[#allocation3 + $0x838] sm:$0xff] }
 0xf51   :  { %5396 = vmatprep.subr.bf16.mxu1 %v5283_v61  ;;  %v4538_v25 = vld [vmem:[#allocation3 + $0x1a0] sm:$0xff]  ;;  %v5260_v61 = vld [vmem:[#allocation3 + $0x830] sm:$0xff] }
 0xf53   :  { %5003 = vmatpush1.bf16.msra.mxu0 %v4494_v58 }
 0xf54   :  { %5004 = vmatprep.subr.bf16.mxu0 %v4499_v40  ;;  %5397 = vmatpush1.bf16.msra.mxu1 %v5282_v29  ;;  %v5265_v29 = vld [vmem:[#allocation3 + $0x858] sm:$0xff] }
 0xf55   :  { %5398 = vmatprep.subr.bf16.mxu1 %v5287_v26  ;;  %v5201_v19 = vpop.f32.mrb[84].mxu1  ;;  %v4550_v26 = vld [vmem:[#allocation3 + $0x200] sm:$0xff] }
 0xf56   :  { %v9134_v23 = vpack.c.bf16 %v5201_v19, %v5201_v19  ;;  %v5203_v24 = vpop.f32.mrb[85].mxu1  ;;  %v4579_v19 = vld [vmem:[#allocation3 + $0x2e8] sm:$0xff] }
 0xf57   :  { %5005 = vmatpush1.bf16.msra.mxu0 %v4498_v42  ;;  %v5250_v58 = vpack.c.bf16 %v5203_v24, %v5203_v24  ;;  %v5205_v40 = vpop.f32.mrb[86].mxu1  ;;  %v5297_v24 = vld [vmem:[#allocation3 + $0x958] sm:$0xff] }
 0xf58   :  { %5006 = vmatprep.subr.bf16.mxu0 %v4503_v55  ;;  %5399 = vmatpush1.bf16.msra.mxu1 %v5286_v43  ;;  %v5206_v42 = vpop.f32.mrb[87].mxu1  ;;  %v4542_v55 = vld [vmem:[#allocation3 + $0x1c0] sm:$0xff]  ;;  %v9139_v43 = vpack.c.bf16 %v9099_v35, %v9099_v35  ;;  %v4587_v40 = vld [vmem:[#allocation3 + $0x328] sm:$0xff] }
 0xf59   :  { %5400 = vmatprep.subr.bf16.mxu1 %v5291_v50  ;;  %5414 = vmatprep.mubr.bf16.mxu1 %v5250_v58  ;;  %v4554_v50 = vld [vmem:[#allocation3 + $0x220] sm:$0xff] }
 0xf5a   :  { %v4558_v35 = vld [vmem:[#allocation3 + $0x240] sm:$0xff] }
 0xf5b   :  { %5007 = vmatpush1.bf16.msra.mxu0 %v4502_v52  ;;  %v4547_v52 = vld [vmem:[#allocation3 + $0x1e8] sm:$0xff]  ;;  %v4586_v42 = vld [vmem:[#allocation3 + $0x320] sm:$0xff] }
 0xf5c   :  { %5008 = vmatprep.subr.bf16.mxu0 %v4507_v27  ;;  %5401 = vmatpush1.bf16.msra.mxu1 %v5290_v53  ;;  %v4546_v27 = vld [vmem:[#allocation3 + $0x1e0] sm:$0xff]  ;;  %v4559_v53 = vld [vmem:[#allocation3 + $0x248] sm:$0xff] }
 0xf5d   :  { %v9130_v33 = vpop.f32.mrb[88].mxu0  ;;  %5402 = vmatprep.subr.bf16.mxu1 %v5295_v0  ;;  %v5277_v0 = vld [vmem:[#allocation3 + $0x8b8] sm:$0xff] }
 0xf5e   :  { %v9132_v12 = vpop.f32.mrb[89].mxu0 }
 0xf5f   :  { %5009 = vmatpush1.bf16.msra.mxu0 %v4506_v32  ;;  %v4872_v46 = vpop.f32.mrb[90].mxu0  ;;  %v4551_v32 = vld [vmem:[#allocation3 + $0x208] sm:$0xff] }
 0xf60   :  { %v4873_v48 = vpop.f32.mrb[91].mxu0  ;;  %5010 = vmatprep.subr.bf16.mxu0 %v4511_v59  ;;  %5403 = vmatpush1.bf16.msra.mxu1 %v5294_v5  ;;  %v5264_v59 = vld [vmem:[#allocation3 + $0x850] sm:$0xff]  ;;  %v4555_v46 = vld [vmem:[#allocation3 + $0x228] sm:$0xff]  ;;  %v4562_v5 = vld [vmem:[#allocation3 + $0x260] sm:$0xff] }
 0xf61   :  { %5404 = vmatprep.subr.bf16.mxu1 %v5299_v31  ;;  %v5269_v48 = vld [vmem:[#allocation3 + $0x878] sm:$0xff]  ;;  %v4567_v31 = vld [vmem:[#allocation3 + $0x288] sm:$0xff] }
 0xf63   :  { %5011 = vmatpush1.bf16.msra.mxu0 %v4510_v49  ;;  %v5268_v49 = vld [vmem:[#allocation3 + $0x870] sm:$0xff] }
 0xf64   :  { %5012 = vmatprep.subr.bf16.mxu0 %v4515_v51  ;;  %5405 = vmatpush1.bf16.msra.mxu1 %v5298_v34  ;;  %v5273_v51 = vld [vmem:[#allocation3 + $0x898] sm:$0xff]  ;;  %v4566_v34 = vld [vmem:[#allocation3 + $0x280] sm:$0xff] }
 0xf65   :  { %5406 = vmatprep.subr.bf16.mxu1 %v5303_v41  ;;  %v4571_v41 = vld [vmem:[#allocation3 + $0x2a8] sm:$0xff] }
 0xf67   :  { %5013 = vmatpush1.bf16.msra.mxu0 %v4514_v60  ;;  %v5272_v60 = vld [vmem:[#allocation3 + $0x890] sm:$0xff] }
 0xf68   :  { %5014 = vmatprep.subr.bf16.mxu0 %v4519_v2  ;;  %5407 = vmatpush1.bf16.msra.mxu1 %v5302_v13  ;;  %v4563_v2 = vld [vmem:[#allocation3 + $0x268] sm:$0xff]  ;;  %v4570_v13 = vld [vmem:[#allocation3 + $0x2a0] sm:$0xff] }
 0xf69   :  { %5408 = vmatprep.subr.bf16.mxu1 %v5307_v56  ;;  %v4575_v56 = vld [vmem:[#allocation3 + $0x2c8] sm:$0xff] }
 0xf6b   :  { %5015 = vmatpush1.bf16.msra.mxu0 %v4518_v28  ;;  %v5281_v28 = vld [vmem:[#allocation3 + $0x8d8] sm:$0xff] }
 0xf6c   :  { %5016 = vmatprep.subr.bf16.mxu0 %v4523_v39  ;;  %5409 = vmatpush1.bf16.msra.mxu1 %v5306_v54  ;;  %v5280_v39 = vld [vmem:[#allocation3 + $0x8d0] sm:$0xff] }
 0xf6d   :  { %5410 = vmatprep.subr.bf16.mxu1 %v5311_v10  ;;  %v5288_v10 = vld [vmem:[#allocation3 + $0x910] sm:$0xff] }
 0xf6f   :  { %5017 = vmatpush1.bf16.msra.mxu0 %v4522_v37  ;;  %v5285_v37 = vld [vmem:[#allocation3 + $0x8f8] sm:$0xff] }
 0xf70   :  { %5018 = vmatprep.subr.bf16.mxu0 %v4527_v47  ;;  %5411 = vmatpush1.bf16.msra.mxu1 %v5310_v15  ;;  %v5284_v47 = vld [vmem:[#allocation3 + $0x8f0] sm:$0xff] }
 0xf71   :  { %5412 = vmatprep.subr.bf16.mxu1 %v5315_v17  ;;  %v4574_v17 = vld [vmem:[#allocation3 + $0x2c0] sm:$0xff] }
 0xf73   :  { %5019 = vmatpush1.bf16.msra.mxu0 %v4526_v45 }
 0xf74   :  { %5020 = vmatprep.subr.bf16.mxu0 %v4531_v63  ;;  %5413 = vmatpush1.bf16.msra.mxu1 %v5314_v21  ;;  %v5289_v63 = vld [vmem:[#allocation3 + $0x918] sm:$0xff]  ;;  %v5292_v21 = vld [vmem:[#allocation3 + $0x930] sm:$0xff] }
 0xf75   :  { %5464 = vmatprep.subr.bf16.mxu1 %v5257_v36  ;;  %v5301_v36 = vld [vmem:[#allocation3 + $0x978] sm:$0xff] }
 0xf77   :  { %5021 = vmatpush1.bf16.msra.mxu0 %v4530_v7  ;;  %5415 = vmatmul.mubr.bf16.vlgmr.msra.gmra.mrb[92].mxu1 %v9134_v23 }
 0xf78   :  { %5022 = vmatprep.subr.bf16.mxu0 %v4535_v11  ;;  %5465 = vmatpush1.bf16.msra.mxu1 %v5256_v44  ;;  %v5305_v44 = vld [vmem:[#allocation3 + $0x998] sm:$0xff] }
 0xf79   :  { %5466 = vmatprep.subr.bf16.mxu1 %v5261_v62  ;;  %5496 = vmatprep.mubr.bf16.mxu1 %v5250_v58  ;;  %v5296_v58 = vld [vmem:[#allocation3 + $0x950] sm:$0xff] }
 0xf7a   :  { %v5304_v62 = vld [vmem:[#allocation3 + $0x990] sm:$0xff] }
 0xf7b   :  { %5023 = vmatpush1.bf16.msra.mxu0 %v4534_v16 }
 0xf7c   :  { %5024 = vmatprep.subr.bf16.mxu0 %v4539_v18  ;;  %5467 = vmatpush1.bf16.msra.mxu1 %v5260_v61  ;;  %v5293_v18 = vld [vmem:[#allocation3 + $0x938] sm:$0xff] }
 0xf7d   :  { %5468 = vmatprep.subr.bf16.mxu1 %v5265_v29  ;;  %v5309_v61 = vld [vmem:[#allocation3 + $0x9b8] sm:$0xff]  ;;  %v5308_v29 = vld [vmem:[#allocation3 + $0x9b0] sm:$0xff] }
 0xf7f   :  { %5025 = vmatpush1.bf16.msra.mxu0 %v4538_v25  ;;  %v4583_v25 = vld [vmem:[#allocation3 + $0x308] sm:$0xff] }
 0xf80   :  { %5026 = vmatprep.subr.bf16.mxu0 %v4543_v4  ;;  %5469 = vmatpush1.bf16.msra.mxu1 %v5264_v59  ;;  %v5300_v4 = vld [vmem:[#allocation3 + $0x970] sm:$0xff]  ;;  %v5313_v59 = vld [vmem:[#allocation3 + $0x9d8] sm:$0xff] }
 0xf81   :  { %5470 = vmatprep.subr.bf16.mxu1 %v5269_v48  ;;  %v4598_v48 = vld [vmem:[#allocation3 + $0x380] sm:$0xff] }
 0xf83   :  { %5027 = vmatpush1.bf16.msra.mxu0 %v4542_v55  ;;  %v4591_v55 = vld [vmem:[#allocation3 + $0x348] sm:$0xff] }
 0xf84   :  { %5028 = vmatprep.subr.bf16.mxu0 %v4547_v52  ;;  %5471 = vmatpush1.bf16.msra.mxu1 %v5268_v49  ;;  %v4590_v52 = vld [vmem:[#allocation3 + $0x340] sm:$0xff]  ;;  %v5317_v49 = vld [vmem:[#allocation3 + $0x9f8] sm:$0xff] }
 0xf85   :  { %5472 = vmatprep.subr.bf16.mxu1 %v5273_v51  ;;  %v5316_v51 = vld [vmem:[#allocation3 + $0x9f0] sm:$0xff] }
 0xf87   :  { %5029 = vmatpush1.bf16.msra.mxu0 %v4546_v27  ;;  %v4595_v27 = vld [vmem:[#allocation3 + $0x368] sm:$0xff] }
 0xf88   :  { %5039 = vmatprep.subr.bf16.mxu0 %v4551_v32  ;;  %5473 = vmatpush1.bf16.msra.mxu1 %v5272_v60  ;;  %v4594_v32 = vld [vmem:[#allocation3 + $0x360] sm:$0xff]  ;;  %v4607_v60 = vld [vmem:[#allocation3 + $0x3c8] sm:$0xff] }
 0xf89   :  { %5474 = vmatprep.subr.bf16.mxu1 %v5277_v0  ;;  %v9150_v0 = vpop.f32.mrb[88].mxu1 }
 0xf8a   :  { %5031 = vmatmul.mubr.bf16.vlgmr.msra.gmra.mrb[104].mxu0 %v9089_v30  ;;  %v5276_v30 = vld [vmem:[#allocation3 + $0x8b0] sm:$0xff] }
 0xf8b   :  { %5040 = vmatpush1.bf16.msra.mxu0 %v4550_v26  ;;  %5071 = vmatprep.mubr.bf16.mxu0 %v9139_v43  ;;  %v4599_v26 = vld [vmem:[#allocation3 + $0x388] sm:$0xff] }
 0xf8c   :  { %5041 = vmatprep.subr.bf16.mxu0 %v4555_v46  ;;  %5475 = vmatpush1.bf16.msra.mxu1 %v5276_v30  ;;  %v5312_v46 = vld [vmem:[#allocation3 + $0x9d0] sm:$0xff]  ;;  %v9152_v30 = vpop.f32.mrb[89].mxu1 }
 0xf8d   :  { %5476 = vmatprep.subr.bf16.mxu1 %v5281_v28  ;;  %v5246_v28 = vpop.f32.mrb[90].mxu1 }
 0xf8f   :  { %5042 = vmatpush1.bf16.msra.mxu0 %v4554_v50  ;;  %v4603_v50 = vld [vmem:[#allocation3 + $0x3a8] sm:$0xff] }
 0xf90   :  { %5043 = vmatprep.subr.bf16.mxu0 %v4559_v53  ;;  %5477 = vmatpush1.bf16.msra.mxu1 %v5280_v39  ;;  %v4602_v53 = vld [vmem:[#allocation3 + $0x3a0] sm:$0xff]  ;;  %v5247_v39 = vpop.f32.mrb[91].mxu1 }
 0xf91   :  { %5478 = vmatprep.subr.bf16.mxu1 %v5285_v37  ;;  %v4557_v37 = vld [vmem:[#allocation3 + $0x238] sm:$0xff] }
 0xf93   :  { %5044 = vmatpush1.bf16.msra.mxu0 %v4558_v35  ;;  %v4606_v35 = vld [vmem:[#allocation3 + $0x3c0] sm:$0xff] }
 0xf94   :  { %5045 = vmatprep.subr.bf16.mxu0 %v4563_v2  ;;  %5479 = vmatpush1.bf16.msra.mxu1 %v5284_v47  ;;  %v4611_v2 = vld [vmem:[#allocation3 + $0x3e8] sm:$0xff]  ;;  %v4561_v47 = vld [vmem:[#allocation3 + $0x258] sm:$0xff] }
 0xf95   :  { %5480 = vmatprep.subr.bf16.mxu1 %v5289_v63  ;;  %v4568_v63 = vld [vmem:[#allocation3 + $0x290] sm:$0xff] }
 0xf97   :  { %5046 = vmatpush1.bf16.msra.mxu0 %v4562_v5  ;;  %v4610_v5 = vld [vmem:[#allocation3 + $0x3e0] sm:$0xff] }
 0xf98   :  { %5047 = vmatprep.subr.bf16.mxu0 %v4567_v31  ;;  %5481 = vmatpush1.bf16.msra.mxu1 %v5288_v10  ;;  %v4553_v31 = vld [vmem:[#allocation3 + $0x218] sm:$0xff]  ;;  %v4572_v10 = vld [vmem:[#allocation3 + $0x2b0] sm:$0xff] }
 0xf99   :  { %5482 = vmatprep.subr.bf16.mxu1 %v5293_v18 }
 0xf9b   :  { %5048 = vmatpush1.bf16.msra.mxu0 %v4566_v34  ;;  %v9156_v34 = vpack.c.bf16 %v9097_v38, %v9097_v38  ;;  %v4569_v38 = vld [vmem:[#allocation3 + $0x298] sm:$0xff] }
 0xf9c   :  { %5049 = vmatprep.subr.bf16.mxu0 %v4571_v41  ;;  %5483 = vmatpush1.bf16.msra.mxu1 %v5292_v21  ;;  %v4556_v41 = vld [vmem:[#allocation3 + $0x230] sm:$0xff]  ;;  %v4581_v21 = vld [vmem:[#allocation3 + $0x2f8] sm:$0xff] }
 0xf9d   :  { %v4909_v45 = vpop.f32.mrb[92].mxu0  ;;  %5484 = vmatprep.subr.bf16.mxu1 %v5297_v24  ;;  %v4585_v24 = vld [vmem:[#allocation3 + $0x318] sm:$0xff] }
 0xf9e   :  { %v9144_v54 = vadd.f32 %v4909_v45, %v9130_v33  ;;  %v4911_v7 = vpop.f32.mrb[93].mxu0  ;;  %v4578_v33 = vld [vmem:[#allocation3 + $0x2e0] sm:$0xff]  ;;  %v4565_v45 = vld [vmem:[#allocation3 + $0x278] sm:$0xff] }
 0xf9f   :  { %v9147_v11 = vadd.f32 %v4911_v7, %v9132_v12  ;;  %v4913_v15 = vpop.f32.mrb[94].mxu0  ;;  %5050 = vmatpush1.bf16.msra.mxu0 %v4570_v13  ;;  %v4582_v12 = vld [vmem:[#allocation3 + $0x300] sm:$0xff]  ;;  %v4560_v13 = vld [vmem:[#allocation3 + $0x250] sm:$0xff]  ;;  %v4573_v7 = vld [vmem:[#allocation3 + $0x2b8] sm:$0xff] }
 0xfa0   :  { %v4914_v16 = vpop.f32.mrb[95].mxu0  ;;  %5051 = vmatprep.subr.bf16.mxu0 %v4575_v56  ;;  %5485 = vmatpush1.bf16.msra.mxu1 %v5296_v58  ;;  %v4564_v56 = vld [vmem:[#allocation3 + $0x270] sm:$0xff]  ;;  %v4589_v58 = vld [vmem:[#allocation3 + $0x338] sm:$0xff] }
 0xfa1   :  { %5486 = vmatprep.subr.bf16.mxu1 %v5301_v36  ;;  %v4593_v36 = vld [vmem:[#allocation3 + $0x358] sm:$0xff] }
 0xfa3   :  { %5052 = vmatpush1.bf16.msra.mxu0 %v4574_v17 }
 0xfa4   :  { %5053 = vmatprep.subr.bf16.mxu0 %v4579_v19  ;;  %5487 = vmatpush1.bf16.msra.mxu1 %v5300_v4  ;;  %v4576_v19 = vld [vmem:[#allocation3 + $0x2d0] sm:$0xff]  ;;  %v4597_v4 = vld [vmem:[#allocation3 + $0x378] sm:$0xff] }
 0xfa5   :  { %5488 = vmatprep.subr.bf16.mxu1 %v5305_v44  ;;  %v4601_v44 = vld [vmem:[#allocation3 + $0x398] sm:$0xff] }
 0xfa7   :  { %5054 = vmatpush1.bf16.msra.mxu0 %v4578_v33  ;;  %v4580_v33 = vld [vmem:[#allocation3 + $0x2f0] sm:$0xff] }
 0xfa8   :  { %5055 = vmatprep.subr.bf16.mxu0 %v4583_v25  ;;  %5489 = vmatpush1.bf16.msra.mxu1 %v5304_v62  ;;  %v4584_v25 = vld [vmem:[#allocation3 + $0x310] sm:$0xff]  ;;  %v4605_v62 = vld [vmem:[#allocation3 + $0x3b8] sm:$0xff] }
 0xfa9   :  { %5490 = vmatprep.subr.bf16.mxu1 %v5309_v61  ;;  %v4609_v61 = vld [vmem:[#allocation3 + $0x3d8] sm:$0xff] }
 0xfab   :  { %5056 = vmatpush1.bf16.msra.mxu0 %v4582_v12  ;;  %v4588_v12 = vld [vmem:[#allocation3 + $0x330] sm:$0xff] }
 0xfac   :  { %5057 = vmatprep.subr.bf16.mxu0 %v4587_v40  ;;  %5491 = vmatpush1.bf16.msra.mxu1 %v5308_v29  ;;  %v4592_v40 = vld [vmem:[#allocation3 + $0x350] sm:$0xff]  ;;  %v4613_v29 = vld [vmem:[#allocation3 + $0x3f8] sm:$0xff] }
 0xfad   :  { %5492 = vmatprep.subr.bf16.mxu1 %v5313_v59  ;;  %v5319_v59 = vld [vmem:[#allocation3 + $0xa08] sm:$0xff] }
 0xfaf   :  { %5058 = vmatpush1.bf16.msra.mxu0 %v4586_v42  ;;  %v4596_v42 = vld [vmem:[#allocation3 + $0x370] sm:$0xff] }
 0xfb0   :  { %5059 = vmatprep.subr.bf16.mxu0 %v4591_v55  ;;  %5493 = vmatpush1.bf16.msra.mxu1 %v5312_v46  ;;  %v4600_v55 = vld [vmem:[#allocation3 + $0x390] sm:$0xff]  ;;  %v5318_v46 = vld [vmem:[#allocation3 + $0xa00] sm:$0xff] }
 0xfb1   :  { %5494 = vmatprep.subr.bf16.mxu1 %v5317_v49  ;;  %v5322_v49 = vld [vmem:[#allocation3 + $0xa20] sm:$0xff] }
 0xfb3   :  { %5060 = vmatpush1.bf16.msra.mxu0 %v4590_v52  ;;  %v4604_v52 = vld [vmem:[#allocation3 + $0x3b0] sm:$0xff] }
 0xfb4   :  { %5061 = vmatprep.subr.bf16.mxu0 %v4595_v27  ;;  %5495 = vmatpush1.bf16.msra.mxu1 %v5316_v51  ;;  %v4608_v27 = vld [vmem:[#allocation3 + $0x3d0] sm:$0xff]  ;;  %v5326_v51 = vld [vmem:[#allocation3 + $0xa40] sm:$0xff] }
 0xfb7   :  { %5062 = vmatpush1.bf16.msra.mxu0 %v4594_v32  ;;  %5497 = vmatmul.mubr.bf16.vlgmr.msra.gmra.mrb[96].mxu1 %v9134_v23  ;;  %v4552_v23 = vld [vmem:[#allocation3 + $0x210] sm:$0xff] }
 0xfb8   :  { %5063 = vmatprep.subr.bf16.mxu0 %v4599_v26  ;;  %v4612_v32 = vld [vmem:[#allocation3 + $0x3f0] sm:$0xff]  ;;  %v9166_v26 = vpack.c.bf16 %v9152_v30, %v9152_v30  ;;  %v5339_v30 = vld [vmem:[#allocation3 + $0xaa8] sm:$0xff] }
 0xfbb   :  { %5064 = vmatpush1.bf16.msra.mxu0 %v4598_v48  ;;  %v5323_v48 = vld [vmem:[#allocation3 + $0xa28] sm:$0xff] }
 0xfbc   :  { %5065 = vmatprep.subr.bf16.mxu0 %v4603_v50  ;;  %v5327_v50 = vld [vmem:[#allocation3 + $0xa48] sm:$0xff] }
 0xfbf   :  { %5066 = vmatpush1.bf16.msra.mxu0 %v4602_v53  ;;  %v5331_v53 = vld [vmem:[#allocation3 + $0xa68] sm:$0xff] }
 0xfc0   :  { %5067 = vmatprep.subr.bf16.mxu0 %v4607_v60  ;;  %v5330_v60 = vld [vmem:[#allocation3 + $0xa60] sm:$0xff] }
 0xfc3   :  { %5068 = vmatpush1.bf16.msra.mxu0 %v4606_v35  ;;  %v5335_v35 = vld [vmem:[#allocation3 + $0xa88] sm:$0xff] }
 0xfc4   :  { %5069 = vmatprep.subr.bf16.mxu0 %v4611_v2  ;;  %v5334_v2 = vld [vmem:[#allocation3 + $0xa80] sm:$0xff] }
 0xfc7   :  { %5070 = vmatpush1.bf16.msra.mxu0 %v4610_v5  ;;  %v5338_v5 = vld [vmem:[#allocation3 + $0xaa0] sm:$0xff] }
 0xfc8   :  { %5121 = vmatprep.subr.bf16.mxu0 %v4553_v31  ;;  %v5343_v31 = vld [vmem:[#allocation3 + $0xac8] sm:$0xff] }
 0xfca   :  { %5072 = vmatmul.mubr.bf16.vlgmr.msra.gmra.mrb[108].mxu0 %v9156_v34 }
 0xfcb   :  { %5122 = vmatpush1.bf16.msra.mxu0 %v4552_v23  ;;  %5153 = vmatprep.mubr.bf16.mxu0 %v9139_v43  ;;  %v4577_v43 = vld [vmem:[#allocation3 + $0x2d8] sm:$0xff] }
 0xfcc   :  { %5123 = vmatprep.subr.bf16.mxu0 %v4557_v37 }
 0xfcf   :  { %5124 = vmatpush1.bf16.msra.mxu0 %v4556_v41 }
 0xfd0   :  { %5125 = vmatprep.subr.bf16.mxu0 %v4561_v47  ;;  %v5342_v47 = vld [vmem:[#allocation3 + $0xac0] sm:$0xff] }
 0xfd3   :  { %5126 = vmatpush1.bf16.msra.mxu0 %v4560_v13 }
 0xfd4   :  { %5127 = vmatprep.subr.bf16.mxu0 %v4565_v45  ;;  %v5347_v45 = vld [vmem:[#allocation3 + $0xae8] sm:$0xff] }
 0xfd7   :  { %5128 = vmatpush1.bf16.msra.mxu0 %v4564_v56 }
 0xfd8   :  { %5129 = vmatprep.subr.bf16.mxu0 %v4569_v38  ;;  %v5346_v38 = vld [vmem:[#allocation3 + $0xae0] sm:$0xff] }
 0xfdb   :  { %5130 = vmatpush1.bf16.msra.mxu0 %v4568_v63  ;;  %v5351_v63 = vld [vmem:[#allocation3 + $0xb08] sm:$0xff] }
 0xfdc   :  { %5131 = vmatprep.subr.bf16.mxu0 %v4573_v7  ;;  %v5350_v7 = vld [vmem:[#allocation3 + $0xb00] sm:$0xff] }
 0xfdd   :  { %v9160_v15 = vpop.f32.mrb[96].mxu0 }
 0xfde   :  { %v9162_v16 = vpop.f32.mrb[97].mxu0 }
 0xfdf   :  { %v4954_v17 = vpop.f32.mrb[98].mxu0  ;;  %5132 = vmatpush1.bf16.msra.mxu0 %v4572_v10  ;;  %v5355_v10 = vld [vmem:[#allocation3 + $0xb28] sm:$0xff] }
 0xfe0   :  { %v4955_v18 = vpop.f32.mrb[99].mxu0  ;;  %5133 = vmatprep.subr.bf16.mxu0 %v4577_v43  ;;  %v5359_v43 = vld [vmem:[#allocation3 + $0xb48] sm:$0xff] }
 0xfe1   :  { %v5367_v17 = vld [vmem:[#allocation3 + $0xb88] sm:$0xff]  ;;  %v5366_v18 = vld [vmem:[#allocation3 + $0xb80] sm:$0xff] }
 0xfe3   :  { %5134 = vmatpush1.bf16.msra.mxu0 %v4576_v19  ;;  %v5371_v19 = vld [vmem:[#allocation3 + $0xba8] sm:$0xff] }
 0xfe4   :  { %5135 = vmatprep.subr.bf16.mxu0 %v4581_v21  ;;  %v5370_v21 = vld [vmem:[#allocation3 + $0xba0] sm:$0xff] }
 0xfe7   :  { %5136 = vmatpush1.bf16.msra.mxu0 %v4580_v33  ;;  %v5375_v33 = vld [vmem:[#allocation3 + $0xbc8] sm:$0xff] }
 0xfe8   :  { %5137 = vmatprep.subr.bf16.mxu0 %v4585_v24  ;;  %v5374_v24 = vld [vmem:[#allocation3 + $0xbc0] sm:$0xff] }
 0xfeb   :  { %5138 = vmatpush1.bf16.msra.mxu0 %v4584_v25  ;;  %v5379_v25 = vld [vmem:[#allocation3 + $0xbe8] sm:$0xff] }
 0xfec   :  { %5139 = vmatprep.subr.bf16.mxu0 %v4589_v58  ;;  %v5378_v58 = vld [vmem:[#allocation3 + $0xbe0] sm:$0xff] }
 0xfef   :  { %5140 = vmatpush1.bf16.msra.mxu0 %v4588_v12  ;;  %v5321_v12 = vld [vmem:[#allocation3 + $0xa18] sm:$0xff] }
 0xff0   :  { %5141 = vmatprep.subr.bf16.mxu0 %v4593_v36  ;;  %v9180_v36 = vpack.c.bf16 %v9150_v0, %v9150_v0  ;;  %v5332_v0 = vld [vmem:[#allocation3 + $0xa70] sm:$0xff] }
 0xff3   :  { %5142 = vmatpush1.bf16.msra.mxu0 %v4592_v40  ;;  %v5320_v40 = vld [vmem:[#allocation3 + $0xa10] sm:$0xff] }
 0xff4   :  { %5143 = vmatprep.subr.bf16.mxu0 %v4597_v4  ;;  %v5325_v4 = vld [vmem:[#allocation3 + $0xa38] sm:$0xff] }
 0xff7   :  { %5144 = vmatpush1.bf16.msra.mxu0 %v4596_v42  ;;  %v5324_v42 = vld [vmem:[#allocation3 + $0xa30] sm:$0xff] }
 0xff8   :  { %5145 = vmatprep.subr.bf16.mxu0 %v4601_v44  ;;  %v5329_v44 = vld [vmem:[#allocation3 + $0xa58] sm:$0xff] }
 0xffb   :  { %5146 = vmatpush1.bf16.msra.mxu0 %v4600_v55  ;;  %v5328_v55 = vld [vmem:[#allocation3 + $0xa50] sm:$0xff] }
 0xffc   :  { %5147 = vmatprep.subr.bf16.mxu0 %v4605_v62  ;;  %v5333_v62 = vld [vmem:[#allocation3 + $0xa78] sm:$0xff] }
 0xfff   :  { %5148 = vmatpush1.bf16.msra.mxu0 %v4604_v52  ;;  %v5337_v52 = vld [vmem:[#allocation3 + $0xa98] sm:$0xff] }
0x1000   :  { %5149 = vmatprep.subr.bf16.mxu0 %v4609_v61  ;;  %v5336_v61 = vld [vmem:[#allocation3 + $0xa90] sm:$0xff] }
0x1003   :  { %5150 = vmatpush1.bf16.msra.mxu0 %v4608_v27  ;;  %v5341_v27 = vld [vmem:[#allocation3 + $0xab8] sm:$0xff] }
0x1004   :  { %5151 = vmatprep.subr.bf16.mxu0 %v4613_v29  ;;  %v5340_v29 = vld [vmem:[#allocation3 + $0xab0] sm:$0xff] }
0x1007   :  { %5152 = vmatpush1.bf16.msra.mxu0 %v4612_v32 }
0x1008   :  { %5423 = vmatprep.subr.bf16.mxu0 %v5319_v59  ;;  %v5345_v59 = vld [vmem:[#allocation3 + $0xad8] sm:$0xff] }
0x100a   :  { %5154 = vmatmul.mubr.bf16.vlgmr.msra.gmra.mrb[112].mxu0 %v9156_v34 }
0x100b   :  { %5424 = vmatpush1.bf16.msra.mxu0 %v5318_v46  ;;  %5455 = vmatprep.mubr.bf16.mxu0 %v9166_v26 }
0x100c   :  { %5425 = vmatprep.subr.bf16.mxu0 %v5323_v48 }
0x100f   :  { %5426 = vmatpush1.bf16.msra.mxu0 %v5322_v49 }
0x1010   :  { %5427 = vmatprep.subr.bf16.mxu0 %v5327_v50 }
0x1013   :  { %5428 = vmatpush1.bf16.msra.mxu0 %v5326_v51  ;;  %v5344_v51 = vld [vmem:[#allocation3 + $0xad0] sm:$0xff] }
0x1014   :  { %5429 = vmatprep.subr.bf16.mxu0 %v5331_v53 }
0x1017   :  { %5430 = vmatpush1.bf16.msra.mxu0 %v5330_v60  ;;  %v5349_v60 = vld [vmem:[#allocation3 + $0xaf8] sm:$0xff] }
0x1018   :  { %5431 = vmatprep.subr.bf16.mxu0 %v5335_v35 }
0x101b   :  { %5432 = vmatpush1.bf16.msra.mxu0 %v5334_v2 }
0x101c   :  { %5433 = vmatprep.subr.bf16.mxu0 %v5339_v30 }
0x101d   :  { %v4991_v28 = vpop.f32.mrb[100].mxu0 }
0x101e   :  { %v4992_v39 = vadd.f32 %v4991_v28, %v9160_v15  ;;  %v4993_v34 = vpop.f32.mrb[101].mxu0  ;;  %v5354_v15 = vld [vmem:[#allocation3 + $0xb20] sm:$0xff]  ;;  %v5353_v28 = vld [vmem:[#allocation3 + $0xb18] sm:$0xff] }
0x101f   :  { %v4994_v23 = vadd.f32 %v4993_v34, %v9162_v16  ;;  %v4995_v37 = vpop.f32.mrb[102].mxu0  ;;  %5434 = vmatpush1.bf16.msra.mxu0 %v5338_v5  ;;  %v5363_v16 = vld [vmem:[#allocation3 + $0xb68] sm:$0xff]  ;;  %v5348_v5 = vld [vmem:[#allocation3 + $0xaf0] sm:$0xff] }
0x1020   :  { %v4996_v41 = vpop.f32.mrb[103].mxu0  ;;  %5435 = vmatprep.subr.bf16.mxu0 %v5343_v31  ;;  %v9173_v13 = vadd.f32 %v9126_v20, %v4992_v39  ;;  %v5358_v20 = vld [vmem:[#allocation3 + $0xb40] sm:$0xff]  ;;  %v5357_v31 = vld [vmem:[#allocation3 + $0xb38] sm:$0xff]  ;;  %v5360_v34 = vld [vmem:[#allocation3 + $0xb50] sm:$0xff] }
0x1021   :  { %v9176_v56 = vadd.f32 %v9128_v22, %v4994_v23  ;;  %v5362_v22 = vld [vmem:[#allocation3 + $0xb60] sm:$0xff]  ;;  %v5361_v39 = vld [vmem:[#allocation3 + $0xb58] sm:$0xff]  ;;  %v5364_v37 = vld [vmem:[#allocation3 + $0xb70] sm:$0xff] }
0x1022   :  { %v5365_v23 = vld [vmem:[#allocation3 + $0xb78] sm:$0xff] }
0x1023   :  { %5436 = vmatpush1.bf16.msra.mxu0 %v5342_v47  ;;  %v5369_v41 = vld [vmem:[#allocation3 + $0xb98] sm:$0xff]  ;;  %v5368_v47 = vld [vmem:[#allocation3 + $0xb90] sm:$0xff] }
0x1024   :  { %5437 = vmatprep.subr.bf16.mxu0 %v5347_v45  ;;  %v5373_v45 = vld [vmem:[#allocation3 + $0xbb8] sm:$0xff] }
0x1027   :  { %5438 = vmatpush1.bf16.msra.mxu0 %v5346_v38  ;;  %v5372_v38 = vld [vmem:[#allocation3 + $0xbb0] sm:$0xff] }
0x1028   :  { %5439 = vmatprep.subr.bf16.mxu0 %v5351_v63  ;;  %v5377_v63 = vld [vmem:[#allocation3 + $0xbd8] sm:$0xff] }
0x102b   :  { %5440 = vmatpush1.bf16.msra.mxu0 %v5350_v7  ;;  %v5376_v7 = vld [vmem:[#allocation3 + $0xbd0] sm:$0xff] }
0x102c   :  { %5441 = vmatprep.subr.bf16.mxu0 %v5355_v10  ;;  %v5381_v10 = vld [vmem:[#allocation3 + $0xbf8] sm:$0xff] }
0x102f   :  { %5442 = vmatpush1.bf16.msra.mxu0 %v5354_v15  ;;  %v5380_v15 = vld [vmem:[#allocation3 + $0xbf0] sm:$0xff] }
0x1030   :  { %5443 = vmatprep.subr.bf16.mxu0 %v5359_v43 }
0x1033   :  { %5444 = vmatpush1.bf16.msra.mxu0 %v5358_v20 }
0x1034   :  { %5445 = vmatprep.subr.bf16.mxu0 %v5363_v16 }
0x1037   :  { %5446 = vmatpush1.bf16.msra.mxu0 %v5362_v22 }
0x1038   :  { %5447 = vmatprep.subr.bf16.mxu0 %v5367_v17 }
0x103b   :  { %5448 = vmatpush1.bf16.msra.mxu0 %v5366_v18 }
0x103c   :  { %5449 = vmatprep.subr.bf16.mxu0 %v5371_v19 }
0x103f   :  { %5450 = vmatpush1.bf16.msra.mxu0 %v5370_v21 }
0x1040   :  { %5451 = vmatprep.subr.bf16.mxu0 %v5375_v33 }
0x1043   :  { %5452 = vmatpush1.bf16.msra.mxu0 %v5374_v24 }
0x1044   :  { %5453 = vmatprep.subr.bf16.mxu0 %v5379_v25 }
0x1047   :  { %5454 = vmatpush1.bf16.msra.mxu0 %v5378_v58 }
0x1048   :  { %5505 = vmatprep.subr.bf16.mxu0 %v5321_v12 }
0x104a   :  { %5456 = vmatmul.mubr.bf16.vlgmr.msra.gmra.mrb[116].mxu0 %v9180_v36  ;;  %v5416_v53 = vpop.f32.mrb[92].mxu1 }
0x104b   :  { %5506 = vmatpush1.bf16.msra.mxu0 %v5320_v40  ;;  %5537 = vmatprep.mubr.bf16.mxu0 %v9166_v26  ;;  %v5418_v35 = vpop.f32.mrb[93].mxu1 }
0x104c   :  { %5507 = vmatprep.subr.bf16.mxu0 %v5325_v4  ;;  %v5420_v2 = vpop.f32.mrb[94].mxu1 }
0x104d   :  { %v5421_v30 = vpop.f32.mrb[95].mxu1 }
0x104f   :  { %5508 = vmatpush1.bf16.msra.mxu0 %v5324_v42 }
0x1050   :  { %5509 = vmatprep.subr.bf16.mxu0 %v5329_v44  ;;  %v4378_v44 = vld [vmem:[#allocation29] sm:$0xf] }
0x1051   :  { %v5566_v2 = vrot.slane %v4378_v44, %v4335_v8 }
0x1053   :  { %5510 = vmatpush1.bf16.msra.mxu0 %v5328_v55 }
0x1054   :  { %5511 = vmatprep.subr.bf16.mxu0 %v5333_v62  ;;  %v5554_v62 = vrot.slane %v4378_v44, %v8890_v6 }
0x1057   :  { %5512 = vmatpush1.bf16.msra.mxu0 %v5332_v0 }
0x1058   :  { %5513 = vmatprep.subr.bf16.mxu0 %v5337_v52 }
0x105b   :  { %5514 = vmatpush1.bf16.msra.mxu0 %v5336_v61  ;;  %v5558_v61 = vrot.slane %v4378_v44, %v8893_v9 }
0x105c   :  { %5515 = vmatprep.subr.bf16.mxu0 %v5341_v27 }
0x105d   :  { %v5032_v32 = vpop.f32.mrb[104].mxu0 }
0x105e   :  { %v5033_v26 = vadd.f32 %v5032_v32, %v9144_v54  ;;  %v5034_v46 = vpop.f32.mrb[105].mxu0  ;;  %v5352_v54 = vld [vmem:[#allocation3 + $0xb10] sm:$0xff] }
0x105f   :  { %v5035_v48 = vadd.f32 %v5034_v46, %v9147_v11  ;;  %v5036_v49 = vpop.f32.mrb[106].mxu0  ;;  %5516 = vmatpush1.bf16.msra.mxu0 %v5340_v29  ;;  %v5356_v11 = vld [vmem:[#allocation3 + $0xb30] sm:$0xff] }
0x1060   :  { %v5037_v50 = vpop.f32.mrb[107].mxu0  ;;  %5517 = vmatprep.subr.bf16.mxu0 %v5345_v59 }
0x1063   :  { %5518 = vmatpush1.bf16.msra.mxu0 %v5344_v51 }
0x1064   :  { %5519 = vmatprep.subr.bf16.mxu0 %v5349_v60 }
0x1067   :  { %5520 = vmatpush1.bf16.msra.mxu0 %v5348_v5 }
0x1068   :  { %5521 = vmatprep.subr.bf16.mxu0 %v5353_v28 }
0x106b   :  { %5522 = vmatpush1.bf16.msra.mxu0 %v5352_v54 }
0x106c   :  { %5523 = vmatprep.subr.bf16.mxu0 %v5357_v31 }
0x106f   :  { %5524 = vmatpush1.bf16.msra.mxu0 %v5356_v11 }
0x1070   :  { %5525 = vmatprep.subr.bf16.mxu0 %v5361_v39 }
0x1073   :  { %5526 = vmatpush1.bf16.msra.mxu0 %v5360_v34 }
0x1074   :  { %5527 = vmatprep.subr.bf16.mxu0 %v5365_v23 }
0x1077   :  { %5528 = vmatpush1.bf16.msra.mxu0 %v5364_v37 }
0x1078   :  { %5529 = vmatprep.subr.bf16.mxu0 %v5369_v41 }
0x107b   :  { %5530 = vmatpush1.bf16.msra.mxu0 %v5368_v47 }
0x107c   :  { %5531 = vmatprep.subr.bf16.mxu0 %v5373_v45 }
0x107f   :  { %5532 = vmatpush1.bf16.msra.mxu0 %v5372_v38 }
0x1080   :  { %5533 = vmatprep.subr.bf16.mxu0 %v5377_v63 }
0x1083   :  { %5534 = vmatpush1.bf16.msra.mxu0 %v5376_v7 }
0x1084   :  { %5535 = vmatprep.subr.bf16.mxu0 %v5381_v10 }
0x1087   :  { %5536 = vmatpush1.bf16.msra.mxu0 %v5380_v15 }
0x108a   :  { %5538 = vmatmul.mubr.bf16.vlgmr.msra.gmra.mrb[120].mxu0 %v9180_v36  ;;  %v5498_v43 = vpop.f32.mrb[96].mxu1 }
0x108b   :  { %v5500_v20 = vpop.f32.mrb[97].mxu1 }
0x108c   :  { %v5502_v16 = vpop.f32.mrb[98].mxu1 }
0x108d   :  { %v5503_v22 = vpop.f32.mrb[99].mxu1 }
0x109d   :  { %v5073_v17 = vpop.f32.mrb[108].mxu0 }
0x109e   :  { %v5074_v18 = vadd.f32 %v5073_v17, %v5033_v26  ;;  %v5075_v19 = vpop.f32.mrb[109].mxu0 }
0x109f   :  { %v5076_v21 = vadd.f32 %v5075_v19, %v5035_v48  ;;  %v5077_v33 = vpop.f32.mrb[110].mxu0 }
0x10a0   :  { %v5078_v24 = vpop.f32.mrb[111].mxu0 }
0x10dd   :  { %v5155_v25 = vpop.f32.mrb[112].mxu0 }
0x10de   :  { %v5156_v58 = vadd.f32 %v5155_v25, %v9173_v13  ;;  %v5157_v12 = vpop.f32.mrb[113].mxu0 }
0x10df   :  { %v5158_v40 = vadd.f32 %v5157_v12, %v9176_v56  ;;  %v5159_v4 = vpop.f32.mrb[114].mxu0 }
0x10e0   :  { %v5160_v42 = vpop.f32.mrb[115].mxu0 }
0x111d   :  { %v5457_v36 = vpop.f32.mrb[116].mxu0 }
0x111e   :  { %v5458_v55 = vadd.f32 %v5457_v36, %v5416_v53  ;;  %v5459_v0 = vpop.f32.mrb[117].mxu0  ;;  %v5562_v53 = vrot.slane %v4378_v44, %v4331_v14 }
0x111f   :  { %v5460_v52 = vadd.f32 %v5459_v0, %v5418_v35  ;;  %v5461_v27 = vpop.f32.mrb[118].mxu0 }
0x1120   :  { %v5546_v29 = vadd.f32 %v5458_v55, %v5074_v18  ;;  %v5462_v32 = vpop.f32.mrb[119].mxu0 }
0x1121   :  { %v5547_v59 = vadd.f32 %v5460_v52, %v5076_v21 }
0x1122   :  { %v5571_v26 = vadd.f32 %v5554_v62, %v5546_v29 }
0x1123   :  { %v5572_v13 = vadd.f32 %v5558_v61, %v5547_v59 }
0x1124   :  { %vm5575_vm10 = vcmp.gt.f32.partialorder %v5571_v26, 0.0  ;;  %v5579_v46 = vmul.f32 0.2, %v5571_v26 }
0x1125   :  { %vm5576_vm11 = vcmp.gt.f32.partialorder %v5572_v13, 0.0  ;;  %v5580_v56 = vmul.f32 0.2, %v5572_v13 }
0x1126   :  { %v5583_v48 = vsel %vm5575_vm10, %v5571_v26, %v5579_v46 }
0x1127   :  { %v5584_v49 = vsel %vm5576_vm11, %v5572_v13, %v5580_v56 }
0x115d   :  { %v5539_v50 = vpop.f32.mrb[120].mxu0 }
0x115e   :  { %v5540_v51 = vadd.f32 %v5539_v50, %v5498_v43  ;;  %v5541_v60 = vpop.f32.mrb[121].mxu0 }
0x115f   :  { %v5542_v35 = vadd.f32 %v5541_v60, %v5500_v20  ;;  %v5543_v30 = vpop.f32.mrb[122].mxu0 }
0x1160   :  { %v5548_v5 = vadd.f32 %v5540_v51, %v5156_v58  ;;  %v5544_v28 = vpop.f32.mrb[123].mxu0 }
0x1161   :  { %v5549_v54 = vadd.f32 %v5542_v35, %v5158_v40 }
0x1162   :  { %v5573_v31 = vadd.f32 %v5562_v53, %v5548_v5 }
0x1163   :  { %v5574_v11 = vadd.f32 %v5566_v2, %v5549_v54 }
0x1164   :  { %vm5577_vm12 = vcmp.gt.f32.partialorder %v5573_v31, 0.0  ;;  %v5581_v39 = vmul.f32 0.2, %v5573_v31 }
0x1165   :  { %vm5578_vm13 = vcmp.gt.f32.partialorder %v5574_v11, 0.0  ;;  %v5582_v34 = vmul.f32 0.2, %v5574_v11 }
0x1166   :  { %v5585_v23 = vsel %vm5577_vm12, %v5573_v31, %v5581_v39 }
0x1167   :  { %v5586_v37 = vsel %vm5578_vm13, %v5574_v11, %v5582_v34 }
0x1168   :  { %8219 = dma.done.wait [#allocation5 + $0x2], 24576 }
0x1169   :  { %8220 = vsyncadd [#allocation5 + $0x2], 4294942720  ;;  %v9195_v14 = vpack.c.bf16 %v5584_v49, %v5584_v49  ;;  %vm5600_vm14 = vcmask 1042432   ;;  %v5591_v41 = vpack.c.bf16 %v5583_v48, %v5583_v48  ;;  %5645 = vmatprep.mubr.bf16.mxu1 %v8259_v57  ;;  %v9198_v3 = vpack.c.bf16 %v5586_v37, %v5586_v37  ;;  %v5595_v38 = vld [vmem:[#allocation30] sm:$0x1]  ;;  %v5856_v63 = vld [vmem:[#allocation4 + $0x208] sm:$0xff] }
0x116a   :  { %v5593_v47 = vpack.c.bf16 %v5585_v23, %v5585_v23  ;;  %vm5596_vm15 = vcmask 48128   ;;  %5919 = vmatprep.subr.bf16.mxu0 %v5856_v63  ;;  %v5855_v7 = vld [vmem:[#allocation4 + $0x200] sm:$0xff]  ;;  %v5858_v10 = vld [vmem:[#allocation4 + $0x218] sm:$0xff]  ;;  %v5857_v15 = vld [vmem:[#allocation4 + $0x210] sm:$0xff]  ;;  %s9397_s16 = sld [smem:[#allocation66_spill]]  ;;  %vm6605_vm3 = vcmask 1024  }
0x116b   :  { %6947 = vmatprep.subr.msk.bf16.mxu1 %vm5600_vm14, %v9195_v14  ;;  %v9203_v8 = vsel %vm5600_vm14, %v5591_v41, 0  ;;  %5920 = vmatpush1.bf16.msra.mxu0 %v5855_v7  ;;  %v5860_v43 = vld [vmem:[#allocation4 + $0x228] sm:$0xff]  ;;  %v5859_v20 = vld [vmem:[#allocation4 + $0x220] sm:$0xff]  ;;  %v5862_v16 = vld [vmem:[#allocation4 + $0x238] sm:$0xff]  ;;  %s9398_s13 = sld [smem:[#allocation67_spill]] }
0x116c   :  { %5614 = vmatpush1.bf16.msra.mxu1 %v9203_v8  ;;  %v9209_v45 = vsel %vm5600_vm14, %v5593_v47, 0  ;;  %5921 = vmatprep.subr.bf16.mxu0 %v5858_v10  ;;  %v5861_v22 = vld [vmem:[#allocation4 + $0x230] sm:$0xff]  ;;  %v5764_v17 = vld [vmem:[#allocation30 + $0x1] sm:$0x1]  ;;  %v5864_v18 = vld [vmem:[#allocation4 + $0x248] sm:$0xff] }
0x116d   :  { %6949 = vmatprep.subr.msk.bf16.mxu1 %vm5600_vm14, %v9198_v3  ;;  %v5888_v19 = vld [vmem:[#allocation4 + $0x308] sm:$0xff]  ;;  %v5863_v21 = vld [vmem:[#allocation4 + $0x240] sm:$0xff]  ;;  %v5866_v33 = vld [vmem:[#allocation4 + $0x258] sm:$0xff] }
0x116e   :  { %v5865_v24 = vld [vmem:[#allocation4 + $0x250] sm:$0xff]  ;;  %v5868_v25 = vld [vmem:[#allocation4 + $0x268] sm:$0xff]  ;;  %v5887_v58 = vld [vmem:[#allocation4 + $0x300] sm:$0xff] }
0x116f   :  { %6948 = vmatmul.mubr.msk.bf16.vlgmr.msra.gmra.mrb[100].mxu1 %vm5596_vm15, %v5595_v38  ;;  %5922 = vmatpush1.bf16.msra.mxu0 %v5857_v15  ;;  %v5890_v12 = vld [vmem:[#allocation4 + $0x318] sm:$0xff]  ;;  %v5867_v40 = vld [vmem:[#allocation4 + $0x260] sm:$0xff]  ;;  %v5889_v42 = vld [vmem:[#allocation4 + $0x310] sm:$0xff] }
0x1170   :  { %5655 = vmatpush1.bf16.msra.mxu1 %v9209_v45  ;;  %5686 = vmatprep.mubr.bf16.mxu1 %v8259_v57  ;;  %v5870_v4 = vld [vmem:[#allocation4 + $0x278] sm:$0xff]  ;;  %v5892_v44 = vld [vmem:[#allocation4 + $0x328] sm:$0xff]  ;;  %v5869_v36 = vld [vmem:[#allocation4 + $0x270] sm:$0xff] }
0x1171   :  { %6951 = vmatprep.subr.msk.bf16.mxu1 %vm5600_vm14, %v9195_v14  ;;  %5923 = vmatprep.subr.bf16.mxu0 %v5860_v43  ;;  %v5872_v55 = vld [vmem:[#allocation4 + $0x288] sm:$0xff]  ;;  %v5891_v62 = vld [vmem:[#allocation4 + $0x320] sm:$0xff]  ;;  %v5894_v0 = vld [vmem:[#allocation4 + $0x338] sm:$0xff] }
0x1172   :  { %v5871_v52 = vld [vmem:[#allocation4 + $0x280] sm:$0xff]  ;;  %v5874_v61 = vld [vmem:[#allocation4 + $0x298] sm:$0xff]  ;;  %v5893_v27 = vld [vmem:[#allocation4 + $0x330] sm:$0xff] }
0x1173   :  { %5924 = vmatpush1.bf16.msra.mxu0 %v5859_v20  ;;  %v5896_v29 = vld [vmem:[#allocation4 + $0x348] sm:$0xff]  ;;  %v5873_v32 = vld [vmem:[#allocation4 + $0x290] sm:$0xff]  ;;  %v5895_v26 = vld [vmem:[#allocation4 + $0x340] sm:$0xff] }
0x1174   :  { %5925 = vmatprep.subr.bf16.mxu0 %v5862_v16  ;;  %v5876_v59 = vld [vmem:[#allocation4 + $0x2a8] sm:$0xff]  ;;  %v5898_v13 = vld [vmem:[#allocation4 + $0x358] sm:$0xff]  ;;  %v5875_v46 = vld [vmem:[#allocation4 + $0x2a0] sm:$0xff] }
0x1175   :  { %v5897_v56 = vld [vmem:[#allocation4 + $0x350] sm:$0xff]  ;;  %v5900_v48 = vld [vmem:[#allocation4 + $0x368] sm:$0xff]  ;;  %v5899_v49 = vld [vmem:[#allocation4 + $0x360] sm:$0xff] }
0x1176   :  { %v5902_v50 = vld [vmem:[#allocation4 + $0x378] sm:$0xff]  ;;  %v5901_v51 = vld [vmem:[#allocation4 + $0x370] sm:$0xff]  ;;  %v5904_v53 = vld [vmem:[#allocation4 + $0x388] sm:$0xff] }
0x1177   :  { %6950 = vmatmul.mubr.msk.bf16.vlgmr.msra.gmra.mrb[104].mxu1 %vm5596_vm15, %v5595_v38  ;;  %5926 = vmatpush1.bf16.msra.mxu0 %v5861_v22  ;;  %v5903_v60 = vld [vmem:[#allocation4 + $0x380] sm:$0xff]  ;;  %v5878_v35 = vld [vmem:[#allocation4 + $0x2b8] sm:$0xff]  ;;  %v5877_v30 = vld [vmem:[#allocation4 + $0x2b0] sm:$0xff] }
0x1178   :  { %5769 = vmatpush1.bf16.msra.mxu1 %v9203_v8  ;;  %5800 = vmatprep.mubr.bf16.mxu1 %v8259_v57  ;;  %v5906_v2 = vld [vmem:[#allocation4 + $0x398] sm:$0xff]  ;;  %v5905_v5 = vld [vmem:[#allocation4 + $0x390] sm:$0xff]  ;;  %v5880_v28 = vld [vmem:[#allocation4 + $0x2c8] sm:$0xff] }
0x1179   :  { %6953 = vmatprep.subr.msk.bf16.mxu1 %vm5600_vm14, %v9198_v3  ;;  %5927 = vmatprep.subr.bf16.mxu0 %v5864_v18  ;;  %v5908_v54 = vld [vmem:[#allocation4 + $0x3a8] sm:$0xff]  ;;  %v5879_v31 = vld [vmem:[#allocation4 + $0x2c0] sm:$0xff]  ;;  %v5882_v39 = vld [vmem:[#allocation4 + $0x2d8] sm:$0xff] }
0x117a   :  { %v5907_v11 = vld [vmem:[#allocation4 + $0x3a0] sm:$0xff]  ;;  %v5910_v34 = vld [vmem:[#allocation4 + $0x3b8] sm:$0xff]  ;;  %v5881_v23 = vld [vmem:[#allocation4 + $0x2d0] sm:$0xff] }
0x117b   :  { %5928 = vmatpush1.bf16.msra.mxu0 %v5863_v21  ;;  %v5909_v37 = vld [vmem:[#allocation4 + $0x3b0] sm:$0xff]  ;;  %v5884_v41 = vld [vmem:[#allocation4 + $0x2e8] sm:$0xff]  ;;  %v5883_v38 = vld [vmem:[#allocation4 + $0x2e0] sm:$0xff] }
0x117c   :  { %5929 = vmatprep.subr.bf16.mxu0 %v5866_v33  ;;  %v5912_v47 = vld [vmem:[#allocation4 + $0x3c8] sm:$0xff]  ;;  %v5911_v63 = vld [vmem:[#allocation4 + $0x3c0] sm:$0xff]  ;;  %v5886_v7 = vld [vmem:[#allocation4 + $0x2f8] sm:$0xff] }
0x117d   :  { %v5914_v10 = vld [vmem:[#allocation4 + $0x3d8] sm:$0xff]  ;;  %v5885_v15 = vld [vmem:[#allocation4 + $0x2f0] sm:$0xff]  ;;  %v5916_v20 = vld [vmem:[#allocation4 + $0x3e8] sm:$0xff] }
0x117e   :  { %v5913_v43 = vld [vmem:[#allocation4 + $0x3d0] sm:$0xff]  ;;  %v5700_v16 = vld [vmem:[#allocation4 + $0x8] sm:$0xff]  ;;  %v5915_v22 = vld [vmem:[#allocation4 + $0x3e0] sm:$0xff] }
0x117f   :  { %6952 = vmatmul.mubr.msk.bf16.vlgmr.msra.gmra.mrb[108].mxu1 %vm5596_vm15, %v5764_v17  ;;  %5930 = vmatpush1.bf16.msra.mxu0 %v5865_v24  ;;  %v5917_v18 = vld [vmem:[#allocation4 + $0x3f0] sm:$0xff] }
0x1180   :  { %5810 = vmatpush1.bf16.msra.mxu1 %v9209_v45  ;;  %5841 = vmatprep.mubr.bf16.mxu1 %v8259_v57 }
0x1181   :  { %5960 = vmatprep.subr.bf16.mxu1 %v5888_v19  ;;  %5931 = vmatprep.subr.bf16.mxu0 %v5868_v25  ;;  %v5732_v19 = vld [vmem:[#allocation4 + $0x108] sm:$0xff] }
0x1183   :  { %5932 = vmatpush1.bf16.msra.mxu0 %v5867_v40 }
0x1184   :  { %5933 = vmatprep.subr.bf16.mxu0 %v5870_v4 }
0x1187   :  { %6954 = vmatmul.mubr.msk.bf16.vlgmr.msra.gmra.mrb[112].mxu1 %vm5596_vm15, %v5764_v17  ;;  %5934 = vmatpush1.bf16.msra.mxu0 %v5869_v36  ;;  %v5918_v17 = vld [vmem:[#allocation4 + $0x3f8] sm:$0xff] }
0x1188   :  { %5961 = vmatpush1.bf16.msra.mxu1 %v5887_v58  ;;  %5935 = vmatprep.subr.bf16.mxu0 %v5872_v55 }
0x1189   :  { %5962 = vmatprep.subr.bf16.mxu1 %v5890_v12 }
0x118b   :  { %5936 = vmatpush1.bf16.msra.mxu0 %v5871_v52  ;;  %v5699_v52 = vld [vmem:[#allocation4] sm:$0xff] }
0x118c   :  { %5963 = vmatpush1.bf16.msra.mxu1 %v5889_v42  ;;  %5937 = vmatprep.subr.bf16.mxu0 %v5874_v61 }
0x118d   :  { %5964 = vmatprep.subr.bf16.mxu1 %v5892_v44 }
0x118f   :  { %5938 = vmatpush1.bf16.msra.mxu0 %v5873_v32 }
0x1190   :  { %5965 = vmatpush1.bf16.msra.mxu1 %v5891_v62  ;;  %5939 = vmatprep.subr.bf16.mxu0 %v5876_v59  ;;  %v5704_v59 = vld [vmem:[#allocation4 + $0x28] sm:$0xff] }
0x1191   :  { %5966 = vmatprep.subr.bf16.mxu1 %v5894_v0 }
0x1193   :  { %5940 = vmatpush1.bf16.msra.mxu0 %v5875_v46 }
0x1194   :  { %5967 = vmatpush1.bf16.msra.mxu1 %v5893_v27  ;;  %5941 = vmatprep.subr.bf16.mxu0 %v5878_v35  ;;  %v5702_v27 = vld [vmem:[#allocation4 + $0x18] sm:$0xff]  ;;  %v5705_v35 = vld [vmem:[#allocation4 + $0x30] sm:$0xff] }
0x1195   :  { %5968 = vmatprep.subr.bf16.mxu1 %v5896_v29  ;;  %v5701_v29 = vld [vmem:[#allocation4 + $0x10] sm:$0xff] }
0x1197   :  { %5942 = vmatpush1.bf16.msra.mxu0 %v5877_v30  ;;  %v5708_v30 = vld [vmem:[#allocation4 + $0x48] sm:$0xff] }
0x1198   :  { %5969 = vmatpush1.bf16.msra.mxu1 %v5895_v26  ;;  %5943 = vmatprep.subr.bf16.mxu0 %v5880_v28  ;;  %v5707_v28 = vld [vmem:[#allocation4 + $0x40] sm:$0xff] }
0x1199   :  { %5970 = vmatprep.subr.bf16.mxu1 %v5898_v13 }
0x119b   :  { %5944 = vmatpush1.bf16.msra.mxu0 %v5879_v31  ;;  %v5710_v31 = vld [vmem:[#allocation4 + $0x58] sm:$0xff] }
0x119c   :  { %5971 = vmatpush1.bf16.msra.mxu1 %v5897_v56  ;;  %5945 = vmatprep.subr.bf16.mxu0 %v5882_v39  ;;  %v5709_v39 = vld [vmem:[#allocation4 + $0x50] sm:$0xff] }
0x119d   :  { %5972 = vmatprep.subr.bf16.mxu1 %v5900_v48 }
0x119f   :  { %5946 = vmatpush1.bf16.msra.mxu0 %v5881_v23  ;;  %v5712_v23 = vld [vmem:[#allocation4 + $0x68] sm:$0xff] }
0x11a0   :  { %5973 = vmatpush1.bf16.msra.mxu1 %v5899_v49  ;;  %5947 = vmatprep.subr.bf16.mxu0 %v5884_v41  ;;  %v5703_v49 = vld [vmem:[#allocation4 + $0x20] sm:$0xff] }
0x11a1   :  { %5974 = vmatprep.subr.bf16.mxu1 %v5902_v50  ;;  %v5731_v50 = vld [vmem:[#allocation4 + $0x100] sm:$0xff] }
0x11a2   :  { %v5711_v41 = vld [vmem:[#allocation4 + $0x60] sm:$0xff] }
0x11a3   :  { %5948 = vmatpush1.bf16.msra.mxu0 %v5883_v38  ;;  %v5714_v38 = vld [vmem:[#allocation4 + $0x78] sm:$0xff] }
0x11a4   :  { %5975 = vmatpush1.bf16.msra.mxu1 %v5901_v51  ;;  %5949 = vmatprep.subr.bf16.mxu0 %v5886_v7  ;;  %v5706_v51 = vld [vmem:[#allocation4 + $0x38] sm:$0xff]  ;;  %v5713_v7 = vld [vmem:[#allocation4 + $0x70] sm:$0xff] }
0x11a5   :  { %5976 = vmatprep.subr.bf16.mxu1 %v5904_v53 }
0x11a7   :  { %5950 = vmatpush1.bf16.msra.mxu0 %v5885_v15  ;;  %v5716_v15 = vld [vmem:[#allocation4 + $0x88] sm:$0xff] }
0x11a8   :  { %5977 = vmatpush1.bf16.msra.mxu1 %v5903_v60  ;;  %6001 = vmatprep.subr.bf16.mxu0 %v5700_v16  ;;  %v5734_v60 = vld [vmem:[#allocation4 + $0x118] sm:$0xff]  ;;  %v5743_v16 = vld [vmem:[#allocation4 + $0x160] sm:$0xff] }
0x11a9   :  { %5978 = vmatprep.subr.bf16.mxu1 %v5906_v2  ;;  %v5733_v2 = vld [vmem:[#allocation4 + $0x110] sm:$0xff] }
0x11ac   :  { %5979 = vmatpush1.bf16.msra.mxu1 %v5905_v5  ;;  %v5736_v5 = vld [vmem:[#allocation4 + $0x128] sm:$0xff] }
0x11ad   :  { %5980 = vmatprep.subr.bf16.mxu1 %v5908_v54  ;;  %v5735_v54 = vld [vmem:[#allocation4 + $0x120] sm:$0xff] }
0x11b0   :  { %5981 = vmatpush1.bf16.msra.mxu1 %v5907_v11  ;;  %v5738_v11 = vld [vmem:[#allocation4 + $0x138] sm:$0xff] }
0x11b1   :  { %5982 = vmatprep.subr.bf16.mxu1 %v5910_v34  ;;  %v5737_v34 = vld [vmem:[#allocation4 + $0x130] sm:$0xff] }
0x11b4   :  { %5983 = vmatpush1.bf16.msra.mxu1 %v5909_v37  ;;  %v5740_v37 = vld [vmem:[#allocation4 + $0x148] sm:$0xff] }
0x11b5   :  { %5984 = vmatprep.subr.bf16.mxu1 %v5912_v47  ;;  %v5739_v47 = vld [vmem:[#allocation4 + $0x140] sm:$0xff] }
0x11b8   :  { %5985 = vmatpush1.bf16.msra.mxu1 %v5911_v63  ;;  %v5742_v63 = vld [vmem:[#allocation4 + $0x158] sm:$0xff] }
0x11b9   :  { %5986 = vmatprep.subr.bf16.mxu1 %v5914_v10  ;;  %v5741_v10 = vld [vmem:[#allocation4 + $0x150] sm:$0xff] }
0x11bc   :  { %5987 = vmatpush1.bf16.msra.mxu1 %v5913_v43  ;;  %v5744_v43 = vld [vmem:[#allocation4 + $0x168] sm:$0xff] }
0x11bd   :  { %5988 = vmatprep.subr.bf16.mxu1 %v5916_v20  ;;  %v5715_v20 = vld [vmem:[#allocation4 + $0x80] sm:$0xff] }
0x11c0   :  { %5989 = vmatpush1.bf16.msra.mxu1 %v5915_v22  ;;  %v5718_v22 = vld [vmem:[#allocation4 + $0x98] sm:$0xff] }
0x11c1   :  { %5990 = vmatprep.subr.bf16.mxu1 %v5918_v17  ;;  %v5746_v17 = vld [vmem:[#allocation4 + $0x178] sm:$0xff] }
0x11c4   :  { %5991 = vmatpush1.bf16.msra.mxu1 %v5917_v18  ;;  %v5717_v18 = vld [vmem:[#allocation4 + $0x90] sm:$0xff] }
0x11c5   :  { %6042 = vmatprep.subr.bf16.mxu1 %v5732_v19  ;;  %v5745_v19 = vld [vmem:[#allocation4 + $0x170] sm:$0xff] }
0x1242   :  { %v9225_v21 = vpop.f32.mrb[100].mxu1 }
0x1243   :  { %v5649_v33 = vpop.f32.mrb[101].mxu1 }
0x1244   :  { %v5651_v24 = vpop.f32.mrb[102].mxu1  ;;  %v5696_v61 = vpack.c.bf16 %v5649_v33, %v5649_v33  ;;  %v5720_v33 = vld [vmem:[#allocation4 + $0xa8] sm:$0xff] }
0x1245   :  { %v5652_v25 = vpop.f32.mrb[103].mxu1  ;;  %v5748_v24 = vld [vmem:[#allocation4 + $0x188] sm:$0xff] }
0x1246   :  { %v5719_v25 = vld [vmem:[#allocation4 + $0xa0] sm:$0xff] }
0x124a   :  { %v9227_v58 = vpop.f32.mrb[104].mxu1 }
0x124b   :  { %v5690_v12 = vpop.f32.mrb[105].mxu1 }
0x124c   :  { %v5692_v40 = vpop.f32.mrb[106].mxu1  ;;  %v5698_v53 = vpack.c.bf16 %v5690_v12, %v5690_v12  ;;  %v5747_v12 = vld [vmem:[#allocation4 + $0x180] sm:$0xff] }
0x124d   :  { %v5693_v4 = vpop.f32.mrb[107].mxu1  ;;  %v5722_v40 = vld [vmem:[#allocation4 + $0xb8] sm:$0xff] }
0x124e   :  { %v5750_v4 = vld [vmem:[#allocation4 + $0x198] sm:$0xff] }
0x1252   :  { %v5802_v42 = vpop.f32.mrb[108].mxu1 }
0x1253   :  { %v5804_v44 = vpop.f32.mrb[109].mxu1  ;;  %v5850_v62 = vpack.c.bf16 %v5802_v42, %v5802_v42  ;;  %v5721_v42 = vld [vmem:[#allocation4 + $0xb0] sm:$0xff] }
0x1254   :  { %v5806_v36 = vpop.f32.mrb[110].mxu1  ;;  %v5851_v55 = vpack.c.bf16 %v5804_v44, %v5804_v44  ;;  %v5749_v44 = vld [vmem:[#allocation4 + $0x190] sm:$0xff] }
0x1255   :  { %v5807_v0 = vpop.f32.mrb[111].mxu1  ;;  %v5724_v36 = vld [vmem:[#allocation4 + $0xc8] sm:$0xff] }
0x1256   :  { %5951 = vmatprep.mubr.bf16.mxu0 %v5851_v55  ;;  %v5752_v55 = vld [vmem:[#allocation4 + $0x1a8] sm:$0xff]  ;;  %v5751_v0 = vld [vmem:[#allocation4 + $0x1a0] sm:$0xff] }
0x1257   :  { %5952 = vmatmul.mubr.bf16.vlgmr.msra.gmra.mrb[124].mxu0 %v5850_v62  ;;  %v5723_v62 = vld [vmem:[#allocation4 + $0xc0] sm:$0xff] }
0x1258   :  { %6002 = vmatpush1.bf16.msra.mxu0 %v5699_v52  ;;  %6033 = vmatprep.mubr.bf16.mxu0 %v5696_v61  ;;  %v5726_v52 = vld [vmem:[#allocation4 + $0xd8] sm:$0xff] }
0x1259   :  { %6003 = vmatprep.subr.bf16.mxu0 %v5702_v27  ;;  %v5754_v61 = vld [vmem:[#allocation4 + $0x1b8] sm:$0xff]  ;;  %v5725_v27 = vld [vmem:[#allocation4 + $0xd0] sm:$0xff] }
0x125a   :  { %v5843_v32 = vpop.f32.mrb[112].mxu1 }
0x125b   :  { %v5845_v26 = vpop.f32.mrb[113].mxu1  ;;  %v5852_v56 = vpack.c.bf16 %v5843_v32, %v5843_v32  ;;  %v5728_v32 = vld [vmem:[#allocation4 + $0xe8] sm:$0xff] }
0x125c   :  { %v5853_v13 = vpack.c.bf16 %v5845_v26, %v5845_v26  ;;  %6004 = vmatpush1.bf16.msra.mxu0 %v5701_v29  ;;  %v5847_v46 = vpop.f32.mrb[114].mxu1  ;;  %v5753_v29 = vld [vmem:[#allocation4 + $0x1b0] sm:$0xff]  ;;  %v5727_v26 = vld [vmem:[#allocation4 + $0xe0] sm:$0xff] }
0x125d   :  { %v5848_v48 = vpop.f32.mrb[115].mxu1  ;;  %6005 = vmatprep.subr.bf16.mxu0 %v5704_v59  ;;  %v5756_v59 = vld [vmem:[#allocation4 + $0x1c8] sm:$0xff]  ;;  %v5730_v46 = vld [vmem:[#allocation4 + $0xf8] sm:$0xff] }
0x125e   :  { %5992 = vmatprep.mubr.bf16.mxu1 %v5853_v13  ;;  %v5755_v13 = vld [vmem:[#allocation4 + $0x1c0] sm:$0xff]  ;;  %v5729_v48 = vld [vmem:[#allocation4 + $0xf0] sm:$0xff] }
0x125f   :  { %5993 = vmatmul.mubr.bf16.vlgmr.msra.gmra.mrb[116].mxu1 %v5852_v56  ;;  %v5758_v56 = vld [vmem:[#allocation4 + $0x1d8] sm:$0xff] }
0x1260   :  { %6006 = vmatpush1.bf16.msra.mxu0 %v5703_v49  ;;  %6043 = vmatpush1.bf16.msra.mxu1 %v5731_v50  ;;  %v5757_v49 = vld [vmem:[#allocation4 + $0x1d0] sm:$0xff]  ;;  %v5760_v50 = vld [vmem:[#allocation4 + $0x1e8] sm:$0xff] }
0x1261   :  { %6074 = vmatprep.mubr.bf16.mxu1 %v5698_v53  ;;  %6007 = vmatprep.subr.bf16.mxu0 %v5706_v51  ;;  %v5695_v51 = vpack.c.bf16 %v9225_v21, %v9225_v21  ;;  %v5759_v53 = vld [vmem:[#allocation4 + $0x1e0] sm:$0xff]  ;;  %v6178_v21 = vld [vmem:[#allocation4 + $0x418] sm:$0xff] }
0x1262   :  { %6044 = vmatprep.subr.bf16.mxu1 %v5734_v60  ;;  %v5762_v60 = vld [vmem:[#allocation4 + $0x1f8] sm:$0xff] }
0x1264   :  { %6008 = vmatpush1.bf16.msra.mxu0 %v5705_v35  ;;  %6045 = vmatpush1.bf16.msra.mxu1 %v5733_v2  ;;  %v5761_v35 = vld [vmem:[#allocation4 + $0x1f0] sm:$0xff]  ;;  %v6084_v2 = vld [vmem:[#allocation30 + $0x2] sm:$0x1] }
0x1265   :  { %6009 = vmatprep.subr.bf16.mxu0 %v5708_v30  ;;  %6046 = vmatprep.subr.bf16.mxu1 %v5736_v5  ;;  %v5697_v30 = vpack.c.bf16 %v9227_v58, %v9227_v58  ;;  %v6208_v5 = vld [vmem:[#allocation4 + $0x508] sm:$0xff]  ;;  %v6210_v58 = vld [vmem:[#allocation4 + $0x518] sm:$0xff] }
0x1268   :  { %6010 = vmatpush1.bf16.msra.mxu0 %v5707_v28  ;;  %6047 = vmatpush1.bf16.msra.mxu1 %v5735_v54  ;;  %v6207_v28 = vld [vmem:[#allocation4 + $0x500] sm:$0xff]  ;;  %v6180_v54 = vld [vmem:[#allocation4 + $0x428] sm:$0xff] }
0x1269   :  { %6011 = vmatprep.subr.bf16.mxu0 %v5710_v31  ;;  %6048 = vmatprep.subr.bf16.mxu1 %v5738_v11  ;;  %v6209_v31 = vld [vmem:[#allocation4 + $0x510] sm:$0xff]  ;;  %v6182_v11 = vld [vmem:[#allocation4 + $0x438] sm:$0xff] }
0x126c   :  { %6012 = vmatpush1.bf16.msra.mxu0 %v5709_v39  ;;  %6049 = vmatpush1.bf16.msra.mxu1 %v5737_v34  ;;  %v6211_v39 = vld [vmem:[#allocation4 + $0x520] sm:$0xff]  ;;  %v6214_v34 = vld [vmem:[#allocation4 + $0x538] sm:$0xff] }
0x126d   :  { %6013 = vmatprep.subr.bf16.mxu0 %v5712_v23  ;;  %6050 = vmatprep.subr.bf16.mxu1 %v5740_v37  ;;  %v6181_v23 = vld [vmem:[#allocation4 + $0x430] sm:$0xff]  ;;  %v6184_v37 = vld [vmem:[#allocation4 + $0x448] sm:$0xff] }
0x1270   :  { %6014 = vmatpush1.bf16.msra.mxu0 %v5711_v41  ;;  %6051 = vmatpush1.bf16.msra.mxu1 %v5739_v47  ;;  %v6213_v41 = vld [vmem:[#allocation4 + $0x530] sm:$0xff]  ;;  %v6216_v47 = vld [vmem:[#allocation4 + $0x548] sm:$0xff] }
0x1271   :  { %6015 = vmatprep.subr.bf16.mxu0 %v5714_v38  ;;  %6052 = vmatprep.subr.bf16.mxu1 %v5742_v63  ;;  %v6183_v38 = vld [vmem:[#allocation4 + $0x440] sm:$0xff]  ;;  %v6186_v63 = vld [vmem:[#allocation4 + $0x458] sm:$0xff] }
0x1274   :  { %6016 = vmatpush1.bf16.msra.mxu0 %v5713_v7  ;;  %6053 = vmatpush1.bf16.msra.mxu1 %v5741_v10  ;;  %v6215_v7 = vld [vmem:[#allocation4 + $0x540] sm:$0xff]  ;;  %v6218_v10 = vld [vmem:[#allocation4 + $0x558] sm:$0xff] }
0x1275   :  { %6017 = vmatprep.subr.bf16.mxu0 %v5716_v15  ;;  %6054 = vmatprep.subr.bf16.mxu1 %v5744_v43  ;;  %v6185_v15 = vld [vmem:[#allocation4 + $0x450] sm:$0xff]  ;;  %v6188_v43 = vld [vmem:[#allocation4 + $0x468] sm:$0xff] }
0x1278   :  { %6018 = vmatpush1.bf16.msra.mxu0 %v5715_v20  ;;  %6055 = vmatpush1.bf16.msra.mxu1 %v5743_v16  ;;  %v6217_v20 = vld [vmem:[#allocation4 + $0x550] sm:$0xff]  ;;  %v6220_v16 = vld [vmem:[#allocation4 + $0x568] sm:$0xff] }
0x1279   :  { %6019 = vmatprep.subr.bf16.mxu0 %v5718_v22  ;;  %6056 = vmatprep.subr.bf16.mxu1 %v5746_v17  ;;  %v6187_v22 = vld [vmem:[#allocation4 + $0x460] sm:$0xff]  ;;  %v6190_v17 = vld [vmem:[#allocation4 + $0x478] sm:$0xff] }
0x127c   :  { %6020 = vmatpush1.bf16.msra.mxu0 %v5717_v18  ;;  %6057 = vmatpush1.bf16.msra.mxu1 %v5745_v19  ;;  %v6219_v18 = vld [vmem:[#allocation4 + $0x560] sm:$0xff]  ;;  %v6222_v19 = vld [vmem:[#allocation4 + $0x578] sm:$0xff] }
0x127d   :  { %6021 = vmatprep.subr.bf16.mxu0 %v5720_v33  ;;  %6058 = vmatprep.subr.bf16.mxu1 %v5748_v24  ;;  %v6189_v33 = vld [vmem:[#allocation4 + $0x470] sm:$0xff]  ;;  %v6192_v24 = vld [vmem:[#allocation4 + $0x488] sm:$0xff] }
0x1280   :  { %6022 = vmatpush1.bf16.msra.mxu0 %v5719_v25  ;;  %6059 = vmatpush1.bf16.msra.mxu1 %v5747_v12  ;;  %v6221_v25 = vld [vmem:[#allocation4 + $0x570] sm:$0xff]  ;;  %v6224_v12 = vld [vmem:[#allocation4 + $0x588] sm:$0xff] }
0x1281   :  { %6023 = vmatprep.subr.bf16.mxu0 %v5722_v40  ;;  %6060 = vmatprep.subr.bf16.mxu1 %v5750_v4  ;;  %v6191_v40 = vld [vmem:[#allocation4 + $0x480] sm:$0xff]  ;;  %v6194_v4 = vld [vmem:[#allocation4 + $0x498] sm:$0xff] }
0x1284   :  { %6024 = vmatpush1.bf16.msra.mxu0 %v5721_v42  ;;  %6061 = vmatpush1.bf16.msra.mxu1 %v5749_v44  ;;  %v6223_v42 = vld [vmem:[#allocation4 + $0x580] sm:$0xff]  ;;  %v6226_v44 = vld [vmem:[#allocation4 + $0x598] sm:$0xff] }
0x1285   :  { %6025 = vmatprep.subr.bf16.mxu0 %v5724_v36  ;;  %6062 = vmatprep.subr.bf16.mxu1 %v5752_v55  ;;  %v6193_v36 = vld [vmem:[#allocation4 + $0x490] sm:$0xff]  ;;  %v6196_v55 = vld [vmem:[#allocation4 + $0x4a8] sm:$0xff] }
0x1288   :  { %6026 = vmatpush1.bf16.msra.mxu0 %v5723_v62  ;;  %6063 = vmatpush1.bf16.msra.mxu1 %v5751_v0  ;;  %v6225_v62 = vld [vmem:[#allocation4 + $0x590] sm:$0xff]  ;;  %v6228_v0 = vld [vmem:[#allocation4 + $0x5a8] sm:$0xff] }
0x1289   :  { %6027 = vmatprep.subr.bf16.mxu0 %v5726_v52  ;;  %6064 = vmatprep.subr.bf16.mxu1 %v5754_v61  ;;  %v6195_v52 = vld [vmem:[#allocation4 + $0x4a0] sm:$0xff]  ;;  %v6198_v61 = vld [vmem:[#allocation4 + $0x4b8] sm:$0xff] }
0x128c   :  { %6028 = vmatpush1.bf16.msra.mxu0 %v5725_v27  ;;  %6065 = vmatpush1.bf16.msra.mxu1 %v5753_v29  ;;  %v6227_v27 = vld [vmem:[#allocation4 + $0x5a0] sm:$0xff]  ;;  %v6197_v29 = vld [vmem:[#allocation4 + $0x4b0] sm:$0xff] }
0x128d   :  { %6029 = vmatprep.subr.bf16.mxu0 %v5728_v32  ;;  %6066 = vmatprep.subr.bf16.mxu1 %v5756_v59  ;;  %v6200_v32 = vld [vmem:[#allocation4 + $0x4c8] sm:$0xff]  ;;  %v6230_v59 = vld [vmem:[#allocation4 + $0x5b8] sm:$0xff] }
0x1290   :  { %6030 = vmatpush1.bf16.msra.mxu0 %v5727_v26  ;;  %6067 = vmatpush1.bf16.msra.mxu1 %v5755_v13  ;;  %v6199_v26 = vld [vmem:[#allocation4 + $0x4c0] sm:$0xff]  ;;  %v6229_v13 = vld [vmem:[#allocation4 + $0x5b0] sm:$0xff] }
0x1291   :  { %6031 = vmatprep.subr.bf16.mxu0 %v5730_v46  ;;  %6068 = vmatprep.subr.bf16.mxu1 %v5758_v56  ;;  %v6202_v46 = vld [vmem:[#allocation4 + $0x4d8] sm:$0xff]  ;;  %v6232_v56 = vld [vmem:[#allocation4 + $0x5c8] sm:$0xff] }
0x1294   :  { %6032 = vmatpush1.bf16.msra.mxu0 %v5729_v48  ;;  %6069 = vmatpush1.bf16.msra.mxu1 %v5757_v49  ;;  %v6201_v48 = vld [vmem:[#allocation4 + $0x4d0] sm:$0xff]  ;;  %v6231_v49 = vld [vmem:[#allocation4 + $0x5c0] sm:$0xff] }
0x1295   :  { %6070 = vmatprep.subr.bf16.mxu1 %v5760_v50  ;;  %6955 = vmatprep.subr.msk.bf16.mxu0 %vm5600_vm14, %v9195_v14  ;;  %v6176_v14 = vld [vmem:[#allocation4 + $0x408] sm:$0xff] }
0x1296   :  { %v6204_v50 = vld [vmem:[#allocation4 + $0x4e8] sm:$0xff] }
0x1297   :  { %6034 = vmatmul.mubr.bf16.vlgmr.msra.gmra.mrb[128].mxu0 %v5695_v51  ;;  %v6234_v51 = vld [vmem:[#allocation4 + $0x5d8] sm:$0xff] }
0x1298   :  { %6071 = vmatpush1.bf16.msra.mxu1 %v5759_v53  ;;  %6089 = vmatpush1.bf16.msra.mxu0 %v9203_v8  ;;  %v6175_v8 = vld [vmem:[#allocation4 + $0x400] sm:$0xff] }
0x1299   :  { %6072 = vmatprep.subr.bf16.mxu1 %v5762_v60  ;;  %6120 = vmatprep.mubr.bf16.mxu0 %v8259_v57  ;;  %v6203_v53 = vld [vmem:[#allocation4 + $0x4e0] sm:$0xff]  ;;  %v6233_v60 = vld [vmem:[#allocation4 + $0x5d0] sm:$0xff] }
0x129a   :  { %6239 = vmatprep.subr.bf16.mxu0 %v6176_v14  ;;  %v6235_v14 = vld [vmem:[#allocation4 + $0x5e0] sm:$0xff] }
0x129c   :  { %6073 = vmatpush1.bf16.msra.mxu1 %v5761_v35  ;;  %v6206_v35 = vld [vmem:[#allocation4 + $0x4f8] sm:$0xff] }
0x129d   :  { %6957 = vmatprep.subr.msk.bf16.mxu1 %vm5600_vm14, %v9198_v3  ;;  %v6177_v3 = vld [vmem:[#allocation4 + $0x410] sm:$0xff] }
0x129f   :  { %6075 = vmatmul.mubr.bf16.vlgmr.msra.gmra.mrb[120].mxu1 %v5697_v30  ;;  %6956 = vmatmul.mubr.msk.bf16.vlgmr.msra.gmra.mrb[132].mxu0 %vm5596_vm15, %v6084_v2  ;;  %v6205_v30 = vld [vmem:[#allocation4 + $0x4f0] sm:$0xff] }
0x12a0   :  { %6130 = vmatpush1.bf16.msra.mxu1 %v9209_v45  ;;  %6161 = vmatprep.mubr.bf16.mxu1 %v8259_v57  ;;  %v6212_v45 = vld [vmem:[#allocation4 + $0x528] sm:$0xff]  ;;  %v6179_v57 = vld [vmem:[#allocation4 + $0x420] sm:$0xff] }
0x12a1   :  { %6240 = vmatpush1.bf16.msra.mxu0 %v6175_v8  ;;  %6280 = vmatprep.subr.bf16.mxu1 %v6208_v5  ;;  %v6238_v8 = vld [vmem:[#allocation4 + $0x5f8] sm:$0xff]  ;;  %v7779_v5 = vld [vmem:[%s9341_s20 + $0x40] sm:$0xff]  }
0x12a2   :  { %6241 = vmatprep.subr.bf16.mxu0 %v6178_v21  ;;  %v6237_v21 = vld [vmem:[#allocation4 + $0x5f0] sm:$0xff] }
0x12a5   :  { %6242 = vmatpush1.bf16.msra.mxu0 %v6177_v3 }
0x12a6   :  { %6243 = vmatprep.subr.bf16.mxu0 %v6180_v54 }
0x12a7   :  { %6958 = vmatmul.mubr.msk.bf16.vlgmr.msra.gmra.mrb[124].mxu1 %vm5596_vm15, %v6084_v2  ;;  %v6236_v2 = vld [vmem:[#allocation4 + $0x5e8] sm:$0xff] }
0x12a8   :  { %6281 = vmatpush1.bf16.msra.mxu1 %v6207_v28 }
0x12a9   :  { %6282 = vmatprep.subr.bf16.mxu1 %v6210_v58  ;;  %6244 = vmatpush1.bf16.msra.mxu0 %v6179_v57 }
0x12aa   :  { %6245 = vmatprep.subr.bf16.mxu0 %v6182_v11 }
0x12ac   :  { %6283 = vmatpush1.bf16.msra.mxu1 %v6209_v31 }
0x12ad   :  { %6284 = vmatprep.subr.bf16.mxu1 %v6212_v45  ;;  %6246 = vmatpush1.bf16.msra.mxu0 %v6181_v23 }
0x12ae   :  { %6247 = vmatprep.subr.bf16.mxu0 %v6184_v37 }
0x12b0   :  { %6285 = vmatpush1.bf16.msra.mxu1 %v6211_v39 }
0x12b1   :  { %6286 = vmatprep.subr.bf16.mxu1 %v6214_v34  ;;  %6248 = vmatpush1.bf16.msra.mxu0 %v6183_v38 }
0x12b2   :  { %6249 = vmatprep.subr.bf16.mxu0 %v6186_v63 }
0x12b4   :  { %6287 = vmatpush1.bf16.msra.mxu1 %v6213_v41 }
0x12b5   :  { %6288 = vmatprep.subr.bf16.mxu1 %v6216_v47  ;;  %6250 = vmatpush1.bf16.msra.mxu0 %v6185_v15 }
0x12b6   :  { %6251 = vmatprep.subr.bf16.mxu0 %v6188_v43 }
0x12b8   :  { %6289 = vmatpush1.bf16.msra.mxu1 %v6215_v7 }
0x12b9   :  { %6290 = vmatprep.subr.bf16.mxu1 %v6218_v10  ;;  %6252 = vmatpush1.bf16.msra.mxu0 %v6187_v22 }
0x12ba   :  { %6253 = vmatprep.subr.bf16.mxu0 %v6190_v17 }
0x12bc   :  { %6291 = vmatpush1.bf16.msra.mxu1 %v6217_v20 }
0x12bd   :  { %6292 = vmatprep.subr.bf16.mxu1 %v6220_v16  ;;  %6254 = vmatpush1.bf16.msra.mxu0 %v6189_v33  ;;  %v7780_v33 = vld [vmem:[%s9341_s20] sm:$0xff]  }
0x12be   :  { %6255 = vmatprep.subr.bf16.mxu0 %v6192_v24 }
0x12c0   :  { %6293 = vmatpush1.bf16.msra.mxu1 %v6219_v18 }
0x12c1   :  { %6294 = vmatprep.subr.bf16.mxu1 %v6222_v19  ;;  %6256 = vmatpush1.bf16.msra.mxu0 %v6191_v40  ;;  %v7782_v40 = vld [vmem:[%s9341_s20 + $0x8] sm:$0xff]  }
0x12c2   :  { %6257 = vmatprep.subr.bf16.mxu0 %v6194_v4  ;;  %v7783_v4 = vld [vmem:[%s9341_s20 + $0x50] sm:$0xff]  }
0x12c4   :  { %6295 = vmatpush1.bf16.msra.mxu1 %v6221_v25 }
0x12c5   :  { %6296 = vmatprep.subr.bf16.mxu1 %v6224_v12  ;;  %6258 = vmatpush1.bf16.msra.mxu0 %v6193_v36  ;;  %v7781_v12 = vld [vmem:[%s9341_s20 + $0x48] sm:$0xff]  }
0x12c6   :  { %6259 = vmatprep.subr.bf16.mxu0 %v6196_v55 }
0x12c8   :  { %6297 = vmatpush1.bf16.msra.mxu1 %v6223_v42 }
0x12c9   :  { %6298 = vmatprep.subr.bf16.mxu1 %v6226_v44  ;;  %6260 = vmatpush1.bf16.msra.mxu0 %v6195_v52 }
0x12ca   :  { %6261 = vmatprep.subr.bf16.mxu0 %v6198_v61  ;;  %v7785_v61 = vld [vmem:[%s9341_s20 + $0x58] sm:$0xff]  }
0x12cc   :  { %6299 = vmatpush1.bf16.msra.mxu1 %v6225_v62  ;;  %v7784_v62 = vld [vmem:[%s9341_s20 + $0x10] sm:$0xff]  }
0x12cd   :  { %6300 = vmatprep.subr.bf16.mxu1 %v6228_v0  ;;  %6262 = vmatpush1.bf16.msra.mxu0 %v6197_v29  ;;  %v7787_v29 = vld [vmem:[%s9341_s20 + $0x60] sm:$0xff]  }
0x12ce   :  { %6263 = vmatprep.subr.bf16.mxu0 %v6200_v32  ;;  %v7788_v32 = vld [vmem:[%s9341_s20 + $0x20] sm:$0xff]  }
0x12d0   :  { %6301 = vmatpush1.bf16.msra.mxu1 %v6227_v27  ;;  %v7786_v27 = vld [vmem:[%s9341_s20 + $0x18] sm:$0xff]  }
0x12d1   :  { %6302 = vmatprep.subr.bf16.mxu1 %v6230_v59  ;;  %6264 = vmatpush1.bf16.msra.mxu0 %v6199_v26  ;;  %v7789_v59 = vld [vmem:[%s9341_s20 + $0x68] sm:$0xff]  }
0x12d2   :  { %6265 = vmatprep.subr.bf16.mxu0 %v6202_v46  ;;  %v7790_v26 = vld [vmem:[%s9341_s20 + $0x28] sm:$0xff]   ;;  %v7792_v46 = vld [vmem:[%s9341_s20 + $0x30] sm:$0xff]  }
0x12d4   :  { %6303 = vmatpush1.bf16.msra.mxu1 %v6229_v13  ;;  %v7791_v13 = vld [vmem:[%s9341_s20 + $0x70] sm:$0xff]  }
0x12d5   :  { %6304 = vmatprep.subr.bf16.mxu1 %v6232_v56  ;;  %6266 = vmatpush1.bf16.msra.mxu0 %v6201_v48  ;;  %v7793_v56 = vld [vmem:[%s9341_s20 + $0x78] sm:$0xff]  }
0x12d6   :  { %6267 = vmatprep.subr.bf16.mxu0 %v6204_v50  ;;  %v7794_v48 = vld [vmem:[%s9341_s20 + $0x38] sm:$0xff]  }
0x12d8   :  { %6305 = vmatpush1.bf16.msra.mxu1 %v6231_v49  ;;  %v7795_v49 = vld [vmem:[%s9397_s16] sm:$0xff]  }
0x12d9   :  { %6306 = vmatprep.subr.bf16.mxu1 %v6234_v51  ;;  %6268 = vmatpush1.bf16.msra.mxu0 %v6203_v53 }
0x12da   :  { %6269 = vmatprep.subr.bf16.mxu0 %v6206_v35  ;;  %v5590_v35 = vld [vmem:[#allocation32] sm:$0x3] }
0x12dc   :  { %6307 = vmatpush1.bf16.msra.mxu1 %v6233_v60 }
0x12dd   :  { %6308 = vmatprep.subr.bf16.mxu1 %v6236_v2  ;;  %6270 = vmatpush1.bf16.msra.mxu0 %v6205_v30 }
0x12de   :  { %7088 = vmatprep.subr.bf16.mxu0 %v7779_v5  ;;  %v6331_v5 = vrot.slane %v5590_v35, %v8893_v9  ;;  %v7796_v9 = vld [vmem:[%s9397_s16 + $0x8] sm:$0xff]  }
0x12e0   :  { %6309 = vmatpush1.bf16.msra.mxu1 %v6235_v14  ;;  %v6327_v14 = vrot.slane %v5590_v35, %v8890_v6 }
0x12e1   :  { %6310 = vmatprep.subr.bf16.mxu1 %v6238_v8 }
0x12e4   :  { %6311 = vmatpush1.bf16.msra.mxu1 %v6237_v21 }
0x12e5   :  { %7341 = vmatprep.subr.bf16.mxu1 %v8245_v1 }
0x132a   :  { %v5953_v28 = vpop.f32.mrb[124].mxu0 }
0x132b   :  { %v5955_v58 = vpop.f32.mrb[125].mxu0 }
0x132c   :  { %v5957_v3 = vpop.f32.mrb[126].mxu0 }
0x132d   :  { %v5958_v54 = vpop.f32.mrb[127].mxu0 }
0x1332   :  { %v5994_v31 = vpop.f32.mrb[116].mxu1 }
0x1333   :  { %v5995_v45 = vadd.f32 %v5994_v31, %v5953_v28  ;;  %v5996_v57 = vpop.f32.mrb[117].mxu1 }
0x1334   :  { %v5997_v11 = vadd.f32 %v5996_v57, %v5955_v58  ;;  %v5998_v39 = vpop.f32.mrb[118].mxu1 }
0x1335   :  { %v5999_v34 = vpop.f32.mrb[119].mxu1 }
0x136a   :  { %v6035_v23 = vpop.f32.mrb[128].mxu0 }
0x136b   :  { %v6036_v37 = vadd.f32 %v6035_v23, %v5995_v45  ;;  %v6037_v41 = vpop.f32.mrb[129].mxu0 }
0x136c   :  { %v6038_v47 = vadd.f32 %v6037_v41, %v5997_v11  ;;  %v6039_v38 = vpop.f32.mrb[130].mxu0  ;;  %v7798_v41 = vld [vmem:[%s9397_s16 + $0x18] sm:$0xff]  }
0x136d   :  { %v6040_v63 = vpop.f32.mrb[131].mxu0  ;;  %v6959_v38 = vld [vmem:[#allocation33] ss:$0 sm:$0xff] }
0x1372   :  { %v6076_v7 = vpop.f32.mrb[120].mxu1  ;;  %v6122_v10 = vpop.f32.mrb[132].mxu0 }
0x1373   :  { %v9247_v15 = vadd.f32 %v6076_v7, %v6036_v37  ;;  %v6078_v43 = vpop.f32.mrb[121].mxu1  ;;  %v6170_v20 = vpack.c.bf16 %v6122_v10, %v6122_v10  ;;  %v6124_v16 = vpop.f32.mrb[133].mxu0  ;;  %v7797_v37 = vld [vmem:[%s9397_s16 + $0x10] sm:$0xff]  }
0x1374   :  { %v9249_v22 = vadd.f32 %v6078_v43, %v6038_v47  ;;  %v6080_v17 = vpop.f32.mrb[122].mxu1  ;;  %v6171_v18 = vpack.c.bf16 %v6124_v16, %v6124_v16  ;;  %v6126_v19 = vpop.f32.mrb[134].mxu0 }
0x1375   :  { %v6081_v24 = vpop.f32.mrb[123].mxu1  ;;  %v6127_v25 = vpop.f32.mrb[135].mxu0  ;;  %v6976_v17 = vld [vmem:[#allocation6] ss:$0 sm:$0xff] }
0x1376   :  { %6271 = vmatprep.mubr.bf16.mxu0 %v6171_v18 }
0x1377   :  { %6272 = vmatmul.mubr.bf16.vlgmr.msra.gmra.mrb[136].mxu0 %v6170_v20 }
0x1378   :  { %7089 = vmatpush3.bf16.msra.mxu0 %v7780_v33 }
0x1379   :  { %7090 = vmatprep.subr.bf16.mxu0 %v7781_v12 }
0x137a   :  { %v6163_v42 = vpop.f32.mrb[124].mxu1 }
0x137b   :  { %v6165_v44 = vpop.f32.mrb[125].mxu1  ;;  %v6172_v0 = vpack.c.bf16 %v6163_v42, %v6163_v42 }
0x137c   :  { %v6173_v36 = vpack.c.bf16 %v6165_v44, %v6165_v44  ;;  %v6167_v55 = vpop.f32.mrb[126].mxu1  ;;  %7091 = vmatpush3.bf16.msra.mxu0 %v7782_v40 }
0x137d   :  { %v6168_v52 = vpop.f32.mrb[127].mxu1  ;;  %7092 = vmatprep.subr.bf16.mxu0 %v7783_v4 }
0x137e   :  { %6312 = vmatprep.mubr.bf16.mxu1 %v6173_v36 }
0x137f   :  { %6313 = vmatmul.mubr.bf16.vlgmr.msra.gmra.mrb[128].mxu1 %v6172_v0 }
0x1380   :  { %7093 = vmatpush3.bf16.msra.mxu0 %v7784_v62  ;;  %7349 = vmatprep.mubr.msk.bf16.mxu1 %vm8247_vm0, %v8245_v1 }
0x1381   :  { %7094 = vmatprep.subr.bf16.mxu0 %v7785_v61  ;;  %7342 = vmatpush3.bf16.msra.mxu1 %v7795_v49 }
0x1382   :  { %7343 = vmatprep.subr.bf16.mxu1 %v8245_v1 }
0x1384   :  { %7095 = vmatpush3.bf16.msra.mxu0 %v7786_v27 }
0x1385   :  { %7096 = vmatprep.subr.bf16.mxu0 %v7787_v29  ;;  %7344 = vmatpush3.bf16.msra.mxu1 %v7796_v9 }
0x1386   :  { %7345 = vmatprep.subr.bf16.mxu1 %v8245_v1 }
0x1388   :  { %7097 = vmatpush3.bf16.msra.mxu0 %v7788_v32 }
0x1389   :  { %7098 = vmatprep.subr.bf16.mxu0 %v7789_v59  ;;  %7346 = vmatpush3.bf16.msra.mxu1 %v7797_v37 }
0x138a   :  { %7347 = vmatprep.subr.bf16.mxu1 %v8245_v1 }
0x138c   :  { %7099 = vmatpush3.bf16.msra.mxu0 %v7790_v26 }
0x138d   :  { %7100 = vmatprep.subr.bf16.mxu0 %v7791_v13  ;;  %7348 = vmatpush3.bf16.msra.mxu1 %v7798_v41 }
0x1390   :  { %7101 = vmatpush3.bf16.msra.mxu0 %v7792_v46 }
0x1391   :  { %7102 = vmatprep.subr.bf16.mxu0 %v7793_v56 }
0x1394   :  { %7103 = vmatpush3.bf16.msra.mxu0 %v7794_v48 }
0x144a   :  { %v6273_v50 = vpop.f32.mrb[136].mxu0 }
0x144b   :  { %v6275_v51 = vpop.f32.mrb[137].mxu0 }
0x144c   :  { %v6277_v53 = vpop.f32.mrb[138].mxu0 }
0x144d   :  { %v6278_v60 = vpop.f32.mrb[139].mxu0 }
0x1452   :  { %v6314_v2 = vpop.f32.mrb[128].mxu1 }
0x1453   :  { %v6315_v30 = vadd.f32 %v6314_v2, %v6273_v50  ;;  %v6316_v8 = vpop.f32.mrb[129].mxu1 }
0x1454   :  { %v6317_v21 = vadd.f32 %v6316_v8, %v6275_v51  ;;  %v6318_v28 = vpop.f32.mrb[130].mxu1 }
0x1455   :  { %v6321_v58 = vadd.f32 %v6315_v30, %v9247_v15  ;;  %v6319_v3 = vpop.f32.mrb[131].mxu1 }
0x1456   :  { %v6322_v54 = vadd.f32 %v6317_v21, %v9249_v22 }
0x1457   :  { %v6334_v31 = vadd.f32 %v6327_v14, %v6321_v58 }
0x1458   :  { %v6335_v45 = vadd.f32 %v6331_v5, %v6322_v54 }
0x1459   :  { %vm6336_vm0 = vcmp.gt.f32.partialorder %v6334_v31, 0.0  ;;  %v6338_v57 = vmul.f32 0.2, %v6334_v31 }
0x145a   :  { %vm6337_vm1 = vcmp.gt.f32.partialorder %v6335_v45, 0.0  ;;  %v6339_v11 = vmul.f32 0.2, %v6335_v45 }
0x145b   :  { %v6340_v39 = vsel %vm6336_vm0, %v6334_v31, %v6338_v57 }
0x145c   :  { %v6341_v34 = vsel %vm6337_vm1, %v6335_v45, %v6339_v11  ;;  %v6375_v6 = vpack.c.bf16 %v6340_v39, %v6340_v39 }
0x145d   :  { %v6376_v23 = vpack.c.bf16 %v6341_v34, %v6341_v34 }
0x145f   :  { %6511 = vmatprep.mubr.bf16.mxu0 %v6376_v23 }
0x1460   :  { %6512 = vmatmul.mubr.bf16.vlgmr.msra.gmra.mrb[140].mxu0 %v6375_v6 }
0x1533   :  { %v7104_v47 = vpop.f32.mrb[140].mxu0 }
0x1534   :  { %v7105_v63 = vpop.f32.mrb[141].mxu0 }
0x1535   :  { %v7106_v7 = vadd.f32 %v7105_v63, %v7104_v47  ;;  %v7107_v10 = vpop.f32.mrb[142].mxu0 }
0x1536   :  { %v7108_v15 = vpop.f32.mrb[143].mxu0 }
0x1537   :  { %v6514_v43 = vadd.f32 %v7106_v7, %v6959_v38 }
0x1539   :  { %vm6519_vm2 = vcmp.gt.f32.partialorder %v6514_v43, 0.0  ;;  %v6520_v20 = vmul.f32 0.2, %v6514_v43 }
0x153b   :  { %v6521_v16 = vsel %vm6519_vm2, %v6514_v43, %v6520_v20 }
0x153c   :  { %v6531_v22 = vpack.c.bf16 %v6521_v16, %v6521_v16 }
0x153e   :  { %7350 = vmatmul.mubr.msk.bf16.vlgmr.msra.gmra.mrb[132].mxu1 %vm613_vm7, %v6531_v22 }
0x1611   :  { %v6599_v1 = vpop.f32.mrb[132].mxu1 }
0x1612   :  { %v6600_v18 = vadd.f32 %v6976_v17, %v6599_v1  ;;  %v7351_v19 = vpop.f32.mrb[133].mxu1 }
0x1613   :  { %v6602_v33 = vpop.f32.mrb[134].mxu1 }
0x1614   :  { %6606 = vst.msk [vmem:[%s9398_s13] sm:$0x3] %vm6605_vm3, %v6600_v18  ;;  %v7352_v24 = vpop.f32.mrb[135].mxu1 }
0x1615   :  { %6611 = vsyncpa [#allocation8], 1 }
0x1616   :  { %6612 = vsyncpa [#allocation10], 1 }
0x1617   :  { %6613 = vsyncpa [#allocation13], 1 }
0x1618   :  { %6614 = vsyncpa [#allocation16], 1 }
0x1619   :  { %6615 = vsyncpa [#allocation19], 1 }
0x161a   :  { %6616 = vsyncpa [#allocation22], 1 }
0x161b   :  { %6617 = vsyncpa [#allocation25], 1 }
0x161c   :  { %6618 = vsyncpa [#allocation28], 1 }
0x161d   :  { %6619 = vsyncpa [#allocation31], 1 }
0x161e   :  { %6620 = vsyncpa [#allocation34], 1 }
0x161f   :  { %6621 = vsyncmov [#allocation5] }
0x1622   :  { %s6622_s6 = vpop.sfrf %6621 }
0x1623   :  { %p6982_p4 = scmp.ne.s32.totalorder %s6622_s6, 0 }
0x1625   :  { %6626 = shalt.err (%p6982_p4)  }
0x1626   :  { %6628 = vsyncmov [#allocation5 + $0x1] }
0x1629   :  { %s6629_s19 = vpop.sfrf %6628 }
0x162a   :  { %p6983_p5 = scmp.ne.s32.totalorder %s6629_s19, 0 }
0x162c   :  { %6633 = shalt.err (%p6983_p5)  }
0x162d   :  { %6635 = vsyncmov [#allocation5 + $0x2] }
0x1630   :  { %s6636_s1 = vpop.sfrf %6635 }
0x1631   :  { %p6984_p6 = scmp.ne.s32.totalorder %s6636_s1, 0 }
0x1633   :  { %6640 = shalt.err (%p6984_p6)  }

</bundles_post_ra>
